<compile_context>
chip_gen: v5e
topology: v5e:2x2
jax: 0.10.0
libtpu: 0.0.40
codegen_flags: <defaults>
</compile_context>

<pallas_src>
import functools

import jax
import jax.numpy as jnp
from jax.experimental import pallas as pl
from jax.experimental.pallas import tpu as pltpu


def _round_up(x, m):
    return (x + m - 1) // m * m


# -----------------------------------------------------------------------------
# Pallas kernel: fused 3x3 conv (padding=1, no bias) + per-channel PReLU.
# One batch element per grid step.
# -----------------------------------------------------------------------------
def _conv3x3_prelu_kernel(x_ref, w_ref, a_ref, o_ref, *, stride, wph, n_out):
    # x_ref : (1, P, Cin, Lpad)  P = stride*stride phase-decomposed, row-flattened,
    #                            zero-padded input (lanes = flattened spatial).
    # w_ref : (9, Cout, Cin)     per-tap weight matrices, tap index = dy*3 + dx.
    # a_ref : (Cout, 1)          PReLU slopes.
    # o_ref : (1, Cout, n_out)   channel-first output, lanes = Hout*Wph
    #                            (wrap columns trimmed by the wrapper).
    acc = jnp.zeros(o_ref.shape[1:], jnp.float32)            # (Cout, n_out)
    for dy in range(3):
        for dx in range(3):
            p = (dy % stride) * stride + (dx % stride)        # phase index
            off = (dy // stride) * wph + (dx // stride)       # flat lane shift
            x_tap = x_ref[0, p, :, off:off + n_out]           # (Cin, n_out)
            w_tap = w_ref[dy * 3 + dx]                        # (Cout, Cin)
            acc = acc + jnp.dot(w_tap, x_tap,
                                preferred_element_type=jnp.float32)
    a = a_ref[...]                                            # (Cout, 1)
    o_ref[0] = jnp.where(acc > 0.0, acc, acc * a)             # PReLU


def conv3x3_prelu(x, w, a, stride):
    """x: (B, Cin, H, W) NCHW; w: (Cout, Cin, 3, 3); a: (Cout,) PReLU slopes."""
    B, Cin, H, W = x.shape
    Cout = w.shape[0]
    assert stride in (1, 2)
    Hout = (H + 2 - 3) // stride + 1
    Wout = (W + 2 - 3) // stride + 1

    x_pad = jnp.pad(x.astype(jnp.float32), ((0, 0), (0, 0), (1, 1), (1, 1)))

    if stride == 1:
        P = 1
        Hph, Wph = H + 2, W + 2
        phases = x_pad[:, None]                               # (B, 1, Cin, Hp, Wp)
    else:
        P = 4
        Hph, Wph = (H + 2) // 2, (W + 2) // 2
        phases = jnp.stack(
            [x_pad[:, :, py::2, px::2] for py in range(2) for px in range(2)],
            axis=1)                                           # (B, 4, Cin, Hph, Wph)

    n_out = Hout * Wph                                        # padded-width flat output
    omax = 2 // stride                                        # max per-axis tap offset
    lpad = _round_up(n_out + omax * Wph + omax, 128)          # lane-aligned input length
    flat = phases.reshape(B, P, Cin, Hph * Wph)
    flat = jnp.pad(flat, ((0, 0), (0, 0), (0, 0), (0, lpad - Hph * Wph)))

    w9 = jnp.transpose(w.astype(jnp.float32), (2, 3, 0, 1)).reshape(9, Cout, Cin)
    a2 = a.astype(jnp.float32).reshape(Cout, 1)

    out = pl.pallas_call(
        functools.partial(_conv3x3_prelu_kernel,
                          stride=stride, wph=Wph, n_out=n_out),
        out_shape=jax.ShapeDtypeStruct((B, Cout, n_out), jnp.float32),
        grid=(B,),
        in_specs=[
            pl.BlockSpec((1, P, Cin, lpad), lambda b: (b, 0, 0, 0)),
            pl.BlockSpec((9, Cout, Cin), lambda b: (0, 0, 0)),
            pl.BlockSpec((Cout, 1), lambda b: (0, 0)),
        ],
        out_specs=pl.BlockSpec((1, Cout, n_out), lambda b: (b, 0, 0)),
        compiler_params=pltpu.CompilerParams(dimension_semantics=("parallel",)),
    )(flat, w9, a2)

    # Trim the wrap columns; output stays NCHW with no transposes.
    return out.reshape(B, Cout, Hout, Wph)[:, :, :, :Wout]


# -----------------------------------------------------------------------------
# Encode module: params + forward (matches the PyTorch reference).
# -----------------------------------------------------------------------------
def init_encode_params(key):
    ks = jax.random.split(key, 6)

    def conv_w(k, cout, cin):
        fan_in = cin * 9
        bound = (1.0 / fan_in) ** 0.5
        return jax.random.uniform(k, (cout, cin, 3, 3), jnp.float32, -bound, bound)

    def prelu(c):
        return jnp.full((c,), 0.25, jnp.float32)

    return {
        "one": [(conv_w(ks[0], 32, 3), prelu(32)), (conv_w(ks[1], 32, 32), prelu(32))],
        "two": [(conv_w(ks[2], 64, 32), prelu(64)), (conv_w(ks[3], 64, 64), prelu(64))],
        "thr": [(conv_w(ks[4], 96, 64), prelu(96)), (conv_w(ks[5], 96, 96), prelu(96))],
    }


def encode_forward(params, x):
    (w1a, a1a), (w1b, a1b) = params["one"]
    f1 = conv3x3_prelu(x, w1a, a1a, 1)
    f1 = conv3x3_prelu(f1, w1b, a1b, 1)

    (w2a, a2a), (w2b, a2b) = params["two"]
    f2 = conv3x3_prelu(f1, w2a, a2a, 2)
    f2 = conv3x3_prelu(f2, w2b, a2b, 1)

    (w3a, a3a), (w3b, a3b) = params["thr"]
    f3 = conv3x3_prelu(f2, w3a, a3a, 2)
    f3 = conv3x3_prelu(f3, w3b, a3b, 1)

    return [jnp.concatenate([x, f1], axis=1), f2, f3]


# -----------------------------------------------------------------------------
# Pure-JAX reference (for a numerical sanity check against the Pallas kernels).
# -----------------------------------------------------------------------------
def _conv3x3_prelu_ref(x, w, a, stride):
    y = jax.lax.conv_general_dilated(
        x, w, window_strides=(stride, stride), padding=((1, 1), (1, 1)),
        dimension_numbers=("NCHW", "OIHW", "NCHW"))
    a = a.reshape(1, -1, 1, 1)
    return jnp.where(y > 0, y, y * a)


def encode_reference(params, x):
    (w1a, a1a), (w1b, a1b) = params["one"]
    f1 = _conv3x3_prelu_ref(x, w1a, a1a, 1)
    f1 = _conv3x3_prelu_ref(f1, w1b, a1b, 1)
    (w2a, a2a), (w2b, a2b) = params["two"]
    f2 = _conv3x3_prelu_ref(f1, w2a, a2a, 2)
    f2 = _conv3x3_prelu_ref(f2, w2b, a2b, 1)
    (w3a, a3a), (w3b, a3b) = params["thr"]
    f3 = _conv3x3_prelu_ref(f2, w3a, a3a, 2)
    f3 = _conv3x3_prelu_ref(f3, w3b, a3b, 1)
    return [jnp.concatenate([x, f1], axis=1), f2, f3]


# -----------------------------------------------------------------------------
if __name__ == "__main__":
    key = jax.random.PRNGKey(0)
    kp, kx = jax.random.split(key)
    params = init_encode_params(kp)
    x = jax.random.normal(kx, (2, 3, 16, 16), jnp.float32)

    outs = jax.jit(encode_forward)(params, x)
    outs = jax.tree_util.tree_map(jax.block_until_ready, outs)

    refs = encode_reference(params, x)
    expected_shapes = [(2, 35, 16, 16), (2, 64, 8, 8), (2, 96, 4, 4)]
    for o, r, s in zip(outs, refs, expected_shapes):
        if tuple(o.shape) != s:
            raise SystemExit(f"SHAPE MISMATCH: {o.shape} vs {s}")
        max_diff = float(jnp.max(jnp.abs(o - r)))
        if max_diff > 5e-2:
            raise SystemExit(f"VALUE MISMATCH: max|diff|={max_diff}")

    print("KERNEL_OK")
</pallas_src>

<mosaic_0001>
module attributes {stable_mosaic.version = 11 : i64} {
  func.func @_conv3x3_prelu_kernel(%arg0: i32, %arg1: memref<1x1x3x384xf32, #tpu.memory_space<vmem>>, %arg2: memref<9x32x3xf32, #tpu.memory_space<vmem>>, %arg3: memref<32x1xf32, #tpu.memory_space<vmem>>, %arg4: memref<1x32x288xf32, #tpu.memory_space<vmem>>) attributes {dimension_semantics = [#tpu.dimension_semantics<parallel>], iteration_bounds = array<i64: 2>, scalar_prefetch = 0 : i64, scratch_operands = 0 : i64, tpu.core_type = #tpu.core_type<tc>, window_params = [{transform_indices = @transform_0, window_bounds = array<i64: 1, 1, 3, 384>}, {pipeline_mode = #tpu.pipeline_mode<synchronous>, transform_indices = @transform_1, window_bounds = array<i64: 9, 32, 3>}, {pipeline_mode = #tpu.pipeline_mode<synchronous>, transform_indices = @transform_2, window_bounds = array<i64: 32, 1>}, {transform_indices = @transform_3, window_bounds = array<i64: 1, 32, 288>}]} {
    %cst = arith.constant 0.000000e+00 : f32
    %0 = vector.broadcast %cst : f32 to vector<32x288xf32>
    %c0 = arith.constant 0 : index
    %c0_0 = arith.constant 0 : index
    %c0_1 = arith.constant 0 : index
    %c0_2 = arith.constant 0 : index
    %1 = vector.load %arg1[%c0, %c0_0, %c0_1, %c0_2] : memref<1x1x3x384xf32, #tpu.memory_space<vmem>>, vector<1x1x3x288xf32>
    %2 = vector.shape_cast %1 : vector<1x1x3x288xf32> to vector<3x288xf32>
    %c0_3 = arith.constant 0 : index
    %c0_4 = arith.constant 0 : index
    %c0_5 = arith.constant 0 : index
    %3 = vector.load %arg2[%c0_3, %c0_4, %c0_5] : memref<9x32x3xf32, #tpu.memory_space<vmem>>, vector<1x32x3xf32>
    %4 = vector.shape_cast %3 : vector<1x32x3xf32> to vector<32x3xf32>
    %cst_6 = arith.constant dense<0.000000e+00> : vector<32x288xf32>
    %5 = tpu.matmul %4, %2, %cst_6 {dimension_numbers = #tpu.dot_dimension_numbers<[1], [0], [0], [1], [0, 0, 1, 1], [], []>} : vector<32x3xf32>, vector<3x288xf32>, vector<32x288xf32> -> vector<32x288xf32>
    %6 = arith.addf %0, %5 : vector<32x288xf32>
    %c0_7 = arith.constant 0 : index
    %c0_8 = arith.constant 0 : index
    %c0_9 = arith.constant 0 : index
    %c1 = arith.constant 1 : index
    %7 = vector.load %arg1[%c0_7, %c0_8, %c0_9, %c1] : memref<1x1x3x384xf32, #tpu.memory_space<vmem>>, vector<1x1x3x288xf32>
    %8 = vector.shape_cast %7 : vector<1x1x3x288xf32> to vector<3x288xf32>
    %c1_10 = arith.constant 1 : index
    %c0_11 = arith.constant 0 : index
    %c0_12 = arith.constant 0 : index
    %9 = vector.load %arg2[%c1_10, %c0_11, %c0_12] : memref<9x32x3xf32, #tpu.memory_space<vmem>>, vector<1x32x3xf32>
    %10 = vector.shape_cast %9 : vector<1x32x3xf32> to vector<32x3xf32>
    %cst_13 = arith.constant dense<0.000000e+00> : vector<32x288xf32>
    %11 = tpu.matmul %10, %8, %cst_13 {dimension_numbers = #tpu.dot_dimension_numbers<[1], [0], [0], [1], [0, 0, 1, 1], [], []>} : vector<32x3xf32>, vector<3x288xf32>, vector<32x288xf32> -> vector<32x288xf32>
    %12 = arith.addf %6, %11 : vector<32x288xf32>
    %c0_14 = arith.constant 0 : index
    %c0_15 = arith.constant 0 : index
    %c0_16 = arith.constant 0 : index
    %c2 = arith.constant 2 : index
    %13 = vector.load %arg1[%c0_14, %c0_15, %c0_16, %c2] : memref<1x1x3x384xf32, #tpu.memory_space<vmem>>, vector<1x1x3x288xf32>
    %14 = vector.shape_cast %13 : vector<1x1x3x288xf32> to vector<3x288xf32>
    %c2_17 = arith.constant 2 : index
    %c0_18 = arith.constant 0 : index
    %c0_19 = arith.constant 0 : index
    %15 = vector.load %arg2[%c2_17, %c0_18, %c0_19] : memref<9x32x3xf32, #tpu.memory_space<vmem>>, vector<1x32x3xf32>
    %16 = vector.shape_cast %15 : vector<1x32x3xf32> to vector<32x3xf32>
    %cst_20 = arith.constant dense<0.000000e+00> : vector<32x288xf32>
    %17 = tpu.matmul %16, %14, %cst_20 {dimension_numbers = #tpu.dot_dimension_numbers<[1], [0], [0], [1], [0, 0, 1, 1], [], []>} : vector<32x3xf32>, vector<3x288xf32>, vector<32x288xf32> -> vector<32x288xf32>
    %18 = arith.addf %12, %17 : vector<32x288xf32>
    %c0_21 = arith.constant 0 : index
    %c0_22 = arith.constant 0 : index
    %c0_23 = arith.constant 0 : index
    %c18 = arith.constant 18 : index
    %19 = vector.load %arg1[%c0_21, %c0_22, %c0_23, %c18] : memref<1x1x3x384xf32, #tpu.memory_space<vmem>>, vector<1x1x3x288xf32>
    %20 = vector.shape_cast %19 : vector<1x1x3x288xf32> to vector<3x288xf32>
    %c3 = arith.constant 3 : index
    %c0_24 = arith.constant 0 : index
    %c0_25 = arith.constant 0 : index
    %21 = vector.load %arg2[%c3, %c0_24, %c0_25] : memref<9x32x3xf32, #tpu.memory_space<vmem>>, vector<1x32x3xf32>
    %22 = vector.shape_cast %21 : vector<1x32x3xf32> to vector<32x3xf32>
    %cst_26 = arith.constant dense<0.000000e+00> : vector<32x288xf32>
    %23 = tpu.matmul %22, %20, %cst_26 {dimension_numbers = #tpu.dot_dimension_numbers<[1], [0], [0], [1], [0, 0, 1, 1], [], []>} : vector<32x3xf32>, vector<3x288xf32>, vector<32x288xf32> -> vector<32x288xf32>
    %24 = arith.addf %18, %23 : vector<32x288xf32>
    %c0_27 = arith.constant 0 : index
    %c0_28 = arith.constant 0 : index
    %c0_29 = arith.constant 0 : index
    %c19 = arith.constant 19 : index
    %25 = vector.load %arg1[%c0_27, %c0_28, %c0_29, %c19] : memref<1x1x3x384xf32, #tpu.memory_space<vmem>>, vector<1x1x3x288xf32>
    %26 = vector.shape_cast %25 : vector<1x1x3x288xf32> to vector<3x288xf32>
    %c4 = arith.constant 4 : index
    %c0_30 = arith.constant 0 : index
    %c0_31 = arith.constant 0 : index
    %27 = vector.load %arg2[%c4, %c0_30, %c0_31] : memref<9x32x3xf32, #tpu.memory_space<vmem>>, vector<1x32x3xf32>
    %28 = vector.shape_cast %27 : vector<1x32x3xf32> to vector<32x3xf32>
    %cst_32 = arith.constant dense<0.000000e+00> : vector<32x288xf32>
    %29 = tpu.matmul %28, %26, %cst_32 {dimension_numbers = #tpu.dot_dimension_numbers<[1], [0], [0], [1], [0, 0, 1, 1], [], []>} : vector<32x3xf32>, vector<3x288xf32>, vector<32x288xf32> -> vector<32x288xf32>
    %30 = arith.addf %24, %29 : vector<32x288xf32>
    %c0_33 = arith.constant 0 : index
    %c0_34 = arith.constant 0 : index
    %c0_35 = arith.constant 0 : index
    %c20 = arith.constant 20 : index
    %31 = vector.load %arg1[%c0_33, %c0_34, %c0_35, %c20] : memref<1x1x3x384xf32, #tpu.memory_space<vmem>>, vector<1x1x3x288xf32>
    %32 = vector.shape_cast %31 : vector<1x1x3x288xf32> to vector<3x288xf32>
    %c5 = arith.constant 5 : index
    %c0_36 = arith.constant 0 : index
    %c0_37 = arith.constant 0 : index
    %33 = vector.load %arg2[%c5, %c0_36, %c0_37] : memref<9x32x3xf32, #tpu.memory_space<vmem>>, vector<1x32x3xf32>
    %34 = vector.shape_cast %33 : vector<1x32x3xf32> to vector<32x3xf32>
    %cst_38 = arith.constant dense<0.000000e+00> : vector<32x288xf32>
    %35 = tpu.matmul %34, %32, %cst_38 {dimension_numbers = #tpu.dot_dimension_numbers<[1], [0], [0], [1], [0, 0, 1, 1], [], []>} : vector<32x3xf32>, vector<3x288xf32>, vector<32x288xf32> -> vector<32x288xf32>
    %36 = arith.addf %30, %35 : vector<32x288xf32>
    %c0_39 = arith.constant 0 : index
    %c0_40 = arith.constant 0 : index
    %c0_41 = arith.constant 0 : index
    %c36 = arith.constant 36 : index
    %37 = vector.load %arg1[%c0_39, %c0_40, %c0_41, %c36] : memref<1x1x3x384xf32, #tpu.memory_space<vmem>>, vector<1x1x3x288xf32>
    %38 = vector.shape_cast %37 : vector<1x1x3x288xf32> to vector<3x288xf32>
    %c6 = arith.constant 6 : index
    %c0_42 = arith.constant 0 : index
    %c0_43 = arith.constant 0 : index
    %39 = vector.load %arg2[%c6, %c0_42, %c0_43] : memref<9x32x3xf32, #tpu.memory_space<vmem>>, vector<1x32x3xf32>
    %40 = vector.shape_cast %39 : vector<1x32x3xf32> to vector<32x3xf32>
    %cst_44 = arith.constant dense<0.000000e+00> : vector<32x288xf32>
    %41 = tpu.matmul %40, %38, %cst_44 {dimension_numbers = #tpu.dot_dimension_numbers<[1], [0], [0], [1], [0, 0, 1, 1], [], []>} : vector<32x3xf32>, vector<3x288xf32>, vector<32x288xf32> -> vector<32x288xf32>
    %42 = arith.addf %36, %41 : vector<32x288xf32>
    %c0_45 = arith.constant 0 : index
    %c0_46 = arith.constant 0 : index
    %c0_47 = arith.constant 0 : index
    %c37 = arith.constant 37 : index
    %43 = vector.load %arg1[%c0_45, %c0_46, %c0_47, %c37] : memref<1x1x3x384xf32, #tpu.memory_space<vmem>>, vector<1x1x3x288xf32>
    %44 = vector.shape_cast %43 : vector<1x1x3x288xf32> to vector<3x288xf32>
    %c7 = arith.constant 7 : index
    %c0_48 = arith.constant 0 : index
    %c0_49 = arith.constant 0 : index
    %45 = vector.load %arg2[%c7, %c0_48, %c0_49] : memref<9x32x3xf32, #tpu.memory_space<vmem>>, vector<1x32x3xf32>
    %46 = vector.shape_cast %45 : vector<1x32x3xf32> to vector<32x3xf32>
    %cst_50 = arith.constant dense<0.000000e+00> : vector<32x288xf32>
    %47 = tpu.matmul %46, %44, %cst_50 {dimension_numbers = #tpu.dot_dimension_numbers<[1], [0], [0], [1], [0, 0, 1, 1], [], []>} : vector<32x3xf32>, vector<3x288xf32>, vector<32x288xf32> -> vector<32x288xf32>
    %48 = arith.addf %42, %47 : vector<32x288xf32>
    %c0_51 = arith.constant 0 : index
    %c0_52 = arith.constant 0 : index
    %c0_53 = arith.constant 0 : index
    %c38 = arith.constant 38 : index
    %49 = vector.load %arg1[%c0_51, %c0_52, %c0_53, %c38] : memref<1x1x3x384xf32, #tpu.memory_space<vmem>>, vector<1x1x3x288xf32>
    %50 = vector.shape_cast %49 : vector<1x1x3x288xf32> to vector<3x288xf32>
    %c8 = arith.constant 8 : index
    %c0_54 = arith.constant 0 : index
    %c0_55 = arith.constant 0 : index
    %51 = vector.load %arg2[%c8, %c0_54, %c0_55] : memref<9x32x3xf32, #tpu.memory_space<vmem>>, vector<1x32x3xf32>
    %52 = vector.shape_cast %51 : vector<1x32x3xf32> to vector<32x3xf32>
    %cst_56 = arith.constant dense<0.000000e+00> : vector<32x288xf32>
    %53 = tpu.matmul %52, %50, %cst_56 {dimension_numbers = #tpu.dot_dimension_numbers<[1], [0], [0], [1], [0, 0, 1, 1], [], []>} : vector<32x3xf32>, vector<3x288xf32>, vector<32x288xf32> -> vector<32x288xf32>
    %54 = arith.addf %48, %53 : vector<32x288xf32>
    %c0_57 = arith.constant 0 : index
    %c0_58 = arith.constant 0 : index
    %55 = vector.load %arg3[%c0_57, %c0_58] : memref<32x1xf32, #tpu.memory_space<vmem>>, vector<32x1xf32>
    %cst_59 = arith.constant 0.000000e+00 : f32
    %56 = vector.broadcast %cst_59 : f32 to vector<32x288xf32>
    %57 = arith.cmpf ogt, %54, %56 : vector<32x288xf32>
    %58 = vector.broadcast %55 : vector<32x1xf32> to vector<32x288xf32>
    %59 = arith.mulf %54, %58 : vector<32x288xf32>
    %60 = arith.select %57, %54, %59 : vector<32x288xi1>, vector<32x288xf32>
    %c0_60 = arith.constant 0 : index
    %c0_61 = arith.constant 0 : index
    %c0_62 = arith.constant 0 : index
    %61 = vector.load %arg4[%c0_60, %c0_61, %c0_62] : memref<1x32x288xf32, #tpu.memory_space<vmem>>, vector<1x32x288xf32>
    %62 = vector.shape_cast %61 : vector<1x32x288xf32> to vector<32x288xf32>
    %63 = vector.shape_cast %60 : vector<32x288xf32> to vector<1x32x288xf32>
    tpu.vector_store %arg4[%c0_60, %c0_61, %c0_62], %63 {strides = array<i32>} : memref<1x32x288xf32, #tpu.memory_space<vmem>>, vector<1x32x288xf32>,
    return
  }
  func.func @transform_0(%arg0: i32) -> (i32, i32, i32, i32) {
    %c0_i32 = arith.constant 0 : i32
    %c0_i32_0 = arith.constant 0 : i32
    %c0_i32_1 = arith.constant 0 : i32
    %c0_i32_2 = arith.constant 0 : i32
    return %arg0, %c0_i32, %c0_i32_0, %c0_i32_1 : i32, i32, i32, i32
  }
  func.func @transform_1(%arg0: i32) -> (i32, i32, i32) {
    %c0_i32 = arith.constant 0 : i32
    %c0_i32_0 = arith.constant 0 : i32
    %c0_i32_1 = arith.constant 0 : i32
    %c0_i32_2 = arith.constant 0 : i32
    return %c0_i32, %c0_i32_0, %c0_i32_1 : i32, i32, i32
  }
  func.func @transform_2(%arg0: i32) -> (i32, i32) {
    %c0_i32 = arith.constant 0 : i32
    %c0_i32_0 = arith.constant 0 : i32
    %c0_i32_1 = arith.constant 0 : i32
    return %c0_i32, %c0_i32_0 : i32, i32
  }
  func.func @transform_3(%arg0: i32) -> (i32, i32, i32) {
    %c0_i32 = arith.constant 0 : i32
    %c0_i32_0 = arith.constant 0 : i32
    %c0_i32_1 = arith.constant 0 : i32
    return %arg0, %c0_i32, %c0_i32_0 : i32, i32, i32
  }
}

module attributes {stable_mosaic.version = 11 : i64} {
  func.func @_conv3x3_prelu_kernel(%arg0: i32, %arg1: memref<1x1x32x384xf32, #tpu.memory_space<vmem>>, %arg2: memref<9x32x32xf32, #tpu.memory_space<vmem>>, %arg3: memref<32x1xf32, #tpu.memory_space<vmem>>, %arg4: memref<1x32x288xf32, #tpu.memory_space<vmem>>) attributes {dimension_semantics = [#tpu.dimension_semantics<parallel>], iteration_bounds = array<i64: 2>, scalar_prefetch = 0 : i64, scratch_operands = 0 : i64, tpu.core_type = #tpu.core_type<tc>, window_params = [{transform_indices = @transform_0, window_bounds = array<i64: 1, 1, 32, 384>}, {pipeline_mode = #tpu.pipeline_mode<synchronous>, transform_indices = @transform_1, window_bounds = array<i64: 9, 32, 32>}, {pipeline_mode = #tpu.pipeline_mode<synchronous>, transform_indices = @transform_2, window_bounds = array<i64: 32, 1>}, {transform_indices = @transform_3, window_bounds = array<i64: 1, 32, 288>}]} {
    %cst = arith.constant 0.000000e+00 : f32
    %0 = vector.broadcast %cst : f32 to vector<32x288xf32>
    %c0 = arith.constant 0 : index
    %c0_0 = arith.constant 0 : index
    %c0_1 = arith.constant 0 : index
    %c0_2 = arith.constant 0 : index
    %1 = vector.load %arg1[%c0, %c0_0, %c0_1, %c0_2] : memref<1x1x32x384xf32, #tpu.memory_space<vmem>>, vector<1x1x32x288xf32>
    %2 = vector.shape_cast %1 : vector<1x1x32x288xf32> to vector<32x288xf32>
    %c0_3 = arith.constant 0 : index
    %c0_4 = arith.constant 0 : index
    %c0_5 = arith.constant 0 : index
    %3 = vector.load %arg2[%c0_3, %c0_4, %c0_5] : memref<9x32x32xf32, #tpu.memory_space<vmem>>, vector<1x32x32xf32>
    %4 = vector.shape_cast %3 : vector<1x32x32xf32> to vector<32x32xf32>
    %cst_6 = arith.constant dense<0.000000e+00> : vector<32x288xf32>
    %5 = tpu.matmul %4, %2, %cst_6 {dimension_numbers = #tpu.dot_dimension_numbers<[1], [0], [0], [1], [0, 0, 1, 1], [], []>} : vector<32x32xf32>, vector<32x288xf32>, vector<32x288xf32> -> vector<32x288xf32>
    %6 = arith.addf %0, %5 : vector<32x288xf32>
    %c0_7 = arith.constant 0 : index
    %c0_8 = arith.constant 0 : index
    %c0_9 = arith.constant 0 : index
    %c1 = arith.constant 1 : index
    %7 = vector.load %arg1[%c0_7, %c0_8, %c0_9, %c1] : memref<1x1x32x384xf32, #tpu.memory_space<vmem>>, vector<1x1x32x288xf32>
    %8 = vector.shape_cast %7 : vector<1x1x32x288xf32> to vector<32x288xf32>
    %c1_10 = arith.constant 1 : index
    %c0_11 = arith.constant 0 : index
    %c0_12 = arith.constant 0 : index
    %9 = vector.load %arg2[%c1_10, %c0_11, %c0_12] : memref<9x32x32xf32, #tpu.memory_space<vmem>>, vector<1x32x32xf32>
    %10 = vector.shape_cast %9 : vector<1x32x32xf32> to vector<32x32xf32>
    %cst_13 = arith.constant dense<0.000000e+00> : vector<32x288xf32>
    %11 = tpu.matmul %10, %8, %cst_13 {dimension_numbers = #tpu.dot_dimension_numbers<[1], [0], [0], [1], [0, 0, 1, 1], [], []>} : vector<32x32xf32>, vector<32x288xf32>, vector<32x288xf32> -> vector<32x288xf32>
    %12 = arith.addf %6, %11 : vector<32x288xf32>
    %c0_14 = arith.constant 0 : index
    %c0_15 = arith.constant 0 : index
    %c0_16 = arith.constant 0 : index
    %c2 = arith.constant 2 : index
    %13 = vector.load %arg1[%c0_14, %c0_15, %c0_16, %c2] : memref<1x1x32x384xf32, #tpu.memory_space<vmem>>, vector<1x1x32x288xf32>
    %14 = vector.shape_cast %13 : vector<1x1x32x288xf32> to vector<32x288xf32>
    %c2_17 = arith.constant 2 : index
    %c0_18 = arith.constant 0 : index
    %c0_19 = arith.constant 0 : index
    %15 = vector.load %arg2[%c2_17, %c0_18, %c0_19] : memref<9x32x32xf32, #tpu.memory_space<vmem>>, vector<1x32x32xf32>
    %16 = vector.shape_cast %15 : vector<1x32x32xf32> to vector<32x32xf32>
    %cst_20 = arith.constant dense<0.000000e+00> : vector<32x288xf32>
    %17 = tpu.matmul %16, %14, %cst_20 {dimension_numbers = #tpu.dot_dimension_numbers<[1], [0], [0], [1], [0, 0, 1, 1], [], []>} : vector<32x32xf32>, vector<32x288xf32>, vector<32x288xf32> -> vector<32x288xf32>
    %18 = arith.addf %12, %17 : vector<32x288xf32>
    %c0_21 = arith.constant 0 : index
    %c0_22 = arith.constant 0 : index
    %c0_23 = arith.constant 0 : index
    %c18 = arith.constant 18 : index
    %19 = vector.load %arg1[%c0_21, %c0_22, %c0_23, %c18] : memref<1x1x32x384xf32, #tpu.memory_space<vmem>>, vector<1x1x32x288xf32>
    %20 = vector.shape_cast %19 : vector<1x1x32x288xf32> to vector<32x288xf32>
    %c3 = arith.constant 3 : index
    %c0_24 = arith.constant 0 : index
    %c0_25 = arith.constant 0 : index
    %21 = vector.load %arg2[%c3, %c0_24, %c0_25] : memref<9x32x32xf32, #tpu.memory_space<vmem>>, vector<1x32x32xf32>
    %22 = vector.shape_cast %21 : vector<1x32x32xf32> to vector<32x32xf32>
    %cst_26 = arith.constant dense<0.000000e+00> : vector<32x288xf32>
    %23 = tpu.matmul %22, %20, %cst_26 {dimension_numbers = #tpu.dot_dimension_numbers<[1], [0], [0], [1], [0, 0, 1, 1], [], []>} : vector<32x32xf32>, vector<32x288xf32>, vector<32x288xf32> -> vector<32x288xf32>
    %24 = arith.addf %18, %23 : vector<32x288xf32>
    %c0_27 = arith.constant 0 : index
    %c0_28 = arith.constant 0 : index
    %c0_29 = arith.constant 0 : index
    %c19 = arith.constant 19 : index
    %25 = vector.load %arg1[%c0_27, %c0_28, %c0_29, %c19] : memref<1x1x32x384xf32, #tpu.memory_space<vmem>>, vector<1x1x32x288xf32>
    %26 = vector.shape_cast %25 : vector<1x1x32x288xf32> to vector<32x288xf32>
    %c4 = arith.constant 4 : index
    %c0_30 = arith.constant 0 : index
    %c0_31 = arith.constant 0 : index
    %27 = vector.load %arg2[%c4, %c0_30, %c0_31] : memref<9x32x32xf32, #tpu.memory_space<vmem>>, vector<1x32x32xf32>
    %28 = vector.shape_cast %27 : vector<1x32x32xf32> to vector<32x32xf32>
    %cst_32 = arith.constant dense<0.000000e+00> : vector<32x288xf32>
    %29 = tpu.matmul %28, %26, %cst_32 {dimension_numbers = #tpu.dot_dimension_numbers<[1], [0], [0], [1], [0, 0, 1, 1], [], []>} : vector<32x32xf32>, vector<32x288xf32>, vector<32x288xf32> -> vector<32x288xf32>
    %30 = arith.addf %24, %29 : vector<32x288xf32>
    %c0_33 = arith.constant 0 : index
    %c0_34 = arith.constant 0 : index
    %c0_35 = arith.constant 0 : index
    %c20 = arith.constant 20 : index
    %31 = vector.load %arg1[%c0_33, %c0_34, %c0_35, %c20] : memref<1x1x32x384xf32, #tpu.memory_space<vmem>>, vector<1x1x32x288xf32>
    %32 = vector.shape_cast %31 : vector<1x1x32x288xf32> to vector<32x288xf32>
    %c5 = arith.constant 5 : index
    %c0_36 = arith.constant 0 : index
    %c0_37 = arith.constant 0 : index
    %33 = vector.load %arg2[%c5, %c0_36, %c0_37] : memref<9x32x32xf32, #tpu.memory_space<vmem>>, vector<1x32x32xf32>
    %34 = vector.shape_cast %33 : vector<1x32x32xf32> to vector<32x32xf32>
    %cst_38 = arith.constant dense<0.000000e+00> : vector<32x288xf32>
    %35 = tpu.matmul %34, %32, %cst_38 {dimension_numbers = #tpu.dot_dimension_numbers<[1], [0], [0], [1], [0, 0, 1, 1], [], []>} : vector<32x32xf32>, vector<32x288xf32>, vector<32x288xf32> -> vector<32x288xf32>
    %36 = arith.addf %30, %35 : vector<32x288xf32>
    %c0_39 = arith.constant 0 : index
    %c0_40 = arith.constant 0 : index
    %c0_41 = arith.constant 0 : index
    %c36 = arith.constant 36 : index
    %37 = vector.load %arg1[%c0_39, %c0_40, %c0_41, %c36] : memref<1x1x32x384xf32, #tpu.memory_space<vmem>>, vector<1x1x32x288xf32>
    %38 = vector.shape_cast %37 : vector<1x1x32x288xf32> to vector<32x288xf32>
    %c6 = arith.constant 6 : index
    %c0_42 = arith.constant 0 : index
    %c0_43 = arith.constant 0 : index
    %39 = vector.load %arg2[%c6, %c0_42, %c0_43] : memref<9x32x32xf32, #tpu.memory_space<vmem>>, vector<1x32x32xf32>
    %40 = vector.shape_cast %39 : vector<1x32x32xf32> to vector<32x32xf32>
    %cst_44 = arith.constant dense<0.000000e+00> : vector<32x288xf32>
    %41 = tpu.matmul %40, %38, %cst_44 {dimension_numbers = #tpu.dot_dimension_numbers<[1], [0], [0], [1], [0, 0, 1, 1], [], []>} : vector<32x32xf32>, vector<32x288xf32>, vector<32x288xf32> -> vector<32x288xf32>
    %42 = arith.addf %36, %41 : vector<32x288xf32>
    %c0_45 = arith.constant 0 : index
    %c0_46 = arith.constant 0 : index
    %c0_47 = arith.constant 0 : index
    %c37 = arith.constant 37 : index
    %43 = vector.load %arg1[%c0_45, %c0_46, %c0_47, %c37] : memref<1x1x32x384xf32, #tpu.memory_space<vmem>>, vector<1x1x32x288xf32>
    %44 = vector.shape_cast %43 : vector<1x1x32x288xf32> to vector<32x288xf32>
    %c7 = arith.constant 7 : index
    %c0_48 = arith.constant 0 : index
    %c0_49 = arith.constant 0 : index
    %45 = vector.load %arg2[%c7, %c0_48, %c0_49] : memref<9x32x32xf32, #tpu.memory_space<vmem>>, vector<1x32x32xf32>
    %46 = vector.shape_cast %45 : vector<1x32x32xf32> to vector<32x32xf32>
    %cst_50 = arith.constant dense<0.000000e+00> : vector<32x288xf32>
    %47 = tpu.matmul %46, %44, %cst_50 {dimension_numbers = #tpu.dot_dimension_numbers<[1], [0], [0], [1], [0, 0, 1, 1], [], []>} : vector<32x32xf32>, vector<32x288xf32>, vector<32x288xf32> -> vector<32x288xf32>
    %48 = arith.addf %42, %47 : vector<32x288xf32>
    %c0_51 = arith.constant 0 : index
    %c0_52 = arith.constant 0 : index
    %c0_53 = arith.constant 0 : index
    %c38 = arith.constant 38 : index
    %49 = vector.load %arg1[%c0_51, %c0_52, %c0_53, %c38] : memref<1x1x32x384xf32, #tpu.memory_space<vmem>>, vector<1x1x32x288xf32>
    %50 = vector.shape_cast %49 : vector<1x1x32x288xf32> to vector<32x288xf32>
    %c8 = arith.constant 8 : index
    %c0_54 = arith.constant 0 : index
    %c0_55 = arith.constant 0 : index
    %51 = vector.load %arg2[%c8, %c0_54, %c0_55] : memref<9x32x32xf32, #tpu.memory_space<vmem>>, vector<1x32x32xf32>
    %52 = vector.shape_cast %51 : vector<1x32x32xf32> to vector<32x32xf32>
    %cst_56 = arith.constant dense<0.000000e+00> : vector<32x288xf32>
    %53 = tpu.matmul %52, %50, %cst_56 {dimension_numbers = #tpu.dot_dimension_numbers<[1], [0], [0], [1], [0, 0, 1, 1], [], []>} : vector<32x32xf32>, vector<32x288xf32>, vector<32x288xf32> -> vector<32x288xf32>
    %54 = arith.addf %48, %53 : vector<32x288xf32>
    %c0_57 = arith.constant 0 : index
    %c0_58 = arith.constant 0 : index
    %55 = vector.load %arg3[%c0_57, %c0_58] : memref<32x1xf32, #tpu.memory_space<vmem>>, vector<32x1xf32>
    %cst_59 = arith.constant 0.000000e+00 : f32
    %56 = vector.broadcast %cst_59 : f32 to vector<32x288xf32>
    %57 = arith.cmpf ogt, %54, %56 : vector<32x288xf32>
    %58 = vector.broadcast %55 : vector<32x1xf32> to vector<32x288xf32>
    %59 = arith.mulf %54, %58 : vector<32x288xf32>
    %60 = arith.select %57, %54, %59 : vector<32x288xi1>, vector<32x288xf32>
    %c0_60 = arith.constant 0 : index
    %c0_61 = arith.constant 0 : index
    %c0_62 = arith.constant 0 : index
    %61 = vector.load %arg4[%c0_60, %c0_61, %c0_62] : memref<1x32x288xf32, #tpu.memory_space<vmem>>, vector<1x32x288xf32>
    %62 = vector.shape_cast %61 : vector<1x32x288xf32> to vector<32x288xf32>
    %63 = vector.shape_cast %60 : vector<32x288xf32> to vector<1x32x288xf32>
    tpu.vector_store %arg4[%c0_60, %c0_61, %c0_62], %63 {strides = array<i32>} : memref<1x32x288xf32, #tpu.memory_space<vmem>>, vector<1x32x288xf32>,
    return
  }
  func.func @transform_0(%arg0: i32) -> (i32, i32, i32, i32) {
    %c0_i32 = arith.constant 0 : i32
    %c0_i32_0 = arith.constant 0 : i32
    %c0_i32_1 = arith.constant 0 : i32
    %c0_i32_2 = arith.constant 0 : i32
    return %arg0, %c0_i32, %c0_i32_0, %c0_i32_1 : i32, i32, i32, i32
  }
  func.func @transform_1(%arg0: i32) -> (i32, i32, i32) {
    %c0_i32 = arith.constant 0 : i32
    %c0_i32_0 = arith.constant 0 : i32
    %c0_i32_1 = arith.constant 0 : i32
    %c0_i32_2 = arith.constant 0 : i32
    return %c0_i32, %c0_i32_0, %c0_i32_1 : i32, i32, i32
  }
  func.func @transform_2(%arg0: i32) -> (i32, i32) {
    %c0_i32 = arith.constant 0 : i32
    %c0_i32_0 = arith.constant 0 : i32
    %c0_i32_1 = arith.constant 0 : i32
    return %c0_i32, %c0_i32_0 : i32, i32
  }
  func.func @transform_3(%arg0: i32) -> (i32, i32, i32) {
    %c0_i32 = arith.constant 0 : i32
    %c0_i32_0 = arith.constant 0 : i32
    %c0_i32_1 = arith.constant 0 : i32
    return %arg0, %c0_i32, %c0_i32_0 : i32, i32, i32
  }
}

module attributes {stable_mosaic.version = 11 : i64} {
  func.func @_conv3x3_prelu_kernel(%arg0: i32, %arg1: memref<1x4x32x128xf32, #tpu.memory_space<vmem>>, %arg2: memref<9x64x32xf32, #tpu.memory_space<vmem>>, %arg3: memref<64x1xf32, #tpu.memory_space<vmem>>, %arg4: memref<1x64x72xf32, #tpu.memory_space<vmem>>) attributes {dimension_semantics = [#tpu.dimension_semantics<parallel>], iteration_bounds = array<i64: 2>, scalar_prefetch = 0 : i64, scratch_operands = 0 : i64, tpu.core_type = #tpu.core_type<tc>, window_params = [{transform_indices = @transform_0, window_bounds = array<i64: 1, 4, 32, 128>}, {pipeline_mode = #tpu.pipeline_mode<synchronous>, transform_indices = @transform_1, window_bounds = array<i64: 9, 64, 32>}, {pipeline_mode = #tpu.pipeline_mode<synchronous>, transform_indices = @transform_2, window_bounds = array<i64: 64, 1>}, {transform_indices = @transform_3, window_bounds = array<i64: 1, 64, 72>}]} {
    %cst = arith.constant 0.000000e+00 : f32
    %0 = vector.broadcast %cst : f32 to vector<64x72xf32>
    %c0 = arith.constant 0 : index
    %c0_0 = arith.constant 0 : index
    %c0_1 = arith.constant 0 : index
    %c0_2 = arith.constant 0 : index
    %1 = vector.load %arg1[%c0, %c0_0, %c0_1, %c0_2] : memref<1x4x32x128xf32, #tpu.memory_space<vmem>>, vector<1x1x32x72xf32>
    %2 = vector.shape_cast %1 : vector<1x1x32x72xf32> to vector<32x72xf32>
    %c0_3 = arith.constant 0 : index
    %c0_4 = arith.constant 0 : index
    %c0_5 = arith.constant 0 : index
    %3 = vector.load %arg2[%c0_3, %c0_4, %c0_5] : memref<9x64x32xf32, #tpu.memory_space<vmem>>, vector<1x64x32xf32>
    %4 = vector.shape_cast %3 : vector<1x64x32xf32> to vector<64x32xf32>
    %cst_6 = arith.constant dense<0.000000e+00> : vector<64x72xf32>
    %5 = tpu.matmul %4, %2, %cst_6 {dimension_numbers = #tpu.dot_dimension_numbers<[1], [0], [0], [1], [0, 0, 1, 1], [], []>} : vector<64x32xf32>, vector<32x72xf32>, vector<64x72xf32> -> vector<64x72xf32>
    %6 = arith.addf %0, %5 : vector<64x72xf32>
    %c0_7 = arith.constant 0 : index
    %c1 = arith.constant 1 : index
    %c0_8 = arith.constant 0 : index
    %c0_9 = arith.constant 0 : index
    %7 = vector.load %arg1[%c0_7, %c1, %c0_8, %c0_9] : memref<1x4x32x128xf32, #tpu.memory_space<vmem>>, vector<1x1x32x72xf32>
    %8 = vector.shape_cast %7 : vector<1x1x32x72xf32> to vector<32x72xf32>
    %c1_10 = arith.constant 1 : index
    %c0_11 = arith.constant 0 : index
    %c0_12 = arith.constant 0 : index
    %9 = vector.load %arg2[%c1_10, %c0_11, %c0_12] : memref<9x64x32xf32, #tpu.memory_space<vmem>>, vector<1x64x32xf32>
    %10 = vector.shape_cast %9 : vector<1x64x32xf32> to vector<64x32xf32>
    %cst_13 = arith.constant dense<0.000000e+00> : vector<64x72xf32>
    %11 = tpu.matmul %10, %8, %cst_13 {dimension_numbers = #tpu.dot_dimension_numbers<[1], [0], [0], [1], [0, 0, 1, 1], [], []>} : vector<64x32xf32>, vector<32x72xf32>, vector<64x72xf32> -> vector<64x72xf32>
    %12 = arith.addf %6, %11 : vector<64x72xf32>
    %c0_14 = arith.constant 0 : index
    %c0_15 = arith.constant 0 : index
    %c0_16 = arith.constant 0 : index
    %c1_17 = arith.constant 1 : index
    %13 = vector.load %arg1[%c0_14, %c0_15, %c0_16, %c1_17] : memref<1x4x32x128xf32, #tpu.memory_space<vmem>>, vector<1x1x32x72xf32>
    %14 = vector.shape_cast %13 : vector<1x1x32x72xf32> to vector<32x72xf32>
    %c2 = arith.constant 2 : index
    %c0_18 = arith.constant 0 : index
    %c0_19 = arith.constant 0 : index
    %15 = vector.load %arg2[%c2, %c0_18, %c0_19] : memref<9x64x32xf32, #tpu.memory_space<vmem>>, vector<1x64x32xf32>
    %16 = vector.shape_cast %15 : vector<1x64x32xf32> to vector<64x32xf32>
    %cst_20 = arith.constant dense<0.000000e+00> : vector<64x72xf32>
    %17 = tpu.matmul %16, %14, %cst_20 {dimension_numbers = #tpu.dot_dimension_numbers<[1], [0], [0], [1], [0, 0, 1, 1], [], []>} : vector<64x32xf32>, vector<32x72xf32>, vector<64x72xf32> -> vector<64x72xf32>
    %18 = arith.addf %12, %17 : vector<64x72xf32>
    %c0_21 = arith.constant 0 : index
    %c2_22 = arith.constant 2 : index
    %c0_23 = arith.constant 0 : index
    %c0_24 = arith.constant 0 : index
    %19 = vector.load %arg1[%c0_21, %c2_22, %c0_23, %c0_24] : memref<1x4x32x128xf32, #tpu.memory_space<vmem>>, vector<1x1x32x72xf32>
    %20 = vector.shape_cast %19 : vector<1x1x32x72xf32> to vector<32x72xf32>
    %c3 = arith.constant 3 : index
    %c0_25 = arith.constant 0 : index
    %c0_26 = arith.constant 0 : index
    %21 = vector.load %arg2[%c3, %c0_25, %c0_26] : memref<9x64x32xf32, #tpu.memory_space<vmem>>, vector<1x64x32xf32>
    %22 = vector.shape_cast %21 : vector<1x64x32xf32> to vector<64x32xf32>
    %cst_27 = arith.constant dense<0.000000e+00> : vector<64x72xf32>
    %23 = tpu.matmul %22, %20, %cst_27 {dimension_numbers = #tpu.dot_dimension_numbers<[1], [0], [0], [1], [0, 0, 1, 1], [], []>} : vector<64x32xf32>, vector<32x72xf32>, vector<64x72xf32> -> vector<64x72xf32>
    %24 = arith.addf %18, %23 : vector<64x72xf32>
    %c0_28 = arith.constant 0 : index
    %c3_29 = arith.constant 3 : index
    %c0_30 = arith.constant 0 : index
    %c0_31 = arith.constant 0 : index
    %25 = vector.load %arg1[%c0_28, %c3_29, %c0_30, %c0_31] : memref<1x4x32x128xf32, #tpu.memory_space<vmem>>, vector<1x1x32x72xf32>
    %26 = vector.shape_cast %25 : vector<1x1x32x72xf32> to vector<32x72xf32>
    %c4 = arith.constant 4 : index
    %c0_32 = arith.constant 0 : index
    %c0_33 = arith.constant 0 : index
    %27 = vector.load %arg2[%c4, %c0_32, %c0_33] : memref<9x64x32xf32, #tpu.memory_space<vmem>>, vector<1x64x32xf32>
    %28 = vector.shape_cast %27 : vector<1x64x32xf32> to vector<64x32xf32>
    %cst_34 = arith.constant dense<0.000000e+00> : vector<64x72xf32>
    %29 = tpu.matmul %28, %26, %cst_34 {dimension_numbers = #tpu.dot_dimension_numbers<[1], [0], [0], [1], [0, 0, 1, 1], [], []>} : vector<64x32xf32>, vector<32x72xf32>, vector<64x72xf32> -> vector<64x72xf32>
    %30 = arith.addf %24, %29 : vector<64x72xf32>
    %c0_35 = arith.constant 0 : index
    %c2_36 = arith.constant 2 : index
    %c0_37 = arith.constant 0 : index
    %c1_38 = arith.constant 1 : index
    %31 = vector.load %arg1[%c0_35, %c2_36, %c0_37, %c1_38] : memref<1x4x32x128xf32, #tpu.memory_space<vmem>>, vector<1x1x32x72xf32>
    %32 = vector.shape_cast %31 : vector<1x1x32x72xf32> to vector<32x72xf32>
    %c5 = arith.constant 5 : index
    %c0_39 = arith.constant 0 : index
    %c0_40 = arith.constant 0 : index
    %33 = vector.load %arg2[%c5, %c0_39, %c0_40] : memref<9x64x32xf32, #tpu.memory_space<vmem>>, vector<1x64x32xf32>
    %34 = vector.shape_cast %33 : vector<1x64x32xf32> to vector<64x32xf32>
    %cst_41 = arith.constant dense<0.000000e+00> : vector<64x72xf32>
    %35 = tpu.matmul %34, %32, %cst_41 {dimension_numbers = #tpu.dot_dimension_numbers<[1], [0], [0], [1], [0, 0, 1, 1], [], []>} : vector<64x32xf32>, vector<32x72xf32>, vector<64x72xf32> -> vector<64x72xf32>
    %36 = arith.addf %30, %35 : vector<64x72xf32>
    %c0_42 = arith.constant 0 : index
    %c0_43 = arith.constant 0 : index
    %c0_44 = arith.constant 0 : index
    %c9 = arith.constant 9 : index
    %37 = vector.load %arg1[%c0_42, %c0_43, %c0_44, %c9] : memref<1x4x32x128xf32, #tpu.memory_space<vmem>>, vector<1x1x32x72xf32>
    %38 = vector.shape_cast %37 : vector<1x1x32x72xf32> to vector<32x72xf32>
    %c6 = arith.constant 6 : index
    %c0_45 = arith.constant 0 : index
    %c0_46 = arith.constant 0 : index
    %39 = vector.load %arg2[%c6, %c0_45, %c0_46] : memref<9x64x32xf32, #tpu.memory_space<vmem>>, vector<1x64x32xf32>
    %40 = vector.shape_cast %39 : vector<1x64x32xf32> to vector<64x32xf32>
    %cst_47 = arith.constant dense<0.000000e+00> : vector<64x72xf32>
    %41 = tpu.matmul %40, %38, %cst_47 {dimension_numbers = #tpu.dot_dimension_numbers<[1], [0], [0], [1], [0, 0, 1, 1], [], []>} : vector<64x32xf32>, vector<32x72xf32>, vector<64x72xf32> -> vector<64x72xf32>
    %42 = arith.addf %36, %41 : vector<64x72xf32>
    %c0_48 = arith.constant 0 : index
    %c1_49 = arith.constant 1 : index
    %c0_50 = arith.constant 0 : index
    %c9_51 = arith.constant 9 : index
    %43 = vector.load %arg1[%c0_48, %c1_49, %c0_50, %c9_51] : memref<1x4x32x128xf32, #tpu.memory_space<vmem>>, vector<1x1x32x72xf32>
    %44 = vector.shape_cast %43 : vector<1x1x32x72xf32> to vector<32x72xf32>
    %c7 = arith.constant 7 : index
    %c0_52 = arith.constant 0 : index
    %c0_53 = arith.constant 0 : index
    %45 = vector.load %arg2[%c7, %c0_52, %c0_53] : memref<9x64x32xf32, #tpu.memory_space<vmem>>, vector<1x64x32xf32>
    %46 = vector.shape_cast %45 : vector<1x64x32xf32> to vector<64x32xf32>
    %cst_54 = arith.constant dense<0.000000e+00> : vector<64x72xf32>
    %47 = tpu.matmul %46, %44, %cst_54 {dimension_numbers = #tpu.dot_dimension_numbers<[1], [0], [0], [1], [0, 0, 1, 1], [], []>} : vector<64x32xf32>, vector<32x72xf32>, vector<64x72xf32> -> vector<64x72xf32>
    %48 = arith.addf %42, %47 : vector<64x72xf32>
    %c0_55 = arith.constant 0 : index
    %c0_56 = arith.constant 0 : index
    %c0_57 = arith.constant 0 : index
    %c10 = arith.constant 10 : index
    %49 = vector.load %arg1[%c0_55, %c0_56, %c0_57, %c10] : memref<1x4x32x128xf32, #tpu.memory_space<vmem>>, vector<1x1x32x72xf32>
    %50 = vector.shape_cast %49 : vector<1x1x32x72xf32> to vector<32x72xf32>
    %c8 = arith.constant 8 : index
    %c0_58 = arith.constant 0 : index
    %c0_59 = arith.constant 0 : index
    %51 = vector.load %arg2[%c8, %c0_58, %c0_59] : memref<9x64x32xf32, #tpu.memory_space<vmem>>, vector<1x64x32xf32>
    %52 = vector.shape_cast %51 : vector<1x64x32xf32> to vector<64x32xf32>
    %cst_60 = arith.constant dense<0.000000e+00> : vector<64x72xf32>
    %53 = tpu.matmul %52, %50, %cst_60 {dimension_numbers = #tpu.dot_dimension_numbers<[1], [0], [0], [1], [0, 0, 1, 1], [], []>} : vector<64x32xf32>, vector<32x72xf32>, vector<64x72xf32> -> vector<64x72xf32>
    %54 = arith.addf %48, %53 : vector<64x72xf32>
    %c0_61 = arith.constant 0 : index
    %c0_62 = arith.constant 0 : index
    %55 = vector.load %arg3[%c0_61, %c0_62] : memref<64x1xf32, #tpu.memory_space<vmem>>, vector<64x1xf32>
    %cst_63 = arith.constant 0.000000e+00 : f32
    %56 = vector.broadcast %cst_63 : f32 to vector<64x72xf32>
    %57 = arith.cmpf ogt, %54, %56 : vector<64x72xf32>
    %58 = vector.broadcast %55 : vector<64x1xf32> to vector<64x72xf32>
    %59 = arith.mulf %54, %58 : vector<64x72xf32>
    %60 = arith.select %57, %54, %59 : vector<64x72xi1>, vector<64x72xf32>
    %c0_64 = arith.constant 0 : index
    %c0_65 = arith.constant 0 : index
    %c0_66 = arith.constant 0 : index
    %61 = vector.load %arg4[%c0_64, %c0_65, %c0_66] : memref<1x64x72xf32, #tpu.memory_space<vmem>>, vector<1x64x72xf32>
    %62 = vector.shape_cast %61 : vector<1x64x72xf32> to vector<64x72xf32>
    %63 = vector.shape_cast %60 : vector<64x72xf32> to vector<1x64x72xf32>
    tpu.vector_store %arg4[%c0_64, %c0_65, %c0_66], %63 {strides = array<i32>} : memref<1x64x72xf32, #tpu.memory_space<vmem>>, vector<1x64x72xf32>,
    return
  }
  func.func @transform_0(%arg0: i32) -> (i32, i32, i32, i32) {
    %c0_i32 = arith.constant 0 : i32
    %c0_i32_0 = arith.constant 0 : i32
    %c0_i32_1 = arith.constant 0 : i32
    %c0_i32_2 = arith.constant 0 : i32
    return %arg0, %c0_i32, %c0_i32_0, %c0_i32_1 : i32, i32, i32, i32
  }
  func.func @transform_1(%arg0: i32) -> (i32, i32, i32) {
    %c0_i32 = arith.constant 0 : i32
    %c0_i32_0 = arith.constant 0 : i32
    %c0_i32_1 = arith.constant 0 : i32
    %c0_i32_2 = arith.constant 0 : i32
    return %c0_i32, %c0_i32_0, %c0_i32_1 : i32, i32, i32
  }
  func.func @transform_2(%arg0: i32) -> (i32, i32) {
    %c0_i32 = arith.constant 0 : i32
    %c0_i32_0 = arith.constant 0 : i32
    %c0_i32_1 = arith.constant 0 : i32
    return %c0_i32, %c0_i32_0 : i32, i32
  }
  func.func @transform_3(%arg0: i32) -> (i32, i32, i32) {
    %c0_i32 = arith.constant 0 : i32
    %c0_i32_0 = arith.constant 0 : i32
    %c0_i32_1 = arith.constant 0 : i32
    return %arg0, %c0_i32, %c0_i32_0 : i32, i32, i32
  }
}

module attributes {stable_mosaic.version = 11 : i64} {
  func.func @_conv3x3_prelu_kernel(%arg0: i32, %arg1: memref<1x1x64x128xf32, #tpu.memory_space<vmem>>, %arg2: memref<9x64x64xf32, #tpu.memory_space<vmem>>, %arg3: memref<64x1xf32, #tpu.memory_space<vmem>>, %arg4: memref<1x64x80xf32, #tpu.memory_space<vmem>>) attributes {dimension_semantics = [#tpu.dimension_semantics<parallel>], iteration_bounds = array<i64: 2>, scalar_prefetch = 0 : i64, scratch_operands = 0 : i64, tpu.core_type = #tpu.core_type<tc>, window_params = [{transform_indices = @transform_0, window_bounds = array<i64: 1, 1, 64, 128>}, {pipeline_mode = #tpu.pipeline_mode<synchronous>, transform_indices = @transform_1, window_bounds = array<i64: 9, 64, 64>}, {pipeline_mode = #tpu.pipeline_mode<synchronous>, transform_indices = @transform_2, window_bounds = array<i64: 64, 1>}, {transform_indices = @transform_3, window_bounds = array<i64: 1, 64, 80>}]} {
    %cst = arith.constant 0.000000e+00 : f32
    %0 = vector.broadcast %cst : f32 to vector<64x80xf32>
    %c0 = arith.constant 0 : index
    %c0_0 = arith.constant 0 : index
    %c0_1 = arith.constant 0 : index
    %c0_2 = arith.constant 0 : index
    %1 = vector.load %arg1[%c0, %c0_0, %c0_1, %c0_2] : memref<1x1x64x128xf32, #tpu.memory_space<vmem>>, vector<1x1x64x80xf32>
    %2 = vector.shape_cast %1 : vector<1x1x64x80xf32> to vector<64x80xf32>
    %c0_3 = arith.constant 0 : index
    %c0_4 = arith.constant 0 : index
    %c0_5 = arith.constant 0 : index
    %3 = vector.load %arg2[%c0_3, %c0_4, %c0_5] : memref<9x64x64xf32, #tpu.memory_space<vmem>>, vector<1x64x64xf32>
    %4 = vector.shape_cast %3 : vector<1x64x64xf32> to vector<64x64xf32>
    %cst_6 = arith.constant dense<0.000000e+00> : vector<64x80xf32>
    %5 = tpu.matmul %4, %2, %cst_6 {dimension_numbers = #tpu.dot_dimension_numbers<[1], [0], [0], [1], [0, 0, 1, 1], [], []>} : vector<64x64xf32>, vector<64x80xf32>, vector<64x80xf32> -> vector<64x80xf32>
    %6 = arith.addf %0, %5 : vector<64x80xf32>
    %c0_7 = arith.constant 0 : index
    %c0_8 = arith.constant 0 : index
    %c0_9 = arith.constant 0 : index
    %c1 = arith.constant 1 : index
    %7 = vector.load %arg1[%c0_7, %c0_8, %c0_9, %c1] : memref<1x1x64x128xf32, #tpu.memory_space<vmem>>, vector<1x1x64x80xf32>
    %8 = vector.shape_cast %7 : vector<1x1x64x80xf32> to vector<64x80xf32>
    %c1_10 = arith.constant 1 : index
    %c0_11 = arith.constant 0 : index
    %c0_12 = arith.constant 0 : index
    %9 = vector.load %arg2[%c1_10, %c0_11, %c0_12] : memref<9x64x64xf32, #tpu.memory_space<vmem>>, vector<1x64x64xf32>
    %10 = vector.shape_cast %9 : vector<1x64x64xf32> to vector<64x64xf32>
    %cst_13 = arith.constant dense<0.000000e+00> : vector<64x80xf32>
    %11 = tpu.matmul %10, %8, %cst_13 {dimension_numbers = #tpu.dot_dimension_numbers<[1], [0], [0], [1], [0, 0, 1, 1], [], []>} : vector<64x64xf32>, vector<64x80xf32>, vector<64x80xf32> -> vector<64x80xf32>
    %12 = arith.addf %6, %11 : vector<64x80xf32>
    %c0_14 = arith.constant 0 : index
    %c0_15 = arith.constant 0 : index
    %c0_16 = arith.constant 0 : index
    %c2 = arith.constant 2 : index
    %13 = vector.load %arg1[%c0_14, %c0_15, %c0_16, %c2] : memref<1x1x64x128xf32, #tpu.memory_space<vmem>>, vector<1x1x64x80xf32>
    %14 = vector.shape_cast %13 : vector<1x1x64x80xf32> to vector<64x80xf32>
    %c2_17 = arith.constant 2 : index
    %c0_18 = arith.constant 0 : index
    %c0_19 = arith.constant 0 : index
    %15 = vector.load %arg2[%c2_17, %c0_18, %c0_19] : memref<9x64x64xf32, #tpu.memory_space<vmem>>, vector<1x64x64xf32>
    %16 = vector.shape_cast %15 : vector<1x64x64xf32> to vector<64x64xf32>
    %cst_20 = arith.constant dense<0.000000e+00> : vector<64x80xf32>
    %17 = tpu.matmul %16, %14, %cst_20 {dimension_numbers = #tpu.dot_dimension_numbers<[1], [0], [0], [1], [0, 0, 1, 1], [], []>} : vector<64x64xf32>, vector<64x80xf32>, vector<64x80xf32> -> vector<64x80xf32>
    %18 = arith.addf %12, %17 : vector<64x80xf32>
    %c0_21 = arith.constant 0 : index
    %c0_22 = arith.constant 0 : index
    %c0_23 = arith.constant 0 : index
    %c10 = arith.constant 10 : index
    %19 = vector.load %arg1[%c0_21, %c0_22, %c0_23, %c10] : memref<1x1x64x128xf32, #tpu.memory_space<vmem>>, vector<1x1x64x80xf32>
    %20 = vector.shape_cast %19 : vector<1x1x64x80xf32> to vector<64x80xf32>
    %c3 = arith.constant 3 : index
    %c0_24 = arith.constant 0 : index
    %c0_25 = arith.constant 0 : index
    %21 = vector.load %arg2[%c3, %c0_24, %c0_25] : memref<9x64x64xf32, #tpu.memory_space<vmem>>, vector<1x64x64xf32>
    %22 = vector.shape_cast %21 : vector<1x64x64xf32> to vector<64x64xf32>
    %cst_26 = arith.constant dense<0.000000e+00> : vector<64x80xf32>
    %23 = tpu.matmul %22, %20, %cst_26 {dimension_numbers = #tpu.dot_dimension_numbers<[1], [0], [0], [1], [0, 0, 1, 1], [], []>} : vector<64x64xf32>, vector<64x80xf32>, vector<64x80xf32> -> vector<64x80xf32>
    %24 = arith.addf %18, %23 : vector<64x80xf32>
    %c0_27 = arith.constant 0 : index
    %c0_28 = arith.constant 0 : index
    %c0_29 = arith.constant 0 : index
    %c11 = arith.constant 11 : index
    %25 = vector.load %arg1[%c0_27, %c0_28, %c0_29, %c11] : memref<1x1x64x128xf32, #tpu.memory_space<vmem>>, vector<1x1x64x80xf32>
    %26 = vector.shape_cast %25 : vector<1x1x64x80xf32> to vector<64x80xf32>
    %c4 = arith.constant 4 : index
    %c0_30 = arith.constant 0 : index
    %c0_31 = arith.constant 0 : index
    %27 = vector.load %arg2[%c4, %c0_30, %c0_31] : memref<9x64x64xf32, #tpu.memory_space<vmem>>, vector<1x64x64xf32>
    %28 = vector.shape_cast %27 : vector<1x64x64xf32> to vector<64x64xf32>
    %cst_32 = arith.constant dense<0.000000e+00> : vector<64x80xf32>
    %29 = tpu.matmul %28, %26, %cst_32 {dimension_numbers = #tpu.dot_dimension_numbers<[1], [0], [0], [1], [0, 0, 1, 1], [], []>} : vector<64x64xf32>, vector<64x80xf32>, vector<64x80xf32> -> vector<64x80xf32>
    %30 = arith.addf %24, %29 : vector<64x80xf32>
    %c0_33 = arith.constant 0 : index
    %c0_34 = arith.constant 0 : index
    %c0_35 = arith.constant 0 : index
    %c12 = arith.constant 12 : index
    %31 = vector.load %arg1[%c0_33, %c0_34, %c0_35, %c12] : memref<1x1x64x128xf32, #tpu.memory_space<vmem>>, vector<1x1x64x80xf32>
    %32 = vector.shape_cast %31 : vector<1x1x64x80xf32> to vector<64x80xf32>
    %c5 = arith.constant 5 : index
    %c0_36 = arith.constant 0 : index
    %c0_37 = arith.constant 0 : index
    %33 = vector.load %arg2[%c5, %c0_36, %c0_37] : memref<9x64x64xf32, #tpu.memory_space<vmem>>, vector<1x64x64xf32>
    %34 = vector.shape_cast %33 : vector<1x64x64xf32> to vector<64x64xf32>
    %cst_38 = arith.constant dense<0.000000e+00> : vector<64x80xf32>
    %35 = tpu.matmul %34, %32, %cst_38 {dimension_numbers = #tpu.dot_dimension_numbers<[1], [0], [0], [1], [0, 0, 1, 1], [], []>} : vector<64x64xf32>, vector<64x80xf32>, vector<64x80xf32> -> vector<64x80xf32>
    %36 = arith.addf %30, %35 : vector<64x80xf32>
    %c0_39 = arith.constant 0 : index
    %c0_40 = arith.constant 0 : index
    %c0_41 = arith.constant 0 : index
    %c20 = arith.constant 20 : index
    %37 = vector.load %arg1[%c0_39, %c0_40, %c0_41, %c20] : memref<1x1x64x128xf32, #tpu.memory_space<vmem>>, vector<1x1x64x80xf32>
    %38 = vector.shape_cast %37 : vector<1x1x64x80xf32> to vector<64x80xf32>
    %c6 = arith.constant 6 : index
    %c0_42 = arith.constant 0 : index
    %c0_43 = arith.constant 0 : index
    %39 = vector.load %arg2[%c6, %c0_42, %c0_43] : memref<9x64x64xf32, #tpu.memory_space<vmem>>, vector<1x64x64xf32>
    %40 = vector.shape_cast %39 : vector<1x64x64xf32> to vector<64x64xf32>
    %cst_44 = arith.constant dense<0.000000e+00> : vector<64x80xf32>
    %41 = tpu.matmul %40, %38, %cst_44 {dimension_numbers = #tpu.dot_dimension_numbers<[1], [0], [0], [1], [0, 0, 1, 1], [], []>} : vector<64x64xf32>, vector<64x80xf32>, vector<64x80xf32> -> vector<64x80xf32>
    %42 = arith.addf %36, %41 : vector<64x80xf32>
    %c0_45 = arith.constant 0 : index
    %c0_46 = arith.constant 0 : index
    %c0_47 = arith.constant 0 : index
    %c21 = arith.constant 21 : index
    %43 = vector.load %arg1[%c0_45, %c0_46, %c0_47, %c21] : memref<1x1x64x128xf32, #tpu.memory_space<vmem>>, vector<1x1x64x80xf32>
    %44 = vector.shape_cast %43 : vector<1x1x64x80xf32> to vector<64x80xf32>
    %c7 = arith.constant 7 : index
    %c0_48 = arith.constant 0 : index
    %c0_49 = arith.constant 0 : index
    %45 = vector.load %arg2[%c7, %c0_48, %c0_49] : memref<9x64x64xf32, #tpu.memory_space<vmem>>, vector<1x64x64xf32>
    %46 = vector.shape_cast %45 : vector<1x64x64xf32> to vector<64x64xf32>
    %cst_50 = arith.constant dense<0.000000e+00> : vector<64x80xf32>
    %47 = tpu.matmul %46, %44, %cst_50 {dimension_numbers = #tpu.dot_dimension_numbers<[1], [0], [0], [1], [0, 0, 1, 1], [], []>} : vector<64x64xf32>, vector<64x80xf32>, vector<64x80xf32> -> vector<64x80xf32>
    %48 = arith.addf %42, %47 : vector<64x80xf32>
    %c0_51 = arith.constant 0 : index
    %c0_52 = arith.constant 0 : index
    %c0_53 = arith.constant 0 : index
    %c22 = arith.constant 22 : index
    %49 = vector.load %arg1[%c0_51, %c0_52, %c0_53, %c22] : memref<1x1x64x128xf32, #tpu.memory_space<vmem>>, vector<1x1x64x80xf32>
    %50 = vector.shape_cast %49 : vector<1x1x64x80xf32> to vector<64x80xf32>
    %c8 = arith.constant 8 : index
    %c0_54 = arith.constant 0 : index
    %c0_55 = arith.constant 0 : index
    %51 = vector.load %arg2[%c8, %c0_54, %c0_55] : memref<9x64x64xf32, #tpu.memory_space<vmem>>, vector<1x64x64xf32>
    %52 = vector.shape_cast %51 : vector<1x64x64xf32> to vector<64x64xf32>
    %cst_56 = arith.constant dense<0.000000e+00> : vector<64x80xf32>
    %53 = tpu.matmul %52, %50, %cst_56 {dimension_numbers = #tpu.dot_dimension_numbers<[1], [0], [0], [1], [0, 0, 1, 1], [], []>} : vector<64x64xf32>, vector<64x80xf32>, vector<64x80xf32> -> vector<64x80xf32>
    %54 = arith.addf %48, %53 : vector<64x80xf32>
    %c0_57 = arith.constant 0 : index
    %c0_58 = arith.constant 0 : index
    %55 = vector.load %arg3[%c0_57, %c0_58] : memref<64x1xf32, #tpu.memory_space<vmem>>, vector<64x1xf32>
    %cst_59 = arith.constant 0.000000e+00 : f32
    %56 = vector.broadcast %cst_59 : f32 to vector<64x80xf32>
    %57 = arith.cmpf ogt, %54, %56 : vector<64x80xf32>
    %58 = vector.broadcast %55 : vector<64x1xf32> to vector<64x80xf32>
    %59 = arith.mulf %54, %58 : vector<64x80xf32>
    %60 = arith.select %57, %54, %59 : vector<64x80xi1>, vector<64x80xf32>
    %c0_60 = arith.constant 0 : index
    %c0_61 = arith.constant 0 : index
    %c0_62 = arith.constant 0 : index
    %61 = vector.load %arg4[%c0_60, %c0_61, %c0_62] : memref<1x64x80xf32, #tpu.memory_space<vmem>>, vector<1x64x80xf32>
    %62 = vector.shape_cast %61 : vector<1x64x80xf32> to vector<64x80xf32>
    %63 = vector.shape_cast %60 : vector<64x80xf32> to vector<1x64x80xf32>
    tpu.vector_store %arg4[%c0_60, %c0_61, %c0_62], %63 {strides = array<i32>} : memref<1x64x80xf32, #tpu.memory_space<vmem>>, vector<1x64x80xf32>,
    return
  }
  func.func @transform_0(%arg0: i32) -> (i32, i32, i32, i32) {
    %c0_i32 = arith.constant 0 : i32
    %c0_i32_0 = arith.constant 0 : i32
    %c0_i32_1 = arith.constant 0 : i32
    %c0_i32_2 = arith.constant 0 : i32
    return %arg0, %c0_i32, %c0_i32_0, %c0_i32_1 : i32, i32, i32, i32
  }
  func.func @transform_1(%arg0: i32) -> (i32, i32, i32) {
    %c0_i32 = arith.constant 0 : i32
    %c0_i32_0 = arith.constant 0 : i32
    %c0_i32_1 = arith.constant 0 : i32
    %c0_i32_2 = arith.constant 0 : i32
    return %c0_i32, %c0_i32_0, %c0_i32_1 : i32, i32, i32
  }
  func.func @transform_2(%arg0: i32) -> (i32, i32) {
    %c0_i32 = arith.constant 0 : i32
    %c0_i32_0 = arith.constant 0 : i32
    %c0_i32_1 = arith.constant 0 : i32
    return %c0_i32, %c0_i32_0 : i32, i32
  }
  func.func @transform_3(%arg0: i32) -> (i32, i32, i32) {
    %c0_i32 = arith.constant 0 : i32
    %c0_i32_0 = arith.constant 0 : i32
    %c0_i32_1 = arith.constant 0 : i32
    return %arg0, %c0_i32, %c0_i32_0 : i32, i32, i32
  }
}

module attributes {stable_mosaic.version = 11 : i64} {
  func.func @_conv3x3_prelu_kernel(%arg0: i32, %arg1: memref<1x4x64x128xf32, #tpu.memory_space<vmem>>, %arg2: memref<9x96x64xf32, #tpu.memory_space<vmem>>, %arg3: memref<96x1xf32, #tpu.memory_space<vmem>>, %arg4: memref<1x96x20xf32, #tpu.memory_space<vmem>>) attributes {dimension_semantics = [#tpu.dimension_semantics<parallel>], iteration_bounds = array<i64: 2>, scalar_prefetch = 0 : i64, scratch_operands = 0 : i64, tpu.core_type = #tpu.core_type<tc>, window_params = [{transform_indices = @transform_0, window_bounds = array<i64: 1, 4, 64, 128>}, {pipeline_mode = #tpu.pipeline_mode<synchronous>, transform_indices = @transform_1, window_bounds = array<i64: 9, 96, 64>}, {pipeline_mode = #tpu.pipeline_mode<synchronous>, transform_indices = @transform_2, window_bounds = array<i64: 96, 1>}, {transform_indices = @transform_3, window_bounds = array<i64: 1, 96, 20>}]} {
    %cst = arith.constant 0.000000e+00 : f32
    %0 = vector.broadcast %cst : f32 to vector<96x20xf32>
    %c0 = arith.constant 0 : index
    %c0_0 = arith.constant 0 : index
    %c0_1 = arith.constant 0 : index
    %c0_2 = arith.constant 0 : index
    %1 = vector.load %arg1[%c0, %c0_0, %c0_1, %c0_2] : memref<1x4x64x128xf32, #tpu.memory_space<vmem>>, vector<1x1x64x20xf32>
    %2 = vector.shape_cast %1 : vector<1x1x64x20xf32> to vector<64x20xf32>
    %c0_3 = arith.constant 0 : index
    %c0_4 = arith.constant 0 : index
    %c0_5 = arith.constant 0 : index
    %3 = vector.load %arg2[%c0_3, %c0_4, %c0_5] : memref<9x96x64xf32, #tpu.memory_space<vmem>>, vector<1x96x64xf32>
    %4 = vector.shape_cast %3 : vector<1x96x64xf32> to vector<96x64xf32>
    %cst_6 = arith.constant dense<0.000000e+00> : vector<96x20xf32>
    %5 = tpu.matmul %4, %2, %cst_6 {dimension_numbers = #tpu.dot_dimension_numbers<[1], [0], [0], [1], [0, 0, 1, 1], [], []>} : vector<96x64xf32>, vector<64x20xf32>, vector<96x20xf32> -> vector<96x20xf32>
    %6 = arith.addf %0, %5 : vector<96x20xf32>
    %c0_7 = arith.constant 0 : index
    %c1 = arith.constant 1 : index
    %c0_8 = arith.constant 0 : index
    %c0_9 = arith.constant 0 : index
    %7 = vector.load %arg1[%c0_7, %c1, %c0_8, %c0_9] : memref<1x4x64x128xf32, #tpu.memory_space<vmem>>, vector<1x1x64x20xf32>
    %8 = vector.shape_cast %7 : vector<1x1x64x20xf32> to vector<64x20xf32>
    %c1_10 = arith.constant 1 : index
    %c0_11 = arith.constant 0 : index
    %c0_12 = arith.constant 0 : index
    %9 = vector.load %arg2[%c1_10, %c0_11, %c0_12] : memref<9x96x64xf32, #tpu.memory_space<vmem>>, vector<1x96x64xf32>
    %10 = vector.shape_cast %9 : vector<1x96x64xf32> to vector<96x64xf32>
    %cst_13 = arith.constant dense<0.000000e+00> : vector<96x20xf32>
    %11 = tpu.matmul %10, %8, %cst_13 {dimension_numbers = #tpu.dot_dimension_numbers<[1], [0], [0], [1], [0, 0, 1, 1], [], []>} : vector<96x64xf32>, vector<64x20xf32>, vector<96x20xf32> -> vector<96x20xf32>
    %12 = arith.addf %6, %11 : vector<96x20xf32>
    %c0_14 = arith.constant 0 : index
    %c0_15 = arith.constant 0 : index
    %c0_16 = arith.constant 0 : index
    %c1_17 = arith.constant 1 : index
    %13 = vector.load %arg1[%c0_14, %c0_15, %c0_16, %c1_17] : memref<1x4x64x128xf32, #tpu.memory_space<vmem>>, vector<1x1x64x20xf32>
    %14 = vector.shape_cast %13 : vector<1x1x64x20xf32> to vector<64x20xf32>
    %c2 = arith.constant 2 : index
    %c0_18 = arith.constant 0 : index
    %c0_19 = arith.constant 0 : index
    %15 = vector.load %arg2[%c2, %c0_18, %c0_19] : memref<9x96x64xf32, #tpu.memory_space<vmem>>, vector<1x96x64xf32>
    %16 = vector.shape_cast %15 : vector<1x96x64xf32> to vector<96x64xf32>
    %cst_20 = arith.constant dense<0.000000e+00> : vector<96x20xf32>
    %17 = tpu.matmul %16, %14, %cst_20 {dimension_numbers = #tpu.dot_dimension_numbers<[1], [0], [0], [1], [0, 0, 1, 1], [], []>} : vector<96x64xf32>, vector<64x20xf32>, vector<96x20xf32> -> vector<96x20xf32>
    %18 = arith.addf %12, %17 : vector<96x20xf32>
    %c0_21 = arith.constant 0 : index
    %c2_22 = arith.constant 2 : index
    %c0_23 = arith.constant 0 : index
    %c0_24 = arith.constant 0 : index
    %19 = vector.load %arg1[%c0_21, %c2_22, %c0_23, %c0_24] : memref<1x4x64x128xf32, #tpu.memory_space<vmem>>, vector<1x1x64x20xf32>
    %20 = vector.shape_cast %19 : vector<1x1x64x20xf32> to vector<64x20xf32>
    %c3 = arith.constant 3 : index
    %c0_25 = arith.constant 0 : index
    %c0_26 = arith.constant 0 : index
    %21 = vector.load %arg2[%c3, %c0_25, %c0_26] : memref<9x96x64xf32, #tpu.memory_space<vmem>>, vector<1x96x64xf32>
    %22 = vector.shape_cast %21 : vector<1x96x64xf32> to vector<96x64xf32>
    %cst_27 = arith.constant dense<0.000000e+00> : vector<96x20xf32>
    %23 = tpu.matmul %22, %20, %cst_27 {dimension_numbers = #tpu.dot_dimension_numbers<[1], [0], [0], [1], [0, 0, 1, 1], [], []>} : vector<96x64xf32>, vector<64x20xf32>, vector<96x20xf32> -> vector<96x20xf32>
    %24 = arith.addf %18, %23 : vector<96x20xf32>
    %c0_28 = arith.constant 0 : index
    %c3_29 = arith.constant 3 : index
    %c0_30 = arith.constant 0 : index
    %c0_31 = arith.constant 0 : index
    %25 = vector.load %arg1[%c0_28, %c3_29, %c0_30, %c0_31] : memref<1x4x64x128xf32, #tpu.memory_space<vmem>>, vector<1x1x64x20xf32>
    %26 = vector.shape_cast %25 : vector<1x1x64x20xf32> to vector<64x20xf32>
    %c4 = arith.constant 4 : index
    %c0_32 = arith.constant 0 : index
    %c0_33 = arith.constant 0 : index
    %27 = vector.load %arg2[%c4, %c0_32, %c0_33] : memref<9x96x64xf32, #tpu.memory_space<vmem>>, vector<1x96x64xf32>
    %28 = vector.shape_cast %27 : vector<1x96x64xf32> to vector<96x64xf32>
    %cst_34 = arith.constant dense<0.000000e+00> : vector<96x20xf32>
    %29 = tpu.matmul %28, %26, %cst_34 {dimension_numbers = #tpu.dot_dimension_numbers<[1], [0], [0], [1], [0, 0, 1, 1], [], []>} : vector<96x64xf32>, vector<64x20xf32>, vector<96x20xf32> -> vector<96x20xf32>
    %30 = arith.addf %24, %29 : vector<96x20xf32>
    %c0_35 = arith.constant 0 : index
    %c2_36 = arith.constant 2 : index
    %c0_37 = arith.constant 0 : index
    %c1_38 = arith.constant 1 : index
    %31 = vector.load %arg1[%c0_35, %c2_36, %c0_37, %c1_38] : memref<1x4x64x128xf32, #tpu.memory_space<vmem>>, vector<1x1x64x20xf32>
    %32 = vector.shape_cast %31 : vector<1x1x64x20xf32> to vector<64x20xf32>
    %c5 = arith.constant 5 : index
    %c0_39 = arith.constant 0 : index
    %c0_40 = arith.constant 0 : index
    %33 = vector.load %arg2[%c5, %c0_39, %c0_40] : memref<9x96x64xf32, #tpu.memory_space<vmem>>, vector<1x96x64xf32>
    %34 = vector.shape_cast %33 : vector<1x96x64xf32> to vector<96x64xf32>
    %cst_41 = arith.constant dense<0.000000e+00> : vector<96x20xf32>
    %35 = tpu.matmul %34, %32, %cst_41 {dimension_numbers = #tpu.dot_dimension_numbers<[1], [0], [0], [1], [0, 0, 1, 1], [], []>} : vector<96x64xf32>, vector<64x20xf32>, vector<96x20xf32> -> vector<96x20xf32>
    %36 = arith.addf %30, %35 : vector<96x20xf32>
    %c0_42 = arith.constant 0 : index
    %c0_43 = arith.constant 0 : index
    %c0_44 = arith.constant 0 : index
    %c5_45 = arith.constant 5 : index
    %37 = vector.load %arg1[%c0_42, %c0_43, %c0_44, %c5_45] : memref<1x4x64x128xf32, #tpu.memory_space<vmem>>, vector<1x1x64x20xf32>
    %38 = vector.shape_cast %37 : vector<1x1x64x20xf32> to vector<64x20xf32>
    %c6 = arith.constant 6 : index
    %c0_46 = arith.constant 0 : index
    %c0_47 = arith.constant 0 : index
    %39 = vector.load %arg2[%c6, %c0_46, %c0_47] : memref<9x96x64xf32, #tpu.memory_space<vmem>>, vector<1x96x64xf32>
    %40 = vector.shape_cast %39 : vector<1x96x64xf32> to vector<96x64xf32>
    %cst_48 = arith.constant dense<0.000000e+00> : vector<96x20xf32>
    %41 = tpu.matmul %40, %38, %cst_48 {dimension_numbers = #tpu.dot_dimension_numbers<[1], [0], [0], [1], [0, 0, 1, 1], [], []>} : vector<96x64xf32>, vector<64x20xf32>, vector<96x20xf32> -> vector<96x20xf32>
    %42 = arith.addf %36, %41 : vector<96x20xf32>
    %c0_49 = arith.constant 0 : index
    %c1_50 = arith.constant 1 : index
    %c0_51 = arith.constant 0 : index
    %c5_52 = arith.constant 5 : index
    %43 = vector.load %arg1[%c0_49, %c1_50, %c0_51, %c5_52] : memref<1x4x64x128xf32, #tpu.memory_space<vmem>>, vector<1x1x64x20xf32>
    %44 = vector.shape_cast %43 : vector<1x1x64x20xf32> to vector<64x20xf32>
    %c7 = arith.constant 7 : index
    %c0_53 = arith.constant 0 : index
    %c0_54 = arith.constant 0 : index
    %45 = vector.load %arg2[%c7, %c0_53, %c0_54] : memref<9x96x64xf32, #tpu.memory_space<vmem>>, vector<1x96x64xf32>
    %46 = vector.shape_cast %45 : vector<1x96x64xf32> to vector<96x64xf32>
    %cst_55 = arith.constant dense<0.000000e+00> : vector<96x20xf32>
    %47 = tpu.matmul %46, %44, %cst_55 {dimension_numbers = #tpu.dot_dimension_numbers<[1], [0], [0], [1], [0, 0, 1, 1], [], []>} : vector<96x64xf32>, vector<64x20xf32>, vector<96x20xf32> -> vector<96x20xf32>
    %48 = arith.addf %42, %47 : vector<96x20xf32>
    %c0_56 = arith.constant 0 : index
    %c0_57 = arith.constant 0 : index
    %c0_58 = arith.constant 0 : index
    %c6_59 = arith.constant 6 : index
    %49 = vector.load %arg1[%c0_56, %c0_57, %c0_58, %c6_59] : memref<1x4x64x128xf32, #tpu.memory_space<vmem>>, vector<1x1x64x20xf32>
    %50 = vector.shape_cast %49 : vector<1x1x64x20xf32> to vector<64x20xf32>
    %c8 = arith.constant 8 : index
    %c0_60 = arith.constant 0 : index
    %c0_61 = arith.constant 0 : index
    %51 = vector.load %arg2[%c8, %c0_60, %c0_61] : memref<9x96x64xf32, #tpu.memory_space<vmem>>, vector<1x96x64xf32>
    %52 = vector.shape_cast %51 : vector<1x96x64xf32> to vector<96x64xf32>
    %cst_62 = arith.constant dense<0.000000e+00> : vector<96x20xf32>
    %53 = tpu.matmul %52, %50, %cst_62 {dimension_numbers = #tpu.dot_dimension_numbers<[1], [0], [0], [1], [0, 0, 1, 1], [], []>} : vector<96x64xf32>, vector<64x20xf32>, vector<96x20xf32> -> vector<96x20xf32>
    %54 = arith.addf %48, %53 : vector<96x20xf32>
    %c0_63 = arith.constant 0 : index
    %c0_64 = arith.constant 0 : index
    %55 = vector.load %arg3[%c0_63, %c0_64] : memref<96x1xf32, #tpu.memory_space<vmem>>, vector<96x1xf32>
    %cst_65 = arith.constant 0.000000e+00 : f32
    %56 = vector.broadcast %cst_65 : f32 to vector<96x20xf32>
    %57 = arith.cmpf ogt, %54, %56 : vector<96x20xf32>
    %58 = vector.broadcast %55 : vector<96x1xf32> to vector<96x20xf32>
    %59 = arith.mulf %54, %58 : vector<96x20xf32>
    %60 = arith.select %57, %54, %59 : vector<96x20xi1>, vector<96x20xf32>
    %c0_66 = arith.constant 0 : index
    %c0_67 = arith.constant 0 : index
    %c0_68 = arith.constant 0 : index
    %61 = vector.load %arg4[%c0_66, %c0_67, %c0_68] : memref<1x96x20xf32, #tpu.memory_space<vmem>>, vector<1x96x20xf32>
    %62 = vector.shape_cast %61 : vector<1x96x20xf32> to vector<96x20xf32>
    %63 = vector.shape_cast %60 : vector<96x20xf32> to vector<1x96x20xf32>
    tpu.vector_store %arg4[%c0_66, %c0_67, %c0_68], %63 {strides = array<i32>} : memref<1x96x20xf32, #tpu.memory_space<vmem>>, vector<1x96x20xf32>,
    return
  }
  func.func @transform_0(%arg0: i32) -> (i32, i32, i32, i32) {
    %c0_i32 = arith.constant 0 : i32
    %c0_i32_0 = arith.constant 0 : i32
    %c0_i32_1 = arith.constant 0 : i32
    %c0_i32_2 = arith.constant 0 : i32
    return %arg0, %c0_i32, %c0_i32_0, %c0_i32_1 : i32, i32, i32, i32
  }
  func.func @transform_1(%arg0: i32) -> (i32, i32, i32) {
    %c0_i32 = arith.constant 0 : i32
    %c0_i32_0 = arith.constant 0 : i32
    %c0_i32_1 = arith.constant 0 : i32
    %c0_i32_2 = arith.constant 0 : i32
    return %c0_i32, %c0_i32_0, %c0_i32_1 : i32, i32, i32
  }
  func.func @transform_2(%arg0: i32) -> (i32, i32) {
    %c0_i32 = arith.constant 0 : i32
    %c0_i32_0 = arith.constant 0 : i32
    %c0_i32_1 = arith.constant 0 : i32
    return %c0_i32, %c0_i32_0 : i32, i32
  }
  func.func @transform_3(%arg0: i32) -> (i32, i32, i32) {
    %c0_i32 = arith.constant 0 : i32
    %c0_i32_0 = arith.constant 0 : i32
    %c0_i32_1 = arith.constant 0 : i32
    return %arg0, %c0_i32, %c0_i32_0 : i32, i32, i32
  }
}

module attributes {stable_mosaic.version = 11 : i64} {
  func.func @_conv3x3_prelu_kernel(%arg0: i32, %arg1: memref<1x1x96x128xf32, #tpu.memory_space<vmem>>, %arg2: memref<9x96x96xf32, #tpu.memory_space<vmem>>, %arg3: memref<96x1xf32, #tpu.memory_space<vmem>>, %arg4: memref<1x96x24xf32, #tpu.memory_space<vmem>>) attributes {dimension_semantics = [#tpu.dimension_semantics<parallel>], iteration_bounds = array<i64: 2>, scalar_prefetch = 0 : i64, scratch_operands = 0 : i64, tpu.core_type = #tpu.core_type<tc>, window_params = [{transform_indices = @transform_0, window_bounds = array<i64: 1, 1, 96, 128>}, {pipeline_mode = #tpu.pipeline_mode<synchronous>, transform_indices = @transform_1, window_bounds = array<i64: 9, 96, 96>}, {pipeline_mode = #tpu.pipeline_mode<synchronous>, transform_indices = @transform_2, window_bounds = array<i64: 96, 1>}, {transform_indices = @transform_3, window_bounds = array<i64: 1, 96, 24>}]} {
    %cst = arith.constant 0.000000e+00 : f32
    %0 = vector.broadcast %cst : f32 to vector<96x24xf32>
    %c0 = arith.constant 0 : index
    %c0_0 = arith.constant 0 : index
    %c0_1 = arith.constant 0 : index
    %c0_2 = arith.constant 0 : index
    %1 = vector.load %arg1[%c0, %c0_0, %c0_1, %c0_2] : memref<1x1x96x128xf32, #tpu.memory_space<vmem>>, vector<1x1x96x24xf32>
    %2 = vector.shape_cast %1 : vector<1x1x96x24xf32> to vector<96x24xf32>
    %c0_3 = arith.constant 0 : index
    %c0_4 = arith.constant 0 : index
    %c0_5 = arith.constant 0 : index
    %3 = vector.load %arg2[%c0_3, %c0_4, %c0_5] : memref<9x96x96xf32, #tpu.memory_space<vmem>>, vector<1x96x96xf32>
    %4 = vector.shape_cast %3 : vector<1x96x96xf32> to vector<96x96xf32>
    %cst_6 = arith.constant dense<0.000000e+00> : vector<96x24xf32>
    %5 = tpu.matmul %4, %2, %cst_6 {dimension_numbers = #tpu.dot_dimension_numbers<[1], [0], [0], [1], [0, 0, 1, 1], [], []>} : vector<96x96xf32>, vector<96x24xf32>, vector<96x24xf32> -> vector<96x24xf32>
    %6 = arith.addf %0, %5 : vector<96x24xf32>
    %c0_7 = arith.constant 0 : index
    %c0_8 = arith.constant 0 : index
    %c0_9 = arith.constant 0 : index
    %c1 = arith.constant 1 : index
    %7 = vector.load %arg1[%c0_7, %c0_8, %c0_9, %c1] : memref<1x1x96x128xf32, #tpu.memory_space<vmem>>, vector<1x1x96x24xf32>
    %8 = vector.shape_cast %7 : vector<1x1x96x24xf32> to vector<96x24xf32>
    %c1_10 = arith.constant 1 : index
    %c0_11 = arith.constant 0 : index
    %c0_12 = arith.constant 0 : index
    %9 = vector.load %arg2[%c1_10, %c0_11, %c0_12] : memref<9x96x96xf32, #tpu.memory_space<vmem>>, vector<1x96x96xf32>
    %10 = vector.shape_cast %9 : vector<1x96x96xf32> to vector<96x96xf32>
    %cst_13 = arith.constant dense<0.000000e+00> : vector<96x24xf32>
    %11 = tpu.matmul %10, %8, %cst_13 {dimension_numbers = #tpu.dot_dimension_numbers<[1], [0], [0], [1], [0, 0, 1, 1], [], []>} : vector<96x96xf32>, vector<96x24xf32>, vector<96x24xf32> -> vector<96x24xf32>
    %12 = arith.addf %6, %11 : vector<96x24xf32>
    %c0_14 = arith.constant 0 : index
    %c0_15 = arith.constant 0 : index
    %c0_16 = arith.constant 0 : index
    %c2 = arith.constant 2 : index
    %13 = vector.load %arg1[%c0_14, %c0_15, %c0_16, %c2] : memref<1x1x96x128xf32, #tpu.memory_space<vmem>>, vector<1x1x96x24xf32>
    %14 = vector.shape_cast %13 : vector<1x1x96x24xf32> to vector<96x24xf32>
    %c2_17 = arith.constant 2 : index
    %c0_18 = arith.constant 0 : index
    %c0_19 = arith.constant 0 : index
    %15 = vector.load %arg2[%c2_17, %c0_18, %c0_19] : memref<9x96x96xf32, #tpu.memory_space<vmem>>, vector<1x96x96xf32>
    %16 = vector.shape_cast %15 : vector<1x96x96xf32> to vector<96x96xf32>
    %cst_20 = arith.constant dense<0.000000e+00> : vector<96x24xf32>
    %17 = tpu.matmul %16, %14, %cst_20 {dimension_numbers = #tpu.dot_dimension_numbers<[1], [0], [0], [1], [0, 0, 1, 1], [], []>} : vector<96x96xf32>, vector<96x24xf32>, vector<96x24xf32> -> vector<96x24xf32>
    %18 = arith.addf %12, %17 : vector<96x24xf32>
    %c0_21 = arith.constant 0 : index
    %c0_22 = arith.constant 0 : index
    %c0_23 = arith.constant 0 : index
    %c6 = arith.constant 6 : index
    %19 = vector.load %arg1[%c0_21, %c0_22, %c0_23, %c6] : memref<1x1x96x128xf32, #tpu.memory_space<vmem>>, vector<1x1x96x24xf32>
    %20 = vector.shape_cast %19 : vector<1x1x96x24xf32> to vector<96x24xf32>
    %c3 = arith.constant 3 : index
    %c0_24 = arith.constant 0 : index
    %c0_25 = arith.constant 0 : index
    %21 = vector.load %arg2[%c3, %c0_24, %c0_25] : memref<9x96x96xf32, #tpu.memory_space<vmem>>, vector<1x96x96xf32>
    %22 = vector.shape_cast %21 : vector<1x96x96xf32> to vector<96x96xf32>
    %cst_26 = arith.constant dense<0.000000e+00> : vector<96x24xf32>
    %23 = tpu.matmul %22, %20, %cst_26 {dimension_numbers = #tpu.dot_dimension_numbers<[1], [0], [0], [1], [0, 0, 1, 1], [], []>} : vector<96x96xf32>, vector<96x24xf32>, vector<96x24xf32> -> vector<96x24xf32>
    %24 = arith.addf %18, %23 : vector<96x24xf32>
    %c0_27 = arith.constant 0 : index
    %c0_28 = arith.constant 0 : index
    %c0_29 = arith.constant 0 : index
    %c7 = arith.constant 7 : index
    %25 = vector.load %arg1[%c0_27, %c0_28, %c0_29, %c7] : memref<1x1x96x128xf32, #tpu.memory_space<vmem>>, vector<1x1x96x24xf32>
    %26 = vector.shape_cast %25 : vector<1x1x96x24xf32> to vector<96x24xf32>
    %c4 = arith.constant 4 : index
    %c0_30 = arith.constant 0 : index
    %c0_31 = arith.constant 0 : index
    %27 = vector.load %arg2[%c4, %c0_30, %c0_31] : memref<9x96x96xf32, #tpu.memory_space<vmem>>, vector<1x96x96xf32>
    %28 = vector.shape_cast %27 : vector<1x96x96xf32> to vector<96x96xf32>
    %cst_32 = arith.constant dense<0.000000e+00> : vector<96x24xf32>
    %29 = tpu.matmul %28, %26, %cst_32 {dimension_numbers = #tpu.dot_dimension_numbers<[1], [0], [0], [1], [0, 0, 1, 1], [], []>} : vector<96x96xf32>, vector<96x24xf32>, vector<96x24xf32> -> vector<96x24xf32>
    %30 = arith.addf %24, %29 : vector<96x24xf32>
    %c0_33 = arith.constant 0 : index
    %c0_34 = arith.constant 0 : index
    %c0_35 = arith.constant 0 : index
    %c8 = arith.constant 8 : index
    %31 = vector.load %arg1[%c0_33, %c0_34, %c0_35, %c8] : memref<1x1x96x128xf32, #tpu.memory_space<vmem>>, vector<1x1x96x24xf32>
    %32 = vector.shape_cast %31 : vector<1x1x96x24xf32> to vector<96x24xf32>
    %c5 = arith.constant 5 : index
    %c0_36 = arith.constant 0 : index
    %c0_37 = arith.constant 0 : index
    %33 = vector.load %arg2[%c5, %c0_36, %c0_37] : memref<9x96x96xf32, #tpu.memory_space<vmem>>, vector<1x96x96xf32>
    %34 = vector.shape_cast %33 : vector<1x96x96xf32> to vector<96x96xf32>
    %cst_38 = arith.constant dense<0.000000e+00> : vector<96x24xf32>
    %35 = tpu.matmul %34, %32, %cst_38 {dimension_numbers = #tpu.dot_dimension_numbers<[1], [0], [0], [1], [0, 0, 1, 1], [], []>} : vector<96x96xf32>, vector<96x24xf32>, vector<96x24xf32> -> vector<96x24xf32>
    %36 = arith.addf %30, %35 : vector<96x24xf32>
    %c0_39 = arith.constant 0 : index
    %c0_40 = arith.constant 0 : index
    %c0_41 = arith.constant 0 : index
    %c12 = arith.constant 12 : index
    %37 = vector.load %arg1[%c0_39, %c0_40, %c0_41, %c12] : memref<1x1x96x128xf32, #tpu.memory_space<vmem>>, vector<1x1x96x24xf32>
    %38 = vector.shape_cast %37 : vector<1x1x96x24xf32> to vector<96x24xf32>
    %c6_42 = arith.constant 6 : index
    %c0_43 = arith.constant 0 : index
    %c0_44 = arith.constant 0 : index
    %39 = vector.load %arg2[%c6_42, %c0_43, %c0_44] : memref<9x96x96xf32, #tpu.memory_space<vmem>>, vector<1x96x96xf32>
    %40 = vector.shape_cast %39 : vector<1x96x96xf32> to vector<96x96xf32>
    %cst_45 = arith.constant dense<0.000000e+00> : vector<96x24xf32>
    %41 = tpu.matmul %40, %38, %cst_45 {dimension_numbers = #tpu.dot_dimension_numbers<[1], [0], [0], [1], [0, 0, 1, 1], [], []>} : vector<96x96xf32>, vector<96x24xf32>, vector<96x24xf32> -> vector<96x24xf32>
    %42 = arith.addf %36, %41 : vector<96x24xf32>
    %c0_46 = arith.constant 0 : index
    %c0_47 = arith.constant 0 : index
    %c0_48 = arith.constant 0 : index
    %c13 = arith.constant 13 : index
    %43 = vector.load %arg1[%c0_46, %c0_47, %c0_48, %c13] : memref<1x1x96x128xf32, #tpu.memory_space<vmem>>, vector<1x1x96x24xf32>
    %44 = vector.shape_cast %43 : vector<1x1x96x24xf32> to vector<96x24xf32>
    %c7_49 = arith.constant 7 : index
    %c0_50 = arith.constant 0 : index
    %c0_51 = arith.constant 0 : index
    %45 = vector.load %arg2[%c7_49, %c0_50, %c0_51] : memref<9x96x96xf32, #tpu.memory_space<vmem>>, vector<1x96x96xf32>
    %46 = vector.shape_cast %45 : vector<1x96x96xf32> to vector<96x96xf32>
    %cst_52 = arith.constant dense<0.000000e+00> : vector<96x24xf32>
    %47 = tpu.matmul %46, %44, %cst_52 {dimension_numbers = #tpu.dot_dimension_numbers<[1], [0], [0], [1], [0, 0, 1, 1], [], []>} : vector<96x96xf32>, vector<96x24xf32>, vector<96x24xf32> -> vector<96x24xf32>
    %48 = arith.addf %42, %47 : vector<96x24xf32>
    %c0_53 = arith.constant 0 : index
    %c0_54 = arith.constant 0 : index
    %c0_55 = arith.constant 0 : index
    %c14 = arith.constant 14 : index
    %49 = vector.load %arg1[%c0_53, %c0_54, %c0_55, %c14] : memref<1x1x96x128xf32, #tpu.memory_space<vmem>>, vector<1x1x96x24xf32>
    %50 = vector.shape_cast %49 : vector<1x1x96x24xf32> to vector<96x24xf32>
    %c8_56 = arith.constant 8 : index
    %c0_57 = arith.constant 0 : index
    %c0_58 = arith.constant 0 : index
    %51 = vector.load %arg2[%c8_56, %c0_57, %c0_58] : memref<9x96x96xf32, #tpu.memory_space<vmem>>, vector<1x96x96xf32>
    %52 = vector.shape_cast %51 : vector<1x96x96xf32> to vector<96x96xf32>
    %cst_59 = arith.constant dense<0.000000e+00> : vector<96x24xf32>
    %53 = tpu.matmul %52, %50, %cst_59 {dimension_numbers = #tpu.dot_dimension_numbers<[1], [0], [0], [1], [0, 0, 1, 1], [], []>} : vector<96x96xf32>, vector<96x24xf32>, vector<96x24xf32> -> vector<96x24xf32>
    %54 = arith.addf %48, %53 : vector<96x24xf32>
    %c0_60 = arith.constant 0 : index
    %c0_61 = arith.constant 0 : index
    %55 = vector.load %arg3[%c0_60, %c0_61] : memref<96x1xf32, #tpu.memory_space<vmem>>, vector<96x1xf32>
    %cst_62 = arith.constant 0.000000e+00 : f32
    %56 = vector.broadcast %cst_62 : f32 to vector<96x24xf32>
    %57 = arith.cmpf ogt, %54, %56 : vector<96x24xf32>
    %58 = vector.broadcast %55 : vector<96x1xf32> to vector<96x24xf32>
    %59 = arith.mulf %54, %58 : vector<96x24xf32>
    %60 = arith.select %57, %54, %59 : vector<96x24xi1>, vector<96x24xf32>
    %c0_63 = arith.constant 0 : index
    %c0_64 = arith.constant 0 : index
    %c0_65 = arith.constant 0 : index
    %61 = vector.load %arg4[%c0_63, %c0_64, %c0_65] : memref<1x96x24xf32, #tpu.memory_space<vmem>>, vector<1x96x24xf32>
    %62 = vector.shape_cast %61 : vector<1x96x24xf32> to vector<96x24xf32>
    %63 = vector.shape_cast %60 : vector<96x24xf32> to vector<1x96x24xf32>
    tpu.vector_store %arg4[%c0_63, %c0_64, %c0_65], %63 {strides = array<i32>} : memref<1x96x24xf32, #tpu.memory_space<vmem>>, vector<1x96x24xf32>,
    return
  }
  func.func @transform_0(%arg0: i32) -> (i32, i32, i32, i32) {
    %c0_i32 = arith.constant 0 : i32
    %c0_i32_0 = arith.constant 0 : i32
    %c0_i32_1 = arith.constant 0 : i32
    %c0_i32_2 = arith.constant 0 : i32
    return %arg0, %c0_i32, %c0_i32_0, %c0_i32_1 : i32, i32, i32, i32
  }
  func.func @transform_1(%arg0: i32) -> (i32, i32, i32) {
    %c0_i32 = arith.constant 0 : i32
    %c0_i32_0 = arith.constant 0 : i32
    %c0_i32_1 = arith.constant 0 : i32
    %c0_i32_2 = arith.constant 0 : i32
    return %c0_i32, %c0_i32_0, %c0_i32_1 : i32, i32, i32
  }
  func.func @transform_2(%arg0: i32) -> (i32, i32) {
    %c0_i32 = arith.constant 0 : i32
    %c0_i32_0 = arith.constant 0 : i32
    %c0_i32_1 = arith.constant 0 : i32
    return %c0_i32, %c0_i32_0 : i32, i32
  }
  func.func @transform_3(%arg0: i32) -> (i32, i32, i32) {
    %c0_i32 = arith.constant 0 : i32
    %c0_i32_0 = arith.constant 0 : i32
    %c0_i32_1 = arith.constant 0 : i32
    return %arg0, %c0_i32, %c0_i32_0 : i32, i32, i32
  }
}

</mosaic_0001>

<bundles_post_ra>
// kernel: encode_forward.6
= control target key start
LH: loop header
LB: loop body
LE: loop exit
PB: predicated region body
PF: predicated region fallthrough
CT: control target
= control target key end

     0   :  { %s1770_s12 = smov 0   ;;  %s2222_s0 = inlined_call_operand.vmem [shape: f32[2,1,3,384], index: 0, kind: input, shape index: {}]   ;;  %s2223_s1 = inlined_call_operand.vmem [shape: f32[9,32,3], index: 1, kind: input, shape index: {}]   ;;  %s2224_s2 = inlined_call_operand.vmem [shape: f32[32,1], index: 2, kind: input, shape index: {}]   ;;  %s2225_s3 = inlined_call_operand.vmem [shape: f32[2,32,288], index: 3, kind: output, shape index: {}]  }
   0x1 LB: > { %s1532_s13 = sadd.s32 4294967295, %s1739_s12   ;;  %p1536_p0 = scmp.ge.s32.totalorder %s1739_s12, 1  ;;  %s1739_s12 = sphi %s1770_s12, %s13_s12  }
   0x2   : > { %p137_p1 = scmp.lt.s32.totalorder %s1739_s12, 3 }
   0x4   : > { %p138_p2 = pnand %p1536_p0, %p137_p1 }
   0x5   : > { %p161_p3 = scmp.lt.s32.totalorder (!%p138_p2), %s1532_s13, 1  ;;  %s1741_s18 = smov (!%p138_p2), 127  }
   0x6   : > { %141 = sbr.rel (%p138_p2) target bundleno = 498 (0x1f2), region = 32  ;;  %s1742_s19 = smov (!%p138_p2), 126  }
   0x7   : > { %s1743_s20 = smov (!%p138_p2), 110   ;;  %s1744_s21 = smov (!%p138_p2), 109  }
   0x8   : > { %s1745_s22 = smov (!%p138_p2), 108   ;;  %s1746_s23 = smov (!%p138_p2), 92  }
   0x9   : > { %s1747_s24 = smov (!%p138_p2), 91   ;;  %s1748_s6 = smov (!%p138_p2), 90  }
   0xb   : > { %s2227_s13 = smov (!%p161_p3, %s1532_s13), 1  ;;  %vm212_vm0 = vcmask 1042432   ;;  %vm199_vm1 = vcmask 23552   ;;  %v1540_v41 = vld [vmem:[%s2223_s1 + $0x28] sm:$0xff]  ;;  %vm196_vm2 = vcmask 1039360   ;;  %v1539_v43 = vld [vmem:[%s2223_s1 + $0x20] sm:$0xff] }
   0xc   : > { %s1711_s14 = smul.u32 12, %s2227_s13  ;;  %vm438_vm3 = vcmask 1031168   ;;  %v1541_v48 = vld [vmem:[%s2223_s1 + $0x30] sm:$0xff]  ;;  %v1542_v52 = vld [vmem:[%s2223_s1 + $0x38] sm:$0xff]  ;;  %vm579_vm4 = vcmask 900096   ;;  %v1573_v59 = vld [vmem:[%s2223_s1 + $0x40] sm:$0xff] }
   0xd   : > { %v173_v61 = vld [vmem:[%s2223_s1] sm:$0xff]  ;;  %v1574_v62 = vld [vmem:[%s2223_s1 + $0x48] sm:$0xff]  ;;  %vm720_vm5 = vcmask 891904   ;;  %vm861_vm6 = vcmask 883712   ;;  %vm1002_vm7 = vcmask 752640   ;;  %vm1143_vm8 = vcmask 744448  }
   0xe   : > { %s1784_s17 = scalar_lea.vmem %s2222_s0, %s1711_s14  ;;  %vm1284_vm9 = vcmask 736256   ;;  %s1712_s4 = smul.u32 96, %s2227_s13  ;;  %vm1466_vm14 = vcmask 261120  }
   0xf   : > { %v171_v0 = vld [vmem:[%s1784_s17] sm:$0x77]  ;;  %v172_v1 = vld [vmem:[%s1784_s17 + $0x8] sm:$0x7] }
  0x10   : > { %184 = vst [vmem:[#allocation1] ss:$2 sm:$0xff] %v171_v0  ;;  %v417_v5 = vld [vmem:[%s1784_s17] sm:$0x77]  ;;  %v418_v6 = vld [vmem:[%s1784_s17 + $0x8] sm:$0x7]  ;;  %s2182_s7 = scalar_lea.vmem %s2225_s3, %s1712_s4 }
  0x11   : > { %186 = vst [vmem:[#allocation1 + $0x10] ss:$2 sm:$0xff] %v172_v1  ;;  %v558_v10 = vld [vmem:[%s1784_s17] sm:$0x77]  ;;  %v559_v11 = vld [vmem:[%s1784_s17 + $0x8] sm:$0x7] }
  0x12   : > { %v699_v15 = vld [vmem:[%s1784_s17] sm:$0x77]  ;;  %v700_v16 = vld [vmem:[%s1784_s17 + $0x8] sm:$0x7] }
  0x13   : > { %v840_v20 = vld [vmem:[%s1784_s17] sm:$0x77]  ;;  %v841_v21 = vld [vmem:[%s1784_s17 + $0x8] sm:$0x7] }
  0x14   : > { %v981_v25 = vld [vmem:[%s1784_s17] sm:$0x77]  ;;  %v982_v26 = vld [vmem:[%s1784_s17 + $0x8] sm:$0x7] }
  0x15   : > { %v1123_v33 = vld [vmem:[%s1784_s17 + $0x8] sm:$0x7]  ;;  %v1122_v36 = vld [vmem:[%s1784_s17] sm:$0x77] }
  0x16   : > { %v1264_v35 = vld [vmem:[%s1784_s17 + $0x8] sm:$0x7]  ;;  %v1263_v60 = vld [vmem:[%s1784_s17] sm:$0x77] }
  0x17   : > { %v187_v2 = vld.sshfl [vmem:[#allocation1] sm:$0xff pattern:$0x75316420]  ;;  %v188_v3 = vld.sshfl [vmem:[#allocation1 + $0x8] sm:$0xff pattern:$0x75316420] }
  0x18   : > { %190 = vrot.lane.b32.xlu0 %v187_v2, %s1741_s18  ;;  %v189_v4 = vld.sshfl [vmem:[#allocation1 + $0x10] sm:$0xff pattern:$0x75316420]  ;;  %306 = vst [vmem:[#allocation1] ss:$2 sm:$0xff] %v171_v0 }
  0x19   : > { %194 = vrot.lane.b32.xlu1 %v189_v4, %s1741_s18  ;;  %308 = vst [vmem:[#allocation1 + $0x10] ss:$2 sm:$0xff] %v172_v1  ;;  %v1575_v4 = vld [vmem:[%s2223_s1 + $0x50] sm:$0xff] }
  0x1f   : > { %v1790_v7 = vld.sshfl [vmem:[#allocation1] sm:$0xff pattern:$0x75316420]  ;;  %v1792_v8 = vld.sshfl [vmem:[#allocation1 + $0x8] sm:$0xff pattern:$0x75316420] }
  0x20   : > { %192 = vrot.lane.b32.xlu0 %v188_v3, %s1741_s18  ;;  %426 = vst [vmem:[#allocation1] ss:$2 sm:$0xff] %v417_v5  ;;  %v1794_v9 = vld.sshfl [vmem:[#allocation1 + $0x10] sm:$0xff pattern:$0x75316420]  ;;  %v174_v3 = vld [vmem:[%s2223_s1 + $0x8] sm:$0xff] }
  0x21   : > { %428 = vst [vmem:[#allocation1 + $0x10] ss:$2 sm:$0xff] %v418_v6 }
  0x27   : > { %v429_v12 = vld.sshfl [vmem:[#allocation1] sm:$0xff pattern:$0x75316420]  ;;  %v430_v13 = vld.sshfl [vmem:[#allocation1 + $0x8] sm:$0xff pattern:$0x75316420] }
  0x28   : > { %432 = vrot.lane.b32.xlu1 %v429_v12, %s1742_s19  ;;  %434 = vrot.lane.b32.xlu2 %v430_v13, %s1742_s19  ;;  %567 = vst [vmem:[#allocation1] ss:$2 sm:$0xff] %v558_v10  ;;  %v431_v14 = vld.sshfl [vmem:[#allocation1 + $0x10] sm:$0xff pattern:$0x75316420]  ;;  %v176_v10 = vld [vmem:[%s2223_s1 + $0x18] sm:$0xff] }
  0x29   : > { %569 = vst [vmem:[#allocation1 + $0x10] ss:$2 sm:$0xff] %v559_v11  ;;  %v1592_v11 = vld [vmem:[%s2223_s1 + $0x60] sm:$0xff] }
  0x2f   : > { %v571_v17 = vld.sshfl [vmem:[#allocation1 + $0x8] sm:$0xff pattern:$0x75316420]  ;;  %v570_v18 = vld.sshfl [vmem:[#allocation1] sm:$0xff pattern:$0x75316420] }
  0x30   : > { %436 = vrot.lane.b32.xlu2 %v431_v14, %s1742_s19  ;;  %v572_v19 = vld.sshfl [vmem:[#allocation1 + $0x10] sm:$0xff pattern:$0x75316420]  ;;  %575 = vrot.lane.b32.xlu0 %v571_v17, %s1743_s20  ;;  %708 = vst [vmem:[#allocation1] ss:$2 sm:$0xff] %v699_v15 }
  0x31   : > { %710 = vst [vmem:[#allocation1 + $0x10] ss:$2 sm:$0xff] %v700_v16  ;;  %577 = vrot.lane.b32.xlu1 %v572_v19, %s1743_s20  ;;  %v1593_v16 = vld [vmem:[%s2223_s1 + $0x68] sm:$0xff] }
  0x37   : > { %v712_v22 = vld.sshfl [vmem:[#allocation1 + $0x8] sm:$0xff pattern:$0x75316420]  ;;  %v711_v23 = vld.sshfl [vmem:[#allocation1] sm:$0xff pattern:$0x75316420] }
  0x38   : > { %573 = vrot.lane.b32.xlu2 %v570_v18, %s1743_s20  ;;  %v713_v24 = vld.sshfl [vmem:[#allocation1 + $0x10] sm:$0xff pattern:$0x75316420]  ;;  %849 = vst [vmem:[#allocation1] ss:$2 sm:$0xff] %v840_v20 }
  0x39   : > { %851 = vst [vmem:[#allocation1 + $0x10] ss:$2 sm:$0xff] %v841_v21  ;;  %718 = vrot.lane.b32.xlu0 %v713_v24, %s1744_s21  ;;  %714 = vrot.lane.b32.xlu1 %v711_v23, %s1744_s21  ;;  %v1594_v21 = vld [vmem:[%s2223_s1 + $0x70] sm:$0xff]  ;;  %v1611_v23 = vld [vmem:[%s2223_s1 + $0x80] sm:$0xff] }
  0x3f   : > { %v853_v27 = vld.sshfl [vmem:[#allocation1 + $0x8] sm:$0xff pattern:$0x75316420]  ;;  %v852_v28 = vld.sshfl [vmem:[#allocation1] sm:$0xff pattern:$0x75316420] }
  0x40   : > { %716 = vrot.lane.b32.xlu2 %v712_v22, %s1744_s21  ;;  %v854_v29 = vld.sshfl [vmem:[#allocation1 + $0x10] sm:$0xff pattern:$0x75316420]  ;;  %990 = vst [vmem:[#allocation1] ss:$2 sm:$0xff] %v981_v25  ;;  %v1595_v22 = vld [vmem:[%s2223_s1 + $0x78] sm:$0xff] }
  0x41   : > { %857 = vrot.lane.b32.xlu1 %v853_v27, %s1745_s22  ;;  %855 = vrot.lane.b32.xlu0 %v852_v28, %s1745_s22  ;;  %992 = vst [vmem:[#allocation1 + $0x10] ss:$2 sm:$0xff] %v982_v26  ;;  %v1612_v26 = vld [vmem:[%s2223_s1 + $0x88] sm:$0xff]  ;;  %v1613_v27 = vld [vmem:[%s2223_s1 + $0x90] sm:$0xff] }
  0x47   : > { %v994_v30 = vld.sshfl [vmem:[#allocation1 + $0x8] sm:$0xff pattern:$0x75316420]  ;;  %v993_v31 = vld.sshfl [vmem:[#allocation1] sm:$0xff pattern:$0x75316420] }
  0x48   : > { %996 = vrot.lane.b32.xlu2 %v993_v31, %s1746_s23  ;;  %v995_v32 = vld.sshfl [vmem:[#allocation1 + $0x10] sm:$0xff pattern:$0x75316420]  ;;  %1131 = vst [vmem:[#allocation1] ss:$2 sm:$0xff] %v1122_v36  ;;  %v1978_v36 = vld [vmem:[%s2223_s1 + $0xc8] sm:$0xff] }
  0x49   : > { %859 = vrot.lane.b32.xlu1 %v854_v29, %s1745_s22  ;;  %998 = vrot.lane.b32.xlu0 %v994_v30, %s1746_s23  ;;  %1133 = vst [vmem:[#allocation1 + $0x10] ss:$2 sm:$0xff] %v1123_v33  ;;  %v1614_v33 = vld [vmem:[%s2223_s1 + $0x98] sm:$0xff] }
  0x4f   : > { %v1135_v37 = vld.sshfl [vmem:[#allocation1 + $0x8] sm:$0xff pattern:$0x75316420]  ;;  %v1134_v49 = vld.sshfl [vmem:[#allocation1] sm:$0xff pattern:$0x75316420] }
  0x50   : > { %1000 = vrot.lane.b32.xlu2 %v995_v32, %s1746_s23  ;;  %v1136_v34 = vld.sshfl [vmem:[#allocation1 + $0x10] sm:$0xff pattern:$0x75316420]  ;;  %1272 = vst [vmem:[#allocation1] ss:$2 sm:$0xff] %v1263_v60 }
  0x51   : > { %1274 = vst [vmem:[#allocation1 + $0x10] ss:$2 sm:$0xff] %v1264_v35  ;;  %1141 = vrot.lane.b32.xlu1 %v1136_v34, %s1747_s24  ;;  %1139 = vrot.lane.b32.xlu0 %v1135_v37, %s1747_s24  ;;  %v1649_v34 = vld [vmem:[%s2223_s1 + $0xc0] sm:$0xff] }
  0x52   : > { %v1630_v35 = vld [vmem:[%s2223_s1 + $0xa0] sm:$0xff] }
  0x57   : > { %v1275_v63 = vld.sshfl [vmem:[#allocation1] sm:$0xff pattern:$0x75316420]  ;;  %v1276_v6 = vld.sshfl [vmem:[#allocation1 + $0x8] sm:$0xff pattern:$0x75316420] }
  0x58   : > { %1137 = vrot.lane.b32.xlu2 %v1134_v49, %s1747_s24  ;;  %v1277_v53 = vld.sshfl [vmem:[#allocation1 + $0x10] sm:$0xff pattern:$0x75316420] }
  0x59   : > { %1282 = vrot.lane.b32.xlu0 %v1277_v53, %s1748_s6  ;;  %1278 = vrot.lane.b32.xlu1 %v1275_v63, %s1748_s6  ;;  %v1633_v53 = vld [vmem:[%s2223_s1 + $0xb8] sm:$0xff] }
  0x60   : > { %1280 = vrot.lane.b32.xlu2 %v1276_v6, %s1748_s6 }
  0x82   : > { %v435_v38 = vpop.permute.xlu2 %434 }
  0x8a   : > { %v191_v39 = vpop.permute.xlu0 %190  ;;  %v437_v46 = vpop.permute.xlu2 %436 }
  0x8b   : > { %v195_v40 = vpop.permute.xlu1 %194  ;;  %v440_v47 = vsel %vm438_vm3, %v435_v38, %v437_v46 }
  0x8c   : > { %1710 = vmatpush.msk.msra.mxu2 %vm212_vm0, %v195_v40 }
  0x8d   : > { %1555 = vmatmul.msk.f32.vlgmr.msra.gmra.mxu2 %vm199_vm1, %v1540_v41 }
  0x92   : > { %v193_v42 = vpop.permute.xlu0 %192  ;;  %v574_v54 = vpop.permute.xlu2 %573 }
  0x93   : > { %v197_v44 = vsel %vm196_vm2, %v191_v39, %v193_v42  ;;  %v198_v45 = vsel %vm196_vm2, %v193_v42, %v195_v40  ;;  %v1631_v39 = vld [vmem:[%s2223_s1 + $0xa8] sm:$0xff] }
  0x94   : > { %1543 = vmatpush.msk.msra.mxu0 %vm212_vm0, %v197_v44  ;;  %1708 = vmatpush.msk.msra.mxu3 %vm212_vm0, %v197_v44 }
  0x95   : > { %1709 = vmatpush.msk.msra.mxu1 %vm212_vm0, %v198_v45  ;;  %1544 = vmatmul.msk.f32.vlgmr.msra.gmra.mxu0 %vm199_vm1, %v1539_v43 }
  0x96   : > { %1545 = vmatmul.msk.f32.vlgmr.msra.gmra.mxu3 %vm199_vm1, %v1540_v41  ;;  %1548 = vmatpush.msk.msrb.mxu0 %vm212_vm0, %v198_v45 }
  0x97   : > { %1550 = vmatmul.msk.f32.vlgmr.msra.gmra.mxu1 %vm199_vm1, %v1540_v41  ;;  %1558 = vmatpush.msk.msrb.mxu3 %vm212_vm0, %v1790_v7  ;;  %v1992_v41 = vld [vmem:[%s2223_s1 + $0xd0] sm:$0xff] }
  0x98   : > { %1553 = vmatpush.msk.msra.mxu0 %vm212_vm0, %v195_v40  ;;  %1556 = vmatmul.msk.f32.gmra.mxu2 %vm199_vm1, %v1541_v48 }
  0x99   : > { %1582 = vmatpush.msk.msra.mxu3 %vm212_vm0, %v440_v47  ;;  %1568 = vmatpush.msk.msrb.mxu1 %vm212_vm0, %v1794_v9  ;;  %v1576_v9 = vld [vmem:[%s2223_s1 + $0x58] sm:$0xff]  ;;  %v1632_v47 = vld [vmem:[%s2223_s1 + $0xb0] sm:$0xff] }
  0x9a   : > { %v433_v50 = vpop.permute.xlu1 %432  ;;  %v717_v1 = vpop.permute.xlu2 %716 }
  0x9b   : > { %v439_v51 = vsel %vm438_vm3, %v433_v50, %v435_v38  ;;  %v2008_v50 = vld [vmem:[%s2223_s1 + $0xd8] sm:$0xff] }
  0x9c   : > { %1577 = vmatpush.msk.msrb.mxu2 %vm212_vm0, %v439_v51 }
  0x9d   : > { %1549 = vmatmul.msk.f32.vlgmr.msrb.gmra.mxu0 %vm199_vm1, %v1539_v43 }
  0x9e   : > { %1546 = vmatmul.msk.f32.gmra.mxu3 %vm199_vm1, %v1541_v48  ;;  %1563 = vmatpush.msk.msrb.mxu0 %vm212_vm0, %v1792_v8  ;;  %v175_v8 = vld [vmem:[%s2223_s1 + $0x10] sm:$0xff] }
  0x9f   : > { %1551 = vmatmul.msk.f32.gmra.mxu1 %vm199_vm1, %v1541_v48 }
  0xa0   : > { %1557 = vmatmul.msk.f32.gmra.mxu2 %vm199_vm1, %v1542_v52 }
  0xa2   : > { %v576_v55 = vpop.permute.xlu0 %575  ;;  %v997_v15 = vpop.permute.xlu2 %996 }
  0xa3   : > { %v578_v56 = vpop.permute.xlu1 %577  ;;  %v580_v57 = vsel %vm579_vm4, %v574_v54, %v576_v55 }
  0xa4   : > { %v581_v58 = vsel %vm579_vm4, %v576_v55, %v578_v56  ;;  %1596 = vmatpush.msk.msra.mxu1 %vm212_vm0, %v580_v57 }
  0xa5   : > { %1554 = vmatmul.msk.f32.vlgmr.msra.gmra.mxu0 %vm199_vm1, %v1539_v43  ;;  %1601 = vmatpush.msk.msra.mxu2 %vm212_vm0, %v581_v58  ;;  %v2025_v58 = vld [vmem:[%s2223_s1 + $0xe0] sm:$0xff] }
  0xa6   : > { %1547 = vmatmul.msk.f32.gmra.mxu3 %vm199_vm1, %v1542_v52  ;;  %1587 = vmatpush.msk.msra.mxu0 %vm212_vm0, %v437_v46 }
  0xa7   : > { %1552 = vmatmul.msk.f32.gmra.mxu1 %vm199_vm1, %v1542_v52 }
  0xa8   : > { %1578 = vmatmul.msk.f32.vlgmr.msrb.gmra.mxu2 %vm199_vm1, %v1573_v59 }
  0xaa   : > { %v1001_v24 = vpop.permute.xlu2 %1000 }
  0xab   : > { %v719_v0 = vpop.permute.xlu0 %718  ;;  %v715_v5 = vpop.permute.xlu1 %714 }
  0xac   : > { %v722_v2 = vsel %vm720_vm5, %v717_v1, %v719_v0  ;;  %1625 = vmatpush.msk.msrb.mxu2 %vm212_vm0, %v719_v0  ;;  %v721_v7 = vsel %vm720_vm5, %v715_v5, %v717_v1  ;;  %v2038_v1 = vld [vmem:[%s2223_s1 + $0xe8] sm:$0xff] }
  0xad   : > { %1564 = vmatmul.msk.f32.vlgmr.msrb.gmra.mxu0 %vm199_vm1, %v173_v61 }
  0xae   : > { %1559 = vmatmul.msk.f32.vlgmr.msrb.gmra.mxu3 %vm199_vm1, %v173_v61  ;;  %1615 = vmatpush.msk.msrb.mxu0 %vm212_vm0, %v721_v7 }
  0xaf   : > { %1569 = vmatmul.msk.f32.vlgmr.msrb.gmra.mxu1 %vm199_vm1, %v173_v61  ;;  %1606 = vmatpush.msk.msrb.mxu3 %vm212_vm0, %v578_v56 }
  0xb0   : > { %1579 = vmatmul.msk.f32.gmra.mxu2 %vm199_vm1, %v1574_v62  ;;  %1620 = vmatpush.msk.msrb.mxu1 %vm212_vm0, %v722_v2 }
  0xb2   : > { %v1138_v29 = vpop.permute.xlu2 %1137 }
  0xb3   : > { %v858_v12 = vpop.permute.xlu1 %857  ;;  %v856_v13 = vpop.permute.xlu0 %855 }
  0xb4   : > { %v862_v14 = vsel %vm861_vm6, %v856_v13, %v858_v12 }
  0xb5   : > { %1565 = vmatmul.msk.f32.gmra.mxu0 %vm199_vm1, %v174_v3 }
  0xb6   : > { %1560 = vmatmul.msk.f32.gmra.mxu3 %vm199_vm1, %v174_v3 }
  0xb7   : > { %1570 = vmatmul.msk.f32.gmra.mxu1 %vm199_vm1, %v174_v3 }
  0xb8   : > { %1580 = vmatmul.msk.f32.gmra.mxu2 %vm199_vm1, %v1575_v4 }
  0xba   : > { %v1281_v43 = vpop.permute.xlu2 %1280 }
  0xbb   : > { %v860_v17 = vpop.permute.xlu1 %859  ;;  %v999_v18 = vpop.permute.xlu0 %998 }
  0xbc   : > { %v863_v19 = vsel %vm861_vm6, %v858_v12, %v860_v17  ;;  %v1003_v20 = vsel %vm1002_vm7, %v997_v15, %v999_v18  ;;  %v1004_v25 = vsel %vm1002_vm7, %v999_v18, %v1001_v24 }
  0xbd   : > { %1566 = vmatmul.msk.f32.gmra.mxu0 %vm199_vm1, %v175_v8 }
  0xbe   : > { %1561 = vmatmul.msk.f32.gmra.mxu3 %vm199_vm1, %v175_v8 }
  0xbf   : > { %1571 = vmatmul.msk.f32.gmra.mxu1 %vm199_vm1, %v175_v8 }
  0xc0   : > { %1581 = vmatmul.msk.f32.gmra.mxu2 %vm199_vm1, %v1576_v9 }
  0xc3   : > { %v1142_v28 = vpop.permute.xlu1 %1141  ;;  %v1140_v30 = vpop.permute.xlu0 %1139 }
  0xc4   : > { %v1145_v31 = vsel %vm1143_vm8, %v1140_v30, %v1142_v28  ;;  %v1144_v32 = vsel %vm1143_vm8, %v1138_v29, %v1140_v30 }
  0xc5   : > { %1567 = vmatmul.msk.f32.gmra.mxu0 %vm199_vm1, %v176_v10 }
  0xc6   : > { %1562 = vmatmul.msk.f32.gmra.mxu3 %vm199_vm1, %v176_v10 }
  0xc7   : > { %1572 = vmatmul.msk.f32.gmra.mxu1 %vm199_vm1, %v176_v10  ;;  %v2053_v10 = vld [vmem:[%s2223_s1 + $0xf0] sm:$0xff] }
  0xc8   : > { %1602 = vmatmul.msk.f32.vlgmr.msra.gmra.mxu2 %vm199_vm1, %v1592_v11 }
  0xc9   : > { %1653 = vmatpush.msk.msra.mxu2 %vm212_vm0, %v1003_v20 }
  0xcb   : > { %v1283_v42 = vpop.permute.xlu0 %1282  ;;  %v1279_v54 = vpop.permute.xlu1 %1278 }
  0xcc   : > { %v1286_v44 = vsel %vm1284_vm9, %v1281_v43, %v1283_v42  ;;  %v1285_v56 = vsel %vm1284_vm9, %v1279_v54, %v1281_v43 }
  0xcd   : > { %1588 = vmatmul.msk.f32.vlgmr.msra.gmra.mxu0 %vm199_vm1, %v1573_v59 }
  0xce   : > { %1583 = vmatmul.msk.f32.vlgmr.msra.gmra.mxu3 %vm199_vm1, %v1573_v59  ;;  %1639 = vmatpush.msk.msra.mxu0 %vm212_vm0, %v863_v19 }
  0xcf   : > { %1597 = vmatmul.msk.f32.vlgmr.msra.gmra.mxu1 %vm199_vm1, %v1592_v11  ;;  %1634 = vmatpush.msk.msra.mxu3 %vm212_vm0, %v862_v14 }
  0xd0   : > { %1603 = vmatmul.msk.f32.gmra.mxu2 %vm199_vm1, %v1593_v16  ;;  %1644 = vmatpush.msk.msra.mxu1 %vm212_vm0, %v860_v17  ;;  %v1404_v17 = vld [vmem:[%s2224_s2] sm:$0xff] }
  0xd5   : > { %1589 = vmatmul.msk.f32.gmra.mxu0 %vm199_vm1, %v1574_v62 }
  0xd6   : > { %1584 = vmatmul.msk.f32.gmra.mxu3 %vm199_vm1, %v1574_v62 }
  0xd7   : > { %1598 = vmatmul.msk.f32.gmra.mxu1 %vm199_vm1, %v1593_v16 }
  0xd8   : > { %1604 = vmatmul.msk.f32.gmra.mxu2 %vm199_vm1, %v1594_v21 }
  0xdd   : > { %1590 = vmatmul.msk.f32.gmra.mxu0 %vm199_vm1, %v1575_v4 }
  0xde   : > { %1585 = vmatmul.msk.f32.gmra.mxu3 %vm199_vm1, %v1575_v4 }
  0xdf   : > { %1599 = vmatmul.msk.f32.gmra.mxu1 %vm199_vm1, %v1594_v21 }
  0xe0   : > { %1605 = vmatmul.msk.f32.gmra.mxu2 %vm199_vm1, %v1595_v22 }
  0xe5   : > { %1591 = vmatmul.msk.f32.gmra.mxu0 %vm199_vm1, %v1576_v9 }
  0xe6   : > { %1586 = vmatmul.msk.f32.gmra.mxu3 %vm199_vm1, %v1576_v9 }
  0xe7   : > { %1600 = vmatmul.msk.f32.gmra.mxu1 %vm199_vm1, %v1595_v22 }
  0xe8   : > { %1626 = vmatmul.msk.f32.vlgmr.msrb.gmra.mxu2 %vm199_vm1, %v1611_v23 }
  0xe9   : > { %1677 = vmatpush.msk.msrb.mxu2 %vm212_vm0, %v1145_v31  ;;  %v1687_v31 = vld [vmem:[%s2223_s1 + $0x100] sm:$0xff] }
  0xed   : > { %1616 = vmatmul.msk.f32.vlgmr.msrb.gmra.mxu0 %vm199_vm1, %v1611_v23 }
  0xee   : > { %1607 = vmatmul.msk.f32.vlgmr.msrb.gmra.mxu3 %vm199_vm1, %v1592_v11  ;;  %1663 = vmatpush.msk.msrb.mxu0 %vm212_vm0, %v1001_v24 }
  0xef   : > { %1621 = vmatmul.msk.f32.vlgmr.msrb.gmra.mxu1 %vm199_vm1, %v1611_v23  ;;  %1658 = vmatpush.msk.msrb.mxu3 %vm212_vm0, %v1004_v25 }
  0xf0   : > { %1627 = vmatmul.msk.f32.gmra.mxu2 %vm199_vm1, %v1612_v26  ;;  %1672 = vmatpush.msk.msrb.mxu1 %vm212_vm0, %v1144_v32 }
  0xf5   : > { %1617 = vmatmul.msk.f32.gmra.mxu0 %vm199_vm1, %v1612_v26 }
  0xf6   : > { %1608 = vmatmul.msk.f32.gmra.mxu3 %vm199_vm1, %v1593_v16  ;;  %v1749_v16 = vmov 0  }
  0xf7   : > { %1622 = vmatmul.msk.f32.gmra.mxu1 %vm199_vm1, %v1612_v26  ;;  %1730 = vset.pattern.permute.xlu0 %v1749_v16 }
  0xf8   : > { %1628 = vmatmul.msk.f32.gmra.mxu2 %vm199_vm1, %v1613_v27  ;;  %1731 = vset.pattern.permute.xlu1 %v1749_v16 }
  0xf9   : > { %1422 = vperm.xlu0 %1730, %v1404_v17   ;;  %1732 = vset.pattern.permute.xlu2 %v1749_v16 }
  0xfd   : > { %1618 = vmatmul.msk.f32.gmra.mxu0 %vm199_vm1, %v1613_v27 }
  0xfe   : > { %1609 = vmatmul.msk.f32.gmra.mxu3 %vm199_vm1, %v1594_v21  ;;  %v2071_v21 = vld [vmem:[%s2223_s1 + $0xf8] sm:$0xff] }
  0xff   : > { %1623 = vmatmul.msk.f32.gmra.mxu1 %vm199_vm1, %v1613_v27  ;;  %v1405_v27 = vld [vmem:[%s2224_s2 + $0x8] sm:$0xff] }
 0x100   : > { %1629 = vmatmul.msk.f32.gmra.mxu2 %vm199_vm1, %v1614_v33  ;;  %1427 = vperm.xlu1 %1731, %v1405_v27  }
 0x105   : > { %1619 = vmatmul.msk.f32.gmra.mxu0 %vm199_vm1, %v1614_v33 }
 0x106   : > { %1610 = vmatmul.msk.f32.gmra.mxu3 %vm199_vm1, %v1595_v22 }
 0x107   : > { %1624 = vmatmul.msk.f32.gmra.mxu1 %vm199_vm1, %v1614_v33 }
 0x108   : > { %1654 = vmatmul.msk.f32.vlgmr.msra.gmra.mxu2 %vm199_vm1, %v1649_v34 }
 0x109   : > { %1701 = vmatpush.msk.msra.mxu2 %vm212_vm0, %v1283_v42 }
 0x10d   : > { %1640 = vmatmul.msk.f32.vlgmr.msra.gmra.mxu0 %vm199_vm1, %v1630_v35 }
 0x10e   : > { %1635 = vmatmul.msk.f32.vlgmr.msra.gmra.mxu3 %vm199_vm1, %v1630_v35  ;;  %1691 = vmatpush.msk.msra.mxu0 %vm212_vm0, %v1285_v56 }
 0x10f   : > { %1645 = vmatmul.msk.f32.vlgmr.msra.gmra.mxu1 %vm199_vm1, %v1630_v35  ;;  %1682 = vmatpush.msk.msra.mxu3 %vm212_vm0, %v1142_v28 }
 0x110   : > { %1655 = vmatmul.msk.f32.gmra.mxu2 %vm199_vm1, %v1978_v36  ;;  %v297_v37 = vpop.f32.mrf.mxu2  ;;  %1696 = vmatpush.msk.msra.mxu1 %vm212_vm0, %v1286_v44 }
 0x112   : > { %v236_v38 = vpop.f32.mrf.mxu0 }
 0x114   : > { %v268_v40 = vpop.f32.mrf.mxu1 }
 0x115   : > { %1641 = vmatmul.msk.f32.gmra.mxu0 %vm199_vm1, %v1631_v39 }
 0x116   : > { %1636 = vmatmul.msk.f32.gmra.mxu3 %vm199_vm1, %v1631_v39 }
 0x117   : > { %1646 = vmatmul.msk.f32.gmra.mxu1 %vm199_vm1, %v1631_v39 }
 0x118   : > { %1656 = vmatmul.msk.f32.gmra.mxu2 %vm199_vm1, %v1992_v41 }
 0x119   : > { %v239_v45 = vpop.f32.mrf.mxu3 }
 0x11a   : > { %v265_v46 = vpop.f32.mrf.mxu0 }
 0x11b   : > { %v300_v48 = vpop.f32.mrf.mxu2 }
 0x11c   : > { %v271_v49 = vpop.f32.mrf.mxu1 }
 0x11d   : > { %1642 = vmatmul.msk.f32.gmra.mxu0 %vm199_vm1, %v1632_v47 }
 0x11e   : > { %1637 = vmatmul.msk.f32.gmra.mxu3 %vm199_vm1, %v1632_v47 }
 0x11f   : > { %1647 = vmatmul.msk.f32.gmra.mxu1 %vm199_vm1, %v1632_v47 }
 0x120   : > { %1657 = vmatmul.msk.f32.gmra.mxu2 %vm199_vm1, %v2008_v50 }
 0x121   : > { %v242_v51 = vpop.f32.mrf.mxu3 }
 0x122   : > { %v294_v52 = vpop.f32.mrf.mxu0 }
 0x123   : > { %v303_v55 = vpop.f32.mrf.mxu2 }
 0x124   : > { %v274_v57 = vpop.f32.mrf.mxu1 }
 0x125   : > { %1643 = vmatmul.msk.f32.gmra.mxu0 %vm199_vm1, %v1633_v53 }
 0x126   : > { %1638 = vmatmul.msk.f32.gmra.mxu3 %vm199_vm1, %v1633_v53 }
 0x127   : > { %1648 = vmatmul.msk.f32.gmra.mxu1 %vm199_vm1, %v1633_v53 }
 0x128   : > { %1678 = vmatmul.msk.f32.vlgmr.msrb.gmra.mxu2 %vm199_vm1, %v2025_v58 }
 0x129   : > { %v245_v59 = vpop.f32.mrf.mxu3 }
 0x12a   : > { %v376_v60 = vpop.f32.mrf.mxu0 }
 0x12b   : > { %v2029_v61 = vadd.f32 %v376_v60, %v265_v46  ;;  %v476_v62 = vpop.f32.mrf.mxu2  ;;  %v1407_v46 = vld [vmem:[%s2224_s2 + $0x18] sm:$0xff] }
 0x12c   : > { %v405_v63 = vpop.f32.mrf.mxu1  ;;  %1437 = vperm.xlu1 %1731, %v1407_v46  }
 0x12d   : > { %v406_v0 = vadd.f32 %v405_v63, %v294_v52  ;;  %1664 = vmatmul.msk.f32.vlgmr.msrb.gmra.mxu0 %vm199_vm1, %v1649_v34 }
 0x12e   : > { %1659 = vmatmul.msk.f32.vlgmr.msrb.gmra.mxu3 %vm199_vm1, %v1649_v34 }
 0x12f   : > { %1673 = vmatmul.msk.f32.vlgmr.msrb.gmra.mxu1 %vm199_vm1, %v2025_v58 }
 0x130   : > { %1679 = vmatmul.msk.f32.gmra.mxu2 %vm199_vm1, %v2038_v1 }
 0x131   : > { %v347_v2 = vpop.f32.mrf.mxu3 }
 0x132   : > { %v348_v3 = vadd.f32 %v347_v2, %v236_v38  ;;  %v379_v4 = vpop.f32.mrf.mxu0 }
 0x133   : > { %v2042_v5 = vadd.f32 %v379_v4, %v268_v40  ;;  %v479_v6 = vpop.f32.mrf.mxu2  ;;  %v1688_v40 = vld [vmem:[%s2223_s1 + $0x108] sm:$0xff] }
 0x134   : > { %v408_v7 = vpop.f32.mrf.mxu1  ;;  %v546_v8 = vadd.f32 %v476_v62, %v348_v3 }
 0x135   : > { %v409_v9 = vadd.f32 %v408_v7, %v297_v37  ;;  %1665 = vmatmul.msk.f32.gmra.mxu0 %vm199_vm1, %v1978_v36 }
 0x136   : > { %1660 = vmatmul.msk.f32.gmra.mxu3 %vm199_vm1, %v1978_v36 }
 0x137   : > { %1674 = vmatmul.msk.f32.gmra.mxu1 %vm199_vm1, %v2038_v1 }
 0x138   : > { %1680 = vmatmul.msk.f32.gmra.mxu2 %vm199_vm1, %v2053_v10 }
 0x139   : > { %v350_v11 = vpop.f32.mrf.mxu3 }
 0x13a   : > { %v351_v12 = vadd.f32 %v350_v11, %v239_v45  ;;  %v382_v13 = vpop.f32.mrf.mxu0 }
 0x13b   : > { %v2057_v14 = vadd.f32 %v382_v13, %v271_v49  ;;  %v482_v15 = vpop.f32.mrf.mxu2 }
 0x13c   : > { %v411_v18 = vpop.f32.mrf.mxu1  ;;  %v549_v19 = vadd.f32 %v479_v6, %v351_v12 }
 0x13d   : > { %v412_v20 = vadd.f32 %v411_v18, %v300_v48  ;;  %1666 = vmatmul.msk.f32.gmra.mxu0 %vm199_vm1, %v1992_v41 }
 0x13e   : > { %1661 = vmatmul.msk.f32.gmra.mxu3 %vm199_vm1, %v1992_v41 }
 0x13f   : > { %1675 = vmatmul.msk.f32.gmra.mxu1 %vm199_vm1, %v2053_v10 }
 0x140   : > { %1681 = vmatmul.msk.f32.gmra.mxu2 %vm199_vm1, %v2071_v21 }
 0x141   : > { %v353_v22 = vpop.f32.mrf.mxu3 }
 0x142   : > { %v354_v23 = vadd.f32 %v353_v22, %v242_v51  ;;  %v385_v24 = vpop.f32.mrf.mxu0 }
 0x143   : > { %v2075_v25 = vadd.f32 %v385_v24, %v274_v57  ;;  %v485_v26 = vpop.f32.mrf.mxu2 }
 0x144   : > { %v414_v28 = vpop.f32.mrf.mxu1  ;;  %v552_v29 = vadd.f32 %v482_v15, %v354_v23 }
 0x145   : > { %v415_v30 = vadd.f32 %v414_v28, %v303_v55  ;;  %1667 = vmatmul.msk.f32.gmra.mxu0 %vm199_vm1, %v2008_v50 }
 0x146   : > { %1662 = vmatmul.msk.f32.gmra.mxu3 %vm199_vm1, %v2008_v50  ;;  %v1689_v50 = vld [vmem:[%s2223_s1 + $0x110] sm:$0xff] }
 0x147   : > { %1676 = vmatmul.msk.f32.gmra.mxu1 %vm199_vm1, %v2071_v21 }
 0x148   : > { %1702 = vmatmul.msk.f32.vlgmr.msra.gmra.mxu2 %vm199_vm1, %v1687_v31 }
 0x149   : > { %v356_v32 = vpop.f32.mrf.mxu3 }
 0x14a   : > { %v357_v33 = vadd.f32 %v356_v32, %v245_v59  ;;  %v534_v34 = vpop.f32.mrf.mxu0  ;;  %v1690_v59 = vld [vmem:[%s2223_s1 + $0x118] sm:$0xff] }
 0x14b   : > { %v548_v35 = vadd.f32 %v534_v34, %v406_v0  ;;  %v646_v36 = vpop.f32.mrf.mxu2 }
 0x14c   : > { %v555_v37 = vadd.f32 %v485_v26, %v357_v33  ;;  %v617_v38 = vpop.f32.mrf.mxu1 }
 0x14d   : > { %v687_v39 = vadd.f32 %v617_v38, %v546_v8  ;;  %1692 = vmatmul.msk.f32.vlgmr.msra.gmra.mxu0 %vm199_vm1, %v1687_v31 }
 0x14e   : > { %1683 = vmatmul.msk.f32.vlgmr.msra.gmra.mxu3 %vm199_vm1, %v2025_v58 }
 0x14f   : > { %1697 = vmatmul.msk.f32.vlgmr.msra.gmra.mxu1 %vm199_vm1, %v1687_v31 }
 0x150   : > { %1703 = vmatmul.msk.f32.gmra.mxu2 %vm199_vm1, %v1688_v40 }
 0x151   : > { %v505_v41 = vpop.f32.mrf.mxu3 }
 0x152   : > { %v547_v42 = vadd.f32 %v505_v41, %v2029_v61  ;;  %v537_v43 = vpop.f32.mrf.mxu0 }
 0x153   : > { %v551_v44 = vadd.f32 %v537_v43, %v409_v9  ;;  %v649_v45 = vpop.f32.mrf.mxu2 }
 0x154   : > { %v620_v47 = vpop.f32.mrf.mxu1  ;;  %v688_v48 = vadd.f32 %v646_v36, %v547_v42 }
 0x155   : > { %v690_v49 = vadd.f32 %v620_v47, %v549_v19  ;;  %1693 = vmatmul.msk.f32.gmra.mxu0 %vm199_vm1, %v1688_v40 }
 0x156   : > { %1684 = vmatmul.msk.f32.gmra.mxu3 %vm199_vm1, %v2038_v1  ;;  %v1406_v1 = vld [vmem:[%s2224_s2 + $0x10] sm:$0xff] }
 0x157   : > { %1698 = vmatmul.msk.f32.gmra.mxu1 %vm199_vm1, %v1688_v40  ;;  %1432 = vperm.xlu2 %1732, %v1406_v1  }
 0x158   : > { %1704 = vmatmul.msk.f32.gmra.mxu2 %vm199_vm1, %v1689_v50 }
 0x159   : > { %v508_v51 = vpop.f32.mrf.mxu3 }
 0x15a   : > { %v550_v52 = vadd.f32 %v508_v51, %v2042_v5  ;;  %v540_v53 = vpop.f32.mrf.mxu0 }
 0x15b   : > { %v554_v54 = vadd.f32 %v540_v53, %v412_v20  ;;  %v652_v55 = vpop.f32.mrf.mxu2 }
 0x15c   : > { %v623_v56 = vpop.f32.mrf.mxu1  ;;  %v691_v57 = vadd.f32 %v649_v45, %v550_v52 }
 0x15d   : > { %v693_v58 = vadd.f32 %v623_v56, %v552_v29  ;;  %1694 = vmatmul.msk.f32.gmra.mxu0 %vm199_vm1, %v1689_v50 }
 0x15e   : > { %1685 = vmatmul.msk.f32.gmra.mxu3 %vm199_vm1, %v2053_v10 }
 0x15f   : > { %1699 = vmatmul.msk.f32.gmra.mxu1 %vm199_vm1, %v1689_v50 }
 0x160   : > { %1705 = vmatmul.msk.f32.gmra.mxu2 %vm199_vm1, %v1690_v59 }
 0x161   : > { %v511_v60 = vpop.f32.mrf.mxu3 }
 0x162   : > { %v553_v61 = vadd.f32 %v511_v60, %v2057_v14  ;;  %v543_v62 = vpop.f32.mrf.mxu0 }
 0x163   : > { %v557_v63 = vadd.f32 %v543_v62, %v415_v30  ;;  %v655_v0 = vpop.f32.mrf.mxu2 }
 0x164   : > { %v626_v2 = vpop.f32.mrf.mxu1  ;;  %v694_v3 = vadd.f32 %v652_v55, %v553_v61 }
 0x165   : > { %v696_v4 = vadd.f32 %v626_v2, %v555_v37  ;;  %1695 = vmatmul.msk.f32.gmra.mxu0 %vm199_vm1, %v1690_v59 }
 0x166   : > { %1686 = vmatmul.msk.f32.gmra.mxu3 %vm199_vm1, %v2071_v21 }
 0x167   : > { %1700 = vmatmul.msk.f32.gmra.mxu1 %vm199_vm1, %v1690_v59 }
 0x169   : > { %v514_v5 = vpop.f32.mrf.mxu3 }
 0x16a   : > { %v556_v6 = vadd.f32 %v514_v5, %v2075_v25  ;;  %v758_v7 = vpop.f32.mrf.mxu0 }
 0x16b   : > { %v2128_v8 = vadd.f32 %v758_v7, %v687_v39  ;;  %v816_v9 = vpop.f32.mrf.mxu2 }
 0x16c   : > { %v697_v10 = vadd.f32 %v655_v0, %v556_v6  ;;  %v787_v11 = vpop.f32.mrf.mxu1 }
 0x16d   : > { %v2130_v12 = vadd.f32 %v787_v11, %v688_v48 }
 0x171   : > { %v675_v13 = vpop.f32.mrf.mxu3 }
 0x172   : > { %v689_v14 = vadd.f32 %v675_v13, %v548_v35  ;;  %v761_v15 = vpop.f32.mrf.mxu0 }
 0x173   : > { %v2132_v16 = vadd.f32 %v761_v15, %v690_v49  ;;  %v819_v17 = vpop.f32.mrf.mxu2 }
 0x174   : > { %v790_v18 = vpop.f32.mrf.mxu1  ;;  %v830_v19 = vadd.f32 %v816_v9, %v689_v14 }
 0x175   : > { %v2134_v20 = vadd.f32 %v790_v18, %v691_v57 }
 0x179   : > { %v678_v21 = vpop.f32.mrf.mxu3 }
 0x17a   : > { %v692_v22 = vadd.f32 %v678_v21, %v551_v44  ;;  %v764_v23 = vpop.f32.mrf.mxu0 }
 0x17b   : > { %v2136_v24 = vadd.f32 %v764_v23, %v693_v58  ;;  %v822_v25 = vpop.f32.mrf.mxu2  ;;  %v1423_v23 = vpop.permute.xlu0 %1422 }
 0x17c   : > { %v793_v26 = vpop.f32.mrf.mxu1  ;;  %v833_v27 = vadd.f32 %v819_v17, %v692_v22 }
 0x17d   : > { %v2138_v28 = vadd.f32 %v793_v26, %v694_v3 }
 0x181   : > { %v681_v29 = vpop.f32.mrf.mxu3 }
 0x182   : > { %v695_v30 = vadd.f32 %v681_v29, %v554_v54  ;;  %v767_v31 = vpop.f32.mrf.mxu0 }
 0x183   : > { %v2140_v32 = vadd.f32 %v767_v31, %v696_v4  ;;  %v825_v33 = vpop.f32.mrf.mxu2 }
 0x184   : > { %v796_v34 = vpop.f32.mrf.mxu1  ;;  %v836_v35 = vadd.f32 %v822_v25, %v695_v30 }
 0x185   : > { %v2142_v36 = vadd.f32 %v796_v34, %v697_v10 }
 0x189   : > { %v684_v37 = vpop.f32.mrf.mxu3 }
 0x18a   : > { %v698_v38 = vadd.f32 %v684_v37, %v557_v63  ;;  %v928_v39 = vpop.f32.mrf.mxu0 }
 0x18b   : > { %v1040_v40 = vpop.f32.mrf.mxu2  ;;  %v970_v14 = vadd.f32 %v928_v39, %v2130_v12 }
 0x18c   : > { %v839_v41 = vadd.f32 %v825_v33, %v698_v38  ;;  %v957_v42 = vpop.f32.mrf.mxu1 }
 0x18d   : > { %v971_v43 = vadd.f32 %v957_v42, %v830_v19  ;;  %v1428_v42 = vpop.permute.xlu1 %1427 }
 0x191   : > { %v899_v44 = vpop.f32.mrf.mxu3 }
 0x192   : > { %v931_v45 = vpop.f32.mrf.mxu0  ;;  %v969_v10 = vadd.f32 %v899_v44, %v2128_v8 }
 0x193   : > { %v1043_v46 = vpop.f32.mrf.mxu2  ;;  %v973_v29 = vadd.f32 %v931_v45, %v2134_v20 }
 0x194   : > { %v960_v47 = vpop.f32.mrf.mxu1  ;;  %v1110_v15 = vadd.f32 %v1040_v40, %v969_v10 }
 0x195   : > { %v2144_v48 = vadd.f32 %v960_v47, %v833_v27 }
 0x199   : > { %v902_v49 = vpop.f32.mrf.mxu3 }
 0x19a   : > { %v2146_v50 = vpop.f32.mrf.mxu0  ;;  %v972_v21 = vadd.f32 %v902_v49, %v2132_v16 }
 0x19b   : > { %v2148_v51 = vpop.f32.mrf.mxu2 }
 0x19c   : > { %v963_v52 = vpop.f32.mrf.mxu1  ;;  %v1113_v31 = vadd.f32 %v1043_v46, %v972_v21  ;;  %v976_v46 = vadd.f32 %v2146_v50, %v2138_v28 }
 0x19d   : > { %v2150_v53 = vadd.f32 %v963_v52, %v836_v35 }
 0x1a1   : > { %v905_v54 = vpop.f32.mrf.mxu3 }
 0x1a2   : > { %v2152_v55 = vpop.f32.mrf.mxu0  ;;  %v975_v39 = vadd.f32 %v905_v54, %v2136_v24 }
 0x1a3   : > { %v2154_v56 = vpop.f32.mrf.mxu2 }
 0x1a4   : > { %v966_v57 = vpop.f32.mrf.mxu1 }
 0x1a5   : > { %v2156_v58 = vadd.f32 %v966_v57, %v839_v41 }
 0x1a9   : > { %v2158_v59 = vpop.f32.mrf.mxu3 }
 0x1aa   : > { %v1098_v60 = vpop.f32.mrf.mxu0 }
 0x1ab   : > { %v1210_v61 = vpop.f32.mrf.mxu2  ;;  %v1112_v35 = vadd.f32 %v1098_v60, %v971_v43  ;;  %v1116_v60 = vadd.f32 %v2148_v51, %v975_v39  ;;  %v978_v51 = vadd.f32 %v2158_v59, %v2140_v32 }
 0x1ac   : > { %v1181_v62 = vpop.f32.mrf.mxu1 }
 0x1ad   : > { %v1251_v18 = vadd.f32 %v1181_v62, %v1110_v15  ;;  %v1119_v32 = vadd.f32 %v2154_v56, %v978_v51 }
 0x1b1   : > { %v1069_v63 = vpop.f32.mrf.mxu3 }
 0x1b2   : > { %v2160_v0 = vpop.f32.mrf.mxu0  ;;  %v1111_v17 = vadd.f32 %v1069_v63, %v970_v14 }
 0x1b3   : > { %v1213_v1 = vpop.f32.mrf.mxu2  ;;  %v1115_v63 = vadd.f32 %v2160_v0, %v2144_v48  ;;  %v979_v0 = vadd.f32 %v2152_v55, %v2142_v36 }
 0x1b4   : > { %v1184_v2 = vpop.f32.mrf.mxu1  ;;  %v1252_v25 = vadd.f32 %v1210_v61, %v1111_v17 }
 0x1b5   : > { %v1254_v37 = vadd.f32 %v1184_v2, %v1113_v31 }
 0x1b9   : > { %v1072_v3 = vpop.f32.mrf.mxu3 }
 0x1ba   : > { %v2162_v4 = vpop.f32.mrf.mxu0  ;;  %v1114_v16 = vadd.f32 %v1072_v3, %v973_v29 }
 0x1bb   : > { %v2164_v5 = vpop.f32.mrf.mxu2 }
 0x1bc   : > { %v1187_v6 = vpop.f32.mrf.mxu1  ;;  %v1255_v44 = vadd.f32 %v1213_v1, %v1114_v16 }
 0x1bd   : > { %v1257_v28 = vadd.f32 %v1187_v6, %v1116_v60 }
 0x1c1   : > { %v1075_v7 = vpop.f32.mrf.mxu3 }
 0x1c2   : > { %v2166_v9 = vpop.f32.mrf.mxu0  ;;  %v1117_v54 = vadd.f32 %v1075_v7, %v976_v46  ;;  %v1433_v7 = vpop.permute.xlu2 %1432 }
 0x1c3   : > { %v2169_v11 = vpop.f32.mrf.mxu2 }
 0x1c4   : > { %v2171_v13 = vpop.f32.mrf.mxu1  ;;  %v1258_v14 = vadd.f32 %v2164_v5, %v1117_v54 }
 0x1c5   : > { %v1260_v36 = vadd.f32 %v2171_v13, %v1119_v32 }
 0x1c9   : > { %v2174_v19 = vpop.f32.mrf.mxu3 }
 0x1ca   : > { %v1322_v22 = vpop.f32.mrf.mxu0  ;;  %v1120_v21 = vadd.f32 %v2174_v19, %v979_v0  ;;  %v1438_v19 = vpop.permute.xlu1 %1437 }
 0x1cb   : > { %v1392_v26 = vadd.f32 %v1322_v22, %v1251_v18  ;;  %v1380_v27 = vpop.f32.mrf.mxu2 }
 0x1cc   : > { %v1351_v8 = vpop.f32.mrf.mxu1  ;;  %v1261_v29 = vadd.f32 %v2169_v11, %v1120_v21 }
 0x1cd   : > { %vm1408_vm10 = vcmp.gt.f32.partialorder %v1392_v26, 0.0  ;;  %v1393_v30 = vadd.f32 %v1351_v8, %v1252_v25  ;;  %v1440_v12 = vmul.f32 %v1423_v23, %v1392_v26  ;;  %v1118_v25 = vadd.f32 %v2162_v4, %v2150_v53 }
 0x1cf   : > { %vm1409_vm11 = vcmp.gt.f32.partialorder %v1393_v30, 0.0  ;;  %v1441_v33 = vmul.f32 %v1423_v23, %v1393_v30  ;;  %v1452_v34 = vsel %vm1408_vm10, %v1392_v26, %v1440_v12 }
 0x1d0   : > { %1464 = vst [vmem:[%s2182_s7] sm:$0xff] %v1452_v34  ;;  %v1121_v34 = vadd.f32 %v2166_v9, %v2156_v58 }
 0x1d1   : > { %v1453_v38 = vsel %vm1409_vm11, %v1393_v30, %v1441_v33  ;;  %v1239_v20 = vpop.f32.mrf.mxu3 }
 0x1d2   : > { %1465 = vst [vmem:[%s2182_s7 + $0x8] sm:$0xff] %v1453_v38  ;;  %v1253_v40 = vadd.f32 %v1239_v20, %v1112_v35  ;;  %v1325_v41 = vpop.f32.mrf.mxu0 }
 0x1d3   : > { %v1395_v45 = vadd.f32 %v1325_v41, %v1254_v37  ;;  %v1383_v57 = vpop.f32.mrf.mxu2 }
 0x1d4   : > { %v1354_v47 = vpop.f32.mrf.mxu1  ;;  %v1394_v49 = vadd.f32 %v1380_v27, %v1253_v40 }
 0x1d5   : > { %vm1411_vm12 = vcmp.gt.f32.partialorder %v1395_v45, 0.0  ;;  %v1396_v43 = vadd.f32 %v1354_v47, %v1255_v44  ;;  %v1443_v52 = vmul.f32 %v1428_v42, %v1395_v45 }
 0x1d6   : > { %vm1410_vm13 = vcmp.gt.f32.partialorder %v1394_v49, 0.0  ;;  %v1442_v24 = vmul.f32 %v1423_v23, %v1394_v49 }
 0x1d7   : > { %vm1412_vm15 = vcmp.gt.f32.partialorder %v1396_v43, 0.0  ;;  %v1444_v61 = vmul.f32 %v1428_v42, %v1396_v43  ;;  %v1455_v62 = vsel %vm1411_vm12, %v1395_v45, %v1443_v52 }
 0x1d8   : > { %v1454_v1 = vsel %vm1410_vm13, %v1394_v49, %v1442_v24  ;;  %1468 = vst [vmem:[%s2182_s7 + $0x18] sm:$0xff] %v1455_v62 }
 0x1d9   : > { %1467 = vst.msk [vmem:[%s2182_s7 + $0x10] sm:$0xff] %vm1466_vm14, %v1454_v1  ;;  %v1456_v50 = vsel %vm1412_vm15, %v1396_v43, %v1444_v61  ;;  %v1242_v2 = vpop.f32.mrf.mxu3 }
 0x1da   : > { %1469 = vst [vmem:[%s2182_s7 + $0x20] sm:$0xff] %v1456_v50  ;;  %v1256_v3 = vadd.f32 %v1242_v2, %v1115_v63  ;;  %v1328_v10 = vpop.f32.mrf.mxu0 }
 0x1db   : > { %v1398_v15 = vadd.f32 %v1328_v10, %v1257_v28  ;;  %v1386_v23 = vpop.f32.mrf.mxu2 }
 0x1dc   : > { %v1357_v17 = vpop.f32.mrf.mxu1  ;;  %v1397_v48 = vadd.f32 %v1383_v57, %v1256_v3 }
 0x1dd   : > { %vm1414_vm0 = vcmp.gt.f32.partialorder %v1398_v15, 0.0  ;;  %v1399_v6 = vadd.f32 %v1357_v17, %v1258_v14  ;;  %v1446_v18 = vmul.f32 %v1433_v7, %v1398_v15 }
 0x1de   : > { %vm1413_vm1 = vcmp.gt.f32.partialorder %v1397_v48, 0.0  ;;  %v1445_v59 = vmul.f32 %v1428_v42, %v1397_v48 }
 0x1df   : > { %vm1415_vm2 = vcmp.gt.f32.partialorder %v1399_v6, 0.0  ;;  %v1447_v5 = vmul.f32 %v1433_v7, %v1399_v6  ;;  %v1458_v22 = vsel %vm1414_vm0, %v1398_v15, %v1446_v18 }
 0x1e0   : > { %v1457_v26 = vsel %vm1413_vm1, %v1397_v48, %v1445_v59  ;;  %1471 = vst [vmem:[%s2182_s7 + $0x30] sm:$0xff] %v1458_v22 }
 0x1e1   : > { %1470 = vst.msk [vmem:[%s2182_s7 + $0x28] sm:$0xff] %vm1466_vm14, %v1457_v26  ;;  %v1459_v55 = vsel %vm1415_vm2, %v1399_v6, %v1447_v5  ;;  %v1245_v27 = vpop.f32.mrf.mxu3 }
 0x1e2   : > { %1472 = vst [vmem:[%s2182_s7 + $0x38] sm:$0xff] %v1459_v55  ;;  %v1259_v56 = vadd.f32 %v1245_v27, %v1118_v25  ;;  %v1331_v8 = vpop.f32.mrf.mxu0 }
 0x1e3   : > { %v1401_v30 = vadd.f32 %v1331_v8, %v1260_v36  ;;  %v1389_v38 = vpop.f32.mrf.mxu2 }
 0x1e4   : > { %v1360_v12 = vpop.f32.mrf.mxu1  ;;  %v1400_v31 = vadd.f32 %v1386_v23, %v1259_v56 }
 0x1e5   : > { %vm1417_vm3 = vcmp.gt.f32.partialorder %v1401_v30, 0.0  ;;  %v1402_v53 = vadd.f32 %v1360_v12, %v1261_v29  ;;  %v1449_v4 = vmul.f32 %v1438_v19, %v1401_v30 }
 0x1e6   : > { %vm1416_vm4 = vcmp.gt.f32.partialorder %v1400_v31, 0.0  ;;  %v1448_v13 = vmul.f32 %v1433_v7, %v1400_v31 }
 0x1e7   : > { %vm1418_vm5 = vcmp.gt.f32.partialorder %v1402_v53, 0.0  ;;  %v1450_v16 = vmul.f32 %v1438_v19, %v1402_v53  ;;  %v1461_v33 = vsel %vm1417_vm3, %v1401_v30, %v1449_v4 }
 0x1e8   : > { %v1460_v35 = vsel %vm1416_vm4, %v1400_v31, %v1448_v13  ;;  %1474 = vst [vmem:[%s2182_s7 + $0x48] sm:$0xff] %v1461_v33 }
 0x1e9   : > { %1473 = vst.msk [vmem:[%s2182_s7 + $0x40] sm:$0xff] %vm1466_vm14, %v1460_v35  ;;  %v1462_v11 = vsel %vm1418_vm5, %v1402_v53, %v1450_v16  ;;  %v1248_v37 = vpop.f32.mrf.mxu3 }
 0x1ea   : > { %1475 = vst [vmem:[%s2182_s7 + $0x50] sm:$0xff] %v1462_v11  ;;  %v1262_v20 = vadd.f32 %v1248_v37, %v1121_v34 }
 0x1ec   : > { %v1403_v39 = vadd.f32 %v1389_v38, %v1262_v20 }
 0x1ee   : > { %vm1419_vm6 = vcmp.gt.f32.partialorder %v1403_v39, 0.0  ;;  %v1451_v40 = vmul.f32 %v1438_v19, %v1403_v39 }
 0x1f0   : > { %v1463_v41 = vsel %vm1419_vm6, %v1403_v39, %v1451_v40 }
 0x1f1   : > { %1476 = vst.msk [vmem:[%s2182_s7 + $0x58] sm:$0xff] %vm1466_vm14, %v1463_v41 }
 0x1f2 PF: > { %s13_s12 = sadd.s32 1, %s1739_s12  }
 0x1f3   : > { %p10_p4 = scmp.ge.s32.totalorder %s13_s12, 4  }
 0x1f5   :  { %12 = sbr.rel (!%p10_p4) target bundleno = 1 (0x1), region = 79 }

// kernel: encode_forward.7
= control target key start
LH: loop header
LB: loop body
LE: loop exit
PB: predicated region body
PF: predicated region fallthrough
CT: control target
= control target key end

     0   :  { %s2161_s12 = smov 0   ;;  %s2865_s0 = inlined_call_operand.vmem [shape: f32[2,1,32,384], index: 0, kind: input, shape index: {}]   ;;  %s2866_s1 = inlined_call_operand.vmem [shape: f32[9,32,32], index: 1, kind: input, shape index: {}]   ;;  %s2867_s2 = inlined_call_operand.vmem [shape: f32[32,1], index: 2, kind: input, shape index: {}]   ;;  %s2868_s3 = inlined_call_operand.vmem [shape: f32[2,32,288], index: 3, kind: output, shape index: {}]  }
   0x1 LB: > { %s1702_s13 = sadd.s32 4294967295, %s2130_s12   ;;  %p1706_p0 = scmp.ge.s32.totalorder %s2130_s12, 1  ;;  %s2130_s12 = sphi %s2161_s12, %s13_s12  }
   0x2   : > { %p137_p1 = scmp.lt.s32.totalorder %s2130_s12, 3 }
   0x4   : > { %p138_p2 = pnand %p1706_p0, %p137_p1 }
   0x5   : > { %p161_p3 = scmp.lt.s32.totalorder (!%p138_p2), %s1702_s13, 1  ;;  %s2132_s18 = smov (!%p138_p2), 127  }
   0x6   : > { %141 = sbr.rel (%p138_p2) target bundleno = 499 (0x1f3), region = 32  ;;  %s2133_s19 = smov (!%p138_p2), 126  }
   0x7   : > { %s2134_s20 = smov (!%p138_p2), 110   ;;  %s2135_s21 = smov (!%p138_p2), 109  }
   0x8   : > { %s2136_s22 = smov (!%p138_p2), 108   ;;  %s2137_s23 = smov (!%p138_p2), 92  }
   0x9   : > { %s2138_s24 = smov (!%p138_p2), 91   ;;  %s2139_s8 = smov (!%p138_p2), 90  }
   0xb   : > { %s2870_s13 = smov (!%p161_p3, %s1702_s13), 1  ;;  %vm228_vm0 = vcmask 1039360   ;;  %v2301_v53 = vld [vmem:[%s2866_s1 + $0x20] sm:$0xff]  ;;  %vm249_vm1 = vcmask 261120   ;;  %v1710_v55 = vld [vmem:[%s2866_s1 + $0x28] sm:$0xff]  ;;  %vm477_vm2 = vcmask 1031168  }
   0xc   : > { %s1863_s14 = smul.u32 96, %s2870_s13  ;;  %vm638_vm3 = vcmask 900096   ;;  %vm799_vm4 = vcmask 891904   ;;  %vm960_vm5 = vcmask 883712   ;;  %vm1121_vm6 = vcmask 752640  }
   0xd   : > { %vm1282_vm7 = vcmask 744448   ;;  %vm1443_vm8 = vcmask 736256  }
   0xe   : > { %s165_s17 = scalar_lea.vmem %s2865_s0, %s1863_s14  ;;  %s2827_s9 = scalar_lea.vmem %s2868_s3, %s1863_s14 }
   0xf   : > { %v2177_v0 = vld [vmem:[%s165_s17 + $0x48] sm:$0xff]  ;;  %v2179_v1 = vld [vmem:[%s165_s17 + $0x50] sm:$0xff]  ;;  %v2181_v2 = vld [vmem:[%s165_s17 + $0x18] sm:$0xff] }
  0x10   : > { %v1881_v3 = vpack.i.bf16 %v2179_v1, %v2177_v0  ;;  %v2185_v4 = vld [vmem:[%s165_s17 + $0x58] sm:$0xff]  ;;  %v2189_v6 = vld [vmem:[%s165_s17] sm:$0xff]  ;;  %v2191_v7 = vld [vmem:[%s165_s17 + $0x8] sm:$0xff] }
  0x11   : > { %v1891_v5 = vpack.i.bf16 %v2181_v2, %v2185_v4  ;;  %v2193_v8 = vld [vmem:[%s165_s17 + $0x30] sm:$0xff]  ;;  %v2195_v9 = vld [vmem:[%s165_s17 + $0x38] sm:$0xff]  ;;  %v2199_v10 = vpack.i.bf16 %v2191_v7, %v2189_v6  ;;  %v2201_v11 = vld [vmem:[%s165_s17 + $0x20] sm:$0xff]  ;;  %v2231_v20 = vpack.i.bf16 %v2185_v4, %v2179_v1  ;;  %v2249_v25 = vpack.i.bf16 %v2189_v6, %v2181_v2 }
  0x12   : > { %1882 = vrot.lane.b32.xlu0 %v1881_v3, %s2132_s18  ;;  %v2203_v12 = vld [vmem:[%s165_s17 + $0x40] sm:$0xff]  ;;  %v2208_v13 = vpack.i.bf16 %v2195_v9, %v2193_v8  ;;  %v2210_v14 = vld [vmem:[%s165_s17 + $0x10] sm:$0xff]  ;;  %v2212_v15 = vld [vmem:[%s165_s17 + $0x28] sm:$0xff]  ;;  %v2221_v18 = vpack.i.bf16 %v2201_v11, %v2181_v2  ;;  %v1961_v24 = vpack.i.bf16 %v2193_v8, %v2177_v0 }
  0x13   : > { %1892 = vrot.lane.b32.xlu1 %v1891_v5, %s2132_s18  ;;  %1902 = vrot.lane.b32.xlu2 %v2199_v10, %s2132_s18  ;;  %v1896_v16 = vpack.i.bf16 %v2203_v12, %v2201_v11  ;;  %v1906_v17 = vpack.i.bf16 %v2210_v14, %v2212_v15  ;;  %v2227_v19 = vpack.i.bf16 %v2203_v12, %v2185_v4 }
  0x14   : > { %v1946_v21 = vpack.i.bf16 %v2203_v12, %v2195_v9  ;;  %v2240_v22 = vpack.i.bf16 %v2212_v15, %v2201_v11  ;;  %v1956_v23 = vpack.i.bf16 %v2210_v14, %v2191_v7  ;;  %v2254_v26 = vpack.i.bf16 %v2177_v0, %v2212_v15 }
  0x15   : > { %v2260_v27 = vpack.i.bf16 %v2210_v14, %v2179_v1 }
  0x1a   : > { %1887 = vrot.lane.b32.xlu0 %v2208_v13, %s2132_s18 }
  0x1b   : > { %1897 = vrot.lane.b32.xlu1 %v1896_v16, %s2132_s18  ;;  %1907 = vrot.lane.b32.xlu2 %v1906_v17, %s2132_s18 }
  0x22   : > { %1912 = vrot.lane.b32.xlu0 %v1881_v3, %s2133_s19 }
  0x23   : > { %1917 = vrot.lane.b32.xlu1 %v2208_v13, %s2133_s19  ;;  %1922 = vrot.lane.b32.xlu2 %v2221_v18, %s2133_s19 }
  0x2a   : > { %1927 = vrot.lane.b32.xlu0 %v2199_v10, %s2133_s19 }
  0x2b   : > { %1932 = vrot.lane.b32.xlu1 %v2227_v19, %s2133_s19  ;;  %1937 = vrot.lane.b32.xlu2 %v2231_v20, %s2134_s20 }
  0x32   : > { %1942 = vrot.lane.b32.xlu0 %v1906_v17, %s2133_s19 }
  0x33   : > { %1947 = vrot.lane.b32.xlu1 %v1946_v21, %s2134_s20  ;;  %1952 = vrot.lane.b32.xlu2 %v2240_v22, %s2134_s20 }
  0x3a   : > { %1957 = vrot.lane.b32.xlu0 %v1956_v23, %s2134_s20 }
  0x3b   : > { %1962 = vrot.lane.b32.xlu1 %v1961_v24, %s2134_s20  ;;  %1967 = vrot.lane.b32.xlu2 %v2249_v25, %s2134_s20 }
  0x42   : > { %1972 = vrot.lane.b32.xlu0 %v2227_v19, %s2135_s21 }
  0x43   : > { %1977 = vrot.lane.b32.xlu1 %v2254_v26, %s2135_s21  ;;  %1982 = vrot.lane.b32.xlu2 %v2260_v27, %s2135_s21 }
  0x4a   : > { %1987 = vrot.lane.b32.xlu0 %v2208_v13, %s2135_s21 }
  0x4b   : > { %1992 = vrot.lane.b32.xlu1 %v2221_v18, %s2135_s21  ;;  %1997 = vrot.lane.b32.xlu2 %v2199_v10, %s2135_s21 }
  0x52   : > { %2002 = vrot.lane.b32.xlu0 %v1881_v3, %s2136_s22 }
  0x53   : > { %2007 = vrot.lane.b32.xlu1 %v2208_v13, %s2136_s22  ;;  %2012 = vrot.lane.b32.xlu2 %v1881_v3, %s2137_s23 }
  0x5a   : > { %2017 = vrot.lane.b32.xlu0 %v2221_v18, %s2136_s22 }
  0x5b   : > { %2022 = vrot.lane.b32.xlu1 %v2208_v13, %s2137_s23  ;;  %2027 = vrot.lane.b32.xlu2 %v2199_v10, %s2136_s22 }
  0x62   : > { %2032 = vrot.lane.b32.xlu0 %v2221_v18, %s2137_s23 }
  0x63   : > { %2037 = vrot.lane.b32.xlu1 %v2227_v19, %s2136_s22  ;;  %2042 = vrot.lane.b32.xlu2 %v2199_v10, %s2137_s23 }
  0x6a   : > { %2047 = vrot.lane.b32.xlu0 %v1906_v17, %s2136_s22 }
  0x6b   : > { %2052 = vrot.lane.b32.xlu1 %v2227_v19, %s2137_s23  ;;  %2057 = vrot.lane.b32.xlu2 %v2231_v20, %s2138_s24 }
  0x6d   : > { %v1903_v28 = vpop.permute.xlu2 %1902 }
  0x6e   : > { %v1905_v45 = vunpack.i.h.bf16 %v1903_v28  ;;  %v1904_v46 = vunpack.i.l.bf16 %v1903_v28 }
  0x70   : > { %v229_v54 = vsel %vm228_vm0, %v1904_v46, %v1905_v45 }
  0x72   : > { %2062 = vrot.lane.b32.xlu0 %v1906_v17, %s2137_s23 }
  0x73   : > { %2067 = vrot.lane.b32.xlu1 %v1946_v21, %s2138_s24  ;;  %v1711_v21 = vld [vmem:[%s2866_s1 + $0x30] sm:$0xff]  ;;  %2072 = vrot.lane.b32.xlu2 %v2240_v22, %s2138_s24 }
  0x75   : > { %v1908_v30 = vpop.permute.xlu2 %1907 }
  0x76   : > { %v2282_v37 = vunpack.i.l.bf16 %v1908_v30  ;;  %v2290_v49 = vunpack.i.h.bf16 %v1908_v30 }
  0x78   : > { %v230_v57 = vsel %vm228_vm0, %v1905_v45, %v2290_v49 }
  0x7a   : > { %2077 = vrot.lane.b32.xlu0 %v1956_v23, %s2138_s24 }
  0x7b   : > { %2082 = vrot.lane.b32.xlu1 %v1961_v24, %s2138_s24  ;;  %2087 = vrot.lane.b32.xlu2 %v2249_v25, %s2138_s24 }
  0x7d   : > { %v2284_v39 = vpop.permute.xlu2 %1922 }
  0x7e   : > { %v1925_v16 = vunpack.i.h.bf16 %v2284_v39  ;;  %v1924_v17 = vunpack.i.l.bf16 %v2284_v39 }
  0x80   : > { %v480_v28 = vsel %vm477_vm2, %v1924_v17, %v1925_v16 }
  0x82   : > { %2092 = vrot.lane.b32.xlu0 %v2227_v19, %s2139_s8 }
  0x83   : > { %2097 = vrot.lane.b32.xlu1 %v2254_v26, %s2139_s8  ;;  %2102 = vrot.lane.b32.xlu2 %v2260_v27, %s2139_s8 }
  0x84   : > { %v1883_v29 = vpop.permute.xlu0 %1882 }
  0x85   : > { %v1885_v31 = vunpack.i.h.bf16 %v1883_v29  ;;  %v1884_v32 = vunpack.i.l.bf16 %v1883_v29  ;;  %v1893_v33 = vpop.permute.xlu1 %1892  ;;  %v2310_v58 = vpop.permute.xlu2 %1937 }
  0x86   : > { %v2275_v34 = vunpack.i.l.bf16 %v1893_v33  ;;  %v1895_v47 = vunpack.i.h.bf16 %v1893_v33  ;;  %v1939_v30 = vunpack.i.l.bf16 %v2310_v58 }
  0x87   : > { %v235_v35 = vsel %vm228_vm0, %v1884_v32, %v1885_v31 }
  0x88   : > { %274 = vmatpush.msra.mxu0 %v235_v35  ;;  %1851 = vmatpush.msra.mxu3 %v235_v35  ;;  %v236_v36 = vsel %vm228_vm0, %v1885_v31, %v2275_v34 }
  0x89   : > { %1855 = vmatpush.msra.mxu1 %v236_v36  ;;  %1859 = vmatpush.msra.mxu2 %v2275_v34 }
  0x8a   : > { %2107 = vrot.lane.b32.xlu0 %v2208_v13, %s2139_s8  ;;  %v2421_v13 = vld [vmem:[%s2866_s1 + $0x48] sm:$0xff] }
  0x8b   : > { %2112 = vrot.lane.b32.xlu1 %v2221_v18, %s2139_s8  ;;  %2117 = vrot.lane.b32.xlu2 %v2199_v10, %s2139_s8 }
  0x8c   : > { %v1888_v38 = vpop.permute.xlu0 %1887 }
  0x8d   : > { %v1890_v40 = vunpack.i.h.bf16 %v1888_v38  ;;  %v1889_v41 = vunpack.i.l.bf16 %v1888_v38  ;;  %v1898_v42 = vpop.permute.xlu1 %1897  ;;  %v2341_v31 = vpop.permute.xlu2 %1952 }
  0x8e   : > { %v2286_v43 = vunpack.i.h.bf16 %v1898_v42  ;;  %v1899_v44 = vunpack.i.l.bf16 %v1898_v42 }
  0x8f   : > { %v233_v48 = vsel %vm228_vm0, %v1889_v41, %v1890_v40  ;;  %v1954_v41 = vunpack.i.l.bf16 %v2341_v31 }
  0x90   : > { %275 = vmatpush.msra.mxu0 %v233_v48  ;;  %1852 = vmatpush.msra.mxu3 %v233_v48  ;;  %v234_v50 = vsel %vm228_vm0, %v1890_v40, %v2286_v43  ;;  %v232_v51 = vsel %vm228_vm0, %v1899_v44, %v2282_v37  ;;  %v231_v52 = vsel %vm228_vm0, %v1895_v47, %v1899_v44  ;;  %v1955_v40 = vunpack.i.h.bf16 %v2341_v31 }
  0x91   : > { %1856 = vmatpush.msra.mxu1 %v234_v50  ;;  %1860 = vmatpush.msra.mxu2 %v2286_v43 }
  0x92   : > { %276 = vmatpush.msra.mxu0 %v231_v52  ;;  %1853 = vmatpush.msra.mxu3 %v231_v52  ;;  %v642_v44 = vsel %vm638_vm3, %v1954_v41, %v1955_v40 }
  0x93   : > { %1857 = vmatpush.msra.mxu1 %v232_v51  ;;  %1861 = vmatpush.msra.mxu2 %v2282_v37 }
  0x94   : > { %v1913_v56 = vpop.permute.xlu0 %1912  ;;  %277 = vmatpush.msra.mxu0 %v229_v54  ;;  %1854 = vmatpush.msra.mxu3 %v229_v54 }
  0x95   : > { %v1915_v59 = vunpack.i.h.bf16 %v1913_v56  ;;  %v1914_v60 = vunpack.i.l.bf16 %v1913_v56  ;;  %v1918_v61 = vpop.permute.xlu1 %1917  ;;  %1858 = vmatpush.msra.mxu1 %v230_v57  ;;  %1713 = vmatmul.msk.f32.vlgmr.msra.gmra.mxu0 %vm249_vm1, %v2301_v53 }
  0x96   : > { %v1920_v62 = vunpack.i.h.bf16 %v1918_v61  ;;  %v1919_v63 = vunpack.i.l.bf16 %v1918_v61  ;;  %1714 = vmatmul.msk.f32.vlgmr.msra.gmra.mxu3 %vm249_vm1, %v1710_v55  ;;  %303 = vmatpush.msrb.mxu0 %v236_v36 }
  0x97   : > { %1718 = vmatmul.msk.f32.vlgmr.msra.gmra.mxu1 %vm249_vm1, %v1710_v55  ;;  %1862 = vmatpush.msra.mxu2 %v2290_v49  ;;  %v484_v3 = vsel %vm477_vm2, %v1914_v60, %v1915_v59 }
  0x98   : > { %373 = vmatpush.msrb.mxu3 %v2177_v0  ;;  %304 = vmatpush.msrb.mxu0 %v234_v50  ;;  %v482_v5 = vsel %vm477_vm2, %v1919_v63, %v1920_v62 }
  0x99   : > { %1722 = vmatmul.msk.f32.vlgmr.msra.gmra.mxu2 %vm249_vm1, %v1710_v55  ;;  %431 = vmatpush.msrb.mxu1 %v2185_v4 }
  0x9a   : > { %522 = vmatpush.msrb.mxu2 %v484_v3  ;;  %305 = vmatpush.msrb.mxu0 %v232_v51  ;;  %v185_v3 = vld [vmem:[%s2866_s1 + $0x10] sm:$0xff] }
  0x9b   : > { %374 = vmatpush.msrb.mxu3 %v2193_v8  ;;  %432 = vmatpush.msrb.mxu1 %v2203_v12  ;;  %v1940_v12 = vunpack.i.h.bf16 %v2310_v58 }
  0x9c   : > { %306 = vmatpush.msrb.mxu0 %v230_v57  ;;  %v1928_v0 = vpop.permute.xlu0 %1927  ;;  %523 = vmatpush.msrb.mxu2 %v482_v5 }
  0x9d   : > { %v2329_v4 = vpop.permute.xlu1 %1932  ;;  %v1930_v23 = vunpack.i.h.bf16 %v1928_v0  ;;  %v1929_v24 = vunpack.i.l.bf16 %v1928_v0  ;;  %375 = vmatpush.msrb.mxu3 %v2181_v2  ;;  %1717 = vmatmul.msk.f32.vlgmr.msrb.gmra.mxu0 %vm249_vm1, %v2301_v53 }
  0x9e   : > { %332 = vmatpush.msra.mxu0 %v2275_v34  ;;  %v1935_v8 = vunpack.i.h.bf16 %v2329_v4  ;;  %v1934_v29 = vunpack.i.l.bf16 %v2329_v4  ;;  %1715 = vmatmul.msk.f32.gmra.mxu3 %vm249_vm1, %v1711_v21  ;;  %v1712_v34 = vld [vmem:[%s2866_s1 + $0x38] sm:$0xff]  ;;  %v2439_v4 = vld [vmem:[%s2866_s1 + $0x50] sm:$0xff] }
  0x9f   : > { %1719 = vmatmul.msk.f32.gmra.mxu1 %vm249_vm1, %v1711_v21  ;;  %376 = vmatpush.msrb.mxu3 %v2189_v6  ;;  %v478_v32 = vsel %vm477_vm2, %v1929_v24, %v1930_v23  ;;  %v646_v6 = vsel %vm638_vm3, %v1939_v30, %v1940_v12 }
  0xa0   : > { %333 = vmatpush.msra.mxu0 %v2286_v43  ;;  %v485_v2 = vsel %vm477_vm2, %v1915_v59, %v1934_v29  ;;  %524 = vmatpush.msrb.mxu2 %v480_v28  ;;  %v483_v33 = vsel %vm477_vm2, %v1920_v62, %v1935_v8  ;;  %v1968_v43 = vpop.permute.xlu2 %1967 }
  0xa1   : > { %1723 = vmatmul.msk.f32.gmra.mxu2 %vm249_vm1, %v1711_v21  ;;  %551 = vmatpush.msra.mxu3 %v485_v2  ;;  %v1969_v47 = vunpack.i.l.bf16 %v1968_v43  ;;  %v1970_v50 = vunpack.i.h.bf16 %v1968_v43 }
  0xa2   : > { %334 = vmatpush.msra.mxu0 %v2282_v37  ;;  %433 = vmatpush.msrb.mxu1 %v2212_v15 }
  0xa3   : > { %525 = vmatpush.msrb.mxu2 %v478_v32  ;;  %552 = vmatpush.msra.mxu3 %v483_v33  ;;  %v641_v52 = vsel %vm638_vm3, %v1969_v47, %v1954_v41  ;;  %v186_v32 = vld [vmem:[%s2866_s1 + $0x18] sm:$0xff] }
  0xa4   : > { %335 = vmatpush.msra.mxu0 %v2290_v49  ;;  %v1943_v35 = vpop.permute.xlu0 %1942  ;;  %434 = vmatpush.msrb.mxu1 %v2210_v14 }
  0xa5   : > { %v1948_v36 = vpop.permute.xlu1 %1947  ;;  %v1945_v37 = vunpack.i.h.bf16 %v1943_v35  ;;  %v1944_v15 = vunpack.i.l.bf16 %v1943_v35  ;;  %712 = vmatpush.msra.mxu2 %v646_v6  ;;  %1721 = vmatmul.msk.f32.vlgmr.msra.gmra.mxu0 %vm249_vm1, %v2301_v53  ;;  %v184_v53 = vld [vmem:[%s2866_s1 + $0x8] sm:$0xff] }
  0xa6   : > { %402 = vmatpush.msrb.mxu0 %v2179_v1  ;;  %v1950_v38 = vunpack.i.h.bf16 %v1948_v36  ;;  %v1949_v39 = vunpack.i.l.bf16 %v1948_v36  ;;  %1716 = vmatmul.msk.f32.gmra.mxu3 %vm249_vm1, %v1712_v34 }
  0xa7   : > { %1720 = vmatmul.msk.f32.gmra.mxu1 %vm249_vm1, %v1712_v34  ;;  %v481_v1 = vsel %vm477_vm2, %v1925_v16, %v1944_v15  ;;  %v479_v14 = vsel %vm477_vm2, %v1930_v23, %v1945_v37 }
  0xa8   : > { %403 = vmatpush.msrb.mxu0 %v2195_v9  ;;  %553 = vmatpush.msra.mxu3 %v481_v1  ;;  %v644_v42 = vsel %vm638_vm3, %v1949_v39, %v1950_v38  ;;  %v183_v9 = vld [vmem:[%s2866_s1] sm:$0xff]  ;;  %v2402_v49 = vpop.permute.xlu2 %1982 }
  0xa9   : > { %1724 = vmatmul.msk.f32.gmra.mxu2 %vm249_vm1, %v1712_v34  ;;  %v1984_v54 = vunpack.i.l.bf16 %v2402_v49  ;;  %v1985_v16 = vunpack.i.h.bf16 %v2402_v49  ;;  %v2462_v34 = vld [vmem:[%s2866_s1 + $0x58] sm:$0xff] }
  0xaa   : > { %404 = vmatpush.msrb.mxu0 %v2201_v11  ;;  %554 = vmatpush.msra.mxu3 %v479_v14 }
  0xab   : > { %713 = vmatpush.msra.mxu2 %v644_v42 }
  0xac   : > { %405 = vmatpush.msrb.mxu0 %v2191_v7  ;;  %v1958_v20 = vpop.permute.xlu0 %1957  ;;  %v2390_v7 = vld [vmem:[%s2866_s1 + $0x40] sm:$0xff] }
  0xad   : > { %v1963_v11 = vpop.permute.xlu1 %1962  ;;  %714 = vmatpush.msra.mxu2 %v642_v44  ;;  %1729 = vmatmul.msk.f32.vlgmr.msrb.gmra.mxu0 %vm249_vm1, %v183_v9  ;;  %v1960_v19 = vunpack.i.h.bf16 %v1958_v20  ;;  %v1959_v51 = vunpack.i.l.bf16 %v1958_v20 }
  0xae   : > { %580 = vmatpush.msra.mxu0 %v1934_v29  ;;  %v1965_v45 = vunpack.i.h.bf16 %v1963_v11  ;;  %v1964_v46 = vunpack.i.l.bf16 %v1963_v11  ;;  %1725 = vmatmul.msk.f32.vlgmr.msrb.gmra.mxu3 %vm249_vm1, %v183_v9 }
  0xaf   : > { %1733 = vmatmul.msk.f32.vlgmr.msrb.gmra.mxu1 %vm249_vm1, %v183_v9  ;;  %741 = vmatpush.msrb.mxu3 %v1940_v12  ;;  %v640_v22 = vsel %vm638_vm3, %v1959_v51, %v1960_v19  ;;  %v639_v58 = vsel %vm638_vm3, %v1970_v50, %v1959_v51 }
  0xb0   : > { %581 = vmatpush.msra.mxu0 %v1935_v8  ;;  %v645_v26 = vsel %vm638_vm3, %v1964_v46, %v1939_v30  ;;  %v643_v48 = vsel %vm638_vm3, %v1965_v45, %v1949_v39  ;;  %715 = vmatpush.msra.mxu2 %v640_v22  ;;  %v1998_v63 = vpop.permute.xlu2 %1997 }
  0xb1   : > { %1741 = vmatmul.msk.f32.vlgmr.msrb.gmra.mxu2 %vm249_vm1, %v2390_v7  ;;  %683 = vmatpush.msra.mxu1 %v645_v26  ;;  %v2000_v0 = vunpack.i.h.bf16 %v1998_v63  ;;  %v1999_v28 = vunpack.i.l.bf16 %v1998_v63 }
  0xb2   : > { %742 = vmatpush.msrb.mxu3 %v1950_v38  ;;  %582 = vmatpush.msra.mxu0 %v1944_v15 }
  0xb3   : > { %684 = vmatpush.msra.mxu1 %v643_v48  ;;  %v801_v31 = vsel %vm799_vm4, %v2000_v0, %v1985_v16  ;;  %v800_v2 = vsel %vm799_vm4, %v1999_v28, %v2000_v0 }
  0xb4   : > { %583 = vmatpush.msra.mxu0 %v1945_v37  ;;  %743 = vmatpush.msrb.mxu3 %v1955_v40  ;;  %v1973_v55 = vpop.permute.xlu0 %1972  ;;  %v2475_v40 = vld [vmem:[%s2866_s1 + $0x60] sm:$0xff] }
  0xb5   : > { %685 = vmatpush.msra.mxu1 %v641_v52  ;;  %v1978_v56 = vpop.permute.xlu1 %1977  ;;  %v1974_v57 = vunpack.i.l.bf16 %v1973_v55  ;;  %1730 = vmatmul.msk.f32.gmra.mxu0 %vm249_vm1, %v184_v53  ;;  %v1975_v60 = vunpack.i.h.bf16 %v1973_v55  ;;  %v1755_v55 = vld [vmem:[%s2866_s1 + $0x70] sm:$0xff] }
  0xb6   : > { %1726 = vmatmul.msk.f32.gmra.mxu3 %vm249_vm1, %v184_v53  ;;  %v1980_v59 = vunpack.i.h.bf16 %v1978_v56  ;;  %v1979_v62 = vunpack.i.l.bf16 %v1978_v56 }
  0xb7   : > { %1734 = vmatmul.msk.f32.gmra.mxu1 %vm249_vm1, %v184_v53  ;;  %v807_v18 = vsel %vm799_vm4, %v1984_v54, %v1974_v57  ;;  %744 = vmatpush.msrb.mxu3 %v1960_v19  ;;  %v2501_v19 = vld [vmem:[%s2866_s1 + $0x68] sm:$0xff] }
  0xb8   : > { %686 = vmatpush.msra.mxu1 %v639_v58  ;;  %v806_v61 = vsel %vm799_vm4, %v1980_v59, %v1984_v54  ;;  %902 = vmatpush.msrb.mxu2 %v1974_v57  ;;  %v2456_v33 = vpop.permute.xlu2 %2012 }
  0xb9   : > { %1742 = vmatmul.msk.f32.gmra.mxu2 %vm249_vm1, %v2421_v13  ;;  %844 = vmatpush.msrb.mxu0 %v806_v61  ;;  %v2015_v38 = vunpack.i.h.bf16 %v2456_v33  ;;  %v2014_v39 = vunpack.i.l.bf16 %v2456_v33 }
  0xba   : > { %873 = vmatpush.msrb.mxu1 %v807_v18  ;;  %903 = vmatpush.msrb.mxu2 %v1975_v60 }
  0xbb   : > { %v1128_v11 = vsel %vm1121_vm6, %v2014_v39, %v2015_v38 }
  0xbc   : > { %v1988_v5 = vpop.permute.xlu0 %1987  ;;  %904 = vmatpush.msrb.mxu2 %v1979_v62 }
  0xbd   : > { %v1993_v25 = vpop.permute.xlu1 %1992  ;;  %v1990_v17 = vunpack.i.h.bf16 %v1988_v5  ;;  %v1989_v21 = vunpack.i.l.bf16 %v1988_v5  ;;  %1731 = vmatmul.msk.f32.gmra.mxu0 %vm249_vm1, %v185_v3 }
  0xbe   : > { %1727 = vmatmul.msk.f32.gmra.mxu3 %vm249_vm1, %v185_v3  ;;  %v1995_v23 = vunpack.i.h.bf16 %v1993_v25  ;;  %v1994_v24 = vunpack.i.l.bf16 %v1993_v25  ;;  %905 = vmatpush.msrb.mxu2 %v1985_v16 }
  0xbf   : > { %1735 = vmatmul.msk.f32.gmra.mxu1 %vm249_vm1, %v185_v3  ;;  %v805_v8 = vsel %vm799_vm4, %v1990_v17, %v1975_v60  ;;  %v804_v29 = vsel %vm799_vm4, %v1989_v21, %v1990_v17  ;;  %v1756_v60 = vld [vmem:[%s2866_s1 + $0x78] sm:$0xff]  ;;  %v1769_v21 = vld [vmem:[%s2866_s1 + $0x80] sm:$0xff] }
  0xc0   : > { %874 = vmatpush.msrb.mxu1 %v805_v8  ;;  %v803_v12 = vsel %vm799_vm4, %v1995_v23, %v1979_v62  ;;  %v802_v30 = vsel %vm799_vm4, %v1994_v24, %v1995_v23  ;;  %845 = vmatpush.msrb.mxu0 %v804_v29  ;;  %v2028_v9 = vpop.permute.xlu2 %2027  ;;  %v1770_v8 = vld [vmem:[%s2866_s1 + $0x88] sm:$0xff] }
  0xc1   : > { %1743 = vmatmul.msk.f32.gmra.mxu2 %vm249_vm1, %v2439_v4  ;;  %v2030_v45 = vunpack.i.h.bf16 %v2028_v9  ;;  %v2029_v46 = vunpack.i.l.bf16 %v2028_v9 }
  0xc2   : > { %875 = vmatpush.msrb.mxu1 %v803_v12  ;;  %846 = vmatpush.msrb.mxu0 %v802_v30  ;;  %v1771_v30 = vld [vmem:[%s2866_s1 + $0x90] sm:$0xff] }
  0xc3   : > { %v961_v49 = vsel %vm960_vm5, %v2029_v46, %v2030_v45  ;;  %v1786_v46 = vld [vmem:[%s2866_s1 + $0xa8] sm:$0xff] }
  0xc4   : > { %876 = vmatpush.msrb.mxu1 %v801_v31  ;;  %v2003_v27 = vpop.permute.xlu0 %2002  ;;  %847 = vmatpush.msrb.mxu0 %v800_v2 }
  0xc5   : > { %v2008_v6 = vpop.permute.xlu1 %2007  ;;  %1732 = vmatmul.msk.f32.gmra.mxu0 %vm249_vm1, %v186_v32  ;;  %v2005_v35 = vunpack.i.h.bf16 %v2003_v27  ;;  %v2004_v36 = vunpack.i.l.bf16 %v2003_v27 }
  0xc6   : > { %1728 = vmatmul.msk.f32.gmra.mxu3 %vm249_vm1, %v186_v32  ;;  %v2010_v37 = vunpack.i.h.bf16 %v2008_v6  ;;  %v2009_v15 = vunpack.i.l.bf16 %v2008_v6 }
  0xc7   : > { %1736 = vmatmul.msk.f32.gmra.mxu1 %vm249_vm1, %v186_v32  ;;  %v967_v42 = vsel %vm960_vm5, %v2004_v36, %v2005_v35  ;;  %v1772_v36 = vld [vmem:[%s2866_s1 + $0x98] sm:$0xff] }
  0xc8   : > { %v965_v20 = vsel %vm960_vm5, %v2009_v15, %v2010_v37  ;;  %v2043_v61 = vpop.permute.xlu2 %2042 }
  0xc9   : > { %1744 = vmatmul.msk.f32.gmra.mxu2 %vm249_vm1, %v2462_v34  ;;  %v2045_v62 = vunpack.i.h.bf16 %v2043_v61  ;;  %v2044_v63 = vunpack.i.l.bf16 %v2043_v61 }
  0xcb   : > { %v1122_v25 = vsel %vm1121_vm6, %v2044_v63, %v2045_v62 }
  0xcc   : > { %v2018_v41 = vpop.permute.xlu0 %2017 }
  0xcd   : > { %v2477_v10 = vpop.permute.xlu1 %2022  ;;  %v2020_v1 = vunpack.i.h.bf16 %v2018_v41  ;;  %v2019_v14 = vunpack.i.l.bf16 %v2018_v41  ;;  %1749 = vmatmul.msk.f32.vlgmr.msra.gmra.mxu0 %vm249_vm1, %v2390_v7 }
  0xce   : > { %1745 = vmatmul.msk.f32.vlgmr.msra.gmra.mxu3 %vm249_vm1, %v2390_v7  ;;  %v2025_v43 = vunpack.i.h.bf16 %v2477_v10  ;;  %v2024_v44 = vunpack.i.l.bf16 %v2477_v10 }
  0xcf   : > { %1757 = vmatmul.msk.f32.vlgmr.msra.gmra.mxu1 %vm249_vm1, %v2475_v40  ;;  %1005 = vmatpush.msra.mxu3 %v967_v42  ;;  %v963_v47 = vsel %vm960_vm5, %v2019_v14, %v2020_v1 }
  0xd0   : > { %v1126_v7 = vsel %vm1121_vm6, %v2024_v44, %v2025_v43  ;;  %v2058_v33 = vpop.permute.xlu2 %2057 }
  0xd1   : > { %1761 = vmatmul.msk.f32.vlgmr.msra.gmra.mxu2 %vm249_vm1, %v2475_v40  ;;  %1006 = vmatpush.msra.mxu3 %v965_v20  ;;  %v2591_v20 = vld [vmem:[%s2866_s1 + $0xc0] sm:$0xff] }
  0xd2   : > { %1166 = vmatpush.msra.mxu2 %v1128_v11 }
  0xd3   : > { %1007 = vmatpush.msra.mxu3 %v963_v47 }
  0xd4   : > { %v2503_v26 = vpop.permute.xlu0 %2032  ;;  %1167 = vmatpush.msra.mxu2 %v1126_v7 }
  0xd5   : > { %v2038_v48 = vpop.permute.xlu1 %2037  ;;  %1750 = vmatmul.msk.f32.gmra.mxu0 %vm249_vm1, %v2421_v13  ;;  %1008 = vmatpush.msra.mxu3 %v961_v49  ;;  %v2035_v22 = vunpack.i.h.bf16 %v2503_v26  ;;  %v2034_v54 = vunpack.i.l.bf16 %v2503_v26  ;;  %v2610_v49 = vld [vmem:[%s2866_s1 + $0xc8] sm:$0xff] }
  0xd6   : > { %1746 = vmatmul.msk.f32.gmra.mxu3 %vm249_vm1, %v2421_v13  ;;  %v2040_v50 = vunpack.i.h.bf16 %v2038_v48  ;;  %v2039_v51 = vunpack.i.l.bf16 %v2038_v48 }
  0xd7   : > { %1758 = vmatmul.msk.f32.gmra.mxu1 %vm249_vm1, %v2501_v19  ;;  %v1124_v59 = vsel %vm1121_vm6, %v2034_v54, %v2035_v22 }
  0xd8   : > { %v968_v52 = vsel %vm960_vm5, %v2005_v35, %v2039_v51  ;;  %v966_v53 = vsel %vm960_vm5, %v2010_v37, %v2040_v50  ;;  %1063 = vmatpush.msra.mxu1 %v2039_v51  ;;  %1168 = vmatpush.msra.mxu2 %v1124_v59  ;;  %v2059_v35 = vunpack.i.l.bf16 %v2058_v33  ;;  %v2073_v10 = vpop.permute.xlu2 %2072 }
  0xd9   : > { %1762 = vmatmul.msk.f32.gmra.mxu2 %vm249_vm1, %v2501_v19  ;;  %1034 = vmatpush.msra.mxu0 %v968_v52  ;;  %v2075_v14 = vunpack.i.h.bf16 %v2073_v10  ;;  %v2074_v42 = vunpack.i.l.bf16 %v2073_v10 }
  0xda   : > { %1064 = vmatpush.msra.mxu1 %v2040_v50  ;;  %1169 = vmatpush.msra.mxu2 %v1122_v25  ;;  %v1788_v25 = vld [vmem:[%s2866_s1 + $0xb8] sm:$0xff] }
  0xdb   : > { %1035 = vmatpush.msra.mxu0 %v966_v53  ;;  %v1286_v44 = vsel %vm1282_vm7, %v2074_v42, %v2075_v14  ;;  %v1787_v53 = vld [vmem:[%s2866_s1 + $0xb0] sm:$0xff] }
  0xdc   : > { %v2048_v56 = vpop.permute.xlu0 %2047 }
  0xdd   : > { %v2050_v57 = vunpack.i.h.bf16 %v2048_v56  ;;  %v2049_v58 = vunpack.i.l.bf16 %v2048_v56  ;;  %1751 = vmatmul.msk.f32.gmra.mxu0 %vm249_vm1, %v2439_v4  ;;  %v2053_v3 = vpop.permute.xlu1 %2052 }
  0xde   : > { %1747 = vmatmul.msk.f32.gmra.mxu3 %vm249_vm1, %v2439_v4  ;;  %v2054_v5 = vunpack.i.l.bf16 %v2053_v3  ;;  %v2055_v17 = vunpack.i.h.bf16 %v2053_v3 }
  0xdf   : > { %1759 = vmatmul.msk.f32.gmra.mxu1 %vm249_vm1, %v1755_v55  ;;  %v964_v13 = vsel %vm960_vm5, %v2020_v1, %v2049_v58  ;;  %v962_v18 = vsel %vm960_vm5, %v2030_v45, %v2050_v57  ;;  %v1785_v1 = vld [vmem:[%s2866_s1 + $0xa0] sm:$0xff] }
  0xe0   : > { %1036 = vmatpush.msra.mxu0 %v964_v13  ;;  %1065 = vmatpush.msra.mxu1 %v2049_v58  ;;  %v1129_v0 = vsel %vm1121_vm6, %v2015_v38, %v2054_v5  ;;  %v1127_v23 = vsel %vm1121_vm6, %v2025_v43, %v2055_v17  ;;  %v2088_v45 = vpop.permute.xlu2 %2087 }
  0xe1   : > { %1763 = vmatmul.msk.f32.gmra.mxu2 %vm249_vm1, %v1755_v55  ;;  %v2090_v47 = vunpack.i.h.bf16 %v2088_v45  ;;  %v2089_v7 = vunpack.i.l.bf16 %v2088_v45  ;;  %v1575_v45 = vld [vmem:[%s2867_s2] sm:$0xff] }
  0xe2   : > { %1037 = vmatpush.msra.mxu0 %v962_v18  ;;  %1066 = vmatpush.msra.mxu1 %v2050_v57  ;;  %v2629_v57 = vld [vmem:[%s2866_s1 + $0xd0] sm:$0xff] }
  0xe3   : > { %v1285_v26 = vsel %vm1282_vm7, %v2089_v7, %v2074_v42 }
  0xe4   : > { %v2063_v16 = vpop.permute.xlu0 %2062 }
  0xe5   : > { %1752 = vmatmul.msk.f32.gmra.mxu0 %vm249_vm1, %v2462_v34  ;;  %v2064_v4 = vunpack.i.l.bf16 %v2063_v16  ;;  %v2065_v24 = vunpack.i.h.bf16 %v2063_v16  ;;  %v2068_v29 = vpop.permute.xlu1 %2067 }
  0xe6   : > { %1748 = vmatmul.msk.f32.gmra.mxu3 %vm249_vm1, %v2462_v34  ;;  %v2069_v2 = vunpack.i.l.bf16 %v2068_v29  ;;  %v2070_v6 = vunpack.i.h.bf16 %v2068_v29  ;;  %v2060_v34 = vunpack.i.h.bf16 %v2058_v33 }
  0xe7   : > { %1760 = vmatmul.msk.f32.gmra.mxu1 %vm249_vm1, %v1756_v60  ;;  %v1125_v28 = vsel %vm1121_vm6, %v2035_v22, %v2064_v4  ;;  %v1123_v12 = vsel %vm1121_vm6, %v2045_v62, %v2065_v24 }
  0xe8   : > { %v1290_v15 = vsel %vm1282_vm7, %v2059_v35, %v2060_v34  ;;  %v1288_v39 = vsel %vm1282_vm7, %v2069_v2, %v2070_v6  ;;  %v2103_v51 = vpop.permute.xlu2 %2102 }
  0xe9   : > { %1764 = vmatmul.msk.f32.gmra.mxu2 %vm249_vm1, %v1756_v60  ;;  %v2105_v3 = vunpack.i.h.bf16 %v2103_v51 }
  0xed   : > { %1773 = vmatmul.msk.f32.vlgmr.msrb.gmra.mxu0 %vm249_vm1, %v1769_v21  ;;  %v2083_v31 = vpop.permute.xlu1 %2082 }
  0xee   : > { %1765 = vmatmul.msk.f32.vlgmr.msrb.gmra.mxu3 %vm249_vm1, %v2475_v40  ;;  %1224 = vmatpush.msrb.mxu0 %v2054_v5  ;;  %v2085_v32 = vunpack.i.h.bf16 %v2083_v31  ;;  %v2084_v27 = vunpack.i.l.bf16 %v2083_v31  ;;  %v2078_v40 = vpop.permute.xlu0 %2077 }
  0xef   : > { %1777 = vmatmul.msk.f32.vlgmr.msrb.gmra.mxu1 %vm249_vm1, %v1769_v21  ;;  %1195 = vmatpush.msrb.mxu3 %v1129_v0  ;;  %v2080_v41 = vunpack.i.h.bf16 %v2078_v40  ;;  %v2079_v43 = vunpack.i.l.bf16 %v2078_v40 }
  0xf0   : > { %1225 = vmatpush.msrb.mxu0 %v2055_v17  ;;  %v1289_v37 = vsel %vm1282_vm7, %v2084_v27, %v2059_v35  ;;  %v1287_v38 = vsel %vm1282_vm7, %v2085_v32, %v2069_v2  ;;  %v2118_v16 = vpop.permute.xlu2 %2117 }
  0xf1   : > { %1781 = vmatmul.msk.f32.vlgmr.msrb.gmra.mxu2 %vm249_vm1, %v1769_v21  ;;  %1196 = vmatpush.msrb.mxu3 %v1127_v23  ;;  %v1284_v9 = vsel %vm1282_vm7, %v2079_v43, %v2080_v41  ;;  %v1283_v48 = vsel %vm1282_vm7, %v2090_v47, %v2079_v43  ;;  %v2119_v32 = vunpack.i.l.bf16 %v2118_v16 }
  0xf2   : > { %1226 = vmatpush.msrb.mxu0 %v2064_v4  ;;  %1327 = vmatpush.msrb.mxu1 %v1289_v37  ;;  %v2650_v4 = vld [vmem:[%s2866_s1 + $0xd8] sm:$0xff] }
  0xf3   : > { %1197 = vmatpush.msrb.mxu3 %v1125_v28  ;;  %1356 = vmatpush.msrb.mxu2 %v1290_v15  ;;  %v2120_v28 = vunpack.i.h.bf16 %v2118_v16 }
  0xf4   : > { %1227 = vmatpush.msrb.mxu0 %v2065_v24  ;;  %1328 = vmatpush.msrb.mxu1 %v1287_v38 }
  0xf5   : > { %1774 = vmatmul.msk.f32.gmra.mxu0 %vm249_vm1, %v1770_v8  ;;  %1198 = vmatpush.msrb.mxu3 %v1123_v12  ;;  %v2098_v59 = vpop.permute.xlu1 %2097  ;;  %v1445_v33 = vsel %vm1443_vm8, %v2120_v28, %v2105_v3 }
  0xf6   : > { %1766 = vmatmul.msk.f32.gmra.mxu3 %vm249_vm1, %v2501_v19  ;;  %1357 = vmatpush.msrb.mxu2 %v1288_v39  ;;  %v2093_v56 = vpop.permute.xlu0 %2092  ;;  %v2100_v18 = vunpack.i.h.bf16 %v2098_v59  ;;  %v1444_v39 = vsel %vm1443_vm8, %v2119_v32, %v2120_v28  ;;  %v1835_v32 = vld [vmem:[%s2866_s1 + $0x110] sm:$0xff] }
  0xf7   : > { %1778 = vmatmul.msk.f32.gmra.mxu1 %vm249_vm1, %v1770_v8  ;;  %v2095_v58 = vunpack.i.h.bf16 %v2093_v56  ;;  %v2094_v13 = vunpack.i.l.bf16 %v2093_v56 }
  0xf8   : > { %1358 = vmatpush.msrb.mxu2 %v1286_v44  ;;  %1329 = vmatpush.msrb.mxu1 %v1285_v26 }
  0xf9   : > { %1782 = vmatmul.msk.f32.gmra.mxu2 %vm249_vm1, %v1770_v8 }
  0xfa   : > { %1359 = vmatpush.msrb.mxu2 %v1284_v9  ;;  %1330 = vmatpush.msrb.mxu1 %v1283_v48 }
  0xfd   : > { %1775 = vmatmul.msk.f32.gmra.mxu0 %vm249_vm1, %v1771_v30  ;;  %v2113_v8 = vpop.permute.xlu1 %2112 }
  0xfe   : > { %1767 = vmatmul.msk.f32.gmra.mxu3 %vm249_vm1, %v1755_v55  ;;  %v2104_v55 = vunpack.i.l.bf16 %v2103_v51  ;;  %v2108_v0 = vpop.permute.xlu0 %2107  ;;  %v2115_v29 = vunpack.i.h.bf16 %v2113_v8  ;;  %v2114_v12 = vunpack.i.l.bf16 %v2113_v8 }
  0xff   : > { %1779 = vmatmul.msk.f32.gmra.mxu1 %vm249_vm1, %v1771_v30  ;;  %v2110_v23 = vunpack.i.h.bf16 %v2108_v0  ;;  %v2109_v24 = vunpack.i.l.bf16 %v2108_v0 }
 0x100   : > { %v1451_v61 = vsel %vm1443_vm8, %v2104_v55, %v2094_v13  ;;  %v1450_v63 = vsel %vm1443_vm8, %v2100_v18, %v2104_v55  ;;  %v1820_v55 = vld [vmem:[%s2866_s1 + $0xf8] sm:$0xff] }
 0x101   : > { %1783 = vmatmul.msk.f32.gmra.mxu2 %vm249_vm1, %v1771_v30  ;;  %v1449_v30 = vsel %vm1443_vm8, %v2110_v23, %v2095_v58  ;;  %v1448_v31 = vsel %vm1443_vm8, %v2109_v24, %v2110_v23  ;;  %v1834_v23 = vld [vmem:[%s2866_s1 + $0x108] sm:$0xff] }
 0x105   : > { %1776 = vmatmul.msk.f32.gmra.mxu0 %vm249_vm1, %v1772_v36 }
 0x106   : > { %1768 = vmatmul.msk.f32.gmra.mxu3 %vm249_vm1, %v1756_v60  ;;  %v2099_v60 = vunpack.i.l.bf16 %v2098_v59 }
 0x107   : > { %1780 = vmatmul.msk.f32.gmra.mxu1 %vm249_vm1, %v1772_v36 }
 0x108   : > { %v1447_v27 = vsel %vm1443_vm8, %v2115_v29, %v2099_v60 }
 0x109   : > { %1784 = vmatmul.msk.f32.gmra.mxu2 %vm249_vm1, %v1772_v36  ;;  %v2666_v36 = vld [vmem:[%s2866_s1 + $0xe0] sm:$0xff] }
 0x10d   : > { %1793 = vmatmul.msk.f32.vlgmr.msra.gmra.mxu0 %vm249_vm1, %v1785_v1 }
 0x10e   : > { %1789 = vmatmul.msk.f32.vlgmr.msra.gmra.mxu3 %vm249_vm1, %v1785_v1  ;;  %1488 = vmatpush.msra.mxu0 %v1450_v63 }
 0x10f   : > { %1797 = vmatmul.msk.f32.vlgmr.msra.gmra.mxu1 %vm249_vm1, %v1785_v1  ;;  %1385 = vmatpush.msra.mxu3 %v2060_v34 }
 0x110   : > { %1517 = vmatpush.msra.mxu1 %v1451_v61  ;;  %1489 = vmatpush.msra.mxu0 %v1448_v31 }
 0x111   : > { %1805 = vmatmul.msk.f32.vlgmr.msra.gmra.mxu2 %vm249_vm1, %v2591_v20  ;;  %1386 = vmatpush.msra.mxu3 %v2070_v6  ;;  %v1446_v6 = vsel %vm1443_vm8, %v2114_v12, %v2115_v29 }
 0x112   : > { %v2597_v11 = vpop.f32.mrf.mxu0  ;;  %1546 = vmatpush.msra.mxu2 %v2094_v13  ;;  %1518 = vmatpush.msra.mxu1 %v1449_v30 }
 0x113   : > { %1387 = vmatpush.msra.mxu3 %v2075_v14  ;;  %1490 = vmatpush.msra.mxu0 %v1446_v6  ;;  %v2683_v14 = vld [vmem:[%s2866_s1 + $0xe8] sm:$0xff] }
 0x114   : > { %v2602_v19 = vpop.f32.mrf.mxu1  ;;  %1547 = vmatpush.msra.mxu2 %v2095_v58  ;;  %1519 = vmatpush.msra.mxu1 %v1447_v27 }
 0x115   : > { %1794 = vmatmul.msk.f32.gmra.mxu0 %vm249_vm1, %v1786_v46  ;;  %1388 = vmatpush.msra.mxu3 %v2080_v41 }
 0x116   : > { %1790 = vmatmul.msk.f32.gmra.mxu3 %vm249_vm1, %v1786_v46  ;;  %1548 = vmatpush.msra.mxu2 %v2099_v60 }
 0x117   : > { %1798 = vmatmul.msk.f32.gmra.mxu1 %vm249_vm1, %v1786_v46  ;;  %1491 = vmatpush.msra.mxu0 %v1444_v39  ;;  %v2140_v46 = vmov 0   ;;  %v1836_v39 = vld [vmem:[%s2866_s1 + $0x118] sm:$0xff] }
 0x118   : > { %1549 = vmatpush.msra.mxu2 %v2105_v3  ;;  %1520 = vmatpush.msra.mxu1 %v1445_v33 }
 0x119   : > { %1806 = vmatmul.msk.f32.gmra.mxu2 %vm249_vm1, %v2610_v49  ;;  %v2616_v50 = vpop.f32.mrf.mxu3  ;;  %2121 = vset.pattern.permute.xlu0 %v2140_v46 }
 0x11a   : > { %v308_v52 = vpop.f32.mrf.mxu0  ;;  %2122 = vset.pattern.permute.xlu1 %v2140_v46  ;;  %1593 = vperm.xlu0 %2121, %v1575_v45  }
 0x11b   : > { %2123 = vset.pattern.permute.xlu2 %v2140_v46 }
 0x11c   : > { %v2621_v22 = vpop.f32.mrf.mxu1  ;;  %v2623_v54 = vpop.f32.mrf.mxu2 }
 0x11d   : > { %1795 = vmatmul.msk.f32.gmra.mxu0 %vm249_vm1, %v1787_v53 }
 0x11e   : > { %1791 = vmatmul.msk.f32.gmra.mxu3 %vm249_vm1, %v1787_v53 }
 0x11f   : > { %1799 = vmatmul.msk.f32.gmra.mxu1 %vm249_vm1, %v1787_v53  ;;  %v1576_v53 = vld [vmem:[%s2867_s2 + $0x8] sm:$0xff] }
 0x120   : > { %1598 = vperm.xlu1 %2122, %v1576_v53  }
 0x121   : > { %1807 = vmatmul.msk.f32.gmra.mxu2 %vm249_vm1, %v2629_v57  ;;  %v2636_v62 = vpop.f32.mrf.mxu3 }
 0x122   : > { %v337_v5 = vpop.f32.mrf.mxu0 }
 0x124   : > { %v2642_v17 = vpop.f32.mrf.mxu1  ;;  %v2644_v21 = vpop.f32.mrf.mxu2 }
 0x125   : > { %1796 = vmatmul.msk.f32.gmra.mxu0 %vm249_vm1, %v1788_v25 }
 0x126   : > { %1792 = vmatmul.msk.f32.gmra.mxu3 %vm249_vm1, %v1788_v25 }
 0x127   : > { %1800 = vmatmul.msk.f32.gmra.mxu1 %vm249_vm1, %v1788_v25 }
 0x129   : > { %1808 = vmatmul.msk.f32.gmra.mxu2 %vm249_vm1, %v2650_v4  ;;  %v2658_v2 = vpop.f32.mrf.mxu3 }
 0x12a   : > { %v407_v35 = vpop.f32.mrf.mxu0 }
 0x12b   : > { %v2668_v37 = vadd.f32 %v407_v35, %v308_v52 }
 0x12c   : > { %v346_v34 = vpop.f32.mrf.mxu2  ;;  %v436_v15 = vpop.f32.mrf.mxu1 }
 0x12d   : > { %v437_v38 = vadd.f32 %v436_v15, %v337_v5  ;;  %1813 = vmatmul.msk.f32.vlgmr.msrb.gmra.mxu0 %vm249_vm1, %v2591_v20 }
 0x12e   : > { %1809 = vmatmul.msk.f32.vlgmr.msrb.gmra.mxu3 %vm249_vm1, %v2591_v20 }
 0x12f   : > { %1821 = vmatmul.msk.f32.vlgmr.msrb.gmra.mxu1 %vm249_vm1, %v2666_v36 }
 0x131   : > { %1825 = vmatmul.msk.f32.vlgmr.msrb.gmra.mxu2 %vm249_vm1, %v2666_v36  ;;  %v378_v40 = vpop.f32.mrf.mxu3 }
 0x132   : > { %v379_v41 = vadd.f32 %v378_v40, %v2597_v11  ;;  %v410_v10 = vpop.f32.mrf.mxu0 }
 0x133   : > { %v2686_v42 = vadd.f32 %v410_v10, %v2602_v19  ;;  %v2704_v19 = vld [vmem:[%s2866_s1 + $0xf0] sm:$0xff] }
 0x134   : > { %v527_v1 = vpop.f32.mrf.mxu2  ;;  %v439_v43 = vpop.f32.mrf.mxu1 }
 0x135   : > { %v597_v44 = vadd.f32 %v527_v1, %v379_v41  ;;  %v440_v9 = vadd.f32 %v439_v43, %v2623_v54  ;;  %1814 = vmatmul.msk.f32.gmra.mxu0 %vm249_vm1, %v2610_v49 }
 0x136   : > { %1810 = vmatmul.msk.f32.gmra.mxu3 %vm249_vm1, %v2610_v49 }
 0x137   : > { %1822 = vmatmul.msk.f32.gmra.mxu1 %vm249_vm1, %v2683_v14 }
 0x139   : > { %1826 = vmatmul.msk.f32.gmra.mxu2 %vm249_vm1, %v2683_v14  ;;  %v381_v20 = vpop.f32.mrf.mxu3 }
 0x13a   : > { %v382_v11 = vadd.f32 %v381_v20, %v2616_v50  ;;  %v413_v47 = vpop.f32.mrf.mxu0 }
 0x13b   : > { %v2707_v26 = vadd.f32 %v413_v47, %v2621_v22 }
 0x13c   : > { %v530_v7 = vpop.f32.mrf.mxu2  ;;  %v442_v48 = vpop.f32.mrf.mxu1 }
 0x13d   : > { %v600_v49 = vadd.f32 %v530_v7, %v382_v11  ;;  %v443_v50 = vadd.f32 %v442_v48, %v2644_v21  ;;  %1815 = vmatmul.msk.f32.gmra.mxu0 %vm249_vm1, %v2629_v57  ;;  %v1578_v21 = vld [vmem:[%s2867_s2 + $0x18] sm:$0xff] }
 0x13e   : > { %1811 = vmatmul.msk.f32.gmra.mxu3 %vm249_vm1, %v2629_v57  ;;  %1608 = vperm.xlu1 %2122, %v1578_v21  }
 0x13f   : > { %1823 = vmatmul.msk.f32.gmra.mxu1 %vm249_vm1, %v2704_v19 }
 0x141   : > { %1827 = vmatmul.msk.f32.gmra.mxu2 %vm249_vm1, %v2704_v19  ;;  %v384_v51 = vpop.f32.mrf.mxu3 }
 0x142   : > { %v385_v52 = vadd.f32 %v384_v51, %v2636_v62  ;;  %v416_v22 = vpop.f32.mrf.mxu0  ;;  %v1833_v62 = vld [vmem:[%s2866_s1 + $0x100] sm:$0xff] }
 0x143   : > { %v2726_v56 = vadd.f32 %v416_v22, %v2642_v17 }
 0x144   : > { %v533_v54 = vpop.f32.mrf.mxu2  ;;  %v445_v57 = vpop.f32.mrf.mxu1 }
 0x145   : > { %v603_v58 = vadd.f32 %v533_v54, %v385_v52  ;;  %v446_v13 = vadd.f32 %v445_v57, %v346_v34  ;;  %1816 = vmatmul.msk.f32.gmra.mxu0 %vm249_vm1, %v2650_v4 }
 0x146   : > { %1812 = vmatmul.msk.f32.gmra.mxu3 %vm249_vm1, %v2650_v4 }
 0x147   : > { %1824 = vmatmul.msk.f32.gmra.mxu1 %vm249_vm1, %v1820_v55 }
 0x149   : > { %1828 = vmatmul.msk.f32.gmra.mxu2 %vm249_vm1, %v1820_v55  ;;  %v387_v59 = vpop.f32.mrf.mxu3 }
 0x14a   : > { %v388_v18 = vadd.f32 %v387_v59, %v2658_v2  ;;  %v585_v61 = vpop.f32.mrf.mxu0 }
 0x14b   : > { %v599_v3 = vadd.f32 %v585_v61, %v437_v38 }
 0x14c   : > { %v536_v60 = vpop.f32.mrf.mxu2  ;;  %v688_v5 = vpop.f32.mrf.mxu1 }
 0x14d   : > { %v606_v63 = vadd.f32 %v536_v60, %v388_v18  ;;  %v758_v25 = vadd.f32 %v688_v5, %v597_v44  ;;  %1837 = vmatmul.msk.f32.vlgmr.msra.gmra.mxu0 %vm249_vm1, %v1833_v62 }
 0x14e   : > { %1829 = vmatmul.msk.f32.vlgmr.msra.gmra.mxu3 %vm249_vm1, %v2666_v36 }
 0x14f   : > { %1841 = vmatmul.msk.f32.vlgmr.msra.gmra.mxu1 %vm249_vm1, %v1833_v62 }
 0x151   : > { %1845 = vmatmul.msk.f32.vlgmr.msra.gmra.mxu2 %vm249_vm1, %v1833_v62  ;;  %v556_v16 = vpop.f32.mrf.mxu3 }
 0x152   : > { %v598_v17 = vadd.f32 %v556_v16, %v2668_v37  ;;  %v588_v0 = vpop.f32.mrf.mxu0  ;;  %v1577_v37 = vld [vmem:[%s2867_s2 + $0x10] sm:$0xff] }
 0x153   : > { %v602_v24 = vadd.f32 %v588_v0, %v440_v9  ;;  %1603 = vperm.xlu2 %2123, %v1577_v37  }
 0x154   : > { %v717_v4 = vpop.f32.mrf.mxu2  ;;  %v691_v28 = vpop.f32.mrf.mxu1 }
 0x155   : > { %v759_v8 = vadd.f32 %v717_v4, %v598_v17  ;;  %v761_v29 = vadd.f32 %v691_v28, %v600_v49  ;;  %1838 = vmatmul.msk.f32.gmra.mxu0 %vm249_vm1, %v1834_v23 }
 0x156   : > { %1830 = vmatmul.msk.f32.gmra.mxu3 %vm249_vm1, %v2683_v14 }
 0x157   : > { %1842 = vmatmul.msk.f32.gmra.mxu1 %vm249_vm1, %v1834_v23 }
 0x159   : > { %1846 = vmatmul.msk.f32.gmra.mxu2 %vm249_vm1, %v1834_v23  ;;  %v559_v12 = vpop.f32.mrf.mxu3 }
 0x15a   : > { %v601_v30 = vadd.f32 %v559_v12, %v2686_v42  ;;  %v591_v31 = vpop.f32.mrf.mxu0 }
 0x15b   : > { %v605_v27 = vadd.f32 %v591_v31, %v443_v50 }
 0x15c   : > { %v720_v2 = vpop.f32.mrf.mxu2  ;;  %v694_v33 = vpop.f32.mrf.mxu1 }
 0x15d   : > { %v762_v6 = vadd.f32 %v720_v2, %v601_v30  ;;  %v764_v34 = vadd.f32 %v694_v33, %v603_v58  ;;  %1839 = vmatmul.msk.f32.gmra.mxu0 %vm249_vm1, %v1835_v32 }
 0x15e   : > { %1831 = vmatmul.msk.f32.gmra.mxu3 %vm249_vm1, %v2704_v19 }
 0x15f   : > { %1843 = vmatmul.msk.f32.gmra.mxu1 %vm249_vm1, %v1835_v32 }
 0x161   : > { %1847 = vmatmul.msk.f32.gmra.mxu2 %vm249_vm1, %v1835_v32  ;;  %v562_v35 = vpop.f32.mrf.mxu3 }
 0x162   : > { %v604_v36 = vadd.f32 %v562_v35, %v2707_v26  ;;  %v594_v15 = vpop.f32.mrf.mxu0 }
 0x163   : > { %v608_v40 = vadd.f32 %v594_v15, %v446_v13 }
 0x164   : > { %v723_v38 = vpop.f32.mrf.mxu2  ;;  %v697_v41 = vpop.f32.mrf.mxu1 }
 0x165   : > { %v765_v10 = vadd.f32 %v723_v38, %v604_v36  ;;  %v767_v1 = vadd.f32 %v697_v41, %v606_v63  ;;  %1840 = vmatmul.msk.f32.gmra.mxu0 %vm249_vm1, %v1836_v39 }
 0x166   : > { %1832 = vmatmul.msk.f32.gmra.mxu3 %vm249_vm1, %v1820_v55 }
 0x167   : > { %1844 = vmatmul.msk.f32.gmra.mxu1 %vm249_vm1, %v1836_v39 }
 0x169   : > { %1848 = vmatmul.msk.f32.gmra.mxu2 %vm249_vm1, %v1836_v39  ;;  %v565_v14 = vpop.f32.mrf.mxu3 }
 0x16a   : > { %v607_v42 = vadd.f32 %v565_v14, %v2726_v56  ;;  %v849_v44 = vpop.f32.mrf.mxu0 }
 0x16b   : > { %v2776_v20 = vadd.f32 %v849_v44, %v758_v25 }
 0x16c   : > { %v726_v43 = vpop.f32.mrf.mxu2  ;;  %v878_v11 = vpop.f32.mrf.mxu1 }
 0x16d   : > { %v768_v9 = vadd.f32 %v726_v43, %v607_v42  ;;  %v2778_v45 = vadd.f32 %v878_v11, %v759_v8 }
 0x171   : > { %v746_v46 = vpop.f32.mrf.mxu3 }
 0x172   : > { %v760_v47 = vadd.f32 %v746_v46, %v599_v3  ;;  %v852_v7 = vpop.f32.mrf.mxu0 }
 0x173   : > { %v2780_v26 = vadd.f32 %v852_v7, %v761_v29 }
 0x174   : > { %v907_v19 = vpop.f32.mrf.mxu2  ;;  %v881_v48 = vpop.f32.mrf.mxu1 }
 0x175   : > { %v921_v49 = vadd.f32 %v907_v19, %v760_v47  ;;  %v2782_v50 = vadd.f32 %v881_v48, %v762_v6 }
 0x179   : > { %v749_v51 = vpop.f32.mrf.mxu3 }
 0x17a   : > { %v763_v52 = vadd.f32 %v749_v51, %v602_v24  ;;  %v855_v53 = vpop.f32.mrf.mxu0 }
 0x17b   : > { %v2784_v54 = vadd.f32 %v855_v53, %v764_v34 }
 0x17c   : > { %v910_v22 = vpop.f32.mrf.mxu2  ;;  %v884_v55 = vpop.f32.mrf.mxu1 }
 0x17d   : > { %v924_v56 = vadd.f32 %v910_v22, %v763_v52  ;;  %v2786_v57 = vadd.f32 %v884_v55, %v765_v10 }
 0x181   : > { %v752_v58 = vpop.f32.mrf.mxu3 }
 0x182   : > { %v766_v13 = vadd.f32 %v752_v58, %v605_v27  ;;  %v858_v59 = vpop.f32.mrf.mxu0 }
 0x183   : > { %v2788_v60 = vadd.f32 %v858_v59, %v767_v1 }
 0x184   : > { %v913_v18 = vpop.f32.mrf.mxu2  ;;  %v887_v61 = vpop.f32.mrf.mxu1 }
 0x185   : > { %v927_v62 = vadd.f32 %v913_v18, %v766_v13  ;;  %v2790_v63 = vadd.f32 %v887_v61, %v768_v9 }
 0x189   : > { %v755_v3 = vpop.f32.mrf.mxu3 }
 0x18a   : > { %v769_v5 = vadd.f32 %v755_v3, %v608_v40  ;;  %v1039_v16 = vpop.f32.mrf.mxu0 }
 0x18b   : > { %v1081_v47 = vadd.f32 %v1039_v16, %v2778_v45 }
 0x18c   : > { %v916_v25 = vpop.f32.mrf.mxu2  ;;  %v1068_v21 = vpop.f32.mrf.mxu1 }
 0x18d   : > { %v930_v17 = vadd.f32 %v916_v25, %v769_v5  ;;  %v1082_v0 = vadd.f32 %v1068_v21, %v921_v49  ;;  %v1594_v51 = vpop.permute.xlu0 %1593 }
 0x191   : > { %v1010_v4 = vpop.f32.mrf.mxu3 }
 0x192   : > { %v1042_v23 = vpop.f32.mrf.mxu0  ;;  %v1080_v11 = vadd.f32 %v1010_v4, %v2776_v20  ;;  %v1599_v16 = vpop.permute.xlu1 %1598 }
 0x193   : > { %v1084_v20 = vadd.f32 %v1042_v23, %v2782_v50 }
 0x194   : > { %v1171_v24 = vpop.f32.mrf.mxu2  ;;  %v1071_v28 = vpop.f32.mrf.mxu1 }
 0x195   : > { %v2792_v8 = vadd.f32 %v1071_v28, %v924_v56  ;;  %v1241_v19 = vadd.f32 %v1171_v24, %v1080_v11 }
 0x199   : > { %v1013_v29 = vpop.f32.mrf.mxu3 }
 0x19a   : > { %v2794_v12 = vpop.f32.mrf.mxu0  ;;  %v1083_v55 = vadd.f32 %v1013_v29, %v2780_v26 }
 0x19b   : > { %v1087_v29 = vadd.f32 %v2794_v12, %v2786_v57 }
 0x19c   : > { %v1174_v30 = vpop.f32.mrf.mxu2  ;;  %v1074_v31 = vpop.f32.mrf.mxu1 }
 0x19d   : > { %v2796_v2 = vadd.f32 %v1074_v31, %v927_v62  ;;  %v1244_v26 = vadd.f32 %v1174_v30, %v1083_v55 }
 0x1a1   : > { %v1016_v32 = vpop.f32.mrf.mxu3 }
 0x1a2   : > { %v2798_v27 = vpop.f32.mrf.mxu0  ;;  %v1086_v23 = vadd.f32 %v1016_v32, %v2784_v54 }
 0x1a4   : > { %v2800_v33 = vpop.f32.mrf.mxu2  ;;  %v1077_v6 = vpop.f32.mrf.mxu1 }
 0x1a5   : > { %v2802_v34 = vadd.f32 %v1077_v6, %v930_v17  ;;  %v1247_v54 = vadd.f32 %v2800_v33, %v1086_v23 }
 0x1a9   : > { %v2804_v35 = vpop.f32.mrf.mxu3 }
 0x1aa   : > { %v1229_v37 = vpop.f32.mrf.mxu0 }
 0x1ab   : > { %v1243_v59 = vadd.f32 %v1229_v37, %v1082_v0 }
 0x1ac   : > { %v2806_v36 = vpop.f32.mrf.mxu2  ;;  %v1332_v15 = vpop.f32.mrf.mxu1 }
 0x1ad   : > { %v1402_v49 = vadd.f32 %v1332_v15, %v1241_v19  ;;  %v1090_v19 = vadd.f32 %v2798_v27, %v2790_v63 }
 0x1b1   : > { %v1200_v38 = vpop.f32.mrf.mxu3 }
 0x1b2   : > { %v1232_v39 = vpop.f32.mrf.mxu0  ;;  %v1242_v7 = vadd.f32 %v1200_v38, %v1081_v47 }
 0x1b3   : > { %v1246_v37 = vadd.f32 %v1232_v39, %v2792_v8  ;;  %v1089_v8 = vadd.f32 %v2804_v35, %v2788_v60 }
 0x1b4   : > { %v1361_v40 = vpop.f32.mrf.mxu2  ;;  %v1335_v41 = vpop.f32.mrf.mxu1 }
 0x1b5   : > { %v1403_v52 = vadd.f32 %v1361_v40, %v1242_v7  ;;  %v1405_v25 = vadd.f32 %v1335_v41, %v1244_v26  ;;  %v1250_v35 = vadd.f32 %v2806_v36, %v1089_v8 }
 0x1b9   : > { %v1203_v10 = vpop.f32.mrf.mxu3 }
 0x1ba   : > { %v2808_v1 = vpop.f32.mrf.mxu0  ;;  %v1245_v18 = vadd.f32 %v1203_v10, %v1084_v20  ;;  %v1609_v20 = vpop.permute.xlu1 %1608 }
 0x1bc   : > { %v1364_v14 = vpop.f32.mrf.mxu2  ;;  %v1338_v42 = vpop.f32.mrf.mxu1 }
 0x1bd   : > { %v1406_v17 = vadd.f32 %v1364_v14, %v1245_v18  ;;  %v1408_v10 = vadd.f32 %v1338_v42, %v1247_v54  ;;  %v1604_v14 = vpop.permute.xlu2 %1603 }
 0x1c1   : > { %v1206_v43 = vpop.f32.mrf.mxu3 }
 0x1c2   : > { %v2810_v44 = vpop.f32.mrf.mxu0  ;;  %v1248_v15 = vadd.f32 %v1206_v43, %v1087_v29 }
 0x1c4   : > { %v1367_v9 = vpop.f32.mrf.mxu2  ;;  %v2813_v46 = vpop.f32.mrf.mxu1 }
 0x1c5   : > { %v1409_v11 = vadd.f32 %v1367_v9, %v1248_v15  ;;  %v1249_v9 = vadd.f32 %v2808_v1, %v2796_v2 }
 0x1c9   : > { %v2816_v48 = vpop.f32.mrf.mxu3 }
 0x1ca   : > { %v1493_v22 = vpop.f32.mrf.mxu0 }
 0x1cb   : > { %v1563_v56 = vadd.f32 %v1493_v22, %v1402_v49 }
 0x1cc   : > { %v2818_v53 = vpop.f32.mrf.mxu2  ;;  %v1522_v58 = vpop.f32.mrf.mxu1 }
 0x1cd   : > { %v1564_v13 = vadd.f32 %v1522_v58, %v1403_v52  ;;  %vm1579_vm9 = vcmp.gt.f32.partialorder %v1563_v56, 0.0  ;;  %v1611_v45 = vmul.f32 %v1594_v51, %v1563_v56  ;;  %v1251_v52 = vadd.f32 %v2816_v48, %v1090_v19 }
 0x1ce   : > { %v1411_v58 = vadd.f32 %v2813_v46, %v1250_v35  ;;  %v1252_v46 = vadd.f32 %v2810_v44, %v2802_v34 }
 0x1cf   : > { %vm1580_vm10 = vcmp.gt.f32.partialorder %v1564_v13, 0.0  ;;  %v1612_v61 = vmul.f32 %v1594_v51, %v1564_v13  ;;  %v1623_v62 = vsel %vm1579_vm9, %v1563_v56, %v1611_v45 }
 0x1d0   : > { %1635 = vst [vmem:[%s2827_s9] sm:$0xff] %v1623_v62 }
 0x1d1   : > { %v1390_v3 = vpop.f32.mrf.mxu3  ;;  %v1624_v5 = vsel %vm1580_vm10, %v1564_v13, %v1612_v61  ;;  %v1412_v13 = vadd.f32 %v2818_v53, %v1251_v52 }
 0x1d2   : > { %v1404_v50 = vadd.f32 %v1390_v3, %v1243_v59  ;;  %1636 = vst [vmem:[%s2827_s9 + $0x8] sm:$0xff] %v1624_v5  ;;  %v1496_v21 = vpop.f32.mrf.mxu0 }
 0x1d3   : > { %v1566_v24 = vadd.f32 %v1496_v21, %v1405_v25 }
 0x1d4   : > { %v1551_v4 = vpop.f32.mrf.mxu2  ;;  %v1525_v28 = vpop.f32.mrf.mxu1 }
 0x1d5   : > { %v1565_v0 = vadd.f32 %v1551_v4, %v1404_v50  ;;  %v1567_v30 = vadd.f32 %v1525_v28, %v1406_v17  ;;  %vm1582_vm11 = vcmp.gt.f32.partialorder %v1566_v24, 0.0  ;;  %v1614_v6 = vmul.f32 %v1599_v16, %v1566_v24 }
 0x1d7   : > { %vm1581_vm12 = vcmp.gt.f32.partialorder %v1565_v0, 0.0  ;;  %v1613_v31 = vmul.f32 %v1594_v51, %v1565_v0  ;;  %vm1583_vm13 = vcmp.gt.f32.partialorder %v1567_v30, 0.0  ;;  %v1615_v38 = vmul.f32 %v1599_v16, %v1567_v30 }
 0x1d8   : > { %v1626_v40 = vsel %vm1582_vm11, %v1566_v24, %v1614_v6 }
 0x1d9   : > { %v1625_v32 = vsel %vm1581_vm12, %v1565_v0, %v1613_v31  ;;  %v1393_v41 = vpop.f32.mrf.mxu3  ;;  %v1627_v57 = vsel %vm1583_vm13, %v1567_v30, %v1615_v38  ;;  %1638 = vst [vmem:[%s2827_s9 + $0x18] sm:$0xff] %v1626_v40 }
 0x1da   : > { %1637 = vst.msk [vmem:[%s2827_s9 + $0x10] sm:$0xff] %vm249_vm1, %v1625_v32  ;;  %v1407_v12 = vadd.f32 %v1393_v41, %v1246_v37  ;;  %v1499_v47 = vpop.f32.mrf.mxu0 }
 0x1db   : > { %1639 = vst [vmem:[%s2827_s9 + $0x20] sm:$0xff] %v1627_v57  ;;  %v1569_v39 = vadd.f32 %v1499_v47, %v1408_v10 }
 0x1dc   : > { %v1554_v7 = vpop.f32.mrf.mxu2  ;;  %v1528_v43 = vpop.f32.mrf.mxu1 }
 0x1dd   : > { %v1568_v33 = vadd.f32 %v1554_v7, %v1407_v12  ;;  %v1570_v49 = vadd.f32 %v1528_v43, %v1409_v11  ;;  %vm1585_vm14 = vcmp.gt.f32.partialorder %v1569_v39, 0.0  ;;  %v1617_v51 = vmul.f32 %v1604_v14, %v1569_v39 }
 0x1df   : > { %vm1584_vm15 = vcmp.gt.f32.partialorder %v1568_v33, 0.0  ;;  %v1616_v42 = vmul.f32 %v1599_v16, %v1568_v33  ;;  %vm1586_vm0 = vcmp.gt.f32.partialorder %v1570_v49, 0.0  ;;  %v1618_v60 = vmul.f32 %v1604_v14, %v1570_v49 }
 0x1e0   : > { %v1629_v55 = vsel %vm1585_vm14, %v1569_v39, %v1617_v51 }
 0x1e1   : > { %v1628_v22 = vsel %vm1584_vm15, %v1568_v33, %v1616_v42  ;;  %v1396_v56 = vpop.f32.mrf.mxu3  ;;  %v1630_v63 = vsel %vm1586_vm0, %v1570_v49, %v1618_v60  ;;  %1641 = vst [vmem:[%s2827_s9 + $0x30] sm:$0xff] %v1629_v55 }
 0x1e2   : > { %1640 = vst.msk [vmem:[%s2827_s9 + $0x28] sm:$0xff] %vm249_vm1, %v1628_v22  ;;  %v1410_v27 = vadd.f32 %v1396_v56, %v1249_v9  ;;  %v1502_v2 = vpop.f32.mrf.mxu0 }
 0x1e3   : > { %1642 = vst [vmem:[%s2827_s9 + $0x38] sm:$0xff] %v1630_v63  ;;  %v1572_v48 = vadd.f32 %v1502_v2, %v1411_v58 }
 0x1e4   : > { %v1557_v1 = vpop.f32.mrf.mxu2  ;;  %v1531_v45 = vpop.f32.mrf.mxu1 }
 0x1e5   : > { %v1571_v36 = vadd.f32 %v1557_v1, %v1410_v27  ;;  %v1573_v59 = vadd.f32 %v1531_v45, %v1412_v13  ;;  %vm1588_vm2 = vcmp.gt.f32.partialorder %v1572_v48, 0.0  ;;  %v1620_v61 = vmul.f32 %v1609_v20, %v1572_v48 }
 0x1e7   : > { %vm1587_vm3 = vcmp.gt.f32.partialorder %v1571_v36, 0.0  ;;  %v1619_v18 = vmul.f32 %v1604_v14, %v1571_v36  ;;  %vm1589_vm4 = vcmp.gt.f32.partialorder %v1573_v59, 0.0  ;;  %v1621_v53 = vmul.f32 %v1609_v20, %v1573_v59 }
 0x1e8   : > { %v1632_v62 = vsel %vm1588_vm2, %v1572_v48, %v1620_v61 }
 0x1e9   : > { %v1631_v26 = vsel %vm1587_vm3, %v1571_v36, %v1619_v18  ;;  %v1399_v3 = vpop.f32.mrf.mxu3  ;;  %v1633_v5 = vsel %vm1589_vm4, %v1573_v59, %v1621_v53  ;;  %1644 = vst [vmem:[%s2827_s9 + $0x48] sm:$0xff] %v1632_v62 }
 0x1ea   : > { %1643 = vst.msk [vmem:[%s2827_s9 + $0x40] sm:$0xff] %vm249_vm1, %v1631_v26  ;;  %v1413_v50 = vadd.f32 %v1399_v3, %v1252_v46 }
 0x1eb   : > { %1645 = vst [vmem:[%s2827_s9 + $0x50] sm:$0xff] %v1633_v5 }
 0x1ec   : > { %v1560_v25 = vpop.f32.mrf.mxu2 }
 0x1ed   : > { %v1574_v16 = vadd.f32 %v1560_v25, %v1413_v50 }
 0x1ef   : > { %vm1590_vm5 = vcmp.gt.f32.partialorder %v1574_v16, 0.0  ;;  %v1622_v17 = vmul.f32 %v1609_v20, %v1574_v16 }
 0x1f1   : > { %v1634_v21 = vsel %vm1590_vm5, %v1574_v16, %v1622_v17 }
 0x1f2   : > { %1646 = vst.msk [vmem:[%s2827_s9 + $0x58] sm:$0xff] %vm249_vm1, %v1634_v21 }
 0x1f3 PF: > { %s13_s12 = sadd.s32 1, %s2130_s12  }
 0x1f4   : > { %p10_p4 = scmp.ge.s32.totalorder %s13_s12, 4  }
 0x1f6   :  { %12 = sbr.rel (!%p10_p4) target bundleno = 1 (0x1), region = 70 }

// kernel: encode_forward.8
= control target key start
LH: loop header
LB: loop body
LE: loop exit
PB: predicated region body
PF: predicated region fallthrough
CT: control target
= control target key end

     0   :  { %s1390_s12 = smov 0   ;;  %s1839_s0 = inlined_call_operand.vmem [shape: f32[2,4,32,128], index: 0, kind: input, shape index: {}]   ;;  %s1840_s1 = inlined_call_operand.vmem [shape: f32[9,64,32], index: 1, kind: input, shape index: {}]   ;;  %s1841_s2 = inlined_call_operand.vmem [shape: f32[64,1], index: 2, kind: input, shape index: {}]   ;;  %s1842_s3 = inlined_call_operand.vmem [shape: f32[2,64,72], index: 3, kind: output, shape index: {}]  }
   0x1 LB: > { %s1120_s13 = sadd.s32 4294967295, %s1364_s12   ;;  %p1124_p0 = scmp.ge.s32.totalorder %s1364_s12, 1  ;;  %s1364_s12 = sphi %s1390_s12, %s13_s12  }
   0x2   : > { %p137_p1 = scmp.lt.s32.totalorder %s1364_s12, 3 }
   0x4   : > { %p138_p2 = pnand %p1124_p0, %p137_p1 }
   0x5   : > { %p161_p3 = scmp.lt.s32.totalorder (!%p138_p2), %s1120_s13, 1  ;;  %s1366_s18 = smov (!%p138_p2), 127  }
   0x6   : > { %141 = sbr.rel (%p138_p2) target bundleno = 407 (0x197), region = 32  ;;  %s1367_s19 = smov (!%p138_p2), 119  }
   0x7   : > { %s1368_s24 = smov (!%p138_p2), 118  }
   0xb   : > { %s1844_s13 = smov (!%p161_p3, %s1120_s13), 1  ;;  %v1135_v12 = vld [vmem:[%s1840_s1 + $0x50] sm:$0xff]  ;;  %vm197_vm0 = vcmask 261120   ;;  %v1136_v18 = vld [vmem:[%s1840_s1 + $0x58] sm:$0xff]  ;;  %v175_v21 = vld [vmem:[%s1840_s1] sm:$0xff]  ;;  %vm1056_vm2 = vcmask 588800  }
   0xc   : > { %s1279_s14 = sshll.u32 %s1844_s13, 7  ;;  %v1137_v22 = vld [vmem:[%s1840_s1 + $0x60] sm:$0xff]  ;;  %v1139_v23 = vld [vmem:[%s1840_s1 + $0x70] sm:$0xff]  ;;  %v176_v24 = vld [vmem:[%s1840_s1 + $0x8] sm:$0xff]  ;;  %s1280_s5 = sshll.u32 %s1844_s13, 6 }
   0xd   : > { %s1404_s17 = scalar_lea.vmem %s1839_s0, %s1279_s14  ;;  %v177_v25 = vld [vmem:[%s1840_s1 + $0x10] sm:$0xff]  ;;  %v178_v26 = vld [vmem:[%s1840_s1 + $0x18] sm:$0xff]  ;;  %v179_v27 = vld [vmem:[%s1840_s1 + $0x20] sm:$0xff]  ;;  %s1795_s8 = scalar_lea.vmem %s1842_s3, %s1280_s5 }
   0xe   : > { %v173_v0 = vld [vmem:[%s1404_s17 + $0x10] sm:$0xff]  ;;  %v174_v1 = vld [vmem:[%s1404_s17 + $0x18] sm:$0xff]  ;;  %v171_v8 = vld [vmem:[%s1404_s17] sm:$0xff] }
   0xf   : > { %v1305_v2 = vpack.i.bf16 %v173_v0, %v174_v1  ;;  %v1132_v3 = vld [vmem:[%s1404_s17 + $0x38] sm:$0xff]  ;;  %v1175_v4 = vld [vmem:[%s1404_s17 + $0x50] sm:$0xff]  ;;  %v172_v9 = vld [vmem:[%s1404_s17 + $0x8] sm:$0xff] }
  0x10   : > { %v1176_v5 = vld [vmem:[%s1404_s17 + $0x58] sm:$0xff]  ;;  %1281 = vmatpush.msra.mxu1 %v1132_v3  ;;  %1282 = vmatpush.msra.mxu2 %v1132_v3  ;;  %v1131_v7 = vld [vmem:[%s1404_s17 + $0x30] sm:$0xff]  ;;  %v1130_v10 = vld [vmem:[%s1404_s17 + $0x28] sm:$0xff]  ;;  %v1310_v13 = vpack.i.bf16 %v171_v8, %v172_v9  ;;  %v1320_v14 = vpack.i.bf16 %v172_v9, %v1132_v3 }
  0x11   : > { %1306 = vrot.lane.b32.xlu0 %v1305_v2, %s1366_s18  ;;  %1316 = vrot.lane.b32.xlu1 %v1305_v2, %s1367_s19  ;;  %v1325_v6 = vpack.i.bf16 %v1175_v4, %v1176_v5  ;;  %v1129_v11 = vld [vmem:[%s1404_s17 + $0x20] sm:$0xff]  ;;  %v1330_v15 = vpack.i.bf16 %v171_v8, %v1131_v7  ;;  %v1174_v17 = vld [vmem:[%s1404_s17 + $0x48] sm:$0xff] }
  0x12   : > { %1284 = vmatpush.msra.mxu1 %v1131_v7  ;;  %1283 = vmatpush.msra.mxu3 %v1132_v3  ;;  %v1173_v16 = vld [vmem:[%s1404_s17 + $0x40] sm:$0xff]  ;;  %v1335_v20 = vpack.i.bf16 %v1129_v11, %v1130_v10  ;;  %v180_v28 = vld [vmem:[%s1840_s1 + $0x28] sm:$0xff]  ;;  %v1140_v31 = vld [vmem:[%s1840_s1 + $0x78] sm:$0xff] }
  0x13   : > { %1326 = vrot.lane.b32.xlu2 %v1325_v6, %s1366_s18  ;;  %1285 = vmatpush.msra.mxu2 %v1131_v7  ;;  %v1340_v19 = vpack.i.bf16 %v1173_v16, %v1174_v17  ;;  %v1138_v29 = vld [vmem:[%s1840_s1 + $0x68] sm:$0xff]  ;;  %v1133_v30 = vld [vmem:[%s1840_s1 + $0x40] sm:$0xff]  ;;  %v181_v32 = vld [vmem:[%s1840_s1 + $0x30] sm:$0xff] }
  0x14   : > { %1287 = vmatpush.msra.mxu1 %v1130_v10  ;;  %1286 = vmatpush.msra.mxu3 %v1131_v7  ;;  %v1196_v36 = vld [vmem:[%s1404_s17 + $0x78] sm:$0xff]  ;;  %v1134_v38 = vld [vmem:[%s1840_s1 + $0x48] sm:$0xff]  ;;  %v1177_v39 = vld [vmem:[%s1840_s1 + $0xc0] sm:$0xff] }
  0x15   : > { %1288 = vmatpush.msra.mxu2 %v1130_v10  ;;  %234 = vmatpush.msra.mxu0 %v1132_v3  ;;  %v182_v37 = vld [vmem:[%s1840_s1 + $0x38] sm:$0xff]  ;;  %v1195_v40 = vld [vmem:[%s1404_s17 + $0x70] sm:$0xff]  ;;  %v1194_v42 = vld [vmem:[%s1404_s17 + $0x68] sm:$0xff] }
  0x16   : > { %1290 = vmatpush.msra.mxu1 %v1129_v11  ;;  %1289 = vmatpush.msra.mxu3 %v1130_v10  ;;  %v1193_v43 = vld [vmem:[%s1404_s17 + $0x60] sm:$0xff]  ;;  %v1178_v44 = vld [vmem:[%s1840_s1 + $0xc8] sm:$0xff]  ;;  %v1179_v49 = vld [vmem:[%s1840_s1 + $0xd0] sm:$0xff] }
  0x17   : > { %1143 = vmatmul.msk.f32.vlgmr.msra.gmra.mxu1 %vm197_vm0, %v1135_v12  ;;  %1291 = vmatpush.msra.mxu2 %v1129_v11  ;;  %v1197_v45 = vld [vmem:[%s1840_s1 + $0x100] sm:$0xff]  ;;  %v1198_v50 = vld [vmem:[%s1840_s1 + $0x108] sm:$0xff]  ;;  %v1180_v55 = vld [vmem:[%s1840_s1 + $0xd8] sm:$0xff] }
  0x18   : > { %299 = vmatpush.msrb.mxu1 %v174_v1  ;;  %1292 = vmatpush.msra.mxu3 %v1129_v11  ;;  %v1199_v56 = vld [vmem:[%s1840_s1 + $0x110] sm:$0xff]  ;;  %v1200_v3 = vld [vmem:[%s1840_s1 + $0x118] sm:$0xff]  ;;  %v1213_v12 = vld [vmem:[%s1840_s1 + $0x140] sm:$0xff] }
  0x19   : > { %1311 = vrot.lane.b32.xlu0 %v1310_v13, %s1366_s18  ;;  %1321 = vrot.lane.b32.xlu1 %v1320_v14, %s1367_s19  ;;  %v1182_v14 = vld [vmem:[%s1840_s1 + $0xe8] sm:$0xff] }
  0x1a   : > { %300 = vmatpush.msrb.mxu1 %v173_v0  ;;  %235 = vmatpush.msra.mxu0 %v1131_v7  ;;  %v1157_v0 = vld [vmem:[%s1840_s1 + $0x80] sm:$0xff] }
  0x1b   : > { %1331 = vrot.lane.b32.xlu2 %v1330_v15, %s1367_s19  ;;  %476 = vmatpush.msrb.mxu3 %v1176_v5  ;;  %v1201_v15 = vld [vmem:[%s1840_s1 + $0x120] sm:$0xff] }
  0x1c   : > { %301 = vmatpush.msrb.mxu1 %v172_v9  ;;  %236 = vmatpush.msra.mxu0 %v1130_v10 }
  0x1d   : > { %477 = vmatpush.msrb.mxu3 %v1175_v4  ;;  %1145 = vmatmul.msk.f32.vlgmr.msra.gmra.mxu2 %vm197_vm0, %v1137_v22  ;;  %v1202_v22 = vld [vmem:[%s1840_s1 + $0x128] sm:$0xff] }
  0x1e   : > { %302 = vmatpush.msrb.mxu1 %v171_v8  ;;  %237 = vmatpush.msra.mxu0 %v1129_v11  ;;  %v1158_v11 = vld [vmem:[%s1840_s1 + $0x88] sm:$0xff] }
  0x1f   : > { %1144 = vmatmul.msk.f32.gmra.mxu1 %vm197_vm0, %v1136_v18  ;;  %478 = vmatpush.msrb.mxu3 %v1174_v17 }
  0x20   : > { %1147 = vmatmul.msk.f32.vlgmr.msra.gmra.mxu3 %vm197_vm0, %v1139_v23  ;;  %1141 = vmatmul.msk.f32.vlgmr.msra.gmra.mxu0 %vm197_vm0, %v1133_v30  ;;  %v1160_v23 = vld [vmem:[%s1840_s1 + $0x98] sm:$0xff]  ;;  %v1245_v30 = vld [vmem:[%s1840_s1 + $0x1c0] sm:$0xff] }
  0x21   : > { %1341 = vrot.lane.b32.xlu1 %v1340_v19, %s1366_s18  ;;  %1336 = vrot.lane.b32.xlu0 %v1335_v20, %s1367_s19  ;;  %v1159_v19 = vld [vmem:[%s1840_s1 + $0x90] sm:$0xff]  ;;  %v1214_v20 = vld [vmem:[%s1840_s1 + $0x148] sm:$0xff] }
  0x22   : > { %479 = vmatpush.msrb.mxu3 %v1173_v16  ;;  %563 = vmatpush.msrb.mxu0 %v1196_v36  ;;  %v1218_v36 = vld [vmem:[%s1840_s1 + $0x168] sm:$0xff] }
  0x23   : > { %1346 = vrot.lane.b32.xlu2 %v1305_v2, %s1368_s24  ;;  %v1181_v2 = vld [vmem:[%s1840_s1 + $0xe0] sm:$0xff] }
  0x24   : > { %564 = vmatpush.msrb.mxu0 %v1195_v40  ;;  %v1369_v40 = vmov 0  }
  0x25   : > { %1146 = vmatmul.msk.f32.gmra.mxu2 %vm197_vm0, %v1138_v29  ;;  %v1204_v29 = vld [vmem:[%s1840_s1 + $0x138] sm:$0xff]  ;;  %1355 = vset.pattern.permute.xlu1 %v1369_v40 }
  0x26   : > { %565 = vmatpush.msrb.mxu0 %v1194_v42  ;;  %1357 = vset.pattern.permute.xlu0 %v1369_v40  ;;  %v1219_v42 = vld [vmem:[%s1840_s1 + $0x170] sm:$0xff] }
  0x27   : > { %1149 = vmatmul.msk.f32.vlgmr.msrb.gmra.mxu1 %vm197_vm0, %v175_v21  ;;  %v1183_v21 = vld [vmem:[%s1840_s1 + $0xf0] sm:$0xff]  ;;  %1356 = vset.pattern.permute.xlu2 %v1369_v40 }
  0x28   : > { %1148 = vmatmul.msk.f32.gmra.mxu3 %vm197_vm0, %v1140_v31  ;;  %1142 = vmatmul.msk.f32.gmra.mxu0 %vm197_vm0, %v1134_v38  ;;  %v1162_v31 = vld [vmem:[%s1840_s1 + $0xa8] sm:$0xff] }
  0x29   : > { %1351 = vrot.lane.b32.xlu0 %v1310_v13, %s1368_s24  ;;  %566 = vmatpush.msrb.mxu0 %v1193_v43  ;;  %v1262_v38 = vld [vmem:[%s1840_s1 + $0x208] sm:$0xff]  ;;  %v1248_v43 = vld [vmem:[%s1840_s1 + $0x1d8] sm:$0xff] }
  0x2f   : > { %1150 = vmatmul.msk.f32.gmra.mxu1 %vm197_vm0, %v176_v24  ;;  %v1215_v24 = vld [vmem:[%s1840_s1 + $0x150] sm:$0xff] }
  0x30   : > { %1185 = vmatmul.msk.f32.vlgmr.msrb.gmra.mxu3 %vm197_vm0, %v1177_v39  ;;  %1205 = vmatmul.msk.f32.vlgmr.msrb.gmra.mxu0 %vm197_vm0, %v1197_v45  ;;  %v984_v39 = vld [vmem:[%s1841_s2] sm:$0xff] }
  0x31   : > { %1002 = vperm.xlu1 %1355, %v984_v39   ;;  %v1229_v45 = vld [vmem:[%s1840_s1 + $0x180] sm:$0xff] }
  0x37   : > { %1151 = vmatmul.msk.f32.gmra.mxu1 %vm197_vm0, %v177_v25  ;;  %v1184_v25 = vld [vmem:[%s1840_s1 + $0xf8] sm:$0xff] }
  0x38   : > { %1186 = vmatmul.msk.f32.gmra.mxu3 %vm197_vm0, %v1178_v44  ;;  %1206 = vmatmul.msk.f32.gmra.mxu0 %vm197_vm0, %v1198_v50  ;;  %v1263_v44 = vld [vmem:[%s1840_s1 + $0x210] sm:$0xff]  ;;  %v1230_v50 = vld [vmem:[%s1840_s1 + $0x188] sm:$0xff] }
  0x3f   : > { %1152 = vmatmul.msk.f32.gmra.mxu1 %vm197_vm0, %v178_v26  ;;  %v1203_v26 = vld [vmem:[%s1840_s1 + $0x130] sm:$0xff] }
  0x40   : > { %1187 = vmatmul.msk.f32.gmra.mxu3 %vm197_vm0, %v1179_v49  ;;  %1207 = vmatmul.msk.f32.gmra.mxu0 %vm197_vm0, %v1199_v56  ;;  %v986_v49 = vld [vmem:[%s1841_s2 + $0x10] sm:$0xff] }
  0x41   : > { %1012 = vperm.xlu0 %1357, %v986_v49   ;;  %v1251_v56 = vld [vmem:[%s1840_s1 + $0x1f0] sm:$0xff] }
  0x47   : > { %1153 = vmatmul.msk.f32.gmra.mxu1 %vm197_vm0, %v179_v27  ;;  %v1161_v27 = vld [vmem:[%s1840_s1 + $0xa0] sm:$0xff] }
  0x48   : > { %1188 = vmatmul.msk.f32.gmra.mxu3 %vm197_vm0, %v1180_v55  ;;  %1208 = vmatmul.msk.f32.gmra.mxu0 %vm197_vm0, %v1200_v3  ;;  %v1233_v3 = vld [vmem:[%s1840_s1 + $0x1a0] sm:$0xff] }
  0x4f   : > { %1154 = vmatmul.msk.f32.gmra.mxu1 %vm197_vm0, %v180_v28  ;;  %v1216_v28 = vld [vmem:[%s1840_s1 + $0x158] sm:$0xff] }
  0x50   : > { %1189 = vmatmul.msk.f32.gmra.mxu3 %vm197_vm0, %v1181_v2  ;;  %1209 = vmatmul.msk.f32.gmra.mxu0 %vm197_vm0, %v1201_v15 }
  0x57   : > { %1155 = vmatmul.msk.f32.gmra.mxu1 %vm197_vm0, %v181_v32  ;;  %v1217_v32 = vld [vmem:[%s1840_s1 + $0x160] sm:$0xff] }
  0x58   : > { %1190 = vmatmul.msk.f32.gmra.mxu3 %vm197_vm0, %v1182_v14  ;;  %1210 = vmatmul.msk.f32.gmra.mxu0 %vm197_vm0, %v1202_v22 }
  0x5f   : > { %1156 = vmatmul.msk.f32.gmra.mxu1 %vm197_vm0, %v182_v37  ;;  %v1247_v37 = vld [vmem:[%s1840_s1 + $0x1d0] sm:$0xff] }
  0x60   : > { %1191 = vmatmul.msk.f32.gmra.mxu3 %vm197_vm0, %v1183_v21  ;;  %1211 = vmatmul.msk.f32.gmra.mxu0 %vm197_vm0, %v1203_v26 }
  0x68   : > { %1192 = vmatmul.msk.f32.gmra.mxu3 %vm197_vm0, %v1184_v25  ;;  %1212 = vmatmul.msk.f32.gmra.mxu0 %vm197_vm0, %v1204_v29 }
  0x6d   : > { %v1327_v33 = vpop.permute.xlu2 %1326 }
  0x6e   : > { %v1329_v34 = vunpack.i.h.bf16 %v1327_v33  ;;  %v1328_v35 = vunpack.i.l.bf16 %v1327_v33  ;;  %v1246_v33 = vld [vmem:[%s1840_s1 + $0x1c8] sm:$0xff] }
  0x70   : > { %661 = vmatpush.msra.mxu1 %v1328_v35  ;;  %v1163_v35 = vld [vmem:[%s1840_s1 + $0xb0] sm:$0xff] }
  0x72   : > { %662 = vmatpush.msra.mxu1 %v1329_v34  ;;  %v1261_v34 = vld [vmem:[%s1840_s1 + $0x200] sm:$0xff] }
  0x75   : > { %v1332_v41 = vpop.permute.xlu2 %1331 }
  0x76   : > { %v1333_v61 = vunpack.i.l.bf16 %v1332_v41  ;;  %v1334_v7 = vunpack.i.h.bf16 %v1332_v41  ;;  %v1164_v41 = vld [vmem:[%s1840_s1 + $0xb8] sm:$0xff] }
  0x7d   : > { %v1347_v46 = vpop.permute.xlu2 %1346 }
  0x7e   : > { %v1349_v47 = vunpack.i.h.bf16 %v1347_v46  ;;  %v1348_v48 = vunpack.i.l.bf16 %v1347_v46  ;;  %v1220_v46 = vld [vmem:[%s1840_s1 + $0x178] sm:$0xff] }
  0x80   : > { %947 = vmatpush.msra.mxu0 %v1348_v48  ;;  %v1264_v48 = vld [vmem:[%s1840_s1 + $0x218] sm:$0xff] }
  0x82   : > { %948 = vmatpush.msra.mxu0 %v1349_v47  ;;  %v1249_v47 = vld [vmem:[%s1840_s1 + $0x1e0] sm:$0xff] }
  0x83   : > { %v1307_v51 = vpop.permute.xlu0 %1306  ;;  %v1317_v52 = vpop.permute.xlu1 %1316 }
  0x84   : > { %v1308_v53 = vunpack.i.l.bf16 %v1307_v51  ;;  %v1309_v54 = vunpack.i.h.bf16 %v1307_v51  ;;  %v1318_v62 = vunpack.i.l.bf16 %v1317_v52  ;;  %v1319_v1 = vunpack.i.h.bf16 %v1317_v52  ;;  %v1250_v51 = vld [vmem:[%s1840_s1 + $0x1e8] sm:$0xff]  ;;  %v1265_v52 = vld [vmem:[%s1840_s1 + $0x220] sm:$0xff] }
  0x86   : > { %389 = vmatpush.msrb.mxu2 %v1308_v53  ;;  %v987_v53 = vld [vmem:[%s1841_s2 + $0x18] sm:$0xff] }
  0x87   : > { %1017 = vperm.xlu1 %1355, %v987_v53  }
  0x88   : > { %390 = vmatpush.msrb.mxu2 %v1309_v54  ;;  %v1231_v54 = vld [vmem:[%s1840_s1 + $0x190] sm:$0xff] }
  0x8b   : > { %v1312_v57 = vpop.permute.xlu0 %1311  ;;  %v1322_v58 = vpop.permute.xlu1 %1321 }
  0x8c   : > { %v1313_v59 = vunpack.i.l.bf16 %v1312_v57  ;;  %v1323_v60 = vunpack.i.l.bf16 %v1322_v58  ;;  %v1314_v63 = vunpack.i.h.bf16 %v1312_v57  ;;  %v1324_v4 = vunpack.i.h.bf16 %v1322_v58  ;;  %v1266_v57 = vld [vmem:[%s1840_s1 + $0x228] sm:$0xff] }
  0x8d   : > { %v985_v58 = vld [vmem:[%s1841_s2 + $0x8] sm:$0xff] }
  0x8e   : > { %391 = vmatpush.msrb.mxu2 %v1313_v59  ;;  %853 = vmatpush.msra.mxu3 %v1323_v60  ;;  %v1232_v60 = vld [vmem:[%s1840_s1 + $0x198] sm:$0xff] }
  0x8f   : > { %1007 = vperm.xlu2 %1356, %v985_v58  }
  0x90   : > { %392 = vmatpush.msrb.mxu2 %v1314_v63  ;;  %854 = vmatpush.msra.mxu3 %v1333_v61  ;;  %v1267_v63 = vld [vmem:[%s1840_s1 + $0x230] sm:$0xff] }
  0x91   : > { %1165 = vmatmul.msk.f32.vlgmr.msrb.gmra.mxu2 %vm197_vm0, %v1157_v0  ;;  %v989_v0 = vld [vmem:[%s1841_s2 + $0x28] sm:$0xff] }
  0x92   : > { %755 = vmatpush.msra.mxu2 %v1318_v62  ;;  %v1252_v62 = vld [vmem:[%s1840_s1 + $0x1f8] sm:$0xff]  ;;  %1027 = vperm.xlu1 %1355, %v989_v0  }
  0x93   : > { %v1342_v5 = vpop.permute.xlu1 %1341  ;;  %v1337_v6 = vpop.permute.xlu0 %1336 }
  0x94   : > { %756 = vmatpush.msra.mxu2 %v1319_v1  ;;  %v1344_v8 = vunpack.i.h.bf16 %v1342_v5  ;;  %v1343_v9 = vunpack.i.l.bf16 %v1342_v5  ;;  %v1338_v10 = vunpack.i.l.bf16 %v1337_v6  ;;  %v1339_v13 = vunpack.i.h.bf16 %v1337_v6  ;;  %v1686_v55 = vpop.f32.mrf.mxu1  ;;  %v1268_v5 = vld [vmem:[%s1840_s1 + $0x238] sm:$0xff] }
  0x96   : > { %757 = vmatpush.msra.mxu2 %v1324_v4  ;;  %663 = vmatpush.msra.mxu1 %v1343_v9  ;;  %v991_v9 = vld [vmem:[%s1841_s2 + $0x38] sm:$0xff] }
  0x97   : > { %855 = vmatpush.msra.mxu3 %v1338_v10  ;;  %1037 = vperm.xlu0 %1357, %v991_v9  }
  0x98   : > { %758 = vmatpush.msra.mxu2 %v1334_v7  ;;  %664 = vmatpush.msra.mxu1 %v1344_v8  ;;  %v1234_v7 = vld [vmem:[%s1840_s1 + $0x1a8] sm:$0xff] }
  0x99   : > { %1166 = vmatmul.msk.f32.gmra.mxu2 %vm197_vm0, %v1158_v11  ;;  %1221 = vmatmul.msk.f32.vlgmr.msra.gmra.mxu1 %vm197_vm0, %v1213_v12  ;;  %v1235_v12 = vld [vmem:[%s1840_s1 + $0x1b0] sm:$0xff] }
  0x9a   : > { %856 = vmatpush.msra.mxu3 %v1339_v13  ;;  %v988_v13 = vld [vmem:[%s1841_s2 + $0x20] sm:$0xff] }
  0x9b   : > { %v1352_v16 = vpop.permute.xlu0 %1351  ;;  %1253 = vmatmul.msk.f32.vlgmr.msra.gmra.mxu3 %vm197_vm0, %v1245_v30  ;;  %1022 = vperm.xlu2 %1356, %v988_v13  }
  0x9c   : > { %v1354_v17 = vunpack.i.h.bf16 %v1352_v16  ;;  %v1353_v18 = vunpack.i.l.bf16 %v1352_v16  ;;  %v1715_v1 = vpop.f32.mrf.mxu1 }
  0x9d   : > { %v239_v61 = vpop.f32.mrf.mxu0 }
  0x9e   : > { %949 = vmatpush.msra.mxu0 %v1353_v18  ;;  %v990_v18 = vld [vmem:[%s1841_s2 + $0x30] sm:$0xff] }
  0xa0   : > { %950 = vmatpush.msra.mxu0 %v1354_v17  ;;  %v1742_v14 = vpop.f32.mrf.mxu2  ;;  %v1236_v17 = vld [vmem:[%s1840_s1 + $0x1b8] sm:$0xff] }
  0xa1   : > { %1167 = vmatmul.msk.f32.gmra.mxu2 %vm197_vm0, %v1159_v19  ;;  %1222 = vmatmul.msk.f32.gmra.mxu1 %vm197_vm0, %v1214_v20 }
  0xa2   : > { %1269 = vmatmul.msk.f32.vlgmr.msra.gmra.mxu0 %vm197_vm0, %v1261_v34 }
  0xa3   : > { %1254 = vmatmul.msk.f32.gmra.mxu3 %vm197_vm0, %v1246_v33  ;;  %v1700_v59 = vpop.f32.mrf.mxu3  ;;  %1032 = vperm.xlu2 %1356, %v990_v18  }
  0xa4   : > { %v304_v6 = vpop.f32.mrf.mxu1 }
  0xa5   : > { %v242_v4 = vpop.f32.mrf.mxu0 }
  0xa8   : > { %v1752_v20 = vpop.f32.mrf.mxu2 }
  0xa9   : > { %1168 = vmatmul.msk.f32.gmra.mxu2 %vm197_vm0, %v1160_v23  ;;  %1223 = vmatmul.msk.f32.gmra.mxu1 %vm197_vm0, %v1215_v24 }
  0xaa   : > { %1270 = vmatmul.msk.f32.gmra.mxu0 %vm197_vm0, %v1262_v38 }
  0xab   : > { %1255 = vmatmul.msk.f32.gmra.mxu3 %vm197_vm0, %v1247_v37  ;;  %v1719_v2 = vpop.f32.mrf.mxu3 }
  0xac   : > { %v307_v11 = vpop.f32.mrf.mxu1 }
  0xad   : > { %v568_v10 = vpop.f32.mrf.mxu0 }
  0xb1   : > { %1169 = vmatmul.msk.f32.gmra.mxu2 %vm197_vm0, %v1161_v27  ;;  %1224 = vmatmul.msk.f32.gmra.mxu1 %vm197_vm0, %v1216_v28 }
  0xb2   : > { %1271 = vmatmul.msk.f32.gmra.mxu0 %vm197_vm0, %v1263_v44 }
  0xb3   : > { %1256 = vmatmul.msk.f32.gmra.mxu3 %vm197_vm0, %v1248_v43  ;;  %v481_v8 = vpop.f32.mrf.mxu3 }
  0xb4   : > { %v310_v19 = vpop.f32.mrf.mxu1 }
  0xb5   : > { %v571_v16 = vpop.f32.mrf.mxu0  ;;  %v311_v0 = vadd.f32 %v310_v19, %v1686_v55 }
  0xb9   : > { %1170 = vmatmul.msk.f32.gmra.mxu2 %vm197_vm0, %v1162_v31  ;;  %1225 = vmatmul.msk.f32.gmra.mxu1 %vm197_vm0, %v1217_v32 }
  0xba   : > { %1272 = vmatmul.msk.f32.gmra.mxu0 %vm197_vm0, %v1264_v48 }
  0xbb   : > { %1257 = vmatmul.msk.f32.gmra.mxu3 %vm197_vm0, %v1249_v47  ;;  %v484_v15 = vpop.f32.mrf.mxu3 }
  0xbc   : > { %v313_v23 = vpop.f32.mrf.mxu1 }
  0xbd   : > { %v574_v22 = vpop.f32.mrf.mxu0 }
  0xc1   : > { %1171 = vmatmul.msk.f32.gmra.mxu2 %vm197_vm0, %v1163_v35  ;;  %1226 = vmatmul.msk.f32.gmra.mxu1 %vm197_vm0, %v1218_v36 }
  0xc2   : > { %1273 = vmatmul.msk.f32.gmra.mxu0 %vm197_vm0, %v1265_v52 }
  0xc3   : > { %1258 = vmatmul.msk.f32.gmra.mxu3 %vm197_vm0, %v1250_v51  ;;  %v487_v21 = vpop.f32.mrf.mxu3  ;;  %v308_v51 = vadd.f32 %v307_v11, %v242_v4  ;;  %v1003_v4 = vpop.permute.xlu1 %1002 }
  0xc4   : > { %v1758_v27 = vpop.f32.mrf.mxu1 }
  0xc5   : > { %v1756_v26 = vpop.f32.mrf.mxu0 }
  0xc9   : > { %1172 = vmatmul.msk.f32.gmra.mxu2 %vm197_vm0, %v1164_v41  ;;  %1227 = vmatmul.msk.f32.gmra.mxu1 %vm197_vm0, %v1219_v42 }
  0xca   : > { %1274 = vmatmul.msk.f32.gmra.mxu0 %vm197_vm0, %v1266_v57 }
  0xcb   : > { %1259 = vmatmul.msk.f32.gmra.mxu3 %vm197_vm0, %v1251_v56  ;;  %v1754_v25 = vpop.f32.mrf.mxu3 }
  0xcc   : > { %v1764_v32 = vpop.f32.mrf.mxu1 }
  0xcd   : > { %v1762_v30 = vpop.f32.mrf.mxu0 }
  0xd1   : > { %1237 = vmatmul.msk.f32.vlgmr.msra.gmra.mxu2 %vm197_vm0, %v1229_v45  ;;  %1228 = vmatmul.msk.f32.gmra.mxu1 %vm197_vm0, %v1220_v46  ;;  %v305_v46 = vadd.f32 %v304_v6, %v239_v61 }
  0xd2   : > { %1275 = vmatmul.msk.f32.gmra.mxu0 %vm197_vm0, %v1267_v63 }
  0xd3   : > { %1260 = vmatmul.msk.f32.gmra.mxu3 %vm197_vm0, %v1252_v62  ;;  %v1760_v29 = vpop.f32.mrf.mxu3 }
  0xd4   : > { %v1770_v36 = vpop.f32.mrf.mxu1 }
  0xd5   : > { %v1768_v34 = vpop.f32.mrf.mxu0 }
  0xd9   : > { %1238 = vmatmul.msk.f32.gmra.mxu2 %vm197_vm0, %v1230_v50 }
  0xda   : > { %1276 = vmatmul.msk.f32.gmra.mxu0 %vm197_vm0, %v1268_v5 }
  0xdb   : > { %v1766_v33 = vpop.f32.mrf.mxu3 }
  0xdc   : > { %v1778_v40 = vpop.f32.mrf.mxu1 }
  0xdd   : > { %v1776_v39 = vpop.f32.mrf.mxu0 }
  0xe1   : > { %1239 = vmatmul.msk.f32.gmra.mxu2 %vm197_vm0, %v1231_v54 }
  0xe3   : > { %v1772_v37 = vpop.f32.mrf.mxu3 }
  0xe5   : > { %v1784_v43 = vpop.f32.mrf.mxu0 }
  0xe9   : > { %1240 = vmatmul.msk.f32.gmra.mxu2 %vm197_vm0, %v1232_v60 }
  0xeb   : > { %v1782_v42 = vpop.f32.mrf.mxu3 }
  0xf1   : > { %1241 = vmatmul.msk.f32.gmra.mxu2 %vm197_vm0, %v1233_v3 }
  0xf9   : > { %1242 = vmatmul.msk.f32.gmra.mxu2 %vm197_vm0, %v1234_v7 }
 0x101   : > { %1243 = vmatmul.msk.f32.gmra.mxu2 %vm197_vm0, %v1235_v12 }
 0x109   : > { %1244 = vmatmul.msk.f32.gmra.mxu2 %vm197_vm0, %v1236_v17 }
 0x114   : > { %v394_v24 = vpop.f32.mrf.mxu2 }
 0x115   : > { %v418_v48 = vadd.f32 %v394_v24, %v305_v46 }
 0x116   : > { %v666_v44 = vpop.f32.mrf.mxu1 }
 0x117   : > { %v505_v50 = vadd.f32 %v481_v8, %v418_v48 }
 0x119   : > { %v592_v56 = vadd.f32 %v568_v10, %v505_v50 }
 0x11b   : > { %v690_v62 = vadd.f32 %v666_v44, %v592_v56 }
 0x11c   : > { %v397_v28 = vpop.f32.mrf.mxu2 }
 0x11d   : > { %v419_v54 = vadd.f32 %v397_v28, %v308_v51  ;;  %v1008_v28 = vpop.permute.xlu2 %1007 }
 0x11e   : > { %v858_v47 = vpop.f32.mrf.mxu3  ;;  %v669_v52 = vpop.f32.mrf.mxu1 }
 0x11f   : > { %v952_v49 = vpop.f32.mrf.mxu0  ;;  %v506_v58 = vadd.f32 %v484_v15, %v419_v54  ;;  %v314_v15 = vadd.f32 %v313_v23, %v1715_v1  ;;  %v317_v1 = vadd.f32 %v1758_v27, %v1742_v14  ;;  %v1013_v54 = vpop.permute.xlu0 %1012  ;;  %v320_v27 = vadd.f32 %v1764_v32, %v1752_v20 }
 0x121   : > { %v593_v61 = vadd.f32 %v571_v16, %v506_v58 }
 0x123   : > { %v691_v9 = vadd.f32 %v669_v52, %v593_v61  ;;  %v1018_v61 = vpop.permute.xlu1 %1017 }
 0x124   : > { %v400_v31 = vpop.f32.mrf.mxu2 }
 0x125   : > { %v420_v6 = vadd.f32 %v400_v31, %v311_v0 }
 0x126   : > { %v861_v57 = vpop.f32.mrf.mxu3  ;;  %v672_v5 = vpop.f32.mrf.mxu1 }
 0x127   : > { %v955_v60 = vpop.f32.mrf.mxu0  ;;  %v507_v12 = vadd.f32 %v487_v21, %v420_v6 }
 0x129   : > { %v594_v18 = vadd.f32 %v574_v22, %v507_v12 }
 0x12b   : > { %v692_v44 = vadd.f32 %v672_v5, %v594_v18 }
 0x12c   : > { %v403_v35 = vpop.f32.mrf.mxu2 }
 0x12d   : > { %v421_v19 = vadd.f32 %v403_v35, %v314_v15 }
 0x12e   : > { %v864_v11 = vpop.f32.mrf.mxu3  ;;  %v675_v24 = vpop.f32.mrf.mxu1 }
 0x12f   : > { %v958_v13 = vpop.f32.mrf.mxu0  ;;  %v508_v46 = vadd.f32 %v1754_v25, %v421_v19 }
 0x131   : > { %v595_v35 = vadd.f32 %v1756_v26, %v508_v46 }
 0x134   : > { %v1774_v38 = vpop.f32.mrf.mxu2 }
 0x135   : > { %v422_v51 = vadd.f32 %v1774_v38, %v317_v1 }
 0x136   : > { %v678_v56 = vpop.f32.mrf.mxu1 }
 0x137   : > { %v961_v22 = vpop.f32.mrf.mxu0  ;;  %v509_v58 = vadd.f32 %v1760_v29, %v422_v51 }
 0x139   : > { %v596_v38 = vadd.f32 %v1762_v30, %v509_v58  ;;  %v1038_v58 = vpop.permute.xlu0 %1037 }
 0x13b   : > { %v694_v6 = vadd.f32 %v678_v56, %v596_v38 }
 0x13c   : > { %v1780_v41 = vpop.f32.mrf.mxu2 }
 0x13d   : > { %v423_v0 = vadd.f32 %v1780_v41, %v320_v27 }
 0x13e   : > { %v681_v20 = vpop.f32.mrf.mxu1 }
 0x13f   : > { %v964_v5 = vpop.f32.mrf.mxu0 }
 0x144   : > { %v1786_v45 = vpop.f32.mrf.mxu2 }
 0x14c   : > { %v1788_v53 = vpop.f32.mrf.mxu2 }
 0x154   : > { %v760_v63 = vpop.f32.mrf.mxu2 }
 0x155   : > { %v784_v3 = vadd.f32 %v760_v63, %v690_v62 }
 0x157   : > { %v882_v7 = vadd.f32 %v858_v47, %v784_v3 }
 0x159   : > { %v976_v8 = vadd.f32 %v952_v49, %v882_v7  ;;  %v867_v49 = vpop.f32.mrf.mxu3  ;;  %v510_v7 = vadd.f32 %v1766_v33, %v423_v0 }
 0x15b   : > { %vm992_vm1 = vcmp.gt.f32.partialorder %v976_v8, 0.0  ;;  %v1040_v55 = vmul.f32 %v1003_v4, %v976_v8  ;;  %v597_v30 = vadd.f32 %v1768_v34, %v510_v7  ;;  %v684_v34 = vpop.f32.mrf.mxu1 }
 0x15c   : > { %v763_v10 = vpop.f32.mrf.mxu2 }
 0x15d   : > { %v1048_v16 = vsel %vm992_vm1, %v976_v8, %v1040_v55  ;;  %v785_v17 = vadd.f32 %v763_v10, %v691_v9  ;;  %v323_v8 = vadd.f32 %v1770_v36, %v1700_v59  ;;  %v1023_v55 = vpop.permute.xlu2 %1022  ;;  %v695_v15 = vadd.f32 %v681_v20, %v597_v30 }
 0x15e   : > { %1057 = vst.msk [vmem:[%s1795_s8] sm:$0xff] %vm1056_vm2, %v1048_v16  ;;  %v326_v36 = vadd.f32 %v1778_v40, %v1719_v2 }
 0x15f   : > { %v883_v21 = vadd.f32 %v861_v57, %v785_v17  ;;  %v693_v57 = vadd.f32 %v675_v24, %v595_v35  ;;  %v424_v41 = vadd.f32 %v1786_v45, %v323_v8 }
 0x161   : > { %v977_v31 = vadd.f32 %v955_v60, %v883_v21  ;;  %v870_v26 = vpop.f32.mrf.mxu3  ;;  %v511_v16 = vadd.f32 %v1772_v37, %v424_v41  ;;  %v425_v21 = vadd.f32 %v1788_v53, %v326_v36 }
 0x163   : > { %vm993_vm3 = vcmp.gt.f32.partialorder %v977_v31, 0.0  ;;  %v1041_v47 = vmul.f32 %v1008_v28, %v977_v31  ;;  %v598_v45 = vadd.f32 %v1776_v39, %v511_v16  ;;  %v1028_v28 = vpop.permute.xlu1 %1027  ;;  %v512_v46 = vadd.f32 %v1782_v42, %v425_v21  ;;  %v687_v53 = vpop.f32.mrf.mxu1 }
 0x164   : > { %v766_v48 = vpop.f32.mrf.mxu2 }
 0x165   : > { %v1049_v23 = vsel %vm993_vm3, %v977_v31, %v1041_v47  ;;  %v786_v50 = vadd.f32 %v766_v48, %v692_v44  ;;  %v696_v44 = vadd.f32 %v684_v34, %v598_v45  ;;  %v599_v39 = vadd.f32 %v1784_v43, %v512_v46 }
 0x166   : > { %1058 = vst.msk [vmem:[%s1795_s8 + $0x8] sm:$0xff] %vm1056_vm2, %v1049_v23 }
 0x167   : > { %v884_v52 = vadd.f32 %v864_v11, %v786_v50  ;;  %v1033_v50 = vpop.permute.xlu2 %1032 }
 0x169   : > { %v978_v25 = vadd.f32 %v958_v13, %v884_v52  ;;  %v873_v10 = vpop.f32.mrf.mxu3  ;;  %v967_v13 = vpop.f32.mrf.mxu0 }
 0x16b   : > { %vm994_vm4 = vcmp.gt.f32.partialorder %v978_v25, 0.0  ;;  %v1042_v60 = vmul.f32 %v1013_v54, %v978_v25 }
 0x16c   : > { %v769_v14 = vpop.f32.mrf.mxu2 }
 0x16d   : > { %v1050_v62 = vsel %vm994_vm4, %v978_v25, %v1042_v60  ;;  %v787_v63 = vadd.f32 %v769_v14, %v693_v57 }
 0x16e   : > { %1059 = vst.msk [vmem:[%s1795_s8 + $0x10] sm:$0xff] %vm1056_vm2, %v1050_v62 }
 0x16f   : > { %v885_v3 = vadd.f32 %v867_v49, %v787_v63 }
 0x171   : > { %v979_v29 = vadd.f32 %v961_v22, %v885_v3  ;;  %v876_v37 = vpop.f32.mrf.mxu3  ;;  %v970_v40 = vpop.f32.mrf.mxu0  ;;  %v697_v22 = vadd.f32 %v687_v53, %v599_v39 }
 0x173   : > { %vm995_vm5 = vcmp.gt.f32.partialorder %v979_v29, 0.0  ;;  %v1043_v4 = vmul.f32 %v1018_v61, %v979_v29 }
 0x174   : > { %v772_v32 = vpop.f32.mrf.mxu2 }
 0x175   : > { %v1051_v9 = vsel %vm995_vm5, %v979_v29, %v1043_v4  ;;  %v788_v11 = vadd.f32 %v772_v32, %v694_v6 }
 0x176   : > { %1060 = vst.msk [vmem:[%s1795_s8 + $0x18] sm:$0xff] %vm1056_vm2, %v1051_v9 }
 0x177   : > { %v886_v12 = vadd.f32 %v870_v26, %v788_v11 }
 0x179   : > { %v980_v33 = vadd.f32 %v964_v5, %v886_v12  ;;  %v879_v51 = vpop.f32.mrf.mxu3  ;;  %v973_v25 = vpop.f32.mrf.mxu0 }
 0x17b   : > { %vm996_vm6 = vcmp.gt.f32.partialorder %v980_v33, 0.0  ;;  %v1044_v17 = vmul.f32 %v1023_v55, %v980_v33 }
 0x17c   : > { %v775_v59 = vpop.f32.mrf.mxu2 }
 0x17d   : > { %v1052_v18 = vsel %vm996_vm6, %v980_v33, %v1044_v17  ;;  %v789_v19 = vadd.f32 %v775_v59, %v695_v15 }
 0x17e   : > { %1061 = vst.msk [vmem:[%s1795_s8 + $0x20] sm:$0xff] %vm1056_vm2, %v1052_v18 }
 0x17f   : > { %v887_v24 = vadd.f32 %v873_v10, %v789_v19 }
 0x181   : > { %v981_v31 = vadd.f32 %v967_v13, %v887_v24 }
 0x183   : > { %vm997_vm7 = vcmp.gt.f32.partialorder %v981_v31, 0.0  ;;  %v1045_v47 = vmul.f32 %v1028_v28, %v981_v31 }
 0x184   : > { %v778_v2 = vpop.f32.mrf.mxu2 }
 0x185   : > { %v1053_v48 = vsel %vm997_vm7, %v981_v31, %v1045_v47  ;;  %v790_v49 = vadd.f32 %v778_v2, %v696_v44 }
 0x186   : > { %1062 = vst.msk [vmem:[%s1795_s8 + $0x28] sm:$0xff] %vm1056_vm2, %v1053_v48 }
 0x187   : > { %v888_v1 = vadd.f32 %v876_v37, %v790_v49 }
 0x189   : > { %v982_v23 = vadd.f32 %v970_v40, %v888_v1 }
 0x18b   : > { %vm998_vm8 = vcmp.gt.f32.partialorder %v982_v23, 0.0  ;;  %v1046_v35 = vmul.f32 %v1033_v50, %v982_v23 }
 0x18c   : > { %v781_v42 = vpop.f32.mrf.mxu2 }
 0x18d   : > { %v1054_v52 = vsel %vm998_vm8, %v982_v23, %v1046_v35  ;;  %v791_v54 = vadd.f32 %v781_v42, %v697_v22 }
 0x18e   : > { %1063 = vst.msk [vmem:[%s1795_s8 + $0x30] sm:$0xff] %vm1056_vm2, %v1054_v52 }
 0x18f   : > { %v889_v56 = vadd.f32 %v879_v51, %v791_v54 }
 0x191   : > { %v983_v57 = vadd.f32 %v973_v25, %v889_v56 }
 0x193   : > { %vm999_vm9 = vcmp.gt.f32.partialorder %v983_v57, 0.0  ;;  %v1047_v43 = vmul.f32 %v1038_v58, %v983_v57 }
 0x195   : > { %v1055_v60 = vsel %vm999_vm9, %v983_v57, %v1047_v43 }
 0x196   : > { %1064 = vst.msk [vmem:[%s1795_s8 + $0x38] sm:$0xff] %vm1056_vm2, %v1055_v60 }
 0x197 PF: > { %s13_s12 = sadd.s32 1, %s1364_s12  }
 0x198   : > { %p10_p4 = scmp.ge.s32.totalorder %s13_s12, 4  }
 0x19a   :  { %12 = sbr.rel (!%p10_p4) target bundleno = 1 (0x1), region = 73 }

// kernel: encode_forward.9
= control target key start
LH: loop header
LB: loop body
LE: loop exit
PB: predicated region body
PF: predicated region fallthrough
CT: control target
= control target key end

     0   :  { %s1627_s12 = smov 0   ;;  %s2102_s0 = inlined_call_operand.vmem [shape: f32[2,1,64,128], index: 0, kind: input, shape index: {}]   ;;  %s2103_s1 = inlined_call_operand.vmem [shape: f32[9,64,64], index: 1, kind: input, shape index: {}]   ;;  %s2104_s2 = inlined_call_operand.vmem [shape: f32[64,1], index: 2, kind: input, shape index: {}]   ;;  %s2105_s3 = inlined_call_operand.vmem [shape: f32[2,64,80], index: 3, kind: output, shape index: {}]  }
   0x1 LB: > { %s1237_s13 = sadd.s32 4294967295, %s1596_s12   ;;  %p1241_p0 = scmp.ge.s32.totalorder %s1596_s12, 1  ;;  %s1596_s12 = sphi %s1627_s12, %s13_s12  }
   0x2   : > { %p137_p1 = scmp.lt.s32.totalorder %s1596_s12, 3 }
   0x4   : > { %p138_p2 = pnand %p1241_p0, %p137_p1 }
   0x5   : > { %p161_p3 = scmp.lt.s32.totalorder (!%p138_p2), %s1237_s13, 1  ;;  %s1598_s18 = smov (!%p138_p2), 127  }
   0x6   : > { %141 = sbr.rel (%p138_p2) target bundleno = 434 (0x1b2), region = 32  ;;  %s1599_s19 = smov (!%p138_p2), 126  }
   0x7   : > { %s1600_s20 = smov (!%p138_p2), 118   ;;  %s1601_s21 = smov (!%p138_p2), 117  }
   0x8   : > { %s1602_s22 = smov (!%p138_p2), 107   ;;  %s1603_s23 = smov (!%p138_p2), 108  }
   0x9   : > { %s1604_s24 = smov (!%p138_p2), 116   ;;  %s1605_s25 = smov (!%p138_p2), 106  }
   0xb   : > { %s2107_s13 = smov (!%p161_p3, %s1237_s13), 1  ;;  %v1248_v30 = vld [vmem:[%s2103_s1 + $0x50] sm:$0xff]  ;;  %vm228_vm0 = vcmask 523264   ;;  %v1250_v31 = vld [vmem:[%s2103_s1 + $0x60] sm:$0xff]  ;;  %v1251_v46 = vld [vmem:[%s2103_s1 + $0x68] sm:$0xff]  ;;  %vm1173_vm2 = vcmask 654336  }
   0xc   : > { %s1384_s14 = sshll.u32 %s2107_s13, 6  ;;  %v1252_v35 = vld [vmem:[%s2103_s1 + $0x70] sm:$0xff]  ;;  %v1246_v39 = vld [vmem:[%s2103_s1 + $0x40] sm:$0xff]  ;;  %v1249_v48 = vld [vmem:[%s2103_s1 + $0x58] sm:$0xff] }
   0xd   : > { %s165_s17 = scalar_lea.vmem %s2102_s0, %s1384_s14  ;;  %v1253_v52 = vld [vmem:[%s2103_s1 + $0x78] sm:$0xff]  ;;  %v179_v62 = vld [vmem:[%s2103_s1] sm:$0xff] }
   0xe   : > { %v1643_v0 = vld [vmem:[%s165_s17 + $0x30] sm:$0xff]  ;;  %v1645_v1 = vld [vmem:[%s165_s17 + $0x38] sm:$0xff]  ;;  %v1655_v6 = vld [vmem:[%s165_s17 + $0x20] sm:$0xff] }
   0xf   : > { %v1647_v2 = vld [vmem:[%s165_s17 + $0x10] sm:$0xff]  ;;  %v1427_v3 = vpack.i.bf16 %v1643_v0, %v1645_v1  ;;  %v1651_v4 = vld [vmem:[%s165_s17 + $0x18] sm:$0xff]  ;;  %v1657_v7 = vld [vmem:[%s165_s17 + $0x28] sm:$0xff] }
  0x10   : > { %v1437_v5 = vpack.i.bf16 %v1647_v2, %v1651_v4  ;;  %v1659_v8 = vld [vmem:[%s165_s17] sm:$0xff]  ;;  %v1661_v9 = vld [vmem:[%s165_s17 + $0x8] sm:$0xff]  ;;  %v1432_v10 = vpack.i.bf16 %v1655_v6, %v1657_v7 }
  0x11   : > { %1428 = vrot.lane.b32.xlu0 %v1427_v3, %s1598_s18  ;;  %1448 = vrot.lane.b32.xlu2 %v1427_v3, %s1599_s19  ;;  %v1442_v11 = vpack.i.bf16 %v1659_v8, %v1661_v9 }
  0x12   : > { %1438 = vrot.lane.b32.xlu1 %v1437_v5, %s1598_s18 }
  0x19   : > { %1433 = vrot.lane.b32.xlu0 %v1432_v10, %s1598_s18  ;;  %1453 = vrot.lane.b32.xlu2 %v1427_v3, %s1600_s20 }
  0x1a   : > { %1443 = vrot.lane.b32.xlu1 %v1442_v11, %s1598_s18 }
  0x21   : > { %1458 = vrot.lane.b32.xlu0 %v1432_v10, %s1599_s19  ;;  %1468 = vrot.lane.b32.xlu2 %v1437_v5, %s1599_s19 }
  0x22   : > { %1463 = vrot.lane.b32.xlu1 %v1432_v10, %s1600_s20 }
  0x29   : > { %1473 = vrot.lane.b32.xlu0 %v1437_v5, %s1600_s20  ;;  %1483 = vrot.lane.b32.xlu2 %v1442_v11, %s1599_s19 }
  0x2a   : > { %1478 = vrot.lane.b32.xlu1 %v1427_v3, %s1601_s21 }
  0x31   : > { %1488 = vrot.lane.b32.xlu0 %v1442_v11, %s1600_s20  ;;  %1498 = vrot.lane.b32.xlu2 %v1437_v5, %s1601_s21  ;;  %s2059_s20 = scalar_lea.vmem %s2105_s3, %s1384_s14 }
  0x32   : > { %1493 = vrot.lane.b32.xlu1 %v1432_v10, %s1601_s21 }
  0x39   : > { %1503 = vrot.lane.b32.xlu0 %v1442_v11, %s1601_s21  ;;  %1513 = vrot.lane.b32.xlu2 %v1427_v3, %s1602_s22 }
  0x3a   : > { %1508 = vrot.lane.b32.xlu1 %v1427_v3, %s1603_s23 }
  0x41   : > { %1518 = vrot.lane.b32.xlu0 %v1427_v3, %s1604_s24  ;;  %1528 = vrot.lane.b32.xlu2 %v1432_v10, %s1602_s22 }
  0x42   : > { %1523 = vrot.lane.b32.xlu1 %v1432_v10, %s1603_s23 }
  0x49   : > { %1533 = vrot.lane.b32.xlu0 %v1432_v10, %s1604_s24  ;;  %1543 = vrot.lane.b32.xlu2 %v1437_v5, %s1602_s22 }
  0x4a   : > { %1538 = vrot.lane.b32.xlu1 %v1437_v5, %s1603_s23 }
  0x51   : > { %1548 = vrot.lane.b32.xlu0 %v1427_v3, %s1605_s25  ;;  %1558 = vrot.lane.b32.xlu2 %v1442_v11, %s1603_s23  ;;  %v1286_v3 = vld [vmem:[%s2103_s1 + $0xc0] sm:$0xff] }
  0x52   : > { %1553 = vrot.lane.b32.xlu1 %v1437_v5, %s1604_s24 }
  0x59   : > { %1563 = vrot.lane.b32.xlu0 %v1442_v11, %s1602_s22  ;;  %1573 = vrot.lane.b32.xlu2 %v1442_v11, %s1604_s24 }
  0x5a   : > { %1568 = vrot.lane.b32.xlu1 %v1432_v10, %s1605_s25 }
  0x61   : > { %1578 = vrot.lane.b32.xlu0 %v1437_v5, %s1605_s25 }
  0x62   : > { %1583 = vrot.lane.b32.xlu1 %v1442_v11, %s1605_s25 }
  0x6b   : > { %v1667_v12 = vpop.permute.xlu2 %1448 }
  0x6c   : > { %v1450_v33 = vunpack.i.l.bf16 %v1667_v12  ;;  %v1451_v37 = vunpack.i.h.bf16 %v1667_v12 }
  0x73   : > { %v1669_v13 = vpop.permute.xlu2 %1453 }
  0x74   : > { %v1455_v34 = vunpack.i.l.bf16 %v1669_v13  ;;  %v1456_v38 = vunpack.i.h.bf16 %v1669_v13 }
  0x7b   : > { %v1671_v17 = vpop.permute.xlu2 %1468 }
  0x7c   : > { %v1470_v51 = vunpack.i.l.bf16 %v1671_v17  ;;  %v1471_v57 = vunpack.i.h.bf16 %v1671_v17  ;;  %v1271_v17 = vld [vmem:[%s2103_s1 + $0x88] sm:$0xff] }
  0x83   : > { %v1429_v14 = vpop.permute.xlu0 %1428  ;;  %v1673_v23 = vpop.permute.xlu2 %1483 }
  0x84   : > { %v1430_v15 = vunpack.i.l.bf16 %v1429_v14  ;;  %v1439_v16 = vpop.permute.xlu1 %1438  ;;  %v1431_v18 = vunpack.i.h.bf16 %v1429_v14  ;;  %v1485_v58 = vunpack.i.l.bf16 %v1673_v23 }
  0x85   : > { %v1440_v24 = vunpack.i.l.bf16 %v1439_v16  ;;  %v1441_v25 = vunpack.i.h.bf16 %v1439_v16 }
  0x86   : > { %261 = vmatpush.msra.mxu0 %v1430_v15  ;;  %1386 = vmatpush.msra.mxu1 %v1430_v15 }
  0x87   : > { %1387 = vmatpush.msra.mxu2 %v1430_v15  ;;  %1388 = vmatpush.msra.mxu3 %v1430_v15  ;;  %v180_v15 = vld [vmem:[%s2103_s1 + $0x8] sm:$0xff] }
  0x88   : > { %262 = vmatpush.msra.mxu0 %v1431_v18  ;;  %1389 = vmatpush.msra.mxu1 %v1431_v18 }
  0x89   : > { %1390 = vmatpush.msra.mxu2 %v1431_v18  ;;  %1391 = vmatpush.msra.mxu3 %v1431_v18  ;;  %v1287_v18 = vld [vmem:[%s2103_s1 + $0xc8] sm:$0xff] }
  0x8b   : > { %v1434_v19 = vpop.permute.xlu0 %1433  ;;  %v1681_v32 = vpop.permute.xlu2 %1498 }
  0x8c   : > { %v1435_v20 = vunpack.i.l.bf16 %v1434_v19  ;;  %v1444_v21 = vpop.permute.xlu1 %1443  ;;  %v1436_v22 = vunpack.i.h.bf16 %v1434_v19  ;;  %v1500_v63 = vunpack.i.l.bf16 %v1681_v32  ;;  %v1302_v19 = vld [vmem:[%s2103_s1 + $0x100] sm:$0xff] }
  0x8d   : > { %v1445_v27 = vunpack.i.l.bf16 %v1444_v21  ;;  %v1446_v29 = vunpack.i.h.bf16 %v1444_v21 }
  0x8e   : > { %263 = vmatpush.msra.mxu0 %v1435_v20  ;;  %1392 = vmatpush.msra.mxu1 %v1435_v20 }
  0x8f   : > { %1393 = vmatpush.msra.mxu2 %v1435_v20  ;;  %1394 = vmatpush.msra.mxu3 %v1435_v20 }
  0x90   : > { %264 = vmatpush.msra.mxu0 %v1436_v22  ;;  %1395 = vmatpush.msra.mxu1 %v1436_v22 }
  0x91   : > { %1396 = vmatpush.msra.mxu2 %v1436_v22  ;;  %1397 = vmatpush.msra.mxu3 %v1436_v22 }
  0x92   : > { %265 = vmatpush.msra.mxu0 %v1440_v24  ;;  %1398 = vmatpush.msra.mxu1 %v1440_v24 }
  0x93   : > { %1399 = vmatpush.msra.mxu2 %v1440_v24  ;;  %1400 = vmatpush.msra.mxu3 %v1440_v24  ;;  %v1459_v26 = vpop.permute.xlu0 %1458  ;;  %v1514_v49 = vpop.permute.xlu2 %1513 }
  0x94   : > { %v1464_v28 = vpop.permute.xlu1 %1463  ;;  %266 = vmatpush.msra.mxu0 %v1441_v25  ;;  %1401 = vmatpush.msra.mxu1 %v1441_v25  ;;  %v1460_v41 = vunpack.i.l.bf16 %v1459_v26  ;;  %v1461_v44 = vunpack.i.h.bf16 %v1459_v26  ;;  %v1515_v5 = vunpack.i.l.bf16 %v1514_v49  ;;  %v1516_v10 = vunpack.i.h.bf16 %v1514_v49 }
  0x95   : > { %1402 = vmatpush.msra.mxu2 %v1441_v25  ;;  %1403 = vmatpush.msra.mxu3 %v1441_v25  ;;  %v1465_v42 = vunpack.i.l.bf16 %v1464_v28  ;;  %v1466_v45 = vunpack.i.h.bf16 %v1464_v28 }
  0x96   : > { %267 = vmatpush.msra.mxu0 %v1445_v27  ;;  %1404 = vmatpush.msra.mxu1 %v1445_v27 }
  0x97   : > { %1405 = vmatpush.msra.mxu2 %v1445_v27  ;;  %1406 = vmatpush.msra.mxu3 %v1445_v27 }
  0x98   : > { %268 = vmatpush.msra.mxu0 %v1446_v29  ;;  %1407 = vmatpush.msra.mxu1 %v1446_v29 }
  0x99   : > { %1408 = vmatpush.msra.mxu2 %v1446_v29  ;;  %1409 = vmatpush.msra.mxu3 %v1446_v29  ;;  %v181_v29 = vld [vmem:[%s2103_s1 + $0x10] sm:$0xff] }
  0x9a   : > { %1256 = vmatmul.msk.f32.vlgmr.msra.gmra.mxu1 %vm228_vm0, %v1248_v30  ;;  %1258 = vmatmul.msk.f32.vlgmr.msra.gmra.mxu2 %vm228_vm0, %v1250_v31  ;;  %v1272_v30 = vld [vmem:[%s2103_s1 + $0x90] sm:$0xff] }
  0x9b   : > { %424 = vmatpush.msrb.mxu2 %v1450_v33  ;;  %530 = vmatpush.msrb.mxu3 %v1455_v34  ;;  %v1474_v36 = vpop.permute.xlu0 %1473  ;;  %v1288_v31 = vld [vmem:[%s2103_s1 + $0xd0] sm:$0xff] }
  0x9c   : > { %326 = vmatpush.msrb.mxu1 %v1645_v1  ;;  %v1479_v40 = vpop.permute.xlu1 %1478  ;;  %1260 = vmatmul.msk.f32.vlgmr.msra.gmra.mxu3 %vm228_vm0, %v1252_v35  ;;  %v1475_v47 = vunpack.i.l.bf16 %v1474_v36  ;;  %v1476_v55 = vunpack.i.h.bf16 %v1474_v36  ;;  %v1270_v1 = vld [vmem:[%s2103_s1 + $0x80] sm:$0xff] }
  0x9d   : > { %425 = vmatpush.msrb.mxu2 %v1451_v37  ;;  %531 = vmatpush.msrb.mxu3 %v1456_v38  ;;  %v1480_v43 = vunpack.i.l.bf16 %v1479_v40  ;;  %v1481_v50 = vunpack.i.h.bf16 %v1479_v40 }
  0x9e   : > { %327 = vmatpush.msrb.mxu1 %v1643_v0  ;;  %1254 = vmatmul.msk.f32.vlgmr.msra.gmra.mxu0 %vm228_vm0, %v1246_v39  ;;  %v1486_v0 = vunpack.i.h.bf16 %v1673_v23 }
  0x9f   : > { %426 = vmatpush.msrb.mxu2 %v1460_v41  ;;  %532 = vmatpush.msrb.mxu3 %v1465_v42  ;;  %v182_v41 = vld [vmem:[%s2103_s1 + $0x18] sm:$0xff] }
  0xa0   : > { %328 = vmatpush.msrb.mxu1 %v1657_v7  ;;  %636 = vmatpush.msrb.mxu0 %v1480_v43  ;;  %v1273_v42 = vld [vmem:[%s2103_s1 + $0x98] sm:$0xff] }
  0xa1   : > { %427 = vmatpush.msrb.mxu2 %v1461_v44  ;;  %533 = vmatpush.msrb.mxu3 %v1466_v45  ;;  %v1289_v43 = vld [vmem:[%s2103_s1 + $0xd8] sm:$0xff]  ;;  %v1304_v44 = vld [vmem:[%s2103_s1 + $0x110] sm:$0xff] }
  0xa2   : > { %329 = vmatpush.msrb.mxu1 %v1655_v6  ;;  %1259 = vmatmul.msk.f32.gmra.mxu2 %vm228_vm0, %v1251_v46  ;;  %v1529_v6 = vpop.permute.xlu2 %1528 }
  0xa3   : > { %1257 = vmatmul.msk.f32.gmra.mxu1 %vm228_vm0, %v1249_v48  ;;  %534 = vmatpush.msrb.mxu3 %v1475_v47  ;;  %v1489_v53 = vpop.permute.xlu0 %1488  ;;  %v1530_v14 = vunpack.i.l.bf16 %v1529_v6  ;;  %v1531_v16 = vunpack.i.h.bf16 %v1529_v6 }
  0xa4   : > { %330 = vmatpush.msrb.mxu1 %v1651_v4  ;;  %428 = vmatpush.msrb.mxu2 %v1470_v51  ;;  %v1494_v54 = vpop.permute.xlu1 %1493  ;;  %v1490_v56 = vunpack.i.l.bf16 %v1489_v53  ;;  %v1491_v61 = vunpack.i.h.bf16 %v1489_v53  ;;  %v1501_v4 = vunpack.i.h.bf16 %v1681_v32  ;;  %v1303_v32 = vld [vmem:[%s2103_s1 + $0x108] sm:$0xff]  ;;  %v183_v53 = vld [vmem:[%s2103_s1 + $0x20] sm:$0xff] }
  0xa5   : > { %1261 = vmatmul.msk.f32.gmra.mxu3 %vm228_vm0, %v1253_v52  ;;  %637 = vmatpush.msrb.mxu0 %v1481_v50  ;;  %v1495_v59 = vunpack.i.l.bf16 %v1494_v54  ;;  %v1496_v60 = vunpack.i.h.bf16 %v1494_v54 }
  0xa6   : > { %535 = vmatpush.msrb.mxu3 %v1476_v55  ;;  %331 = vmatpush.msrb.mxu1 %v1647_v2  ;;  %v1247_v2 = vld [vmem:[%s2103_s1 + $0x48] sm:$0xff]  ;;  %v1274_v55 = vld [vmem:[%s2103_s1 + $0xa0] sm:$0xff] }
  0xa7   : > { %429 = vmatpush.msrb.mxu2 %v1471_v57  ;;  %638 = vmatpush.msrb.mxu0 %v1495_v59  ;;  %v1305_v57 = vld [vmem:[%s2103_s1 + $0x118] sm:$0xff] }
  0xa8   : > { %332 = vmatpush.msrb.mxu1 %v1661_v9  ;;  %536 = vmatpush.msrb.mxu3 %v1490_v56  ;;  %v1290_v56 = vld [vmem:[%s2103_s1 + $0xe0] sm:$0xff] }
  0xa9   : > { %430 = vmatpush.msrb.mxu2 %v1485_v58  ;;  %639 = vmatpush.msrb.mxu0 %v1496_v60 }
  0xaa   : > { %333 = vmatpush.msrb.mxu1 %v1659_v8  ;;  %537 = vmatpush.msrb.mxu3 %v1491_v61  ;;  %v1544_v24 = vpop.permute.xlu2 %1543 }
  0xab   : > { %431 = vmatpush.msrb.mxu2 %v1486_v0  ;;  %1262 = vmatmul.msk.f32.vlgmr.msrb.gmra.mxu1 %vm228_vm0, %v179_v62  ;;  %v1504_v7 = vpop.permute.xlu0 %1503  ;;  %v1546_v27 = vunpack.i.h.bf16 %v1544_v24  ;;  %v1545_v28 = vunpack.i.l.bf16 %v1544_v24  ;;  %v1350_v24 = vld [vmem:[%s2103_s1 + $0x1c0] sm:$0xff] }
  0xac   : > { %1278 = vmatmul.msk.f32.vlgmr.msrb.gmra.mxu2 %vm228_vm0, %v1270_v1  ;;  %640 = vmatpush.msrb.mxu0 %v1500_v63  ;;  %v1505_v8 = vunpack.i.l.bf16 %v1504_v7  ;;  %v1509_v9 = vpop.permute.xlu1 %1508  ;;  %v1506_v13 = vunpack.i.h.bf16 %v1504_v7  ;;  %v184_v1 = vld [vmem:[%s2103_s1 + $0x28] sm:$0xff] }
  0xad   : > { %1255 = vmatmul.msk.f32.gmra.mxu0 %vm228_vm0, %v1247_v2  ;;  %1294 = vmatmul.msk.f32.vlgmr.msrb.gmra.mxu3 %vm228_vm0, %v1286_v3  ;;  %v1511_v11 = vunpack.i.h.bf16 %v1509_v9  ;;  %v1510_v12 = vunpack.i.l.bf16 %v1509_v9  ;;  %v1275_v2 = vld [vmem:[%s2103_s1 + $0xa8] sm:$0xff] }
  0xae   : > { %641 = vmatpush.msrb.mxu0 %v1501_v4  ;;  %954 = vmatpush.msra.mxu3 %v1515_v5  ;;  %v1291_v3 = vld [vmem:[%s2103_s1 + $0xe8] sm:$0xff]  ;;  %v1306_v4 = vld [vmem:[%s2103_s1 + $0x120] sm:$0xff] }
  0xaf   : > { %848 = vmatpush.msra.mxu2 %v1510_v12  ;;  %v1276_v12 = vld [vmem:[%s2103_s1 + $0xb0] sm:$0xff] }
  0xb0   : > { %642 = vmatpush.msrb.mxu0 %v1505_v8  ;;  %955 = vmatpush.msra.mxu3 %v1516_v10  ;;  %v185_v10 = vld [vmem:[%s2103_s1 + $0x30] sm:$0xff] }
  0xb1   : > { %849 = vmatpush.msra.mxu2 %v1511_v11 }
  0xb2   : > { %643 = vmatpush.msrb.mxu0 %v1506_v13  ;;  %956 = vmatpush.msra.mxu3 %v1530_v14  ;;  %v1559_v37 = vpop.permute.xlu2 %1558  ;;  %v1292_v13 = vld [vmem:[%s2103_s1 + $0xf0] sm:$0xff]  ;;  %v1307_v14 = vld [vmem:[%s2103_s1 + $0x128] sm:$0xff] }
  0xb3   : > { %1263 = vmatmul.msk.f32.gmra.mxu1 %vm228_vm0, %v180_v15  ;;  %v1519_v20 = vpop.permute.xlu0 %1518  ;;  %v1560_v40 = vunpack.i.l.bf16 %v1559_v37  ;;  %v1561_v45 = vunpack.i.h.bf16 %v1559_v37  ;;  %v186_v15 = vld [vmem:[%s2103_s1 + $0x38] sm:$0xff] }
  0xb4   : > { %1279 = vmatmul.msk.f32.gmra.mxu2 %vm228_vm0, %v1271_v17  ;;  %v1521_v21 = vunpack.i.h.bf16 %v1519_v20  ;;  %v1520_v22 = vunpack.i.l.bf16 %v1519_v20  ;;  %v1524_v23 = vpop.permute.xlu1 %1523  ;;  %957 = vmatpush.msra.mxu3 %v1531_v16  ;;  %v1277_v16 = vld [vmem:[%s2103_s1 + $0xb8] sm:$0xff]  ;;  %v1606_v20 = vmov 0  }
  0xb5   : > { %1295 = vmatmul.msk.f32.gmra.mxu3 %vm228_vm0, %v1287_v18  ;;  %1310 = vmatmul.msk.f32.vlgmr.msrb.gmra.mxu0 %vm228_vm0, %v1302_v19  ;;  %v1526_v25 = vunpack.i.h.bf16 %v1524_v23  ;;  %v1525_v26 = vunpack.i.l.bf16 %v1524_v23  ;;  %v1293_v17 = vld [vmem:[%s2103_s1 + $0xf8] sm:$0xff]  ;;  %v1308_v18 = vld [vmem:[%s2103_s1 + $0x130] sm:$0xff]  ;;  %v1102_v19 = vld [vmem:[%s2104_s2 + $0x8] sm:$0xff] }
  0xb6   : > { %742 = vmatpush.msra.mxu1 %v1520_v22  ;;  %958 = vmatpush.msra.mxu3 %v1545_v28  ;;  %v1334_v22 = vld [vmem:[%s2103_s1 + $0x180] sm:$0xff]  ;;  %v1309_v23 = vld [vmem:[%s2103_s1 + $0x138] sm:$0xff]  ;;  %v1351_v28 = vld [vmem:[%s2103_s1 + $0x1c8] sm:$0xff] }
  0xb7   : > { %850 = vmatpush.msra.mxu2 %v1525_v26  ;;  %1588 = vset.pattern.permute.xlu0 %v1606_v20  ;;  %v1319_v26 = vld [vmem:[%s2103_s1 + $0x148] sm:$0xff]  ;;  %v1337_v37 = vld [vmem:[%s2103_s1 + $0x198] sm:$0xff] }
  0xb8   : > { %743 = vmatpush.msra.mxu1 %v1521_v21  ;;  %959 = vmatpush.msra.mxu3 %v1546_v27  ;;  %v1318_v21 = vld [vmem:[%s2103_s1 + $0x140] sm:$0xff]  ;;  %v1335_v27 = vld [vmem:[%s2103_s1 + $0x188] sm:$0xff] }
  0xb9   : > { %851 = vmatpush.msra.mxu2 %v1526_v25  ;;  %1589 = vset.pattern.permute.xlu1 %v1606_v20  ;;  %v1103_v25 = vld [vmem:[%s2104_s2 + $0x10] sm:$0xff] }
  0xba   : > { %v1574_v52 = vpop.permute.xlu2 %1573  ;;  %1124 = vperm.xlu0 %1588, %v1102_v19   ;;  %1587 = vset.pattern.permute.xlu2 %v1606_v20 }
  0xbb   : > { %1264 = vmatmul.msk.f32.gmra.mxu1 %vm228_vm0, %v181_v29  ;;  %v1534_v33 = vpop.permute.xlu0 %1533  ;;  %v1575_v54 = vunpack.i.l.bf16 %v1574_v52  ;;  %v1576_v58 = vunpack.i.h.bf16 %v1574_v52  ;;  %1129 = vperm.xlu1 %1589, %v1103_v25   ;;  %v1366_v29 = vld [vmem:[%s2103_s1 + $0x200] sm:$0xff]  ;;  %v1324_v52 = vld [vmem:[%s2103_s1 + $0x170] sm:$0xff] }
  0xbc   : > { %1280 = vmatmul.msk.f32.gmra.mxu2 %vm228_vm0, %v1272_v30  ;;  %v1536_v34 = vunpack.i.h.bf16 %v1534_v33  ;;  %v1535_v35 = vunpack.i.l.bf16 %v1534_v33  ;;  %v1539_v36 = vpop.permute.xlu1 %1538  ;;  %v1101_v30 = vld [vmem:[%s2104_s2] sm:$0xff]  ;;  %v1352_v33 = vld [vmem:[%s2103_s1 + $0x1d0] sm:$0xff] }
  0xbd   : > { %1296 = vmatmul.msk.f32.gmra.mxu3 %vm228_vm0, %v1288_v31  ;;  %1311 = vmatmul.msk.f32.gmra.mxu0 %vm228_vm0, %v1303_v32  ;;  %v1541_v38 = vunpack.i.h.bf16 %v1539_v36  ;;  %v1540_v39 = vunpack.i.l.bf16 %v1539_v36  ;;  %v1320_v31 = vld [vmem:[%s2103_s1 + $0x150] sm:$0xff]  ;;  %v1105_v36 = vld [vmem:[%s2104_s2 + $0x20] sm:$0xff] }
  0xbe   : > { %744 = vmatpush.msra.mxu1 %v1535_v35  ;;  %1119 = vperm.xlu2 %1587, %v1101_v30   ;;  %v1336_v32 = vld [vmem:[%s2103_s1 + $0x190] sm:$0xff]  ;;  %v1321_v35 = vld [vmem:[%s2103_s1 + $0x158] sm:$0xff] }
  0xbf   : > { %852 = vmatpush.msra.mxu2 %v1540_v39  ;;  %v1368_v39 = vld [vmem:[%s2103_s1 + $0x210] sm:$0xff] }
  0xc0   : > { %745 = vmatpush.msra.mxu1 %v1536_v34  ;;  %v1367_v34 = vld [vmem:[%s2103_s1 + $0x208] sm:$0xff] }
  0xc1   : > { %853 = vmatpush.msra.mxu2 %v1541_v38  ;;  %v1353_v38 = vld [vmem:[%s2103_s1 + $0x1d8] sm:$0xff] }
  0xc3   : > { %1265 = vmatmul.msk.f32.gmra.mxu1 %vm228_vm0, %v182_v41  ;;  %v1549_v46 = vpop.permute.xlu0 %1548  ;;  %854 = vmatpush.msra.mxu2 %v1560_v40  ;;  %v1322_v40 = vld [vmem:[%s2103_s1 + $0x160] sm:$0xff] }
  0xc4   : > { %1281 = vmatmul.msk.f32.gmra.mxu2 %vm228_vm0, %v1273_v42  ;;  %v1551_v47 = vunpack.i.h.bf16 %v1549_v46  ;;  %v1550_v48 = vunpack.i.l.bf16 %v1549_v46  ;;  %v1554_v49 = vpop.permute.xlu1 %1553  ;;  %1139 = vperm.xlu1 %1589, %v1105_v36   ;;  %v1338_v41 = vld [vmem:[%s2103_s1 + $0x1a0] sm:$0xff]  ;;  %v1339_v46 = vld [vmem:[%s2103_s1 + $0x1a8] sm:$0xff] }
  0xc5   : > { %1297 = vmatmul.msk.f32.gmra.mxu3 %vm228_vm0, %v1289_v43  ;;  %1312 = vmatmul.msk.f32.gmra.mxu0 %vm228_vm0, %v1304_v44  ;;  %v1556_v50 = vunpack.i.h.bf16 %v1554_v49  ;;  %v1555_v51 = vunpack.i.l.bf16 %v1554_v49  ;;  %v1354_v42 = vld [vmem:[%s2103_s1 + $0x1e0] sm:$0xff]  ;;  %v1369_v43 = vld [vmem:[%s2103_s1 + $0x218] sm:$0xff]  ;;  %v1107_v49 = vld [vmem:[%s2104_s2 + $0x30] sm:$0xff] }
  0xc6   : > { %1060 = vmatpush.msra.mxu0 %v1550_v48  ;;  %855 = vmatpush.msra.mxu2 %v1561_v45  ;;  %v1108_v44 = vld [vmem:[%s2104_s2 + $0x38] sm:$0xff]  ;;  %v1323_v45 = vld [vmem:[%s2103_s1 + $0x168] sm:$0xff]  ;;  %v1370_v48 = vld [vmem:[%s2103_s1 + $0x220] sm:$0xff] }
  0xc7   : > { %746 = vmatpush.msra.mxu1 %v1555_v51  ;;  %1149 = vperm.xlu0 %1588, %v1107_v49  }
  0xc8   : > { %1061 = vmatpush.msra.mxu0 %v1551_v47  ;;  %v1355_v47 = vld [vmem:[%s2103_s1 + $0x1e8] sm:$0xff] }
  0xc9   : > { %747 = vmatpush.msra.mxu1 %v1556_v50  ;;  %v1104_v50 = vld [vmem:[%s2104_s2 + $0x18] sm:$0xff] }
  0xca   : > { %1134 = vperm.xlu2 %1587, %v1104_v50  }
  0xcb   : > { %1266 = vmatmul.msk.f32.gmra.mxu1 %vm228_vm0, %v183_v53  ;;  %v1564_v59 = vpop.permute.xlu0 %1563  ;;  %v1340_v53 = vld [vmem:[%s2103_s1 + $0x1b0] sm:$0xff] }
  0xcc   : > { %1282 = vmatmul.msk.f32.gmra.mxu2 %vm228_vm0, %v1274_v55  ;;  %v1569_v60 = vpop.permute.xlu1 %1568  ;;  %v1566_v61 = vunpack.i.h.bf16 %v1564_v59  ;;  %v1565_v62 = vunpack.i.l.bf16 %v1564_v59  ;;  %748 = vmatpush.msra.mxu1 %v1575_v54  ;;  %v1356_v54 = vld [vmem:[%s2103_s1 + $0x1f0] sm:$0xff]  ;;  %v1371_v55 = vld [vmem:[%s2103_s1 + $0x228] sm:$0xff] }
  0xcd   : > { %1298 = vmatmul.msk.f32.gmra.mxu3 %vm228_vm0, %v1290_v56  ;;  %1313 = vmatmul.msk.f32.gmra.mxu0 %vm228_vm0, %v1305_v57  ;;  %v1571_v63 = vunpack.i.h.bf16 %v1569_v60  ;;  %v1570_v0 = vunpack.i.l.bf16 %v1569_v60  ;;  %v1325_v60 = vld [vmem:[%s2103_s1 + $0x178] sm:$0xff] }
  0xce   : > { %960 = vmatpush.msra.mxu3 %v1565_v62  ;;  %749 = vmatpush.msra.mxu1 %v1576_v58  ;;  %v1357_v62 = vld [vmem:[%s2103_s1 + $0x1f8] sm:$0xff] }
  0xcf   : > { %1062 = vmatpush.msra.mxu0 %v1570_v0  ;;  %1154 = vperm.xlu1 %1589, %v1108_v44   ;;  %v1106_v0 = vld [vmem:[%s2104_s2 + $0x28] sm:$0xff] }
  0xd0   : > { %961 = vmatpush.msra.mxu3 %v1566_v61  ;;  %v1341_v61 = vld [vmem:[%s2103_s1 + $0x1b8] sm:$0xff] }
  0xd1   : > { %1063 = vmatpush.msra.mxu0 %v1571_v63  ;;  %v1372_v63 = vld [vmem:[%s2103_s1 + $0x230] sm:$0xff] }
  0xd2   : > { %1144 = vperm.xlu2 %1587, %v1106_v0  }
  0xd3   : > { %1267 = vmatmul.msk.f32.gmra.mxu1 %vm228_vm0, %v184_v1  ;;  %v1579_v5 = vpop.permute.xlu0 %1578 }
  0xd4   : > { %1283 = vmatmul.msk.f32.gmra.mxu2 %vm228_vm0, %v1275_v2  ;;  %v1581_v6 = vunpack.i.h.bf16 %v1579_v5  ;;  %v1580_v7 = vunpack.i.l.bf16 %v1579_v5  ;;  %v1584_v8 = vpop.permute.xlu1 %1583  ;;  %v1373_v5 = vld [vmem:[%s2103_s1 + $0x238] sm:$0xff] }
  0xd5   : > { %1299 = vmatmul.msk.f32.gmra.mxu3 %vm228_vm0, %v1291_v3  ;;  %1314 = vmatmul.msk.f32.gmra.mxu0 %vm228_vm0, %v1306_v4  ;;  %v1585_v9 = vunpack.i.l.bf16 %v1584_v8  ;;  %v1586_v11 = vunpack.i.h.bf16 %v1584_v8 }
  0xd6   : > { %1064 = vmatpush.msra.mxu0 %v1580_v7 }
  0xd8   : > { %1065 = vmatpush.msra.mxu0 %v1581_v6 }
  0xda   : > { %1066 = vmatpush.msra.mxu0 %v1585_v9 }
  0xdb   : > { %1268 = vmatmul.msk.f32.gmra.mxu1 %vm228_vm0, %v185_v10 }
  0xdc   : > { %1284 = vmatmul.msk.f32.gmra.mxu2 %vm228_vm0, %v1276_v12  ;;  %1067 = vmatpush.msra.mxu0 %v1586_v11 }
  0xdd   : > { %1300 = vmatmul.msk.f32.gmra.mxu3 %vm228_vm0, %v1292_v13  ;;  %1315 = vmatmul.msk.f32.gmra.mxu0 %vm228_vm0, %v1307_v14 }
  0xe3   : > { %1269 = vmatmul.msk.f32.gmra.mxu1 %vm228_vm0, %v186_v15 }
  0xe4   : > { %1285 = vmatmul.msk.f32.gmra.mxu2 %vm228_vm0, %v1277_v16 }
  0xe5   : > { %1301 = vmatmul.msk.f32.gmra.mxu3 %vm228_vm0, %v1293_v17  ;;  %1316 = vmatmul.msk.f32.gmra.mxu0 %vm228_vm0, %v1308_v18 }
  0xeb   : > { %1326 = vmatmul.msk.f32.vlgmr.msra.gmra.mxu1 %vm228_vm0, %v1318_v21 }
  0xec   : > { %1342 = vmatmul.msk.f32.vlgmr.msra.gmra.mxu2 %vm228_vm0, %v1334_v22 }
  0xed   : > { %1317 = vmatmul.msk.f32.gmra.mxu0 %vm228_vm0, %v1309_v23  ;;  %1358 = vmatmul.msk.f32.vlgmr.msra.gmra.mxu3 %vm228_vm0, %v1350_v24 }
  0xf3   : > { %1327 = vmatmul.msk.f32.gmra.mxu1 %vm228_vm0, %v1319_v26 }
  0xf4   : > { %1343 = vmatmul.msk.f32.gmra.mxu2 %vm228_vm0, %v1335_v27 }
  0xf5   : > { %1359 = vmatmul.msk.f32.gmra.mxu3 %vm228_vm0, %v1351_v28  ;;  %1374 = vmatmul.msk.f32.vlgmr.msra.gmra.mxu0 %vm228_vm0, %v1366_v29 }
  0xfb   : > { %1328 = vmatmul.msk.f32.gmra.mxu1 %vm228_vm0, %v1320_v31 }
  0xfc   : > { %1344 = vmatmul.msk.f32.gmra.mxu2 %vm228_vm0, %v1336_v32 }
  0xfd   : > { %1360 = vmatmul.msk.f32.gmra.mxu3 %vm228_vm0, %v1352_v33  ;;  %1375 = vmatmul.msk.f32.gmra.mxu0 %vm228_vm0, %v1367_v34 }
 0x103   : > { %1329 = vmatmul.msk.f32.gmra.mxu1 %vm228_vm0, %v1321_v35 }
 0x104   : > { %1345 = vmatmul.msk.f32.gmra.mxu2 %vm228_vm0, %v1337_v37 }
 0x105   : > { %1361 = vmatmul.msk.f32.gmra.mxu3 %vm228_vm0, %v1353_v38  ;;  %1376 = vmatmul.msk.f32.gmra.mxu0 %vm228_vm0, %v1368_v39 }
 0x10b   : > { %1330 = vmatmul.msk.f32.gmra.mxu1 %vm228_vm0, %v1322_v40 }
 0x10c   : > { %1346 = vmatmul.msk.f32.gmra.mxu2 %vm228_vm0, %v1338_v41 }
 0x10d   : > { %1362 = vmatmul.msk.f32.gmra.mxu3 %vm228_vm0, %v1354_v42  ;;  %1377 = vmatmul.msk.f32.gmra.mxu0 %vm228_vm0, %v1369_v43 }
 0x113   : > { %1331 = vmatmul.msk.f32.gmra.mxu1 %vm228_vm0, %v1323_v45 }
 0x114   : > { %1347 = vmatmul.msk.f32.gmra.mxu2 %vm228_vm0, %v1339_v46 }
 0x115   : > { %1363 = vmatmul.msk.f32.gmra.mxu3 %vm228_vm0, %v1355_v47  ;;  %1378 = vmatmul.msk.f32.gmra.mxu0 %vm228_vm0, %v1370_v48 }
 0x117   : > { %v1968_v51 = vpop.f32.mrf.mxu1 }
 0x11b   : > { %1332 = vmatmul.msk.f32.gmra.mxu1 %vm228_vm0, %v1324_v52  ;;  %v270_v59 = vpop.f32.mrf.mxu0 }
 0x11c   : > { %1348 = vmatmul.msk.f32.gmra.mxu2 %vm228_vm0, %v1340_v53 }
 0x11d   : > { %1364 = vmatmul.msk.f32.gmra.mxu3 %vm228_vm0, %v1356_v54  ;;  %1379 = vmatmul.msk.f32.gmra.mxu0 %vm228_vm0, %v1371_v55  ;;  %v1986_v56 = vpop.f32.mrf.mxu2  ;;  %v1120_v54 = vpop.permute.xlu2 %1119 }
 0x11f   : > { %v1988_v57 = vpop.f32.mrf.mxu3 }
 0x120   : > { %v1990_v58 = vpop.f32.mrf.mxu1 }
 0x123   : > { %1333 = vmatmul.msk.f32.gmra.mxu1 %vm228_vm0, %v1325_v60 }
 0x124   : > { %1349 = vmatmul.msk.f32.gmra.mxu2 %vm228_vm0, %v1341_v61 }
 0x125   : > { %1365 = vmatmul.msk.f32.gmra.mxu3 %vm228_vm0, %v1357_v62  ;;  %1380 = vmatmul.msk.f32.gmra.mxu0 %vm228_vm0, %v1372_v63  ;;  %v2011_v1 = vpop.f32.mrf.mxu2 }
 0x128   : > { %v2013_v2 = vpop.f32.mrf.mxu3  ;;  %v335_v3 = vpop.f32.mrf.mxu1 }
 0x129   : > { %v336_v33 = vadd.f32 %v335_v3, %v270_v59 }
 0x12a   : > { %v273_v4 = vpop.f32.mrf.mxu0 }
 0x12d   : > { %1381 = vmatmul.msk.f32.gmra.mxu0 %vm228_vm0, %v1373_v5 }
 0x12f   : > { %v433_v6 = vpop.f32.mrf.mxu2 }
 0x130   : > { %v338_v7 = vpop.f32.mrf.mxu1  ;;  %v539_v8 = vpop.f32.mrf.mxu3  ;;  %v457_v35 = vadd.f32 %v433_v6, %v336_v33 }
 0x131   : > { %v339_v40 = vadd.f32 %v338_v7, %v273_v4 }
 0x132   : > { %v645_v9 = vpop.f32.mrf.mxu0  ;;  %v563_v37 = vadd.f32 %v539_v8, %v457_v35 }
 0x134   : > { %v669_v42 = vadd.f32 %v645_v9, %v563_v37  ;;  %v1125_v9 = vpop.permute.xlu0 %1124 }
 0x137   : > { %v436_v10 = vpop.f32.mrf.mxu2 }
 0x138   : > { %v341_v11 = vpop.f32.mrf.mxu1  ;;  %v542_v12 = vpop.f32.mrf.mxu3  ;;  %v458_v43 = vadd.f32 %v436_v10, %v339_v40 }
 0x139   : > { %v342_v50 = vadd.f32 %v341_v11, %v1968_v51 }
 0x13a   : > { %v648_v13 = vpop.f32.mrf.mxu0  ;;  %v564_v46 = vadd.f32 %v542_v12, %v458_v43 }
 0x13c   : > { %v670_v55 = vadd.f32 %v648_v13, %v564_v46 }
 0x13f   : > { %v439_v14 = vpop.f32.mrf.mxu2 }
 0x140   : > { %v344_v15 = vpop.f32.mrf.mxu1  ;;  %v545_v16 = vpop.f32.mrf.mxu3  ;;  %v459_v59 = vadd.f32 %v439_v14, %v342_v50 }
 0x141   : > { %v345_v6 = vadd.f32 %v344_v15, %v1990_v58 }
 0x142   : > { %v651_v17 = vpop.f32.mrf.mxu0  ;;  %v565_v0 = vadd.f32 %v545_v16, %v459_v59 }
 0x144   : > { %v671_v10 = vadd.f32 %v651_v17, %v565_v0  ;;  %v1130_v17 = vpop.permute.xlu1 %1129 }
 0x147   : > { %v442_v18 = vpop.f32.mrf.mxu2 }
 0x148   : > { %v2019_v19 = vpop.f32.mrf.mxu1  ;;  %v548_v20 = vpop.f32.mrf.mxu3  ;;  %v460_v11 = vadd.f32 %v442_v18, %v345_v6 }
 0x149   : > { %v348_v58 = vadd.f32 %v2019_v19, %v1986_v56 }
 0x14a   : > { %v2021_v21 = vpop.f32.mrf.mxu0  ;;  %v566_v16 = vadd.f32 %v548_v20, %v460_v11 }
 0x14c   : > { %v672_v18 = vadd.f32 %v2021_v21, %v566_v16 }
 0x14f   : > { %v2023_v22 = vpop.f32.mrf.mxu2 }
 0x150   : > { %v2025_v23 = vpop.f32.mrf.mxu1  ;;  %v2027_v24 = vpop.f32.mrf.mxu3  ;;  %v461_v43 = vadd.f32 %v2023_v22, %v348_v58 }
 0x151   : > { %v351_v56 = vadd.f32 %v2025_v23, %v2011_v1  ;;  %v1135_v22 = vpop.permute.xlu2 %1134 }
 0x152   : > { %v2029_v25 = vpop.f32.mrf.mxu0 }
 0x157   : > { %v2031_v26 = vpop.f32.mrf.mxu2 }
 0x158   : > { %v2033_v27 = vpop.f32.mrf.mxu1  ;;  %v2035_v28 = vpop.f32.mrf.mxu3 }
 0x159   : > { %v354_v1 = vadd.f32 %v2033_v27, %v1988_v57 }
 0x15a   : > { %v2037_v29 = vpop.f32.mrf.mxu0 }
 0x15f   : > { %v2039_v30 = vpop.f32.mrf.mxu2 }
 0x160   : > { %v2041_v31 = vpop.f32.mrf.mxu1  ;;  %v2043_v32 = vpop.f32.mrf.mxu3 }
 0x161   : > { %v357_v27 = vadd.f32 %v2041_v31, %v2013_v2 }
 0x162   : > { %v2045_v34 = vpop.f32.mrf.mxu0 }
 0x167   : > { %v2047_v36 = vpop.f32.mrf.mxu2 }
 0x168   : > { %v2049_v38 = vpop.f32.mrf.mxu3  ;;  %v751_v39 = vpop.f32.mrf.mxu1 }
 0x169   : > { %v775_v44 = vadd.f32 %v751_v39, %v669_v42 }
 0x16a   : > { %v2051_v41 = vpop.f32.mrf.mxu0 }
 0x16f   : > { %v857_v45 = vpop.f32.mrf.mxu2 }
 0x170   : > { %v881_v47 = vadd.f32 %v857_v45, %v775_v44  ;;  %v754_v48 = vpop.f32.mrf.mxu1  ;;  %v963_v49 = vpop.f32.mrf.mxu3 }
 0x171   : > { %v776_v61 = vadd.f32 %v754_v48, %v670_v55 }
 0x172   : > { %v987_v52 = vadd.f32 %v963_v49, %v881_v47  ;;  %v1069_v53 = vpop.f32.mrf.mxu0  ;;  %v567_v47 = vadd.f32 %v2027_v24, %v461_v43 }
 0x174   : > { %v1093_v60 = vadd.f32 %v1069_v53, %v987_v52  ;;  %v673_v53 = vadd.f32 %v2029_v25, %v567_v47 }
 0x176   : > { %vm1109_vm1 = vcmp.gt.f32.partialorder %v1093_v60, 0.0  ;;  %v1157_v62 = vmul.f32 %v1120_v54, %v1093_v60  ;;  %v462_v54 = vadd.f32 %v2031_v26, %v351_v56  ;;  %v1140_v26 = vpop.permute.xlu1 %1139 }
 0x177   : > { %v860_v63 = vpop.f32.mrf.mxu2 }
 0x178   : > { %v1165_v51 = vsel %vm1109_vm1, %v1093_v60, %v1157_v62  ;;  %v882_v3 = vadd.f32 %v860_v63, %v776_v61  ;;  %v757_v4 = vpop.f32.mrf.mxu1  ;;  %v966_v5 = vpop.f32.mrf.mxu3  ;;  %v568_v61 = vadd.f32 %v2035_v28, %v462_v54 }
 0x179   : > { %1174 = vst.msk [vmem:[%s2059_s20] sm:$0xff] %vm1173_vm2, %v1165_v51  ;;  %v777_v13 = vadd.f32 %v757_v4, %v671_v10  ;;  %v463_v4 = vadd.f32 %v2039_v30, %v354_v1  ;;  %v1145_v30 = vpop.permute.xlu2 %1144 }
 0x17a   : > { %v988_v7 = vadd.f32 %v966_v5, %v882_v3  ;;  %v1072_v8 = vpop.f32.mrf.mxu0  ;;  %v674_v3 = vadd.f32 %v2037_v29, %v568_v61 }
 0x17c   : > { %v1094_v12 = vadd.f32 %v1072_v8, %v988_v7  ;;  %v569_v8 = vadd.f32 %v2043_v32, %v463_v4 }
 0x17e   : > { %vm1110_vm3 = vcmp.gt.f32.partialorder %v1094_v12, 0.0  ;;  %v1158_v14 = vmul.f32 %v1125_v9, %v1094_v12 }
 0x17f   : > { %v863_v33 = vpop.f32.mrf.mxu2 }
 0x180   : > { %v1166_v35 = vsel %vm1110_vm3, %v1094_v12, %v1158_v14  ;;  %v883_v37 = vadd.f32 %v863_v33, %v777_v13  ;;  %v760_v39 = vpop.f32.mrf.mxu1  ;;  %v969_v40 = vpop.f32.mrf.mxu3  ;;  %v675_v13 = vadd.f32 %v2045_v34, %v569_v8  ;;  %v464_v14 = vadd.f32 %v2047_v36, %v357_v27 }
 0x181   : > { %1175 = vst.msk [vmem:[%s2059_s20 + $0x8] sm:$0xff] %vm1173_vm2, %v1166_v35  ;;  %v778_v45 = vadd.f32 %v760_v39, %v672_v18 }
 0x182   : > { %v989_v15 = vadd.f32 %v969_v40, %v883_v37  ;;  %v1075_v42 = vpop.f32.mrf.mxu0  ;;  %v570_v37 = vadd.f32 %v2049_v38, %v464_v14 }
 0x184   : > { %v1095_v44 = vadd.f32 %v1075_v42, %v989_v15  ;;  %v1150_v42 = vpop.permute.xlu0 %1149  ;;  %v676_v34 = vadd.f32 %v2051_v41, %v570_v37 }
 0x186   : > { %vm1111_vm4 = vcmp.gt.f32.partialorder %v1095_v44, 0.0  ;;  %v1159_v20 = vmul.f32 %v1130_v17, %v1095_v44 }
 0x187   : > { %v866_v46 = vpop.f32.mrf.mxu2 }
 0x188   : > { %v1167_v48 = vsel %vm1111_vm4, %v1095_v44, %v1159_v20  ;;  %v884_v49 = vadd.f32 %v866_v46, %v778_v45  ;;  %v763_v50 = vpop.f32.mrf.mxu1  ;;  %v972_v52 = vpop.f32.mrf.mxu3 }
 0x189   : > { %1176 = vst.msk [vmem:[%s2059_s20 + $0x10] sm:$0xff] %vm1173_vm2, %v1167_v48  ;;  %v779_v59 = vadd.f32 %v763_v50, %v673_v53  ;;  %v1155_v48 = vpop.permute.xlu1 %1154 }
 0x18a   : > { %v990_v19 = vadd.f32 %v972_v52, %v884_v49  ;;  %v1078_v21 = vpop.f32.mrf.mxu0 }
 0x18c   : > { %v1096_v55 = vadd.f32 %v1078_v21, %v990_v19 }
 0x18e   : > { %vm1112_vm5 = vcmp.gt.f32.partialorder %v1096_v55, 0.0  ;;  %v1160_v24 = vmul.f32 %v1135_v22, %v1096_v55 }
 0x18f   : > { %v869_v60 = vpop.f32.mrf.mxu2 }
 0x190   : > { %v1168_v62 = vsel %vm1112_vm5, %v1096_v55, %v1160_v24  ;;  %v885_v63 = vadd.f32 %v869_v60, %v779_v59  ;;  %v766_v0 = vpop.f32.mrf.mxu1  ;;  %v975_v51 = vpop.f32.mrf.mxu3 }
 0x191   : > { %1177 = vst.msk [vmem:[%s2059_s20 + $0x18] sm:$0xff] %vm1173_vm2, %v1168_v62  ;;  %v780_v6 = vadd.f32 %v766_v0, %v674_v3 }
 0x192   : > { %v991_v23 = vadd.f32 %v975_v51, %v885_v63  ;;  %v1081_v25 = vpop.f32.mrf.mxu0 }
 0x194   : > { %v1097_v5 = vadd.f32 %v1081_v25, %v991_v23 }
 0x196   : > { %vm1113_vm6 = vcmp.gt.f32.partialorder %v1097_v5, 0.0  ;;  %v1161_v28 = vmul.f32 %v1140_v26, %v1097_v5 }
 0x197   : > { %v872_v7 = vpop.f32.mrf.mxu2 }
 0x198   : > { %v1169_v9 = vsel %vm1113_vm6, %v1097_v5, %v1161_v28  ;;  %v886_v10 = vadd.f32 %v872_v7, %v780_v6  ;;  %v978_v11 = vpop.f32.mrf.mxu3  ;;  %v769_v57 = vpop.f32.mrf.mxu1 }
 0x199   : > { %1178 = vst.msk [vmem:[%s2059_s20 + $0x20] sm:$0xff] %vm1173_vm2, %v1169_v9  ;;  %v781_v16 = vadd.f32 %v769_v57, %v675_v13 }
 0x19a   : > { %v992_v29 = vadd.f32 %v978_v11, %v886_v10  ;;  %v1084_v12 = vpop.f32.mrf.mxu0 }
 0x19c   : > { %v1098_v33 = vadd.f32 %v1084_v12, %v992_v29 }
 0x19e   : > { %vm1114_vm7 = vcmp.gt.f32.partialorder %v1098_v33, 0.0  ;;  %v1162_v32 = vmul.f32 %v1145_v30, %v1098_v33 }
 0x19f   : > { %v875_v35 = vpop.f32.mrf.mxu2 }
 0x1a0   : > { %v1170_v39 = vsel %vm1114_vm7, %v1098_v33, %v1162_v32  ;;  %v887_v40 = vadd.f32 %v875_v35, %v781_v16  ;;  %v981_v58 = vpop.f32.mrf.mxu3  ;;  %v772_v15 = vpop.f32.mrf.mxu1 }
 0x1a1   : > { %1179 = vst.msk [vmem:[%s2059_s20 + $0x28] sm:$0xff] %vm1173_vm2, %v1170_v39  ;;  %v782_v17 = vadd.f32 %v772_v15, %v676_v34 }
 0x1a2   : > { %v993_v2 = vadd.f32 %v981_v58, %v887_v40  ;;  %v1087_v31 = vpop.f32.mrf.mxu0 }
 0x1a4   : > { %v1099_v36 = vadd.f32 %v1087_v31, %v993_v2 }
 0x1a6   : > { %vm1115_vm8 = vcmp.gt.f32.partialorder %v1099_v36, 0.0  ;;  %v1163_v18 = vmul.f32 %v1150_v42, %v1099_v36 }
 0x1a7   : > { %v878_v43 = vpop.f32.mrf.mxu2 }
 0x1a8   : > { %v1171_v44 = vsel %vm1115_vm8, %v1099_v36, %v1163_v18  ;;  %v888_v38 = vadd.f32 %v878_v43, %v782_v17  ;;  %v984_v45 = vpop.f32.mrf.mxu3 }
 0x1a9   : > { %1180 = vst.msk [vmem:[%s2059_s20 + $0x30] sm:$0xff] %vm1173_vm2, %v1171_v44 }
 0x1aa   : > { %v994_v20 = vadd.f32 %v984_v45, %v888_v38  ;;  %v1090_v46 = vpop.f32.mrf.mxu0 }
 0x1ac   : > { %v1100_v47 = vadd.f32 %v1090_v46, %v994_v20 }
 0x1ae   : > { %vm1116_vm9 = vcmp.gt.f32.partialorder %v1100_v47, 0.0  ;;  %v1164_v49 = vmul.f32 %v1155_v48, %v1100_v47 }
 0x1b0   : > { %v1172_v50 = vsel %vm1116_vm9, %v1100_v47, %v1164_v49 }
 0x1b1   : > { %1181 = vst.msk [vmem:[%s2059_s20 + $0x38] sm:$0xff] %vm1173_vm2, %v1172_v50 }
 0x1b2 PF: > { %s13_s12 = sadd.s32 1, %s1596_s12  }
 0x1b3   : > { %p10_p4 = scmp.ge.s32.totalorder %s13_s12, 4  }
 0x1b5   :  { %12 = sbr.rel (!%p10_p4) target bundleno = 1 (0x1), region = 70 }

// kernel: encode_forward.10
= control target key start
LH: loop header
LB: loop body
LE: loop exit
PB: predicated region body
PF: predicated region fallthrough
CT: control target
= control target key end

     0   :  { %s1939_s12 = smov 0   ;;  %s2696_s0 = inlined_call_operand.vmem [shape: f32[2,4,64,128], index: 0, kind: input, shape index: {}]   ;;  %s2697_s1 = inlined_call_operand.vmem [shape: f32[9,96,64], index: 1, kind: input, shape index: {}]   ;;  %s2698_s2 = inlined_call_operand.vmem [shape: f32[96,1], index: 2, kind: input, shape index: {}]   ;;  %s2699_s3 = inlined_call_operand.vmem [shape: f32[2,96,20], index: 3, kind: output, shape index: {}]  }
   0x1 LB: > { %s1528_s13 = sadd.s32 4294967295, %s1913_s12   ;;  %p1532_p0 = scmp.ge.s32.totalorder %s1913_s12, 1  ;;  %s1913_s12 = sphi %s1939_s12, %s13_s12  }
   0x2   : > { %p137_p1 = scmp.lt.s32.totalorder %s1913_s12, 3 }
   0x4   : > { %p138_p2 = pnand %p1532_p0, %p137_p1 }
   0x5   : > { %p161_p3 = scmp.lt.s32.totalorder (!%p138_p2), %s1528_s13, 1  ;;  %s1915_s18 = smov (!%p138_p2), 127  }
   0x6   : > { %141 = sbr.rel (%p138_p2) target bundleno = 479 (0x1df), region = 32  ;;  %s1916_s19 = smov (!%p138_p2), 123  }
   0x7   : > { %s1917_s26 = smov (!%p138_p2), 122  }
   0xb   : > { %s2701_s13 = smov (!%p161_p3, %s1528_s13), 1  ;;  %v1547_v24 = vld [vmem:[%s2697_s1 + $0x78] sm:$0xff]  ;;  %vm213_vm0 = vcmask 523264   ;;  %v1548_v30 = vld [vmem:[%s2697_s1 + $0x80] sm:$0xff]  ;;  %v1549_v35 = vld [vmem:[%s2697_s1 + $0x88] sm:$0xff]  ;;  %vm1460_vm2 = vcmask 162816  }
   0xc   : > { %s1766_s14 = sshll.u32 %s2701_s13, 8  ;;  %v179_v40 = vld [vmem:[%s2697_s1] sm:$0xff]  ;;  %v180_v43 = vld [vmem:[%s2697_s1 + $0x8] sm:$0xff]  ;;  %v181_v44 = vld [vmem:[%s2697_s1 + $0x10] sm:$0xff]  ;;  %s1791_s10 = smul.u32 96, %s2701_s13 }
   0xd   : > { %s1953_s17 = scalar_lea.vmem %s2696_s0, %s1766_s14  ;;  %v182_v45 = vld [vmem:[%s2697_s1 + $0x18] sm:$0xff]  ;;  %v1550_v46 = vld [vmem:[%s2697_s1 + $0x90] sm:$0xff]  ;;  %v1553_v47 = vld [vmem:[%s2697_s1 + $0xa8] sm:$0xff] }
   0xe   : > { %v1956_v0 = vld [vmem:[%s1953_s17 + $0x30] sm:$0xff]  ;;  %v178_v1 = vld [vmem:[%s1953_s17 + $0x38] sm:$0xff]  ;;  %v1976_v7 = vld [vmem:[%s1953_s17 + $0x20] sm:$0xff]  ;;  %s2657_s15 = scalar_lea.vmem %s2699_s3, %s1791_s10 }
   0xf   : > { %v1960_v2 = vld [vmem:[%s1953_s17 + $0x10] sm:$0xff]  ;;  %v1963_v3 = vpack.i.bf16 %v1956_v0, %v178_v1  ;;  %v1966_v4 = vld [vmem:[%s1953_s17 + $0x18] sm:$0xff]  ;;  %v176_v9 = vld [vmem:[%s1953_s17 + $0x28] sm:$0xff] }
  0x10   : > { %v1970_v5 = vpack.i.bf16 %v1960_v2, %v1966_v4  ;;  %v1543_v6 = vld [vmem:[%s1953_s17 + $0x78] sm:$0xff]  ;;  %v1542_v8 = vld [vmem:[%s1953_s17 + $0x70] sm:$0xff]  ;;  %v1541_v10 = vld [vmem:[%s1953_s17 + $0x68] sm:$0xff]  ;;  %v1995_v14 = vpack.i.bf16 %v1976_v7, %v176_v9 }
  0x11   : > { %1805 = vrot.lane.b32.xlu0 %v1963_v3, %s1915_s18  ;;  %1767 = vmatpush.msra.mxu1 %v1543_v6  ;;  %v1986_v11 = vld [vmem:[%s1953_s17] sm:$0xff]  ;;  %v1989_v12 = vld [vmem:[%s1953_s17 + $0x8] sm:$0xff]  ;;  %v1539_v16 = vld [vmem:[%s1953_s17 + $0x58] sm:$0xff]  ;;  %v1829_v17 = vpack.i.bf16 %v176_v9, %v1543_v6  ;;  %v1839_v25 = vpack.i.bf16 %v1976_v7, %v1542_v8  ;;  %v1844_v26 = vpack.i.bf16 %v1966_v4, %v1541_v10 }
  0x12   : > { %1815 = vrot.lane.b32.xlu1 %v1970_v5, %s1915_s18  ;;  %1825 = vrot.lane.b32.xlu2 %v1963_v3, %s1916_s19  ;;  %v1992_v13 = vld [vmem:[%s1953_s17 + $0x60] sm:$0xff]  ;;  %v1999_v15 = vpack.i.bf16 %v1986_v11, %v1989_v12  ;;  %v2004_v18 = vld [vmem:[%s1953_s17 + $0x50] sm:$0xff]  ;;  %v1859_v32 = vpack.i.bf16 %v1989_v12, %v1539_v16 }
  0x13   : > { %1770 = vmatpush.msra.mxu1 %v1542_v8  ;;  %1768 = vmatpush.msra.mxu2 %v1543_v6  ;;  %v1610_v19 = vld [vmem:[%s1953_s17 + $0xb0] sm:$0xff]  ;;  %v1611_v20 = vld [vmem:[%s1953_s17 + $0xb8] sm:$0xff]  ;;  %v2013_v21 = vld [vmem:[%s1953_s17 + $0x48] sm:$0xff]  ;;  %v1854_v31 = vpack.i.bf16 %v1960_v2, %v1992_v13  ;;  %v1874_v37 = vpack.i.bf16 %v1986_v11, %v2004_v18 }
  0x14   : > { %1769 = vmatpush.msra.mxu3 %v1543_v6  ;;  %258 = vmatpush.msra.mxu0 %v1543_v6  ;;  %v2019_v22 = vld [vmem:[%s1953_s17 + $0x40] sm:$0xff]  ;;  %v1834_v23 = vpack.i.bf16 %v1610_v19, %v1611_v20  ;;  %v1609_v28 = vld [vmem:[%s1953_s17 + $0xa8] sm:$0xff]  ;;  %v1606_v33 = vld [vmem:[%s1953_s17 + $0x90] sm:$0xff] }
  0x15   : > { %1773 = vmatpush.msra.mxu1 %v1541_v10  ;;  %1771 = vmatpush.msra.mxu2 %v1542_v8  ;;  %v1608_v27 = vld [vmem:[%s1953_s17 + $0xa0] sm:$0xff]  ;;  %v1607_v34 = vld [vmem:[%s1953_s17 + $0x98] sm:$0xff]  ;;  %v1605_v39 = vld [vmem:[%s1953_s17 + $0x88] sm:$0xff]  ;;  %v1879_v41 = vpack.i.bf16 %v2019_v22, %v2013_v21 }
  0x16   : > { %1772 = vmatpush.msra.mxu3 %v1542_v8  ;;  %259 = vmatpush.msra.mxu0 %v1542_v8  ;;  %v1849_v29 = vpack.i.bf16 %v1608_v27, %v1609_v28  ;;  %v1869_v36 = vpack.i.bf16 %v1606_v33, %v1607_v34  ;;  %v1604_v38 = vld [vmem:[%s1953_s17 + $0x80] sm:$0xff]  ;;  %v184_v49 = vld [vmem:[%s2697_s1 + $0x28] sm:$0xff]  ;;  %v185_v50 = vld [vmem:[%s2697_s1 + $0x30] sm:$0xff] }
  0x17   : > { %1776 = vmatpush.msra.mxu1 %v1992_v13  ;;  %1774 = vmatpush.msra.mxu2 %v1541_v10  ;;  %v1889_v42 = vpack.i.bf16 %v1604_v38, %v1605_v39  ;;  %v183_v48 = vld [vmem:[%s2697_s1 + $0x20] sm:$0xff]  ;;  %v1551_v51 = vld [vmem:[%s2697_s1 + $0x98] sm:$0xff]  ;;  %v1554_v53 = vld [vmem:[%s2697_s1 + $0xb0] sm:$0xff] }
  0x18   : > { %1775 = vmatpush.msra.mxu3 %v1541_v10  ;;  %260 = vmatpush.msra.mxu0 %v1541_v10  ;;  %v1544_v52 = vld [vmem:[%s2697_s1 + $0x60] sm:$0xff]  ;;  %v186_v55 = vld [vmem:[%s2697_s1 + $0x38] sm:$0xff]  ;;  %v1545_v58 = vld [vmem:[%s2697_s1 + $0x68] sm:$0xff] }
  0x19   : > { %1810 = vrot.lane.b32.xlu0 %v1995_v14, %s1915_s18  ;;  %1779 = vmatpush.msra.mxu1 %v1539_v16  ;;  %v1552_v56 = vld [vmem:[%s2697_s1 + $0xa0] sm:$0xff]  ;;  %v1643_v57 = vld [vmem:[%s1953_s17 + $0xf8] sm:$0xff]  ;;  %v1642_v63 = vld [vmem:[%s1953_s17 + $0xf0] sm:$0xff] }
  0x1a   : > { %1820 = vrot.lane.b32.xlu1 %v1999_v15, %s1915_s18  ;;  %1830 = vrot.lane.b32.xlu2 %v1829_v17, %s1916_s19  ;;  %v1555_v59 = vld [vmem:[%s2697_s1 + $0xb8] sm:$0xff]  ;;  %v187_v62 = vld [vmem:[%s2697_s1 + $0x40] sm:$0xff] }
  0x1b   : > { %1782 = vmatpush.msra.mxu1 %v2004_v18  ;;  %1777 = vmatpush.msra.mxu2 %v1992_v13  ;;  %v1638_v6 = vld [vmem:[%s1953_s17 + $0xd0] sm:$0xff]  ;;  %v1636_v8 = vld [vmem:[%s1953_s17 + $0xc0] sm:$0xff] }
  0x1c   : > { %1778 = vmatpush.msra.mxu3 %v1992_v13  ;;  %261 = vmatpush.msra.mxu0 %v1992_v13  ;;  %v1644_v10 = vld [vmem:[%s2697_s1 + $0x180] sm:$0xff] }
  0x1d   : > { %1785 = vmatpush.msra.mxu1 %v2013_v21  ;;  %1780 = vmatpush.msra.mxu2 %v1539_v16 }
  0x1e   : > { %1781 = vmatpush.msra.mxu3 %v1539_v16  ;;  %262 = vmatpush.msra.mxu0 %v1539_v16 }
  0x1f   : > { %1788 = vmatpush.msra.mxu1 %v2019_v22  ;;  %1783 = vmatpush.msra.mxu2 %v2004_v18 }
  0x20   : > { %1559 = vmatmul.msk.f32.vlgmr.msra.gmra.mxu1 %vm213_vm0, %v1547_v24  ;;  %1784 = vmatpush.msra.mxu3 %v2004_v18 }
  0x21   : > { %1835 = vrot.lane.b32.xlu0 %v1834_v23, %s1915_s18  ;;  %347 = vmatpush.msrb.mxu1 %v178_v1  ;;  %v1640_v1 = vld [vmem:[%s1953_s17 + $0xe0] sm:$0xff] }
  0x22   : > { %1840 = vrot.lane.b32.xlu1 %v1839_v25, %s1916_s19  ;;  %1845 = vrot.lane.b32.xlu2 %v1844_v26, %s1916_s19  ;;  %v1615_v26 = vld [vmem:[%s2697_s1 + $0x138] sm:$0xff] }
  0x23   : > { %348 = vmatpush.msrb.mxu1 %v1956_v0  ;;  %1786 = vmatpush.msra.mxu2 %v2013_v21  ;;  %v1641_v0 = vld [vmem:[%s1953_s17 + $0xe8] sm:$0xff] }
  0x24   : > { %1787 = vmatpush.msra.mxu3 %v2013_v21  ;;  %263 = vmatpush.msra.mxu0 %v2004_v18  ;;  %v1614_v18 = vld [vmem:[%s2697_s1 + $0x130] sm:$0xff] }
  0x25   : > { %349 = vmatpush.msrb.mxu1 %v176_v9  ;;  %1789 = vmatpush.msra.mxu2 %v2019_v22  ;;  %v1613_v9 = vld [vmem:[%s2697_s1 + $0x128] sm:$0xff] }
  0x26   : > { %1790 = vmatpush.msra.mxu3 %v2019_v22  ;;  %264 = vmatpush.msra.mxu0 %v2013_v21 }
  0x27   : > { %350 = vmatpush.msrb.mxu1 %v1976_v7  ;;  %1562 = vmatmul.msk.f32.vlgmr.msra.gmra.mxu2 %vm213_vm0, %v1550_v46  ;;  %v1637_v7 = vld [vmem:[%s1953_s17 + $0xc8] sm:$0xff] }
  0x28   : > { %604 = vmatpush.msrb.mxu3 %v1611_v20  ;;  %1560 = vmatmul.msk.f32.gmra.mxu1 %vm213_vm0, %v1548_v30 }
  0x29   : > { %265 = vmatpush.msra.mxu0 %v2019_v22  ;;  %1850 = vrot.lane.b32.xlu0 %v1849_v29, %s1915_s18  ;;  %v190_v22 = vld [vmem:[%s2697_s1 + $0x58] sm:$0xff]  ;;  %v1646_v29 = vld [vmem:[%s2697_s1 + $0x190] sm:$0xff] }
  0x2a   : > { %351 = vmatpush.msrb.mxu1 %v1966_v4  ;;  %1855 = vrot.lane.b32.xlu1 %v1854_v31, %s1916_s19  ;;  %v1639_v4 = vld [vmem:[%s1953_s17 + $0xd8] sm:$0xff] }
  0x2b   : > { %1860 = vrot.lane.b32.xlu2 %v1859_v32, %s1916_s19  ;;  %605 = vmatpush.msrb.mxu3 %v1610_v19  ;;  %v1645_v19 = vld [vmem:[%s2697_s1 + $0x188] sm:$0xff] }
  0x2c   : > { %352 = vmatpush.msrb.mxu1 %v1960_v2  ;;  %1565 = vmatmul.msk.f32.vlgmr.msra.gmra.mxu3 %vm213_vm0, %v1553_v47  ;;  %v1546_v2 = vld [vmem:[%s2697_s1 + $0x70] sm:$0xff] }
  0x2d   : > { %606 = vmatpush.msrb.mxu3 %v1609_v28  ;;  %1556 = vmatmul.msk.f32.vlgmr.msra.gmra.mxu0 %vm213_vm0, %v1544_v52 }
  0x2e   : > { %353 = vmatpush.msrb.mxu1 %v1989_v12  ;;  %727 = vmatpush.msrb.mxu0 %v1643_v57 }
  0x2f   : > { %607 = vmatpush.msrb.mxu3 %v1608_v27  ;;  %1563 = vmatmul.msk.f32.gmra.mxu2 %vm213_vm0, %v1551_v51 }
  0x30   : > { %354 = vmatpush.msrb.mxu1 %v1986_v11  ;;  %728 = vmatpush.msrb.mxu0 %v1642_v63 }
  0x31   : > { %1561 = vmatmul.msk.f32.gmra.mxu1 %vm213_vm0, %v1549_v35  ;;  %1865 = vrot.lane.b32.xlu0 %v1963_v3, %s1917_s26  ;;  %v1612_v3 = vld [vmem:[%s2697_s1 + $0x120] sm:$0xff] }
  0x32   : > { %608 = vmatpush.msrb.mxu3 %v1607_v34  ;;  %1870 = vrot.lane.b32.xlu1 %v1869_v36, %s1915_s18 }
  0x33   : > { %1875 = vrot.lane.b32.xlu2 %v1874_v37, %s1916_s19  ;;  %729 = vmatpush.msrb.mxu0 %v1641_v0 }
  0x34   : > { %609 = vmatpush.msrb.mxu3 %v1606_v33 }
  0x35   : > { %1566 = vmatmul.msk.f32.gmra.mxu3 %vm213_vm0, %v1554_v53  ;;  %1557 = vmatmul.msk.f32.gmra.mxu0 %vm213_vm0, %v1545_v58  ;;  %v1581_v53 = vld [vmem:[%s2697_s1 + $0xc8] sm:$0xff]  ;;  %v1648_v58 = vld [vmem:[%s2697_s1 + $0x1a0] sm:$0xff] }
  0x36   : > { %610 = vmatpush.msrb.mxu3 %v1605_v39  ;;  %730 = vmatpush.msrb.mxu0 %v1640_v1 }
  0x37   : > { %1564 = vmatmul.msk.f32.gmra.mxu2 %vm213_vm0, %v1552_v56  ;;  %v1617_v56 = vld [vmem:[%s2697_s1 + $0x148] sm:$0xff] }
  0x38   : > { %611 = vmatpush.msrb.mxu3 %v1604_v38  ;;  %731 = vmatpush.msrb.mxu0 %v1639_v4  ;;  %v1580_v38 = vld [vmem:[%s2697_s1 + $0xc0] sm:$0xff]  ;;  %v1582_v4 = vld [vmem:[%s2697_s1 + $0xd0] sm:$0xff] }
  0x39   : > { %1568 = vmatmul.msk.f32.vlgmr.msrb.gmra.mxu1 %vm213_vm0, %v179_v40  ;;  %1880 = vrot.lane.b32.xlu0 %v1879_v41, %s1916_s19  ;;  %v1616_v40 = vld [vmem:[%s2697_s1 + $0x140] sm:$0xff] }
  0x3a   : > { %1885 = vrot.lane.b32.xlu1 %v1995_v14, %s1917_s26  ;;  %732 = vmatpush.msrb.mxu0 %v1638_v6  ;;  %v189_v14 = vld [vmem:[%s2697_s1 + $0x50] sm:$0xff] }
  0x3b   : > { %1890 = vrot.lane.b32.xlu2 %v1889_v42, %s1915_s18 }
  0x3c   : > { %733 = vmatpush.msrb.mxu0 %v1637_v7  ;;  %v1618_v7 = vld [vmem:[%s2697_s1 + $0x150] sm:$0xff] }
  0x3d   : > { %1567 = vmatmul.msk.f32.gmra.mxu3 %vm213_vm0, %v1555_v59  ;;  %1558 = vmatmul.msk.f32.gmra.mxu0 %vm213_vm0, %v1546_v2 }
  0x3e   : > { %734 = vmatpush.msrb.mxu0 %v1636_v8  ;;  %v1649_v8 = vld [vmem:[%s2697_s1 + $0x1a8] sm:$0xff] }
  0x41   : > { %1569 = vmatmul.msk.f32.gmra.mxu1 %vm213_vm0, %v180_v43  ;;  %1895 = vrot.lane.b32.xlu0 %v1970_v5, %s1917_s26  ;;  %v188_v5 = vld [vmem:[%s2697_s1 + $0x48] sm:$0xff]  ;;  %v1647_v43 = vld [vmem:[%s2697_s1 + $0x198] sm:$0xff] }
  0x42   : > { %1900 = vrot.lane.b32.xlu1 %v1999_v15, %s1917_s26 }
  0x45   : > { %1624 = vmatmul.msk.f32.vlgmr.msrb.gmra.mxu3 %vm213_vm0, %v1612_v3  ;;  %1656 = vmatmul.msk.f32.vlgmr.msrb.gmra.mxu0 %vm213_vm0, %v1644_v10 }
  0x49   : > { %1570 = vmatmul.msk.f32.gmra.mxu1 %vm213_vm0, %v181_v44 }
  0x4d   : > { %1625 = vmatmul.msk.f32.gmra.mxu3 %vm213_vm0, %v1613_v9  ;;  %1657 = vmatmul.msk.f32.gmra.mxu0 %vm213_vm0, %v1645_v19  ;;  %v1668_v9 = vld [vmem:[%s2697_s1 + $0x1e0] sm:$0xff]  ;;  %v1650_v19 = vld [vmem:[%s2697_s1 + $0x1b0] sm:$0xff] }
  0x51   : > { %1571 = vmatmul.msk.f32.gmra.mxu1 %vm213_vm0, %v182_v45 }
  0x55   : > { %1626 = vmatmul.msk.f32.gmra.mxu3 %vm213_vm0, %v1614_v18  ;;  %1658 = vmatmul.msk.f32.gmra.mxu0 %vm213_vm0, %v1646_v29  ;;  %v1619_v18 = vld [vmem:[%s2697_s1 + $0x158] sm:$0xff] }
  0x59   : > { %1572 = vmatmul.msk.f32.gmra.mxu1 %vm213_vm0, %v183_v48 }
  0x5d   : > { %1627 = vmatmul.msk.f32.gmra.mxu3 %vm213_vm0, %v1615_v26  ;;  %1659 = vmatmul.msk.f32.gmra.mxu0 %vm213_vm0, %v1647_v43  ;;  %v1620_v26 = vld [vmem:[%s2697_s1 + $0x160] sm:$0xff]  ;;  %v1587_v43 = vld [vmem:[%s2697_s1 + $0xf8] sm:$0xff] }
  0x61   : > { %1573 = vmatmul.msk.f32.gmra.mxu1 %vm213_vm0, %v184_v49 }
  0x65   : > { %1628 = vmatmul.msk.f32.gmra.mxu3 %vm213_vm0, %v1616_v40  ;;  %1660 = vmatmul.msk.f32.gmra.mxu0 %vm213_vm0, %v1648_v58 }
  0x69   : > { %1574 = vmatmul.msk.f32.gmra.mxu1 %vm213_vm0, %v185_v50 }
  0x6c   : > { %v2129_v54 = vpop.permute.xlu2 %1825 }
  0x6d   : > { %v1827_v36 = vunpack.i.l.bf16 %v2129_v54  ;;  %v1828_v39 = vunpack.i.h.bf16 %v2129_v54  ;;  %1629 = vmatmul.msk.f32.gmra.mxu3 %vm213_vm0, %v1617_v56  ;;  %1661 = vmatmul.msk.f32.gmra.mxu0 %vm213_vm0, %v1649_v8  ;;  %v1740_v56 = vld [vmem:[%s2697_s1 + $0x300] sm:$0xff]  ;;  %v1742_v8 = vld [vmem:[%s2697_s1 + $0x310] sm:$0xff] }
  0x71   : > { %1575 = vmatmul.msk.f32.gmra.mxu1 %vm213_vm0, %v186_v55 }
  0x74   : > { %v2147_v60 = vpop.permute.xlu2 %1830 }
  0x75   : > { %v1832_v61 = vunpack.i.l.bf16 %v2147_v60  ;;  %v1833_v41 = vunpack.i.h.bf16 %v2147_v60  ;;  %1630 = vmatmul.msk.f32.gmra.mxu3 %vm213_vm0, %v1618_v7  ;;  %1662 = vmatmul.msk.f32.gmra.mxu0 %vm213_vm0, %v1650_v19  ;;  %v1353_v7 = vld [vmem:[%s2698_s2 + $0x8] sm:$0xff] }
  0x77   : > { %1157 = vmatpush.msra.mxu3 %v1832_v61 }
  0x79   : > { %1576 = vmatmul.msk.f32.gmra.mxu1 %vm213_vm0, %v187_v62 }
  0x7c   : > { %v2185_v16 = vpop.permute.xlu2 %1845 }
  0x7d   : > { %v1847_v34 = vunpack.i.l.bf16 %v2185_v16  ;;  %v1848_v52 = vunpack.i.h.bf16 %v2185_v16  ;;  %1631 = vmatmul.msk.f32.gmra.mxu3 %vm213_vm0, %v1619_v18  ;;  %v1678_v18 = vld [vmem:[%s2697_s1 + $0x230] sm:$0xff] }
  0x81   : > { %1577 = vmatmul.msk.f32.gmra.mxu1 %vm213_vm0, %v188_v5 }
  0x83   : > { %v1806_v11 = vpop.permute.xlu0 %1805 }
  0x84   : > { %v1816_v12 = vpop.permute.xlu1 %1815  ;;  %v1807_v13 = vunpack.i.l.bf16 %v1806_v11  ;;  %v1808_v15 = vunpack.i.h.bf16 %v1806_v11 }
  0x85   : > { %v1817_v24 = vunpack.i.l.bf16 %v1816_v12  ;;  %v2199_v25 = vpop.permute.xlu2 %1860  ;;  %v1818_v27 = vunpack.i.h.bf16 %v1816_v12  ;;  %1632 = vmatmul.msk.f32.gmra.mxu3 %vm213_vm0, %v1620_v26 }
  0x86   : > { %481 = vmatpush.msrb.mxu2 %v1807_v13  ;;  %v1862_v49 = vunpack.i.l.bf16 %v2199_v25  ;;  %v1863_v57 = vunpack.i.h.bf16 %v2199_v25  ;;  %v1584_v25 = vld [vmem:[%s2697_s1 + $0xe0] sm:$0xff] }
  0x88   : > { %482 = vmatpush.msrb.mxu2 %v1808_v15 }
  0x89   : > { %1578 = vmatmul.msk.f32.gmra.mxu1 %vm213_vm0, %v189_v14 }
  0x8b   : > { %v1811_v17 = vpop.permute.xlu0 %1810 }
  0x8c   : > { %v1821_v20 = vpop.permute.xlu1 %1820  ;;  %v1812_v21 = vunpack.i.l.bf16 %v1811_v17  ;;  %v1813_v23 = vunpack.i.h.bf16 %v1811_v17  ;;  %v1583_v17 = vld [vmem:[%s2697_s1 + $0xd8] sm:$0xff] }
  0x8d   : > { %v1822_v28 = vunpack.i.l.bf16 %v1821_v20  ;;  %v1823_v37 = vunpack.i.h.bf16 %v1821_v20  ;;  %v1876_v42 = vpop.permute.xlu2 %1875  ;;  %v1669_v20 = vld [vmem:[%s2697_s1 + $0x1e8] sm:$0xff] }
  0x8e   : > { %483 = vmatpush.msrb.mxu2 %v1812_v21  ;;  %v1877_v54 = vunpack.i.l.bf16 %v1876_v42  ;;  %v1878_v60 = vunpack.i.h.bf16 %v1876_v42 }
  0x90   : > { %484 = vmatpush.msrb.mxu2 %v1813_v23 }
  0x91   : > { %1579 = vmatmul.msk.f32.gmra.mxu1 %vm213_vm0, %v190_v22 }
  0x92   : > { %485 = vmatpush.msrb.mxu2 %v1817_v24 }
  0x93   : > { %v1836_v30 = vpop.permute.xlu0 %1835 }
  0x94   : > { %v1841_v31 = vpop.permute.xlu1 %1840  ;;  %486 = vmatpush.msrb.mxu2 %v1818_v27  ;;  %v1838_v32 = vunpack.i.h.bf16 %v1836_v30  ;;  %v1837_v33 = vunpack.i.l.bf16 %v1836_v30  ;;  %v1651_v27 = vld [vmem:[%s2697_s1 + $0x1b8] sm:$0xff]  ;;  %v1585_v30 = vld [vmem:[%s2697_s1 + $0xe8] sm:$0xff] }
  0x95   : > { %v1842_v35 = vunpack.i.l.bf16 %v1841_v31  ;;  %v1843_v45 = vunpack.i.h.bf16 %v1841_v31  ;;  %v1891_v0 = vpop.permute.xlu2 %1890  ;;  %1663 = vmatmul.msk.f32.gmra.mxu0 %vm213_vm0, %v1651_v27  ;;  %v1621_v31 = vld [vmem:[%s2697_s1 + $0x168] sm:$0xff] }
  0x96   : > { %487 = vmatpush.msrb.mxu2 %v1822_v28  ;;  %873 = vmatpush.msra.mxu1 %v1837_v33  ;;  %v1892_v5 = vunpack.i.l.bf16 %v1891_v0  ;;  %v1893_v6 = vunpack.i.h.bf16 %v1891_v0  ;;  %v1670_v28 = vld [vmem:[%s2697_s1 + $0x1f0] sm:$0xff]  ;;  %v1671_v33 = vld [vmem:[%s2697_s1 + $0x1f8] sm:$0xff]  ;;  %v1676_v0 = vld [vmem:[%s2697_s1 + $0x220] sm:$0xff] }
  0x97   : > { %1158 = vmatpush.msra.mxu3 %v1842_v35  ;;  %v1586_v35 = vld [vmem:[%s2697_s1 + $0xf0] sm:$0xff]  ;;  %v1721_v27 = vld [vmem:[%s2697_s1 + $0x2c8] sm:$0xff] }
  0x98   : > { %488 = vmatpush.msrb.mxu2 %v1823_v37  ;;  %874 = vmatpush.msra.mxu1 %v1838_v32  ;;  %v1652_v32 = vld [vmem:[%s2697_s1 + $0x1c0] sm:$0xff] }
  0x99   : > { %1592 = vmatmul.msk.f32.vlgmr.msrb.gmra.mxu2 %vm213_vm0, %v1580_v38  ;;  %1159 = vmatpush.msra.mxu3 %v1847_v34  ;;  %v1653_v38 = vld [vmem:[%s2697_s1 + $0x1c8] sm:$0xff] }
  0x9a   : > { %1011 = vmatpush.msra.mxu2 %v1827_v36  ;;  %1633 = vmatmul.msk.f32.gmra.mxu3 %vm213_vm0, %v1621_v31  ;;  %v1622_v36 = vld [vmem:[%s2697_s1 + $0x170] sm:$0xff] }
  0x9b   : > { %v1851_v44 = vpop.permute.xlu0 %1850 }
  0x9c   : > { %v1856_v46 = vpop.permute.xlu1 %1855  ;;  %1012 = vmatpush.msra.mxu2 %v1828_v39  ;;  %v1853_v47 = vunpack.i.h.bf16 %v1851_v44  ;;  %v1852_v48 = vunpack.i.l.bf16 %v1851_v44  ;;  %v1623_v44 = vld [vmem:[%s2697_s1 + $0x178] sm:$0xff] }
  0x9d   : > { %v1857_v50 = vunpack.i.l.bf16 %v1856_v46  ;;  %v2226_v51 = vpop.f32.mrf.mxu1  ;;  %v1858_v55 = vunpack.i.h.bf16 %v1856_v46  ;;  %1664 = vmatmul.msk.f32.gmra.mxu0 %vm213_vm0, %v1652_v32  ;;  %v1673_v46 = vld [vmem:[%s2697_s1 + $0x208] sm:$0xff]  ;;  %v1694_v32 = vld [vmem:[%s2697_s1 + $0x250] sm:$0xff] }
  0x9e   : > { %875 = vmatpush.msra.mxu1 %v1852_v48  ;;  %1013 = vmatpush.msra.mxu2 %v1833_v41  ;;  %v1672_v41 = vld [vmem:[%s2697_s1 + $0x200] sm:$0xff] }
  0x9f   : > { %1160 = vmatpush.msra.mxu3 %v1857_v50  ;;  %v1588_v48 = vld [vmem:[%s2697_s1 + $0x100] sm:$0xff]  ;;  %v1655_v50 = vld [vmem:[%s2697_s1 + $0x1d8] sm:$0xff] }
  0xa0   : > { %876 = vmatpush.msra.mxu1 %v1853_v47  ;;  %1014 = vmatpush.msra.mxu2 %v1843_v45  ;;  %v1654_v45 = vld [vmem:[%s2697_s1 + $0x1d0] sm:$0xff] }
  0xa1   : > { %1593 = vmatmul.msk.f32.gmra.mxu2 %vm213_vm0, %v1581_v53  ;;  %1161 = vmatpush.msra.mxu3 %v1862_v49  ;;  %v1716_v49 = vld [vmem:[%s2697_s1 + $0x2a0] sm:$0xff] }
  0xa2   : > { %1015 = vmatpush.msra.mxu2 %v1848_v52  ;;  %1634 = vmatmul.msk.f32.gmra.mxu3 %vm213_vm0, %v1622_v36  ;;  %v1674_v52 = vld [vmem:[%s2697_s1 + $0x210] sm:$0xff] }
  0xa3   : > { %v1866_v59 = vpop.permute.xlu0 %1865  ;;  %1162 = vmatpush.msra.mxu3 %v1877_v54  ;;  %v1589_v54 = vld [vmem:[%s2697_s1 + $0x108] sm:$0xff] }
  0xa4   : > { %v1871_v61 = vpop.permute.xlu1 %1870  ;;  %v1868_v62 = vunpack.i.h.bf16 %v1866_v59  ;;  %v1867_v63 = vunpack.i.l.bf16 %v1866_v59  ;;  %1016 = vmatpush.msra.mxu2 %v1858_v55  ;;  %v1717_v55 = vld [vmem:[%s2697_s1 + $0x2a8] sm:$0xff]  ;;  %v1590_v59 = vld [vmem:[%s2697_s1 + $0x110] sm:$0xff] }
  0xa5   : > { %v1873_v1 = vunpack.i.h.bf16 %v1871_v61  ;;  %v1872_v2 = vunpack.i.l.bf16 %v1871_v61  ;;  %v2242_v3 = vpop.f32.mrf.mxu1  ;;  %1665 = vmatmul.msk.f32.gmra.mxu0 %vm213_vm0, %v1653_v38 }
  0xa6   : > { %1295 = vmatpush.msra.mxu0 %v1867_v63  ;;  %1017 = vmatpush.msra.mxu2 %v1863_v57  ;;  %v1675_v57 = vld [vmem:[%s2697_s1 + $0x218] sm:$0xff]  ;;  %v1741_v63 = vld [vmem:[%s2697_s1 + $0x308] sm:$0xff] }
  0xa7   : > { %877 = vmatpush.msra.mxu1 %v1872_v2  ;;  %v1591_v2 = vld [vmem:[%s2697_s1 + $0x118] sm:$0xff] }
  0xa8   : > { %1296 = vmatpush.msra.mxu0 %v1868_v62  ;;  %1018 = vmatpush.msra.mxu2 %v1878_v60  ;;  %v1718_v62 = vld [vmem:[%s2697_s1 + $0x2b0] sm:$0xff] }
  0xa9   : > { %878 = vmatpush.msra.mxu1 %v1873_v1  ;;  %1594 = vmatmul.msk.f32.gmra.mxu2 %vm213_vm0, %v1582_v4 }
  0xaa   : > { %1635 = vmatmul.msk.f32.gmra.mxu3 %vm213_vm0, %v1623_v44  ;;  %v2392_v61 = vpop.f32.mrf.mxu0 }
  0xab   : > { %879 = vmatpush.msra.mxu1 %v1892_v5  ;;  %v1881_v10 = vpop.permute.xlu0 %1880 }
  0xac   : > { %v1886_v11 = vpop.permute.xlu1 %1885  ;;  %v1883_v12 = vunpack.i.h.bf16 %v1881_v10  ;;  %v1882_v13 = vunpack.i.l.bf16 %v1881_v10  ;;  %v1677_v10 = vld [vmem:[%s2697_s1 + $0x228] sm:$0xff] }
  0xad   : > { %880 = vmatpush.msra.mxu1 %v1893_v6  ;;  %v1888_v15 = vunpack.i.h.bf16 %v1886_v11  ;;  %v1887_v16 = vunpack.i.l.bf16 %v1886_v11  ;;  %1666 = vmatmul.msk.f32.gmra.mxu0 %vm213_vm0, %v1654_v45  ;;  %v1719_v6 = vld [vmem:[%s2697_s1 + $0x2b8] sm:$0xff] }
  0xae   : > { %v2259_v14 = vpop.f32.mrf.mxu1  ;;  %1680 = vmatmul.msk.f32.vlgmr.msra.gmra.mxu1 %vm213_vm0, %v1668_v9  ;;  %1163 = vmatpush.msra.mxu3 %v1882_v13  ;;  %v1918_v9 = vmov 0  }
  0xaf   : > { %1297 = vmatpush.msra.mxu0 %v1887_v16  ;;  %v294_v60 = vpop.f32.mrf.mxu3  ;;  %1905 = vset.pattern.permute.xlu0 %v1918_v9  ;;  %v1720_v16 = vld [vmem:[%s2697_s1 + $0x2c0] sm:$0xff] }
  0xb0   : > { %1164 = vmatpush.msra.mxu3 %v1883_v12  ;;  %1906 = vset.pattern.permute.xlu1 %v1918_v9  ;;  %v1692_v12 = vld [vmem:[%s2697_s1 + $0x240] sm:$0xff] }
  0xb1   : > { %1595 = vmatmul.msk.f32.gmra.mxu2 %vm213_vm0, %v1583_v17  ;;  %1298 = vmatpush.msra.mxu0 %v1888_v15  ;;  %v1743_v17 = vld [vmem:[%s2697_s1 + $0x318] sm:$0xff] }
  0xb2   : > { %1728 = vmatmul.msk.f32.vlgmr.msra.gmra.mxu3 %vm213_vm0, %v1716_v49  ;;  %v2413_v5 = vpop.f32.mrf.mxu0  ;;  %1383 = vperm.xlu0 %1905, %v1353_v7  }
  0xb3   : > { %v1896_v21 = vpop.permute.xlu0 %1895  ;;  %1904 = vset.pattern.permute.xlu2 %v1918_v9  ;;  %v1725_v9 = vld [vmem:[%s2697_s1 + $0x2e8] sm:$0xff] }
  0xb4   : > { %v1898_v22 = vunpack.i.h.bf16 %v1896_v21  ;;  %v1897_v23 = vunpack.i.l.bf16 %v1896_v21  ;;  %v1901_v37 = vpop.permute.xlu1 %1900  ;;  %v2453_v21 = vpop.f32.mrf.mxu2 }
  0xb5   : > { %v1903_v39 = vunpack.i.h.bf16 %v1901_v37  ;;  %v1902_v40 = vunpack.i.l.bf16 %v1901_v37  ;;  %1667 = vmatmul.msk.f32.gmra.mxu0 %vm213_vm0, %v1655_v50  ;;  %v1352_v37 = vld [vmem:[%s2698_s2] sm:$0xff]  ;;  %v1723_v50 = vld [vmem:[%s2697_s1 + $0x2d8] sm:$0xff] }
  0xb6   : > { %v2277_v24 = vpop.f32.mrf.mxu1  ;;  %1681 = vmatmul.msk.f32.gmra.mxu1 %vm213_vm0, %v1669_v20  ;;  %1299 = vmatpush.msra.mxu0 %v1897_v23  ;;  %v1693_v20 = vld [vmem:[%s2697_s1 + $0x248] sm:$0xff] }
  0xb7   : > { %1378 = vperm.xlu2 %1904, %v1352_v37  }
  0xb8   : > { %1300 = vmatpush.msra.mxu0 %v1898_v22  ;;  %v297_v4 = vpop.f32.mrf.mxu3 }
  0xb9   : > { %1596 = vmatmul.msk.f32.gmra.mxu2 %vm213_vm0, %v1584_v25  ;;  %v1354_v25 = vld [vmem:[%s2698_s2 + $0x10] sm:$0xff] }
  0xba   : > { %1301 = vmatpush.msra.mxu0 %v1902_v40  ;;  %1729 = vmatmul.msk.f32.gmra.mxu3 %vm213_vm0, %v1717_v55  ;;  %v2436_v15 = vpop.f32.mrf.mxu0  ;;  %v1745_v40 = vld [vmem:[%s2697_s1 + $0x328] sm:$0xff] }
  0xbb   : > { %1388 = vperm.xlu1 %1906, %v1354_v25   ;;  %v1749_v25 = vld [vmem:[%s2697_s1 + $0x348] sm:$0xff] }
  0xbc   : > { %1302 = vmatpush.msra.mxu0 %v1903_v39  ;;  %v2478_v36 = vpop.f32.mrf.mxu2  ;;  %v1722_v39 = vld [vmem:[%s2697_s1 + $0x2d0] sm:$0xff] }
  0xbd   : > { %1752 = vmatmul.msk.f32.vlgmr.msra.gmra.mxu0 %vm213_vm0, %v1740_v56 }
  0xbe   : > { %v2295_v29 = vpop.f32.mrf.mxu1  ;;  %1682 = vmatmul.msk.f32.gmra.mxu1 %vm213_vm0, %v1670_v28  ;;  %v1744_v28 = vld [vmem:[%s2697_s1 + $0x320] sm:$0xff] }
  0xc0   : > { %v300_v13 = vpop.f32.mrf.mxu3 }
  0xc1   : > { %1597 = vmatmul.msk.f32.gmra.mxu2 %vm213_vm0, %v1585_v30  ;;  %v1679_v30 = vld [vmem:[%s2697_s1 + $0x238] sm:$0xff] }
  0xc2   : > { %1730 = vmatmul.msk.f32.gmra.mxu3 %vm213_vm0, %v1718_v62  ;;  %v736_v26 = vpop.f32.mrf.mxu0 }
  0xc5   : > { %1753 = vmatmul.msk.f32.gmra.mxu0 %vm213_vm0, %v1741_v63 }
  0xc6   : > { %v2313_v34 = vpop.f32.mrf.mxu1  ;;  %1683 = vmatmul.msk.f32.gmra.mxu1 %vm213_vm0, %v1671_v33 }
  0xc8   : > { %v613_v23 = vpop.f32.mrf.mxu3 }
  0xc9   : > { %1598 = vmatmul.msk.f32.gmra.mxu2 %vm213_vm0, %v1586_v35 }
  0xca   : > { %1731 = vmatmul.msk.f32.gmra.mxu3 %vm213_vm0, %v1719_v6  ;;  %v739_v38 = vpop.f32.mrf.mxu0 }
  0xcd   : > { %1754 = vmatmul.msk.f32.gmra.mxu0 %vm213_vm0, %v1742_v8  ;;  %v360_v8 = vadd.f32 %v2295_v29, %v2413_v5  ;;  %v1359_v5 = vld [vmem:[%s2698_s2 + $0x38] sm:$0xff] }
  0xce   : > { %v2331_v42 = vpop.f32.mrf.mxu1  ;;  %1684 = vmatmul.msk.f32.gmra.mxu1 %vm213_vm0, %v1672_v41 }
  0xcf   : > { %v366_v37 = vadd.f32 %v2331_v42, %v2226_v51  ;;  %v1361_v42 = vld [vmem:[%s2698_s2 + $0x48] sm:$0xff] }
  0xd0   : > { %v616_v35 = vpop.f32.mrf.mxu3 }
  0xd1   : > { %1599 = vmatmul.msk.f32.gmra.mxu2 %vm213_vm0, %v1587_v43  ;;  %v1695_v43 = vld [vmem:[%s2697_s1 + $0x258] sm:$0xff] }
  0xd2   : > { %1732 = vmatmul.msk.f32.gmra.mxu3 %vm213_vm0, %v1720_v16  ;;  %v742_v49 = vpop.f32.mrf.mxu0  ;;  %v1698_v16 = vld [vmem:[%s2697_s1 + $0x270] sm:$0xff] }
  0xd5   : > { %1755 = vmatmul.msk.f32.gmra.mxu0 %vm213_vm0, %v1743_v17 }
  0xd6   : > { %v2349_v47 = vpop.f32.mrf.mxu1  ;;  %1685 = vmatmul.msk.f32.gmra.mxu1 %vm213_vm0, %v1673_v46  ;;  %v1356_v46 = vld [vmem:[%s2698_s2 + $0x20] sm:$0xff] }
  0xd7   : > { %1398 = vperm.xlu1 %1906, %v1356_v46   ;;  %v1360_v46 = vld [vmem:[%s2698_s2 + $0x40] sm:$0xff] }
  0xd8   : > { %v619_v45 = vpop.f32.mrf.mxu3 }
  0xd9   : > { %1600 = vmatmul.msk.f32.gmra.mxu2 %vm213_vm0, %v1588_v48  ;;  %v2501_v48 = vpop.f32.mrf.mxu2 }
  0xda   : > { %1733 = vmatmul.msk.f32.gmra.mxu3 %vm213_vm0, %v1721_v27  ;;  %v745_v56 = vpop.f32.mrf.mxu0 }
  0xdd   : > { %1756 = vmatmul.msk.f32.gmra.mxu0 %vm213_vm0, %v1744_v28  ;;  %v1699_v28 = vld [vmem:[%s2697_s1 + $0x278] sm:$0xff] }
  0xde   : > { %v2367_v53 = vpop.f32.mrf.mxu1  ;;  %1686 = vmatmul.msk.f32.gmra.mxu1 %vm213_vm0, %v1674_v52  ;;  %v1746_v52 = vld [vmem:[%s2697_s1 + $0x330] sm:$0xff] }
  0xdf   : > { %1413 = vperm.xlu1 %1906, %v1359_v5  }
  0xe0   : > { %v622_v55 = vpop.f32.mrf.mxu3 }
  0xe1   : > { %1601 = vmatmul.msk.f32.gmra.mxu2 %vm213_vm0, %v1589_v54  ;;  %v1696_v54 = vld [vmem:[%s2697_s1 + $0x260] sm:$0xff] }
  0xe2   : > { %1734 = vmatmul.msk.f32.gmra.mxu3 %vm213_vm0, %v1722_v39  ;;  %v748_v7 = vpop.f32.mrf.mxu0  ;;  %v1750_v39 = vld [vmem:[%s2697_s1 + $0x350] sm:$0xff] }
  0xe5   : > { %1757 = vmatmul.msk.f32.gmra.mxu0 %vm213_vm0, %v1745_v40 }
  0xe6   : > { %v2385_v58 = vpop.f32.mrf.mxu1  ;;  %1687 = vmatmul.msk.f32.gmra.mxu1 %vm213_vm0, %v1675_v57  ;;  %v357_v57 = vadd.f32 %v2277_v24, %v2392_v61  ;;  %v1358_v61 = vld [vmem:[%s2698_s2 + $0x30] sm:$0xff] }
  0xe7   : > { %1408 = vperm.xlu0 %1905, %v1358_v61  }
  0xe8   : > { %v2528_v24 = vpop.f32.mrf.mxu3 }
  0xe9   : > { %1602 = vmatmul.msk.f32.gmra.mxu2 %vm213_vm0, %v1590_v59  ;;  %v1724_v59 = vld [vmem:[%s2697_s1 + $0x2e0] sm:$0xff] }
  0xea   : > { %1735 = vmatmul.msk.f32.gmra.mxu3 %vm213_vm0, %v1723_v50 }
  0xed   : > { %1758 = vmatmul.msk.f32.gmra.mxu0 %vm213_vm0, %v1746_v52  ;;  %v369_v52 = vadd.f32 %v2349_v47, %v2242_v3 }
  0xee   : > { %v2405_v1 = vpop.f32.mrf.mxu1  ;;  %1688 = vmatmul.msk.f32.gmra.mxu1 %vm213_vm0, %v1676_v0  ;;  %v1697_v0 = vld [vmem:[%s2697_s1 + $0x268] sm:$0xff] }
  0xef   : > { %1423 = vperm.xlu0 %1905, %v1361_v42  }
  0xf0   : > { %v628_v29 = vpop.f32.mrf.mxu3 }
  0xf1   : > { %1603 = vmatmul.msk.f32.gmra.mxu2 %vm213_vm0, %v1591_v2 }
  0xf2   : > { %1736 = vmatmul.msk.f32.gmra.mxu3 %vm213_vm0, %v1724_v59 }
  0xf6   : > { %v2428_v11 = vpop.f32.mrf.mxu1  ;;  %1689 = vmatmul.msk.f32.gmra.mxu1 %vm213_vm0, %v1677_v10  ;;  %v1748_v10 = vld [vmem:[%s2697_s1 + $0x340] sm:$0xff] }
  0xf9   : > { %1704 = vmatmul.msk.f32.vlgmr.msra.gmra.mxu2 %vm213_vm0, %v1692_v12 }
  0xfa   : > { %1737 = vmatmul.msk.f32.gmra.mxu3 %vm213_vm0, %v1725_v9  ;;  %v375_v9 = vadd.f32 %v2385_v58, %v2453_v21  ;;  %v381_v21 = vadd.f32 %v2428_v11, %v2501_v48 }
  0xfe   : > { %v383_v19 = vpop.f32.mrf.mxu1  ;;  %1690 = vmatmul.msk.f32.gmra.mxu1 %vm213_vm0, %v1678_v18 }
  0xff   : > { %v2455_v22 = vadd.f32 %v383_v19, %v294_v60  ;;  %v1747_v60 = vld [vmem:[%s2697_s1 + $0x338] sm:$0xff]  ;;  %v751_v19 = vpop.f32.mrf.mxu0 }
 0x100   : > { %1759 = vmatmul.msk.f32.gmra.mxu0 %vm213_vm0, %v1747_v60 }
 0x101   : > { %1705 = vmatmul.msk.f32.gmra.mxu2 %vm213_vm0, %v1693_v20  ;;  %v363_v20 = vadd.f32 %v2313_v34, %v2436_v15  ;;  %v631_v34 = vpop.f32.mrf.mxu3  ;;  %v1357_v15 = vld [vmem:[%s2698_s2 + $0x28] sm:$0xff] }
 0x106   : > { %v386_v31 = vpop.f32.mrf.mxu1  ;;  %1691 = vmatmul.msk.f32.gmra.mxu1 %vm213_vm0, %v1679_v30 }
 0x107   : > { %v2476_v33 = vadd.f32 %v386_v31, %v297_v4  ;;  %v1355_v4 = vld [vmem:[%s2698_s2 + $0x18] sm:$0xff]  ;;  %v1362_v31 = vld [vmem:[%s2698_s2 + $0x50] sm:$0xff] }
 0x108   : > { %1393 = vperm.xlu2 %1904, %v1355_v4   ;;  %1760 = vmatmul.msk.f32.gmra.mxu0 %vm213_vm0, %v1748_v10 }
 0x109   : > { %1706 = vmatmul.msk.f32.gmra.mxu2 %vm213_vm0, %v1694_v32  ;;  %1428 = vperm.xlu1 %1906, %v1362_v31   ;;  %v634_v51 = vpop.f32.mrf.mxu3 }
 0x10e   : > { %v389_v41 = vpop.f32.mrf.mxu1 }
 0x10f   : > { %v2495_v44 = vadd.f32 %v389_v41, %v300_v13 }
 0x110   : > { %1761 = vmatmul.msk.f32.gmra.mxu0 %vm213_vm0, %v1749_v25  ;;  %1403 = vperm.xlu2 %1904, %v1357_v15  }
 0x111   : > { %1707 = vmatmul.msk.f32.gmra.mxu2 %vm213_vm0, %v1695_v43  ;;  %v1700_v43 = vld [vmem:[%s2697_s1 + $0x280] sm:$0xff]  ;;  %v637_v60 = vpop.f32.mrf.mxu3 }
 0x118   : > { %1762 = vmatmul.msk.f32.gmra.mxu0 %vm213_vm0, %v1750_v39  ;;  %1418 = vperm.xlu2 %1904, %v1360_v46  }
 0x119   : > { %1708 = vmatmul.msk.f32.gmra.mxu2 %vm213_vm0, %v1696_v54  ;;  %v1751_v54 = vld [vmem:[%s2697_s1 + $0x358] sm:$0xff] }
 0x11c   : > { %v490_v62 = vpop.f32.mrf.mxu2 }
 0x11d   : > { %v526_v63 = vadd.f32 %v490_v62, %v357_v57  ;;  %v1363_v62 = vld [vmem:[%s2698_s2 + $0x58] sm:$0xff]  ;;  %v640_v4 = vpop.f32.mrf.mxu3 }
 0x11f   : > { %v649_v2 = vadd.f32 %v613_v23, %v526_v63  ;;  %v1726_v23 = vld [vmem:[%s2697_s1 + $0x2f0] sm:$0xff]  ;;  %v372_v63 = vadd.f32 %v2367_v53, %v2259_v14  ;;  %v1703_v14 = vld [vmem:[%s2697_s1 + $0x298] sm:$0xff] }
 0x120   : > { %1738 = vmatmul.msk.f32.gmra.mxu3 %vm213_vm0, %v1726_v23  ;;  %1763 = vmatmul.msk.f32.gmra.mxu0 %vm213_vm0, %v1751_v54 }
 0x121   : > { %v2536_v6 = vadd.f32 %v736_v26, %v649_v2  ;;  %1709 = vmatmul.msk.f32.gmra.mxu2 %vm213_vm0, %v1697_v0  ;;  %1433 = vperm.xlu2 %1904, %v1363_v62  }
 0x124   : > { %v493_v12 = vpop.f32.mrf.mxu2 }
 0x125   : > { %v527_v13 = vadd.f32 %v493_v12, %v360_v8 }
 0x127   : > { %v650_v17 = vadd.f32 %v616_v35, %v527_v13  ;;  %v754_v35 = vpop.f32.mrf.mxu0 }
 0x129   : > { %v2555_v18 = vadd.f32 %v739_v38, %v650_v17  ;;  %1710 = vmatmul.msk.f32.gmra.mxu2 %vm213_vm0, %v1698_v16  ;;  %v1727_v38 = vld [vmem:[%s2697_s1 + $0x2f8] sm:$0xff]  ;;  %v643_v16 = vpop.f32.mrf.mxu3  ;;  %v378_v17 = vadd.f32 %v2405_v1, %v2478_v36 }
 0x12a   : > { %1739 = vmatmul.msk.f32.gmra.mxu3 %vm213_vm0, %v1727_v38 }
 0x12c   : > { %v496_v26 = vpop.f32.mrf.mxu2 }
 0x12d   : > { %v528_v27 = vadd.f32 %v496_v26, %v363_v20 }
 0x12f   : > { %v651_v30 = vadd.f32 %v619_v45, %v528_v27  ;;  %v757_v50 = vpop.f32.mrf.mxu0 }
 0x131   : > { %v2577_v32 = vadd.f32 %v742_v49, %v651_v30  ;;  %1711 = vmatmul.msk.f32.gmra.mxu2 %vm213_vm0, %v1699_v28  ;;  %v646_v25 = vpop.f32.mrf.mxu3 }
 0x134   : > { %v499_v40 = vpop.f32.mrf.mxu2 }
 0x135   : > { %v529_v41 = vadd.f32 %v499_v40, %v366_v37 }
 0x137   : > { %v652_v45 = vadd.f32 %v622_v55, %v529_v41  ;;  %v760_v47 = vpop.f32.mrf.mxu0 }
 0x139   : > { %v2599_v49 = vadd.f32 %v745_v56, %v652_v45  ;;  %1712 = vmatmul.msk.f32.gmra.mxu2 %vm213_vm0, %v1700_v43  ;;  %v1701_v56 = vld [vmem:[%s2697_s1 + $0x288] sm:$0xff]  ;;  %v1166_v36 = vpop.f32.mrf.mxu3 }
 0x13c   : > { %v502_v55 = vpop.f32.mrf.mxu2 }
 0x13d   : > { %v530_v57 = vadd.f32 %v502_v55, %v369_v52 }
 0x13f   : > { %v653_v59 = vadd.f32 %v2528_v24, %v530_v57  ;;  %v1702_v24 = vld [vmem:[%s2697_s1 + $0x290] sm:$0xff] }
 0x141   : > { %v2615_v3 = vadd.f32 %v748_v7, %v653_v59  ;;  %1713 = vmatmul.msk.f32.gmra.mxu2 %vm213_vm0, %v1701_v56  ;;  %v763_v7 = vpop.f32.mrf.mxu0  ;;  %v1169_v40 = vpop.f32.mrf.mxu3 }
 0x142   : > { %v1379_v59 = vpop.permute.xlu2 %1378 }
 0x144   : > { %v505_v0 = vpop.f32.mrf.mxu2 }
 0x145   : > { %v531_v2 = vadd.f32 %v505_v0, %v372_v63 }
 0x147   : > { %v654_v61 = vadd.f32 %v628_v29, %v531_v2 }
 0x149   : > { %v2623_v8 = vadd.f32 %v751_v19, %v654_v61  ;;  %1714 = vmatmul.msk.f32.gmra.mxu2 %vm213_vm0, %v1702_v24  ;;  %v766_v5 = vpop.f32.mrf.mxu0  ;;  %v1384_v61 = vpop.permute.xlu0 %1383 }
 0x14c   : > { %v508_v10 = vpop.f32.mrf.mxu2 }
 0x14d   : > { %v532_v12 = vadd.f32 %v508_v10, %v375_v9 }
 0x14f   : > { %v655_v53 = vadd.f32 %v631_v34, %v532_v12  ;;  %v882_v34 = vpop.f32.mrf.mxu1 }
 0x150   : > { %v918_v52 = vadd.f32 %v882_v34, %v2536_v6 }
 0x151   : > { %v2631_v13 = vadd.f32 %v754_v35, %v655_v53  ;;  %1715 = vmatmul.msk.f32.gmra.mxu2 %vm213_vm0, %v1703_v14  ;;  %v769_v27 = vpop.f32.mrf.mxu0 }
 0x154   : > { %v511_v29 = vpop.f32.mrf.mxu2 }
 0x155   : > { %v533_v19 = vadd.f32 %v511_v29, %v378_v17  ;;  %v1389_v17 = vpop.permute.xlu1 %1388 }
 0x157   : > { %v656_v20 = vadd.f32 %v634_v51, %v533_v19  ;;  %v885_v38 = vpop.f32.mrf.mxu1 }
 0x158   : > { %v919_v62 = vadd.f32 %v885_v38, %v2555_v18 }
 0x159   : > { %v2636_v58 = vadd.f32 %v757_v50, %v656_v20  ;;  %v1304_v35 = vpop.f32.mrf.mxu0  ;;  %v1172_v50 = vpop.f32.mrf.mxu3 }
 0x15c   : > { %v514_v23 = vpop.f32.mrf.mxu2 }
 0x15d   : > { %v534_v26 = vadd.f32 %v514_v23, %v381_v21 }
 0x15f   : > { %v657_v28 = vadd.f32 %v637_v60, %v534_v26  ;;  %v888_v42 = vpop.f32.mrf.mxu1 }
 0x161   : > { %v2640_v30 = vadd.f32 %v760_v47, %v657_v28  ;;  %v1307_v43 = vpop.f32.mrf.mxu0  ;;  %v1175_v47 = vpop.f32.mrf.mxu3 }
 0x164   : > { %v517_v15 = vpop.f32.mrf.mxu2 }
 0x165   : > { %v535_v1 = vadd.f32 %v517_v15, %v2455_v22 }
 0x167   : > { %v658_v31 = vadd.f32 %v640_v4, %v535_v1  ;;  %v891_v56 = vpop.f32.mrf.mxu1 }
 0x168   : > { %v921_v19 = vadd.f32 %v891_v56, %v2599_v49 }
 0x169   : > { %v2643_v37 = vadd.f32 %v763_v7, %v658_v31  ;;  %v1310_v55 = vpop.f32.mrf.mxu0  ;;  %v920_v7 = vadd.f32 %v888_v42, %v2577_v32  ;;  %v1178_v53 = vpop.f32.mrf.mxu3 }
 0x16c   : > { %v520_v39 = vpop.f32.mrf.mxu2 }
 0x16d   : > { %v536_v11 = vadd.f32 %v520_v39, %v2476_v33 }
 0x16f   : > { %v659_v48 = vadd.f32 %v643_v16, %v536_v11  ;;  %v894_v4 = vpop.f32.mrf.mxu1  ;;  %v1399_v11 = vpop.permute.xlu1 %1398 }
 0x170   : > { %v922_v1 = vadd.f32 %v894_v4, %v2615_v3 }
 0x171   : > { %v2646_v41 = vadd.f32 %v766_v5, %v659_v48  ;;  %v1313_v2 = vpop.f32.mrf.mxu0  ;;  %v1181_v28 = vpop.f32.mrf.mxu3 }
 0x174   : > { %v523_v45 = vpop.f32.mrf.mxu2 }
 0x175   : > { %v537_v51 = vadd.f32 %v523_v45, %v2495_v44 }
 0x177   : > { %v660_v22 = vadd.f32 %v646_v25, %v537_v51  ;;  %v897_v21 = vpop.f32.mrf.mxu1 }
 0x179   : > { %v2649_v46 = vadd.f32 %v769_v27, %v660_v22  ;;  %v1316_v29 = vpop.f32.mrf.mxu0  ;;  %v1394_v27 = vpop.permute.xlu2 %1393 }
 0x17c   : > { %v1020_v54 = vpop.f32.mrf.mxu2 }
 0x17d   : > { %v1056_v57 = vadd.f32 %v1020_v54, %v918_v52 }
 0x17f   : > { %v1202_v33 = vadd.f32 %v1166_v36, %v1056_v57  ;;  %v900_v38 = vpop.f32.mrf.mxu1 }
 0x180   : > { %v924_v57 = vadd.f32 %v900_v38, %v2631_v13 }
 0x181   : > { %v1340_v60 = vadd.f32 %v1304_v35, %v1202_v33  ;;  %v1319_v15 = vpop.f32.mrf.mxu0  ;;  %v1404_v54 = vpop.permute.xlu2 %1403 }
 0x183   : > { %vm1364_vm1 = vcmp.gt.f32.partialorder %v1340_v60, 0.0  ;;  %v1436_v44 = vmul.f32 %v1379_v59, %v1340_v60 }
 0x184   : > { %v1023_v6 = vpop.f32.mrf.mxu2 }
 0x185   : > { %v1448_v63 = vsel %vm1364_vm1, %v1340_v60, %v1436_v44  ;;  %v1057_v0 = vadd.f32 %v1023_v6, %v919_v62  ;;  %v1409_v6 = vpop.permute.xlu0 %1408 }
 0x186   : > { %1461 = vst.msk [vmem:[%s2657_s15] sm:$0xff] %vm1460_vm2, %v1448_v63 }
 0x187   : > { %v1203_v24 = vadd.f32 %v1169_v40, %v1057_v0  ;;  %v1184_v40 = vpop.f32.mrf.mxu3  ;;  %v903_v52 = vpop.f32.mrf.mxu1 }
 0x188   : > { %v925_v0 = vadd.f32 %v903_v52, %v2636_v58 }
 0x189   : > { %v1341_v18 = vadd.f32 %v1307_v43, %v1203_v24  ;;  %v923_v43 = vadd.f32 %v897_v21, %v2623_v8  ;;  %v1322_v3 = vpop.f32.mrf.mxu0 }
 0x18b   : > { %vm1365_vm3 = vcmp.gt.f32.partialorder %v1341_v18, 0.0  ;;  %v1437_v9 = vmul.f32 %v1384_v61, %v1341_v18 }
 0x18c   : > { %v1026_v10 = vpop.f32.mrf.mxu2 }
 0x18d   : > { %v1449_v12 = vsel %vm1365_vm3, %v1341_v18, %v1437_v9  ;;  %v1058_v14 = vadd.f32 %v1026_v10, %v920_v7  ;;  %v1414_v7 = vpop.permute.xlu1 %1413 }
 0x18e   : > { %1462 = vst.msk [vmem:[%s2657_s15 + $0x8] sm:$0xff] %vm1460_vm2, %v1449_v12 }
 0x18f   : > { %v1204_v16 = vadd.f32 %v1172_v50, %v1058_v14  ;;  %v1187_v8 = vpop.f32.mrf.mxu3  ;;  %v906_v63 = vpop.f32.mrf.mxu1 }
 0x190   : > { %v926_v12 = vadd.f32 %v906_v63, %v2640_v30 }
 0x191   : > { %v1342_v5 = vadd.f32 %v1310_v55, %v1204_v16  ;;  %v1325_v62 = vpop.f32.mrf.mxu0 }
 0x193   : > { %vm1366_vm4 = vcmp.gt.f32.partialorder %v1342_v5, 0.0  ;;  %v1438_v20 = vmul.f32 %v1389_v17, %v1342_v5 }
 0x194   : > { %v1029_v23 = vpop.f32.mrf.mxu2 }
 0x195   : > { %v1450_v32 = vsel %vm1366_vm4, %v1342_v5, %v1438_v20  ;;  %v1059_v25 = vadd.f32 %v1029_v23, %v921_v19  ;;  %v1419_v20 = vpop.permute.xlu2 %1418 }
 0x196   : > { %1463 = vst.msk [vmem:[%s2657_s15 + $0x10] sm:$0xff] %vm1460_vm2, %v1450_v32 }
 0x197   : > { %v1205_v26 = vadd.f32 %v1175_v47, %v1059_v25  ;;  %v1190_v18 = vpop.f32.mrf.mxu3 }
 0x199   : > { %v1343_v34 = vadd.f32 %v1313_v2, %v1205_v26  ;;  %v1328_v9 = vpop.f32.mrf.mxu0 }
 0x19b   : > { %vm1367_vm5 = vcmp.gt.f32.partialorder %v1343_v34, 0.0  ;;  %v1439_v36 = vmul.f32 %v1394_v27, %v1343_v34 }
 0x19c   : > { %v1032_v31 = vpop.f32.mrf.mxu2 }
 0x19d   : > { %v1451_v49 = vsel %vm1367_vm5, %v1343_v34, %v1439_v36  ;;  %v1060_v35 = vadd.f32 %v1032_v31, %v922_v1  ;;  %v1424_v34 = vpop.permute.xlu0 %1423 }
 0x19e   : > { %1464 = vst.msk [vmem:[%s2657_s15 + $0x18] sm:$0xff] %vm1460_vm2, %v1451_v49 }
 0x19f   : > { %v1206_v39 = vadd.f32 %v1178_v53, %v1060_v35  ;;  %v909_v53 = vpop.f32.mrf.mxu1  ;;  %v1193_v5 = vpop.f32.mrf.mxu3 }
 0x1a0   : > { %v927_v23 = vadd.f32 %v909_v53, %v2643_v37 }
 0x1a1   : > { %v1344_v48 = vadd.f32 %v1316_v29, %v1206_v39  ;;  %v1331_v21 = vpop.f32.mrf.mxu0 }
 0x1a3   : > { %vm1368_vm6 = vcmp.gt.f32.partialorder %v1344_v48, 0.0  ;;  %v1440_v45 = vmul.f32 %v1399_v11, %v1344_v48 }
 0x1a4   : > { %v1035_v51 = vpop.f32.mrf.mxu2 }
 0x1a5   : > { %v1452_v42 = vsel %vm1368_vm6, %v1344_v48, %v1440_v45  ;;  %v1061_v22 = vadd.f32 %v1035_v51, %v923_v43 }
 0x1a6   : > { %1465 = vst.msk [vmem:[%s2657_s15 + $0x20] sm:$0xff] %vm1460_vm2, %v1452_v42 }
 0x1a7   : > { %v1207_v50 = vadd.f32 %v1181_v28, %v1061_v22  ;;  %v912_v27 = vpop.f32.mrf.mxu1  ;;  %v1196_v1 = vpop.f32.mrf.mxu3 }
 0x1a8   : > { %v928_v36 = vadd.f32 %v912_v27, %v2646_v41 }
 0x1a9   : > { %v1345_v55 = vadd.f32 %v1319_v15, %v1207_v50  ;;  %v1334_v37 = vpop.f32.mrf.mxu0 }
 0x1ab   : > { %vm1369_vm7 = vcmp.gt.f32.partialorder %v1345_v55, 0.0  ;;  %v1441_v33 = vmul.f32 %v1404_v54, %v1345_v55  ;;  %v1434_v54 = vpop.permute.xlu2 %1433 }
 0x1ac   : > { %v1038_v56 = vpop.f32.mrf.mxu2 }
 0x1ad   : > { %v1453_v59 = vsel %vm1369_vm7, %v1345_v55, %v1441_v33  ;;  %v1062_v60 = vadd.f32 %v1038_v56, %v924_v57 }
 0x1ae   : > { %1466 = vst.msk [vmem:[%s2657_s15 + $0x28] sm:$0xff] %vm1460_vm2, %v1453_v59 }
 0x1af   : > { %v1208_v44 = vadd.f32 %v1184_v40, %v1062_v60  ;;  %v915_v11 = vpop.f32.mrf.mxu1  ;;  %v1429_v40 = vpop.permute.xlu1 %1428 }
 0x1b0   : > { %v929_v43 = vadd.f32 %v915_v11, %v2649_v46  ;;  %v1199_v41 = vpop.f32.mrf.mxu3 }
 0x1b1   : > { %v1346_v47 = vadd.f32 %v1322_v3, %v1208_v44  ;;  %v1337_v22 = vpop.f32.mrf.mxu0 }
 0x1b3   : > { %vm1370_vm8 = vcmp.gt.f32.partialorder %v1346_v47, 0.0  ;;  %v1442_v2 = vmul.f32 %v1409_v6, %v1346_v47 }
 0x1b4   : > { %v1041_v24 = vpop.f32.mrf.mxu2 }
 0x1b5   : > { %v1454_v13 = vsel %vm1370_vm8, %v1346_v47, %v1442_v2  ;;  %v1063_v61 = vadd.f32 %v1041_v24, %v925_v0 }
 0x1b6   : > { %1467 = vst.msk [vmem:[%s2657_s15 + $0x30] sm:$0xff] %vm1460_vm2, %v1454_v13 }
 0x1b7   : > { %v1209_v4 = vadd.f32 %v1187_v8, %v1063_v61 }
 0x1b9   : > { %v1347_v10 = vadd.f32 %v1325_v62, %v1209_v4 }
 0x1bb   : > { %vm1371_vm9 = vcmp.gt.f32.partialorder %v1347_v10, 0.0  ;;  %v1443_v14 = vmul.f32 %v1414_v7, %v1347_v10 }
 0x1bc   : > { %v1044_v16 = vpop.f32.mrf.mxu2 }
 0x1bd   : > { %v1455_v58 = vsel %vm1371_vm9, %v1347_v10, %v1443_v14  ;;  %v1064_v17 = vadd.f32 %v1044_v16, %v926_v12 }
 0x1be   : > { %1468 = vst.msk [vmem:[%s2657_s15 + $0x38] sm:$0xff] %vm1460_vm2, %v1455_v58 }
 0x1bf   : > { %v1210_v29 = vadd.f32 %v1190_v18, %v1064_v17 }
 0x1c1   : > { %v1348_v19 = vadd.f32 %v1328_v9, %v1210_v29 }
 0x1c3   : > { %vm1372_vm10 = vcmp.gt.f32.partialorder %v1348_v19, 0.0  ;;  %v1444_v32 = vmul.f32 %v1419_v20, %v1348_v19 }
 0x1c4   : > { %v1047_v25 = vpop.f32.mrf.mxu2 }
 0x1c5   : > { %v1456_v30 = vsel %vm1372_vm10, %v1348_v19, %v1444_v32  ;;  %v1065_v26 = vadd.f32 %v1047_v25, %v927_v23 }
 0x1c6   : > { %1469 = vst.msk [vmem:[%s2657_s15 + $0x40] sm:$0xff] %vm1460_vm2, %v1456_v30 }
 0x1c7   : > { %v1211_v28 = vadd.f32 %v1193_v5, %v1065_v26 }
 0x1c9   : > { %v1349_v15 = vadd.f32 %v1331_v21, %v1211_v28 }
 0x1cb   : > { %vm1373_vm11 = vcmp.gt.f32.partialorder %v1349_v15, 0.0  ;;  %v1445_v31 = vmul.f32 %v1424_v34, %v1349_v15 }
 0x1cc   : > { %v1050_v49 = vpop.f32.mrf.mxu2 }
 0x1cd   : > { %v1457_v35 = vsel %vm1373_vm11, %v1349_v15, %v1445_v31  ;;  %v1066_v38 = vadd.f32 %v1050_v49, %v928_v36 }
 0x1ce   : > { %1470 = vst.msk [vmem:[%s2657_s15 + $0x48] sm:$0xff] %vm1460_vm2, %v1457_v35 }
 0x1cf   : > { %v1212_v39 = vadd.f32 %v1196_v1, %v1066_v38 }
 0x1d1   : > { %v1350_v48 = vadd.f32 %v1334_v37, %v1212_v39 }
 0x1d3   : > { %vm1374_vm12 = vcmp.gt.f32.partialorder %v1350_v48, 0.0  ;;  %v1446_v45 = vmul.f32 %v1429_v40, %v1350_v48 }
 0x1d4   : > { %v1053_v51 = vpop.f32.mrf.mxu2 }
 0x1d5   : > { %v1458_v3 = vsel %vm1374_vm12, %v1350_v48, %v1446_v45  ;;  %v1067_v42 = vadd.f32 %v1053_v51, %v929_v43 }
 0x1d6   : > { %1471 = vst.msk [vmem:[%s2657_s15 + $0x50] sm:$0xff] %vm1460_vm2, %v1458_v3 }
 0x1d7   : > { %v1213_v50 = vadd.f32 %v1199_v41, %v1067_v42 }
 0x1d9   : > { %v1351_v52 = vadd.f32 %v1337_v22, %v1213_v50 }
 0x1db   : > { %vm1375_vm13 = vcmp.gt.f32.partialorder %v1351_v52, 0.0  ;;  %v1447_v55 = vmul.f32 %v1434_v54, %v1351_v52 }
 0x1dd   : > { %v1459_v57 = vsel %vm1375_vm13, %v1351_v52, %v1447_v55 }
 0x1de   : > { %1472 = vst.msk [vmem:[%s2657_s15 + $0x58] sm:$0xff] %vm1460_vm2, %v1459_v57 }
 0x1df PF: > { %s13_s12 = sadd.s32 1, %s1913_s12  }
 0x1e0   : > { %p10_p4 = scmp.ge.s32.totalorder %s13_s12, 4  }
 0x1e2   :  { %12 = sbr.rel (!%p10_p4) target bundleno = 1 (0x1), region = 73 }

// kernel: encode_forward.11
= control target key start
LH: loop header
LB: loop body
LE: loop exit
PB: predicated region body
PF: predicated region fallthrough
CT: control target
= control target key end

     0   :  { %s2208_s12 = smov 0   ;;  %s2915_s0 = inlined_call_operand.vmem [shape: f32[2,1,96,128], index: 0, kind: input, shape index: {}]   ;;  %s2916_s1 = inlined_call_operand.vmem [shape: f32[9,96,96], index: 1, kind: input, shape index: {}]   ;;  %s2917_s2 = inlined_call_operand.vmem [shape: f32[96,1], index: 2, kind: input, shape index: {}]   ;;  %s2918_s3 = inlined_call_operand.vmem [shape: f32[2,96,24], index: 3, kind: output, shape index: {}]  }
   0x1 LB: > { %s1661_s13 = sadd.s32 4294967295, %s2177_s12   ;;  %p1665_p0 = scmp.ge.s32.totalorder %s2177_s12, 1  ;;  %s2177_s12 = sphi %s2208_s12, %s13_s12  }
   0x2   : > { %p137_p1 = scmp.lt.s32.totalorder %s2177_s12, 3 }
   0x4   : > { %p138_p2 = pnand %p1665_p0, %p137_p1 }
   0x5   : > { %p161_p3 = scmp.lt.s32.totalorder (!%p138_p2), %s1661_s13, 1  ;;  %s2179_s18 = smov (!%p138_p2), 127  }
   0x6   : > { %141 = sbr.rel (%p138_p2) target bundleno = 522 (0x20a), region = 32  ;;  %s2180_s19 = smov (!%p138_p2), 126  }
   0x7   : > { %s2181_s20 = smov (!%p138_p2), 122   ;;  %s2182_s21 = smov (!%p138_p2), 121  }
   0x8   : > { %s2183_s22 = smov (!%p138_p2), 116   ;;  %s2184_s23 = smov (!%p138_p2), 115  }
   0x9   : > { %s2185_s24 = smov (!%p138_p2), 120   ;;  %s2186_s25 = smov (!%p138_p2), 114  }
   0xb   : > { %s2920_s13 = smov (!%p161_p3, %s1661_s13), 1  ;;  %v1671_v44 = vld [vmem:[%s2916_s1 + $0x78] sm:$0xff]  ;;  %vm256_vm0 = vcmask 785408   ;;  %v1674_v45 = vld [vmem:[%s2916_s1 + $0x90] sm:$0xff]  ;;  %v1677_v48 = vld [vmem:[%s2916_s1 + $0xa8] sm:$0xff]  ;;  %vm1593_vm2 = vcmask 195584  }
   0xc   : > { %s1910_s14 = smul.u32 96, %s2920_s13  ;;  %v1675_v60 = vld [vmem:[%s2916_s1 + $0x98] sm:$0xff]  ;;  %v1672_v61 = vld [vmem:[%s2916_s1 + $0x80] sm:$0xff] }
   0xe   : > { %s165_s17 = scalar_lea.vmem %s2915_s0, %s1910_s14  ;;  %s2876_s29 = scalar_lea.vmem %s2918_s3, %s1910_s14 }
   0xf   : > { %v2224_v0 = vld [vmem:[%s165_s17 + $0x50] sm:$0xff]  ;;  %v2226_v1 = vld [vmem:[%s165_s17 + $0x58] sm:$0xff]  ;;  %v2240_v8 = vld [vmem:[%s165_s17 + $0x40] sm:$0xff] }
  0x10   : > { %v2228_v2 = vld [vmem:[%s165_s17 + $0x30] sm:$0xff]  ;;  %v1928_v3 = vpack.i.bf16 %v2224_v0, %v2226_v1  ;;  %v2232_v4 = vld [vmem:[%s165_s17 + $0x38] sm:$0xff]  ;;  %v2242_v9 = vld [vmem:[%s165_s17 + $0x48] sm:$0xff] }
  0x11   : > { %v1938_v5 = vpack.i.bf16 %v2228_v2, %v2232_v4  ;;  %v2236_v6 = vld [vmem:[%s165_s17 + $0x10] sm:$0xff]  ;;  %v2238_v7 = vld [vmem:[%s165_s17 + $0x18] sm:$0xff]  ;;  %v2248_v11 = vld [vmem:[%s165_s17 + $0x20] sm:$0xff]  ;;  %v1933_v13 = vpack.i.bf16 %v2240_v8, %v2242_v9 }
  0x12   : > { %1929 = vrot.lane.b32.xlu0 %v1928_v3, %s2179_s18  ;;  %v2246_v10 = vpack.i.bf16 %v2236_v6, %v2238_v7  ;;  %v2250_v12 = vld [vmem:[%s165_s17 + $0x28] sm:$0xff]  ;;  %v2255_v14 = vld [vmem:[%s165_s17] sm:$0xff] }
  0x13   : > { %1939 = vrot.lane.b32.xlu1 %v1938_v5, %s2179_s18  ;;  %v2257_v15 = vld [vmem:[%s165_s17 + $0x8] sm:$0xff]  ;;  %v2261_v16 = vpack.i.bf16 %v2248_v11, %v2250_v12 }
  0x14   : > { %1949 = vrot.lane.b32.xlu2 %v2246_v10, %s2179_s18  ;;  %v2265_v17 = vpack.i.bf16 %v2255_v14, %v2257_v15 }
  0x1a   : > { %1934 = vrot.lane.b32.xlu0 %v1933_v13, %s2179_s18 }
  0x1b   : > { %1944 = vrot.lane.b32.xlu1 %v2261_v16, %s2179_s18 }
  0x1c   : > { %1954 = vrot.lane.b32.xlu2 %v2265_v17, %s2179_s18 }
  0x22   : > { %1959 = vrot.lane.b32.xlu0 %v1928_v3, %s2180_s19 }
  0x23   : > { %1964 = vrot.lane.b32.xlu1 %v1928_v3, %s2181_s20 }
  0x24   : > { %1969 = vrot.lane.b32.xlu2 %v1933_v13, %s2180_s19 }
  0x2a   : > { %1974 = vrot.lane.b32.xlu0 %v1933_v13, %s2181_s20 }
  0x2b   : > { %1979 = vrot.lane.b32.xlu1 %v1938_v5, %s2180_s19 }
  0x2c   : > { %1984 = vrot.lane.b32.xlu2 %v1938_v5, %s2181_s20 }
  0x32   : > { %1989 = vrot.lane.b32.xlu0 %v1928_v3, %s2182_s21 }
  0x33   : > { %1994 = vrot.lane.b32.xlu1 %v2261_v16, %s2180_s19 }
  0x34   : > { %1999 = vrot.lane.b32.xlu2 %v2261_v16, %s2181_s20 }
  0x3a   : > { %2004 = vrot.lane.b32.xlu0 %v1933_v13, %s2182_s21 }
  0x3b   : > { %2009 = vrot.lane.b32.xlu1 %v2246_v10, %s2180_s19 }
  0x3c   : > { %2014 = vrot.lane.b32.xlu2 %v2246_v10, %s2181_s20 }
  0x42   : > { %2019 = vrot.lane.b32.xlu0 %v1938_v5, %s2182_s21 }
  0x43   : > { %2024 = vrot.lane.b32.xlu1 %v2265_v17, %s2180_s19 }
  0x44   : > { %2029 = vrot.lane.b32.xlu2 %v2265_v17, %s2181_s20 }
  0x4a   : > { %2034 = vrot.lane.b32.xlu0 %v2261_v16, %s2182_s21 }
  0x4b   : > { %2039 = vrot.lane.b32.xlu1 %v2246_v10, %s2182_s21 }
  0x4c   : > { %2044 = vrot.lane.b32.xlu2 %v2265_v17, %s2182_s21 }
  0x52   : > { %2049 = vrot.lane.b32.xlu0 %v1928_v3, %s2183_s22 }
  0x53   : > { %2054 = vrot.lane.b32.xlu1 %v1928_v3, %s2184_s23 }
  0x54   : > { %2059 = vrot.lane.b32.xlu2 %v1928_v3, %s2185_s24 }
  0x5a   : > { %2064 = vrot.lane.b32.xlu0 %v1933_v13, %s2183_s22 }
  0x5b   : > { %2069 = vrot.lane.b32.xlu1 %v1933_v13, %s2184_s23 }
  0x5c   : > { %2074 = vrot.lane.b32.xlu2 %v1933_v13, %s2185_s24 }
  0x62   : > { %2079 = vrot.lane.b32.xlu0 %v1938_v5, %s2183_s22 }
  0x63   : > { %2084 = vrot.lane.b32.xlu1 %v1938_v5, %s2184_s23 }
  0x64   : > { %2089 = vrot.lane.b32.xlu2 %v1928_v3, %s2186_s25 }
  0x6a   : > { %2094 = vrot.lane.b32.xlu0 %v1938_v5, %s2185_s24 }
  0x6b   : > { %2099 = vrot.lane.b32.xlu1 %v2261_v16, %s2183_s22 }
  0x6c   : > { %2104 = vrot.lane.b32.xlu2 %v2261_v16, %s2184_s23 }
  0x6e   : > { %v2283_v18 = vpop.permute.xlu2 %1949 }
  0x6f   : > { %v1951_v37 = vunpack.i.l.bf16 %v2283_v18  ;;  %v1952_v39 = vunpack.i.h.bf16 %v2283_v18 }
  0x72   : > { %2109 = vrot.lane.b32.xlu0 %v1933_v13, %s2186_s25 }
  0x73   : > { %2114 = vrot.lane.b32.xlu1 %v2261_v16, %s2185_s24 }
  0x74   : > { %2119 = vrot.lane.b32.xlu2 %v2246_v10, %s2183_s22 }
  0x76   : > { %v2289_v19 = vpop.permute.xlu2 %1954 }
  0x77   : > { %v1956_v41 = vunpack.i.l.bf16 %v2289_v19  ;;  %v1957_v43 = vunpack.i.h.bf16 %v2289_v19 }
  0x7a   : > { %2124 = vrot.lane.b32.xlu0 %v2246_v10, %s2184_s23 }
  0x7b   : > { %2129 = vrot.lane.b32.xlu1 %v1938_v5, %s2186_s25 }
  0x7c   : > { %2134 = vrot.lane.b32.xlu2 %v2246_v10, %s2185_s24 }
  0x7e   : > { %v2294_v20 = vpop.permute.xlu2 %1969 }
  0x7f   : > { %v1971_v55 = vunpack.i.l.bf16 %v2294_v20  ;;  %v1972_v58 = vunpack.i.h.bf16 %v2294_v20 }
  0x82   : > { %2139 = vrot.lane.b32.xlu0 %v2265_v17, %s2183_s22 }
  0x83   : > { %2144 = vrot.lane.b32.xlu1 %v2265_v17, %s2184_s23 }
  0x84   : > { %v1930_v21 = vpop.permute.xlu0 %1929  ;;  %2149 = vrot.lane.b32.xlu2 %v2261_v16, %s2186_s25 }
  0x85   : > { %v1931_v22 = vunpack.i.l.bf16 %v1930_v21  ;;  %v1940_v23 = vpop.permute.xlu1 %1939  ;;  %v1932_v24 = vunpack.i.h.bf16 %v1930_v21  ;;  %v1673_v21 = vld [vmem:[%s2916_s1 + $0x88] sm:$0xff] }
  0x86   : > { %v2300_v25 = vpop.permute.xlu2 %1984  ;;  %v1941_v31 = vunpack.i.l.bf16 %v1940_v23  ;;  %v1942_v32 = vunpack.i.h.bf16 %v1940_v23 }
  0x87   : > { %297 = vmatpush.msra.mxu0 %v1931_v22  ;;  %1874 = vmatpush.msra.mxu1 %v1931_v22  ;;  %v1986_v63 = vunpack.i.l.bf16 %v2300_v25 }
  0x88   : > { %1875 = vmatpush.msra.mxu2 %v1931_v22  ;;  %1876 = vmatpush.msra.mxu3 %v1931_v22 }
  0x89   : > { %298 = vmatpush.msra.mxu0 %v1932_v24  ;;  %1877 = vmatpush.msra.mxu1 %v1932_v24 }
  0x8a   : > { %1878 = vmatpush.msra.mxu2 %v1932_v24  ;;  %1879 = vmatpush.msra.mxu3 %v1932_v24 }
  0x8b   : > { %2159 = vrot.lane.b32.xlu1 %v2246_v10, %s2186_s25  ;;  %2154 = vrot.lane.b32.xlu0 %v2265_v17, %s2185_s24 }
  0x8c   : > { %v1935_v26 = vpop.permute.xlu0 %1934  ;;  %2164 = vrot.lane.b32.xlu2 %v2265_v17, %s2186_s25 }
  0x8d   : > { %v1936_v27 = vunpack.i.l.bf16 %v1935_v26  ;;  %v1945_v28 = vpop.permute.xlu1 %1944  ;;  %v1937_v29 = vunpack.i.h.bf16 %v1935_v26 }
  0x8e   : > { %v2308_v30 = vpop.permute.xlu2 %1999  ;;  %v1946_v34 = vunpack.i.l.bf16 %v1945_v28  ;;  %v1947_v36 = vunpack.i.h.bf16 %v1945_v28 }
  0x8f   : > { %299 = vmatpush.msra.mxu0 %v1936_v27  ;;  %1880 = vmatpush.msra.mxu1 %v1936_v27  ;;  %v2001_v10 = vunpack.i.l.bf16 %v2308_v30  ;;  %v2002_v18 = vunpack.i.h.bf16 %v2308_v30 }
  0x90   : > { %1881 = vmatpush.msra.mxu2 %v1936_v27  ;;  %1882 = vmatpush.msra.mxu3 %v1936_v27 }
  0x91   : > { %300 = vmatpush.msra.mxu0 %v1937_v29  ;;  %1883 = vmatpush.msra.mxu1 %v1937_v29 }
  0x92   : > { %1884 = vmatpush.msra.mxu2 %v1937_v29  ;;  %1885 = vmatpush.msra.mxu3 %v1937_v29 }
  0x93   : > { %301 = vmatpush.msra.mxu0 %v1941_v31  ;;  %1886 = vmatpush.msra.mxu1 %v1941_v31 }
  0x94   : > { %1887 = vmatpush.msra.mxu2 %v1941_v31  ;;  %1888 = vmatpush.msra.mxu3 %v1941_v31  ;;  %v1960_v33 = vpop.permute.xlu0 %1959 }
  0x95   : > { %v1965_v35 = vpop.permute.xlu1 %1964  ;;  %302 = vmatpush.msra.mxu0 %v1942_v32  ;;  %1889 = vmatpush.msra.mxu1 %v1942_v32  ;;  %v1961_v46 = vunpack.i.l.bf16 %v1960_v33  ;;  %v1962_v51 = vunpack.i.h.bf16 %v1960_v33 }
  0x96   : > { %1890 = vmatpush.msra.mxu2 %v1942_v32  ;;  %1891 = vmatpush.msra.mxu3 %v1942_v32  ;;  %v2311_v38 = vpop.permute.xlu2 %2014  ;;  %v1966_v47 = vunpack.i.l.bf16 %v1965_v35  ;;  %v1967_v52 = vunpack.i.h.bf16 %v1965_v35  ;;  %v1728_v35 = vld [vmem:[%s2916_s1 + $0x120] sm:$0xff] }
  0x97   : > { %303 = vmatpush.msra.mxu0 %v1946_v34  ;;  %1892 = vmatpush.msra.mxu1 %v1946_v34  ;;  %v2016_v22 = vunpack.i.l.bf16 %v2311_v38  ;;  %v2017_v26 = vunpack.i.h.bf16 %v2311_v38 }
  0x98   : > { %1893 = vmatpush.msra.mxu2 %v1946_v34  ;;  %1894 = vmatpush.msra.mxu3 %v1946_v34  ;;  %v183_v34 = vld [vmem:[%s2916_s1] sm:$0xff] }
  0x99   : > { %304 = vmatpush.msra.mxu0 %v1947_v36  ;;  %1895 = vmatpush.msra.mxu1 %v1947_v36 }
  0x9a   : > { %1896 = vmatpush.msra.mxu2 %v1947_v36  ;;  %1897 = vmatpush.msra.mxu3 %v1947_v36 }
  0x9b   : > { %305 = vmatpush.msra.mxu0 %v1951_v37  ;;  %1898 = vmatpush.msra.mxu1 %v1951_v37 }
  0x9c   : > { %1899 = vmatpush.msra.mxu2 %v1951_v37  ;;  %1900 = vmatpush.msra.mxu3 %v1951_v37  ;;  %v1975_v40 = vpop.permute.xlu0 %1974 }
  0x9d   : > { %v2315_v42 = vpop.permute.xlu1 %1979  ;;  %306 = vmatpush.msra.mxu0 %v1952_v39  ;;  %1901 = vmatpush.msra.mxu1 %v1952_v39  ;;  %v1976_v56 = vunpack.i.l.bf16 %v1975_v40  ;;  %v1977_v59 = vunpack.i.h.bf16 %v1975_v40 }
  0x9e   : > { %1902 = vmatpush.msra.mxu2 %v1952_v39  ;;  %1903 = vmatpush.msra.mxu3 %v1952_v39  ;;  %v2329_v49 = vpop.permute.xlu2 %2029  ;;  %v1981_v62 = vunpack.i.l.bf16 %v2315_v42  ;;  %v1982_v5 = vunpack.i.h.bf16 %v2315_v42  ;;  %v1670_v42 = vld [vmem:[%s2916_s1 + $0x70] sm:$0xff] }
  0x9f   : > { %307 = vmatpush.msra.mxu0 %v1956_v41  ;;  %1904 = vmatpush.msra.mxu1 %v1956_v41  ;;  %v2032_v32 = vunpack.i.h.bf16 %v2329_v49 }
  0xa0   : > { %1905 = vmatpush.msra.mxu2 %v1956_v41  ;;  %1906 = vmatpush.msra.mxu3 %v1956_v41 }
  0xa1   : > { %308 = vmatpush.msra.mxu0 %v1957_v43  ;;  %1907 = vmatpush.msra.mxu1 %v1957_v43 }
  0xa2   : > { %1908 = vmatpush.msra.mxu2 %v1957_v43  ;;  %1909 = vmatpush.msra.mxu3 %v1957_v43  ;;  %v184_v43 = vld [vmem:[%s2916_s1 + $0x8] sm:$0xff] }
  0xa3   : > { %1683 = vmatmul.msk.f32.vlgmr.msra.gmra.mxu1 %vm256_vm0, %v1671_v44  ;;  %1686 = vmatmul.msk.f32.vlgmr.msra.gmra.mxu2 %vm256_vm0, %v1674_v45  ;;  %v1705_v44 = vld [vmem:[%s2916_s1 + $0xc8] sm:$0xff] }
  0xa4   : > { %524 = vmatpush.msrb.mxu2 %v1961_v46  ;;  %674 = vmatpush.msrb.mxu3 %v1966_v47  ;;  %v1990_v50 = vpop.permute.xlu0 %1989  ;;  %v1729_v46 = vld [vmem:[%s2916_s1 + $0x128] sm:$0xff] }
  0xa5   : > { %386 = vmatpush.msrb.mxu1 %v2226_v1  ;;  %v1995_v53 = vpop.permute.xlu1 %1994  ;;  %1689 = vmatmul.msk.f32.vlgmr.msra.gmra.mxu3 %vm256_vm0, %v1677_v48  ;;  %v1991_v54 = vunpack.i.l.bf16 %v1990_v50  ;;  %v1992_v57 = vunpack.i.h.bf16 %v1990_v50 }
  0xa6   : > { %525 = vmatpush.msrb.mxu2 %v1962_v51  ;;  %675 = vmatpush.msrb.mxu3 %v1967_v52  ;;  %v2350_v1 = vpop.permute.xlu2 %2044  ;;  %v1996_v16 = vunpack.i.l.bf16 %v1995_v53  ;;  %v1997_v19 = vunpack.i.h.bf16 %v1995_v53 }
  0xa7   : > { %387 = vmatpush.msrb.mxu1 %v2224_v0  ;;  %824 = vmatpush.msrb.mxu0 %v1991_v54  ;;  %v1678_v0 = vld [vmem:[%s2916_s1 + $0xb0] sm:$0xff] }
  0xa8   : > { %526 = vmatpush.msrb.mxu2 %v1971_v55  ;;  %676 = vmatpush.msrb.mxu3 %v1976_v56 }
  0xa9   : > { %388 = vmatpush.msrb.mxu1 %v2242_v9  ;;  %825 = vmatpush.msrb.mxu0 %v1992_v57  ;;  %v1987_v9 = vunpack.i.h.bf16 %v2300_v25  ;;  %v1679_v25 = vld [vmem:[%s2916_s1 + $0xb8] sm:$0xff]  ;;  %v2047_v57 = vunpack.i.h.bf16 %v2350_v1 }
  0xaa   : > { %527 = vmatpush.msrb.mxu2 %v1972_v58  ;;  %677 = vmatpush.msrb.mxu3 %v1977_v59  ;;  %v1752_v58 = vld [vmem:[%s2916_s1 + $0x180] sm:$0xff]  ;;  %v185_v59 = vld [vmem:[%s2916_s1 + $0x10] sm:$0xff] }
  0xab   : > { %389 = vmatpush.msrb.mxu1 %v2240_v8  ;;  %1687 = vmatmul.msk.f32.gmra.mxu2 %vm256_vm0, %v1675_v60  ;;  %v1706_v60 = vld [vmem:[%s2916_s1 + $0xd0] sm:$0xff] }
  0xac   : > { %1684 = vmatmul.msk.f32.gmra.mxu1 %vm256_vm0, %v1672_v61  ;;  %528 = vmatpush.msrb.mxu2 %v1981_v62  ;;  %v2005_v3 = vpop.permute.xlu0 %2004  ;;  %v1730_v62 = vld [vmem:[%s2916_s1 + $0x130] sm:$0xff] }
  0xad   : > { %678 = vmatpush.msrb.mxu3 %v1986_v63  ;;  %390 = vmatpush.msrb.mxu1 %v2232_v4  ;;  %v2010_v8 = vpop.permute.xlu1 %2009  ;;  %v2006_v13 = vunpack.i.l.bf16 %v2005_v3  ;;  %v2007_v20 = vunpack.i.h.bf16 %v2005_v3  ;;  %v1668_v4 = vld [vmem:[%s2916_s1 + $0x60] sm:$0xff] }
  0xae   : > { %1690 = vmatmul.msk.f32.gmra.mxu3 %vm256_vm0, %v1678_v0  ;;  %529 = vmatpush.msrb.mxu2 %v1982_v5  ;;  %v2011_v23 = vunpack.i.l.bf16 %v2010_v8  ;;  %v2012_v28 = vunpack.i.h.bf16 %v2010_v8 }
  0xaf   : > { %679 = vmatpush.msrb.mxu3 %v1987_v9  ;;  %391 = vmatpush.msrb.mxu1 %v2228_v2  ;;  %v1676_v2 = vld [vmem:[%s2916_s1 + $0xa0] sm:$0xff] }
  0xb0   : > { %530 = vmatpush.msrb.mxu2 %v1996_v16  ;;  %826 = vmatpush.msrb.mxu0 %v2006_v13  ;;  %v186_v13 = vld [vmem:[%s2916_s1 + $0x18] sm:$0xff] }
  0xb1   : > { %680 = vmatpush.msrb.mxu3 %v2001_v10  ;;  %392 = vmatpush.msrb.mxu1 %v2250_v12  ;;  %v2060_v12 = vpop.permute.xlu2 %2059  ;;  %v1753_v10 = vld [vmem:[%s2916_s1 + $0x188] sm:$0xff]  ;;  %v1707_v16 = vld [vmem:[%s2916_s1 + $0xd8] sm:$0xff] }
  0xb2   : > { %531 = vmatpush.msrb.mxu2 %v1997_v19  ;;  %827 = vmatpush.msrb.mxu0 %v2007_v20  ;;  %v2061_v36 = vunpack.i.l.bf16 %v2060_v12  ;;  %v2062_v17 = vunpack.i.h.bf16 %v2060_v12  ;;  %v1731_v19 = vld [vmem:[%s2916_s1 + $0x138] sm:$0xff]  ;;  %v1754_v12 = vld [vmem:[%s2916_s1 + $0x190] sm:$0xff] }
  0xb3   : > { %681 = vmatpush.msrb.mxu3 %v2002_v18  ;;  %393 = vmatpush.msrb.mxu1 %v2248_v11  ;;  %v2031_v11 = vunpack.i.l.bf16 %v2329_v49  ;;  %v2046_v49 = vunpack.i.l.bf16 %v2350_v1 }
  0xb4   : > { %1680 = vmatmul.msk.f32.vlgmr.msra.gmra.mxu0 %vm256_vm0, %v1668_v4  ;;  %1685 = vmatmul.msk.f32.gmra.mxu1 %vm256_vm0, %v1673_v21  ;;  %v2020_v24 = vpop.permute.xlu0 %2019 }
  0xb5   : > { %1688 = vmatmul.msk.f32.gmra.mxu2 %vm256_vm0, %v1676_v2  ;;  %682 = vmatpush.msrb.mxu3 %v2016_v22  ;;  %v2025_v27 = vpop.permute.xlu1 %2024  ;;  %v2021_v29 = vunpack.i.l.bf16 %v2020_v24  ;;  %v2022_v31 = vunpack.i.h.bf16 %v2020_v24  ;;  %v187_v24 = vld [vmem:[%s2916_s1 + $0x20] sm:$0xff] }
  0xb6   : > { %394 = vmatpush.msrb.mxu1 %v2238_v7  ;;  %532 = vmatpush.msrb.mxu2 %v2011_v23  ;;  %v2026_v30 = vunpack.i.l.bf16 %v2025_v27  ;;  %v2027_v33 = vunpack.i.h.bf16 %v2025_v27  ;;  %v1669_v7 = vld [vmem:[%s2916_s1 + $0x68] sm:$0xff] }
  0xb7   : > { %1691 = vmatmul.msk.f32.gmra.mxu3 %vm256_vm0, %v1679_v25  ;;  %828 = vmatpush.msrb.mxu0 %v2021_v29  ;;  %v1708_v25 = vld [vmem:[%s2916_s1 + $0xe0] sm:$0xff] }
  0xb8   : > { %683 = vmatpush.msrb.mxu3 %v2017_v26  ;;  %395 = vmatpush.msrb.mxu1 %v2236_v6  ;;  %v1704_v6 = vld [vmem:[%s2916_s1 + $0xc0] sm:$0xff] }
  0xb9   : > { %533 = vmatpush.msrb.mxu2 %v2012_v28  ;;  %829 = vmatpush.msrb.mxu0 %v2022_v31  ;;  %v2075_v39 = vpop.permute.xlu2 %2074  ;;  %v1732_v28 = vld [vmem:[%s2916_s1 + $0x140] sm:$0xff] }
  0xba   : > { %684 = vmatpush.msrb.mxu3 %v2031_v11  ;;  %396 = vmatpush.msrb.mxu1 %v2257_v15  ;;  %v2076_v41 = vunpack.i.l.bf16 %v2075_v39  ;;  %v2077_v51 = vunpack.i.h.bf16 %v2075_v39 }
  0xbb   : > { %534 = vmatpush.msrb.mxu2 %v2026_v30 }
  0xbc   : > { %685 = vmatpush.msrb.mxu3 %v2032_v32  ;;  %397 = vmatpush.msrb.mxu1 %v2255_v14  ;;  %v2035_v15 = vpop.permute.xlu0 %2034 }
  0xbd   : > { %535 = vmatpush.msrb.mxu2 %v2027_v33  ;;  %1681 = vmatmul.msk.f32.gmra.mxu0 %vm256_vm0, %v1669_v7  ;;  %v2036_v37 = vunpack.i.l.bf16 %v2035_v15  ;;  %v2040_v38 = vpop.permute.xlu1 %2039  ;;  %v2037_v14 = vunpack.i.h.bf16 %v2035_v15  ;;  %v1709_v15 = vld [vmem:[%s2916_s1 + $0xe8] sm:$0xff] }
  0xbe   : > { %1692 = vmatmul.msk.f32.vlgmr.msrb.gmra.mxu1 %vm256_vm0, %v183_v34  ;;  %1716 = vmatmul.msk.f32.vlgmr.msrb.gmra.mxu2 %vm256_vm0, %v1704_v6  ;;  %v2041_v40 = vunpack.i.l.bf16 %v2040_v38  ;;  %v2042_v48 = vunpack.i.h.bf16 %v2040_v38  ;;  %v1755_v34 = vld [vmem:[%s2916_s1 + $0x198] sm:$0xff]  ;;  %v188_v6 = vld [vmem:[%s2916_s1 + $0x28] sm:$0xff] }
  0xbf   : > { %1740 = vmatmul.msk.f32.vlgmr.msrb.gmra.mxu3 %vm256_vm0, %v1728_v35  ;;  %830 = vmatpush.msrb.mxu0 %v2036_v37 }
  0xc0   : > { %974 = vmatpush.msra.mxu1 %v2061_v36  ;;  %v1733_v36 = vld [vmem:[%s2916_s1 + $0x148] sm:$0xff] }
  0xc1   : > { %831 = vmatpush.msrb.mxu0 %v2037_v14  ;;  %v2090_v55 = vpop.permute.xlu2 %2089 }
  0xc2   : > { %975 = vmatpush.msra.mxu1 %v2062_v17  ;;  %v2091_v56 = vunpack.i.l.bf16 %v2090_v55  ;;  %v2092_v63 = vunpack.i.h.bf16 %v2090_v55 }
  0xc3   : > { %832 = vmatpush.msrb.mxu0 %v2041_v40 }
  0xc4   : > { %v2050_v45 = vpop.permute.xlu0 %2049  ;;  %976 = vmatpush.msra.mxu1 %v2076_v41 }
  0xc5   : > { %1682 = vmatmul.msk.f32.gmra.mxu0 %vm256_vm0, %v1670_v42  ;;  %v2051_v47 = vunpack.i.l.bf16 %v2050_v45  ;;  %v2055_v50 = vpop.permute.xlu1 %2054  ;;  %v2052_v52 = vunpack.i.h.bf16 %v2050_v45  ;;  %v1710_v45 = vld [vmem:[%s2916_s1 + $0xf0] sm:$0xff] }
  0xc6   : > { %1693 = vmatmul.msk.f32.gmra.mxu1 %vm256_vm0, %v184_v43  ;;  %1717 = vmatmul.msk.f32.gmra.mxu2 %vm256_vm0, %v1705_v44  ;;  %v2057_v53 = vunpack.i.h.bf16 %v2055_v50  ;;  %v2056_v54 = vunpack.i.l.bf16 %v2055_v50  ;;  %v1756_v43 = vld [vmem:[%s2916_s1 + $0x1a0] sm:$0xff]  ;;  %v189_v44 = vld [vmem:[%s2916_s1 + $0x30] sm:$0xff] }
  0xc7   : > { %1741 = vmatmul.msk.f32.gmra.mxu3 %vm256_vm0, %v1729_v46  ;;  %833 = vmatpush.msrb.mxu0 %v2042_v48 }
  0xc8   : > { %1124 = vmatpush.msra.mxu2 %v2051_v47  ;;  %1274 = vmatpush.msra.mxu3 %v2056_v54  ;;  %v1734_v47 = vld [vmem:[%s2916_s1 + $0x150] sm:$0xff] }
  0xc9   : > { %834 = vmatpush.msrb.mxu0 %v2046_v49  ;;  %977 = vmatpush.msra.mxu1 %v2077_v51  ;;  %v2105_v9 = vpop.permute.xlu2 %2104 }
  0xca   : > { %1125 = vmatpush.msra.mxu2 %v2052_v52  ;;  %1275 = vmatpush.msra.mxu3 %v2057_v53  ;;  %v2106_v23 = vunpack.i.l.bf16 %v2105_v9  ;;  %v2107_v29 = vunpack.i.h.bf16 %v2105_v9  ;;  %v1712_v9 = vld [vmem:[%s2916_s1 + $0x100] sm:$0xff] }
  0xcb   : > { %835 = vmatpush.msrb.mxu0 %v2047_v57  ;;  %v190_v57 = vld [vmem:[%s2916_s1 + $0x38] sm:$0xff] }
  0xcc   : > { %v2065_v61 = vpop.permute.xlu0 %2064 }
  0xcd   : > { %1424 = vmatpush.msra.mxu0 %v2091_v56  ;;  %v2067_v0 = vunpack.i.h.bf16 %v2065_v61  ;;  %v2066_v1 = vunpack.i.l.bf16 %v2065_v61  ;;  %v2070_v3 = vpop.permute.xlu1 %2069  ;;  %v1757_v56 = vld [vmem:[%s2916_s1 + $0x1a8] sm:$0xff] }
  0xce   : > { %1764 = vmatmul.msk.f32.vlgmr.msrb.gmra.mxu0 %vm256_vm0, %v1752_v58  ;;  %1694 = vmatmul.msk.f32.gmra.mxu1 %vm256_vm0, %v185_v59  ;;  %v2072_v5 = vunpack.i.h.bf16 %v2070_v3  ;;  %v2071_v8 = vunpack.i.l.bf16 %v2070_v3  ;;  %v1711_v58 = vld [vmem:[%s2916_s1 + $0xf8] sm:$0xff] }
  0xcf   : > { %1718 = vmatmul.msk.f32.gmra.mxu2 %vm256_vm0, %v1706_v60  ;;  %1742 = vmatmul.msk.f32.gmra.mxu3 %vm256_vm0, %v1730_v62  ;;  %v1735_v60 = vld [vmem:[%s2916_s1 + $0x158] sm:$0xff] }
  0xd0   : > { %1126 = vmatpush.msra.mxu2 %v2066_v1  ;;  %1276 = vmatpush.msra.mxu3 %v2071_v8  ;;  %v191_v8 = vld [vmem:[%s2916_s1 + $0x40] sm:$0xff] }
  0xd1   : > { %1425 = vmatpush.msra.mxu0 %v2092_v63  ;;  %v2120_v26 = vpop.permute.xlu2 %2119 }
  0xd2   : > { %1127 = vmatpush.msra.mxu2 %v2067_v0  ;;  %1277 = vmatpush.msra.mxu3 %v2072_v5  ;;  %v2121_v7 = vunpack.i.l.bf16 %v2120_v26  ;;  %v2122_v37 = vunpack.i.h.bf16 %v2120_v26  ;;  %v1758_v5 = vld [vmem:[%s2916_s1 + $0x1b0] sm:$0xff] }
  0xd3   : > { %v1738_v26 = vld [vmem:[%s2916_s1 + $0x170] sm:$0xff] }
  0xd4   : > { %v2080_v18 = vpop.permute.xlu0 %2079 }
  0xd5   : > { %v2082_v20 = vunpack.i.h.bf16 %v2080_v18  ;;  %v2081_v4 = vunpack.i.l.bf16 %v2080_v18  ;;  %v2085_v21 = vpop.permute.xlu1 %2084 }
  0xd6   : > { %1765 = vmatmul.msk.f32.gmra.mxu0 %vm256_vm0, %v1753_v10  ;;  %1695 = vmatmul.msk.f32.gmra.mxu1 %vm256_vm0, %v186_v13  ;;  %v2087_v22 = vunpack.i.h.bf16 %v2085_v21  ;;  %v2086_v2 = vunpack.i.l.bf16 %v2085_v21  ;;  %v1736_v10 = vld [vmem:[%s2916_s1 + $0x160] sm:$0xff]  ;;  %v1759_v21 = vld [vmem:[%s2916_s1 + $0x1b8] sm:$0xff] }
  0xd7   : > { %1719 = vmatmul.msk.f32.gmra.mxu2 %vm256_vm0, %v1707_v16  ;;  %1743 = vmatmul.msk.f32.gmra.mxu3 %vm256_vm0, %v1731_v19 }
  0xd8   : > { %1128 = vmatpush.msra.mxu2 %v2081_v4  ;;  %1278 = vmatpush.msra.mxu3 %v2086_v2  ;;  %v1713_v2 = vld [vmem:[%s2916_s1 + $0x108] sm:$0xff] }
  0xd9   : > { %v2135_v14 = vpop.permute.xlu2 %2134 }
  0xda   : > { %1129 = vmatpush.msra.mxu2 %v2082_v20  ;;  %1279 = vmatpush.msra.mxu3 %v2087_v22  ;;  %v2136_v42 = vunpack.i.l.bf16 %v2135_v14  ;;  %v2137_v46 = vunpack.i.h.bf16 %v2135_v14  ;;  %v192_v22 = vld [vmem:[%s2916_s1 + $0x48] sm:$0xff] }
  0xdb   : > { %v1825_v14 = vld [vmem:[%s2916_s1 + $0x2a8] sm:$0xff] }
  0xdc   : > { %v2095_v27 = vpop.permute.xlu0 %2094  ;;  %1280 = vmatpush.msra.mxu3 %v2106_v23  ;;  %v1737_v23 = vld [vmem:[%s2916_s1 + $0x168] sm:$0xff] }
  0xdd   : > { %v2097_v11 = vunpack.i.h.bf16 %v2095_v27  ;;  %v2096_v30 = vunpack.i.l.bf16 %v2095_v27  ;;  %v2100_v31 = vpop.permute.xlu1 %2099  ;;  %v1761_v27 = vld [vmem:[%s2916_s1 + $0x1c8] sm:$0xff] }
  0xde   : > { %1766 = vmatmul.msk.f32.gmra.mxu0 %vm256_vm0, %v1754_v12  ;;  %1696 = vmatmul.msk.f32.gmra.mxu1 %vm256_vm0, %v187_v24  ;;  %v2102_v32 = vunpack.i.h.bf16 %v2100_v31  ;;  %v2101_v33 = vunpack.i.l.bf16 %v2100_v31  ;;  %v1760_v12 = vld [vmem:[%s2916_s1 + $0x1c0] sm:$0xff]  ;;  %v193_v24 = vld [vmem:[%s2916_s1 + $0x50] sm:$0xff] }
  0xdf   : > { %1720 = vmatmul.msk.f32.gmra.mxu2 %vm256_vm0, %v1708_v25  ;;  %1744 = vmatmul.msk.f32.gmra.mxu3 %vm256_vm0, %v1732_v28  ;;  %v1714_v25 = vld [vmem:[%s2916_s1 + $0x110] sm:$0xff]  ;;  %v194_v28 = vld [vmem:[%s2916_s1 + $0x58] sm:$0xff] }
  0xe0   : > { %978 = vmatpush.msra.mxu1 %v2096_v30  ;;  %1130 = vmatpush.msra.mxu2 %v2101_v33  ;;  %v1485_v33 = vld [vmem:[%s2917_s2] sm:$0xff] }
  0xe1   : > { %1281 = vmatpush.msra.mxu3 %v2107_v29  ;;  %v2150_v50 = vpop.permute.xlu2 %2149  ;;  %v1715_v29 = vld [vmem:[%s2916_s1 + $0x118] sm:$0xff] }
  0xe2   : > { %979 = vmatpush.msra.mxu1 %v2097_v11  ;;  %1131 = vmatpush.msra.mxu2 %v2102_v32  ;;  %v2151_v55 = vunpack.i.l.bf16 %v2150_v50  ;;  %v2152_v59 = vunpack.i.h.bf16 %v2150_v50  ;;  %v1739_v11 = vld [vmem:[%s2916_s1 + $0x178] sm:$0xff] }
  0xe4   : > { %v2110_v35 = vpop.permute.xlu0 %2109  ;;  %1132 = vmatpush.msra.mxu2 %v2121_v7  ;;  %v2187_v7 = vmov 0  }
  0xe5   : > { %v2112_v38 = vunpack.i.h.bf16 %v2110_v35  ;;  %v2111_v39 = vunpack.i.l.bf16 %v2110_v35  ;;  %v2115_v17 = vpop.permute.xlu1 %2114  ;;  %2168 = vset.pattern.permute.xlu0 %v2187_v7  ;;  %2169 = vset.pattern.permute.xlu1 %v2187_v7  ;;  %v1824_v35 = vld [vmem:[%s2916_s1 + $0x2a0] sm:$0xff] }
  0xe6   : > { %1767 = vmatmul.msk.f32.gmra.mxu0 %vm256_vm0, %v1755_v34  ;;  %1697 = vmatmul.msk.f32.gmra.mxu1 %vm256_vm0, %v188_v6  ;;  %v2117_v40 = vunpack.i.h.bf16 %v2115_v17  ;;  %v2116_v41 = vunpack.i.l.bf16 %v2115_v17  ;;  %v1762_v34 = vld [vmem:[%s2916_s1 + $0x1d0] sm:$0xff]  ;;  %v1776_v6 = vld [vmem:[%s2916_s1 + $0x1e0] sm:$0xff]  ;;  %v1801_v17 = vld [vmem:[%s2916_s1 + $0x248] sm:$0xff] }
  0xe7   : > { %1721 = vmatmul.msk.f32.gmra.mxu2 %vm256_vm0, %v1709_v15  ;;  %1745 = vmatmul.msk.f32.gmra.mxu3 %vm256_vm0, %v1733_v36  ;;  %v1800_v15 = vld [vmem:[%s2916_s1 + $0x240] sm:$0xff] }
  0xe8   : > { %1426 = vmatpush.msra.mxu0 %v2111_v39  ;;  %980 = vmatpush.msra.mxu1 %v2116_v41  ;;  %v1777_v39 = vld [vmem:[%s2916_s1 + $0x1e8] sm:$0xff] }
  0xe9   : > { %1133 = vmatpush.msra.mxu2 %v2122_v37  ;;  %v2165_v30 = vpop.permute.xlu2 %2164  ;;  %1511 = vperm.xlu0 %2168, %v1485_v33   ;;  %v1763_v37 = vld [vmem:[%s2916_s1 + $0x1d8] sm:$0xff] }
  0xea   : > { %1427 = vmatpush.msra.mxu0 %v2112_v38  ;;  %981 = vmatpush.msra.mxu1 %v2117_v40  ;;  %v2167_v31 = vunpack.i.h.bf16 %v2165_v30  ;;  %v2166_v32 = vunpack.i.l.bf16 %v2165_v30  ;;  %v1486_v38 = vld [vmem:[%s2917_s2 + $0x8] sm:$0xff] }
  0xeb   : > { %2170 = vset.pattern.permute.xlu2 %v2187_v7  ;;  %1516 = vperm.xlu1 %2169, %v1486_v38   ;;  %v1783_v38 = vld [vmem:[%s2916_s1 + $0x218] sm:$0xff] }
  0xec   : > { %982 = vmatpush.msra.mxu1 %v2136_v42  ;;  %v2125_v48 = vpop.permute.xlu0 %2124 }
  0xed   : > { %v2130_v49 = vpop.permute.xlu1 %2129  ;;  %v2126_v51 = vunpack.i.l.bf16 %v2125_v48  ;;  %v2127_v54 = vunpack.i.h.bf16 %v2125_v48 }
  0xee   : > { %1768 = vmatmul.msk.f32.gmra.mxu0 %vm256_vm0, %v1756_v43  ;;  %1698 = vmatmul.msk.f32.gmra.mxu1 %vm256_vm0, %v189_v44  ;;  %v2132_v52 = vunpack.i.h.bf16 %v2130_v49  ;;  %v2131_v53 = vunpack.i.l.bf16 %v2130_v49  ;;  %v1848_v43 = vld [vmem:[%s2916_s1 + $0x300] sm:$0xff]  ;;  %v1778_v44 = vld [vmem:[%s2916_s1 + $0x1f0] sm:$0xff] }
  0xef   : > { %1722 = vmatmul.msk.f32.gmra.mxu2 %vm256_vm0, %v1710_v45  ;;  %1746 = vmatmul.msk.f32.gmra.mxu3 %vm256_vm0, %v1734_v47  ;;  %v1802_v45 = vld [vmem:[%s2916_s1 + $0x250] sm:$0xff] }
  0xf0   : > { %983 = vmatpush.msra.mxu1 %v2137_v46  ;;  %1428 = vmatpush.msra.mxu0 %v2131_v53  ;;  %v1826_v46 = vld [vmem:[%s2916_s1 + $0x2b0] sm:$0xff]  ;;  %v1779_v53 = vld [vmem:[%s2916_s1 + $0x1f8] sm:$0xff] }
  0xf1   : > { %1282 = vmatpush.msra.mxu3 %v2126_v51  ;;  %v1849_v51 = vld [vmem:[%s2916_s1 + $0x308] sm:$0xff] }
  0xf2   : > { %1429 = vmatpush.msra.mxu0 %v2132_v52  ;;  %v1488_v52 = vld [vmem:[%s2917_s2 + $0x18] sm:$0xff] }
  0xf3   : > { %1283 = vmatpush.msra.mxu3 %v2127_v54  ;;  %v1803_v54 = vld [vmem:[%s2916_s1 + $0x258] sm:$0xff]  ;;  %1526 = vperm.xlu1 %2169, %v1488_v52   ;;  %v1854_v52 = vld [vmem:[%s2916_s1 + $0x330] sm:$0xff] }
  0xf4   : > { %1430 = vmatpush.msra.mxu0 %v2151_v55  ;;  %v2140_v61 = vpop.permute.xlu0 %2139  ;;  %v1827_v55 = vld [vmem:[%s2916_s1 + $0x2b8] sm:$0xff] }
  0xf5   : > { %v2145_v62 = vpop.permute.xlu1 %2144  ;;  %v2141_v63 = vunpack.i.l.bf16 %v2140_v61  ;;  %v2142_v3 = vunpack.i.h.bf16 %v2140_v61  ;;  %v1780_v61 = vld [vmem:[%s2916_s1 + $0x200] sm:$0xff] }
  0xf6   : > { %1769 = vmatmul.msk.f32.gmra.mxu0 %vm256_vm0, %v1757_v56  ;;  %1699 = vmatmul.msk.f32.gmra.mxu1 %vm256_vm0, %v190_v57  ;;  %v2147_v0 = vunpack.i.h.bf16 %v2145_v62  ;;  %v2146_v1 = vunpack.i.l.bf16 %v2145_v62  ;;  %v1804_v62 = vld [vmem:[%s2916_s1 + $0x260] sm:$0xff] }
  0xf7   : > { %1723 = vmatmul.msk.f32.gmra.mxu2 %vm256_vm0, %v1711_v58  ;;  %1747 = vmatmul.msk.f32.gmra.mxu3 %vm256_vm0, %v1735_v60 }
  0xf8   : > { %1431 = vmatpush.msra.mxu0 %v2152_v59  ;;  %1284 = vmatpush.msra.mxu3 %v2146_v1  ;;  %v1850_v59 = vld [vmem:[%s2916_s1 + $0x310] sm:$0xff] }
  0xf9   : > { %1134 = vmatpush.msra.mxu2 %v2141_v63 }
  0xfa   : > { %1285 = vmatpush.msra.mxu3 %v2147_v0  ;;  %v1828_v0 = vld [vmem:[%s2916_s1 + $0x2c0] sm:$0xff] }
  0xfb   : > { %1135 = vmatpush.msra.mxu2 %v2142_v3 }
  0xfd   : > { %v2160_v13 = vpop.permute.xlu1 %2159  ;;  %v2155_v16 = vpop.permute.xlu0 %2154 }
  0xfe   : > { %1770 = vmatmul.msk.f32.gmra.mxu0 %vm256_vm0, %v1758_v5  ;;  %1700 = vmatmul.msk.f32.gmra.mxu1 %vm256_vm0, %v191_v8  ;;  %v2162_v18 = vunpack.i.h.bf16 %v2160_v13  ;;  %v2161_v19 = vunpack.i.l.bf16 %v2160_v13  ;;  %v2157_v20 = vunpack.i.h.bf16 %v2155_v16  ;;  %v2156_v4 = vunpack.i.l.bf16 %v2155_v16  ;;  %v1487_v13 = vld [vmem:[%s2917_s2 + $0x10] sm:$0xff] }
  0xff   : > { %1724 = vmatmul.msk.f32.gmra.mxu2 %vm256_vm0, %v1712_v9  ;;  %1748 = vmatmul.msk.f32.gmra.mxu3 %vm256_vm0, %v1736_v10  ;;  %v1851_v9 = vld [vmem:[%s2916_s1 + $0x318] sm:$0xff]  ;;  %v1490_v10 = vld [vmem:[%s2917_s2 + $0x28] sm:$0xff] }
 0x100   : > { %1432 = vmatpush.msra.mxu0 %v2161_v19  ;;  %984 = vmatpush.msra.mxu1 %v2156_v4  ;;  %v1805_v19 = vld [vmem:[%s2916_s1 + $0x268] sm:$0xff] }
 0x101   : > { %1536 = vperm.xlu0 %2168, %v1490_v10   ;;  %1521 = vperm.xlu2 %2170, %v1487_v13   ;;  %v1809_v10 = vld [vmem:[%s2916_s1 + $0x288] sm:$0xff] }
 0x102   : > { %1433 = vmatpush.msra.mxu0 %v2162_v18  ;;  %985 = vmatpush.msra.mxu1 %v2157_v20  ;;  %v1781_v18 = vld [vmem:[%s2916_s1 + $0x208] sm:$0xff] }
 0x104   : > { %1434 = vmatpush.msra.mxu0 %v2166_v32 }
 0x106   : > { %1771 = vmatmul.msk.f32.gmra.mxu0 %vm256_vm0, %v1759_v21  ;;  %1701 = vmatmul.msk.f32.gmra.mxu1 %vm256_vm0, %v192_v22  ;;  %v1829_v21 = vld [vmem:[%s2916_s1 + $0x2c8] sm:$0xff] }
 0x107   : > { %1725 = vmatmul.msk.f32.gmra.mxu2 %vm256_vm0, %v1713_v2  ;;  %1749 = vmatmul.msk.f32.gmra.mxu3 %vm256_vm0, %v1737_v23 }
 0x108   : > { %1435 = vmatpush.msra.mxu0 %v2167_v31  ;;  %v1830_v31 = vld [vmem:[%s2916_s1 + $0x2d0] sm:$0xff] }
 0x10e   : > { %1772 = vmatmul.msk.f32.gmra.mxu0 %vm256_vm0, %v1760_v12  ;;  %1702 = vmatmul.msk.f32.gmra.mxu1 %vm256_vm0, %v193_v24  ;;  %v1852_v24 = vld [vmem:[%s2916_s1 + $0x320] sm:$0xff] }
 0x10f   : > { %1726 = vmatmul.msk.f32.gmra.mxu2 %vm256_vm0, %v1714_v25  ;;  %1750 = vmatmul.msk.f32.gmra.mxu3 %vm256_vm0, %v1738_v26  ;;  %v1491_v25 = vld [vmem:[%s2917_s2 + $0x30] sm:$0xff] }
 0x110   : > { %1541 = vperm.xlu1 %2169, %v1491_v25  }
 0x116   : > { %1773 = vmatmul.msk.f32.gmra.mxu0 %vm256_vm0, %v1761_v27  ;;  %1703 = vmatmul.msk.f32.gmra.mxu1 %vm256_vm0, %v194_v28  ;;  %v1782_v28 = vld [vmem:[%s2916_s1 + $0x210] sm:$0xff] }
 0x117   : > { %1727 = vmatmul.msk.f32.gmra.mxu2 %vm256_vm0, %v1715_v29  ;;  %1751 = vmatmul.msk.f32.gmra.mxu3 %vm256_vm0, %v1739_v11  ;;  %v1806_v29 = vld [vmem:[%s2916_s1 + $0x270] sm:$0xff] }
 0x11e   : > { %1774 = vmatmul.msk.f32.gmra.mxu0 %vm256_vm0, %v1762_v34  ;;  %1788 = vmatmul.msk.f32.vlgmr.msra.gmra.mxu1 %vm256_vm0, %v1776_v6  ;;  %v1853_v6 = vld [vmem:[%s2916_s1 + $0x328] sm:$0xff] }
 0x11f   : > { %1812 = vmatmul.msk.f32.vlgmr.msra.gmra.mxu2 %vm256_vm0, %v1800_v15  ;;  %1836 = vmatmul.msk.f32.vlgmr.msra.gmra.mxu3 %vm256_vm0, %v1824_v35  ;;  %v1489_v15 = vld [vmem:[%s2917_s2 + $0x20] sm:$0xff] }
 0x120   : > { %v2601_v36 = vpop.f32.mrf.mxu1  ;;  %1531 = vperm.xlu2 %2170, %v1489_v15  }
 0x126   : > { %1775 = vmatmul.msk.f32.gmra.mxu0 %vm256_vm0, %v1763_v37  ;;  %1789 = vmatmul.msk.f32.gmra.mxu1 %vm256_vm0, %v1777_v39  ;;  %v2621_v40 = vpop.f32.mrf.mxu2  ;;  %v1807_v39 = vld [vmem:[%s2916_s1 + $0x278] sm:$0xff] }
 0x127   : > { %1813 = vmatmul.msk.f32.gmra.mxu2 %vm256_vm0, %v1801_v17  ;;  %1837 = vmatmul.msk.f32.gmra.mxu3 %vm256_vm0, %v1825_v14  ;;  %v1493_v17 = vld [vmem:[%s2917_s2 + $0x40] sm:$0xff] }
 0x128   : > { %v2624_v41 = vpop.f32.mrf.mxu3  ;;  %1551 = vperm.xlu0 %2168, %v1493_v17  }
 0x129   : > { %v2626_v42 = vpop.f32.mrf.mxu1 }
 0x12e   : > { %1860 = vmatmul.msk.f32.vlgmr.msra.gmra.mxu0 %vm256_vm0, %v1848_v43  ;;  %1790 = vmatmul.msk.f32.gmra.mxu1 %vm256_vm0, %v1778_v44  ;;  %v2643_v47 = vpop.f32.mrf.mxu2  ;;  %v1831_v44 = vld [vmem:[%s2916_s1 + $0x2d8] sm:$0xff] }
 0x12f   : > { %1814 = vmatmul.msk.f32.gmra.mxu2 %vm256_vm0, %v1802_v45  ;;  %1838 = vmatmul.msk.f32.gmra.mxu3 %vm256_vm0, %v1826_v46 }
 0x131   : > { %v310_v48 = vpop.f32.mrf.mxu0  ;;  %v2646_v49 = vpop.f32.mrf.mxu1 }
 0x132   : > { %v2648_v50 = vpop.f32.mrf.mxu3 }
 0x136   : > { %1861 = vmatmul.msk.f32.gmra.mxu0 %vm256_vm0, %v1849_v51  ;;  %1791 = vmatmul.msk.f32.gmra.mxu1 %vm256_vm0, %v1779_v53 }
 0x137   : > { %1815 = vmatmul.msk.f32.gmra.mxu2 %vm256_vm0, %v1803_v54  ;;  %1839 = vmatmul.msk.f32.gmra.mxu3 %vm256_vm0, %v1827_v55  ;;  %v1808_v55 = vld [vmem:[%s2916_s1 + $0x280] sm:$0xff] }
 0x138   : > { %v2669_v56 = vpop.f32.mrf.mxu2 }
 0x13a   : > { %v313_v57 = vpop.f32.mrf.mxu0  ;;  %v2671_v58 = vpop.f32.mrf.mxu3 }
 0x13b   : > { %v399_v60 = vpop.f32.mrf.mxu1 }
 0x13c   : > { %v400_v63 = vadd.f32 %v399_v60, %v310_v48 }
 0x13e   : > { %1862 = vmatmul.msk.f32.gmra.mxu0 %vm256_vm0, %v1850_v59  ;;  %1792 = vmatmul.msk.f32.gmra.mxu1 %vm256_vm0, %v1780_v61  ;;  %v1496_v59 = vld [vmem:[%s2917_s2 + $0x58] sm:$0xff] }
 0x13f   : > { %1816 = vmatmul.msk.f32.gmra.mxu2 %vm256_vm0, %v1804_v62  ;;  %1840 = vmatmul.msk.f32.gmra.mxu3 %vm256_vm0, %v1828_v0  ;;  %v1832_v62 = vld [vmem:[%s2916_s1 + $0x2e0] sm:$0xff] }
 0x140   : > { %1566 = vperm.xlu0 %2168, %v1496_v59  }
 0x141   : > { %v537_v1 = vpop.f32.mrf.mxu2 }
 0x142   : > { %v573_v3 = vadd.f32 %v537_v1, %v400_v63  ;;  %v316_v5 = vpop.f32.mrf.mxu0  ;;  %v687_v8 = vpop.f32.mrf.mxu3 }
 0x143   : > { %v402_v16 = vpop.f32.mrf.mxu1 }
 0x144   : > { %v403_v20 = vadd.f32 %v402_v16, %v313_v57  ;;  %v723_v4 = vadd.f32 %v687_v8, %v573_v3  ;;  %v1494_v57 = vld [vmem:[%s2917_s2 + $0x48] sm:$0xff] }
 0x145   : > { %1556 = vperm.xlu1 %2169, %v1494_v57  }
 0x146   : > { %1863 = vmatmul.msk.f32.gmra.mxu0 %vm256_vm0, %v1851_v9  ;;  %1793 = vmatmul.msk.f32.gmra.mxu1 %vm256_vm0, %v1781_v18  ;;  %v1785_v9 = vld [vmem:[%s2916_s1 + $0x228] sm:$0xff] }
 0x147   : > { %1817 = vmatmul.msk.f32.gmra.mxu2 %vm256_vm0, %v1805_v19  ;;  %1841 = vmatmul.msk.f32.gmra.mxu3 %vm256_vm0, %v1829_v21  ;;  %v1833_v18 = vld [vmem:[%s2916_s1 + $0x2e8] sm:$0xff] }
 0x149   : > { %v540_v22 = vpop.f32.mrf.mxu2 }
 0x14a   : > { %v574_v2 = vadd.f32 %v540_v22, %v403_v20  ;;  %v690_v23 = vpop.f32.mrf.mxu3  ;;  %v1492_v22 = vld [vmem:[%s2917_s2 + $0x38] sm:$0xff] }
 0x14b   : > { %v837_v12 = vpop.f32.mrf.mxu0  ;;  %v405_v26 = vpop.f32.mrf.mxu1  ;;  %1546 = vperm.xlu2 %2170, %v1492_v22  }
 0x14c   : > { %v2717_v27 = vadd.f32 %v837_v12, %v723_v4  ;;  %v406_v11 = vadd.f32 %v405_v26, %v316_v5  ;;  %v724_v30 = vadd.f32 %v690_v23, %v574_v2  ;;  %v1786_v12 = vld [vmem:[%s2916_s1 + $0x230] sm:$0xff] }
 0x14e   : > { %1864 = vmatmul.msk.f32.gmra.mxu0 %vm256_vm0, %v1852_v24  ;;  %1794 = vmatmul.msk.f32.gmra.mxu1 %vm256_vm0, %v1782_v28  ;;  %v1810_v24 = vld [vmem:[%s2916_s1 + $0x290] sm:$0xff] }
 0x14f   : > { %1818 = vmatmul.msk.f32.gmra.mxu2 %vm256_vm0, %v1806_v29  ;;  %1842 = vmatmul.msk.f32.gmra.mxu3 %vm256_vm0, %v1830_v31  ;;  %v1834_v28 = vld [vmem:[%s2916_s1 + $0x2f0] sm:$0xff] }
 0x152   : > { %v543_v32 = vpop.f32.mrf.mxu2  ;;  %v693_v7 = vpop.f32.mrf.mxu3 }
 0x153   : > { %v575_v33 = vadd.f32 %v543_v32, %v406_v11  ;;  %v840_v34 = vpop.f32.mrf.mxu0  ;;  %v408_v35 = vpop.f32.mrf.mxu1 }
 0x154   : > { %v2738_v37 = vadd.f32 %v840_v34, %v724_v30  ;;  %v409_v14 = vadd.f32 %v408_v35, %v2601_v36  ;;  %v1784_v36 = vld [vmem:[%s2916_s1 + $0x220] sm:$0xff]  ;;  %v1811_v34 = vld [vmem:[%s2916_s1 + $0x298] sm:$0xff] }
 0x155   : > { %v725_v43 = vadd.f32 %v693_v7, %v575_v33  ;;  %v1787_v7 = vld [vmem:[%s2916_s1 + $0x238] sm:$0xff] }
 0x156   : > { %1865 = vmatmul.msk.f32.gmra.mxu0 %vm256_vm0, %v1853_v6  ;;  %1795 = vmatmul.msk.f32.gmra.mxu1 %vm256_vm0, %v1783_v38  ;;  %v1495_v6 = vld [vmem:[%s2917_s2 + $0x50] sm:$0xff]  ;;  %v1835_v38 = vld [vmem:[%s2916_s1 + $0x2f8] sm:$0xff] }
 0x157   : > { %1819 = vmatmul.msk.f32.gmra.mxu2 %vm256_vm0, %v1807_v39  ;;  %1843 = vmatmul.msk.f32.gmra.mxu3 %vm256_vm0, %v1831_v44 }
 0x158   : > { %1561 = vperm.xlu2 %2170, %v1495_v6  }
 0x15a   : > { %v546_v45 = vpop.f32.mrf.mxu2  ;;  %v696_v48 = vpop.f32.mrf.mxu3 }
 0x15b   : > { %v576_v46 = vadd.f32 %v546_v45, %v409_v14  ;;  %v843_v51 = vpop.f32.mrf.mxu0  ;;  %v411_v53 = vpop.f32.mrf.mxu1 }
 0x15c   : > { %v2763_v54 = vadd.f32 %v843_v51, %v725_v43  ;;  %v412_v60 = vadd.f32 %v411_v53, %v2626_v42  ;;  %v1855_v42 = vld [vmem:[%s2916_s1 + $0x338] sm:$0xff] }
 0x15d   : > { %v726_v61 = vadd.f32 %v696_v48, %v576_v46 }
 0x15e   : > { %1866 = vmatmul.msk.f32.gmra.mxu0 %vm256_vm0, %v1854_v52  ;;  %1796 = vmatmul.msk.f32.gmra.mxu1 %vm256_vm0, %v1784_v36 }
 0x15f   : > { %1820 = vmatmul.msk.f32.gmra.mxu2 %vm256_vm0, %v1808_v55  ;;  %1844 = vmatmul.msk.f32.gmra.mxu3 %vm256_vm0, %v1832_v62  ;;  %v1859_v55 = vld [vmem:[%s2916_s1 + $0x358] sm:$0xff] }
 0x162   : > { %v549_v63 = vpop.f32.mrf.mxu2  ;;  %v699_v1 = vpop.f32.mrf.mxu3 }
 0x163   : > { %v577_v0 = vadd.f32 %v549_v63, %v412_v60  ;;  %v846_v3 = vpop.f32.mrf.mxu0  ;;  %v414_v5 = vpop.f32.mrf.mxu1 }
 0x164   : > { %v2785_v8 = vadd.f32 %v846_v3, %v726_v61  ;;  %v415_v13 = vadd.f32 %v414_v5, %v2646_v49  ;;  %v1856_v49 = vld [vmem:[%s2916_s1 + $0x340] sm:$0xff] }
 0x165   : > { %v727_v16 = vadd.f32 %v699_v1, %v577_v0 }
 0x166   : > { %1867 = vmatmul.msk.f32.gmra.mxu0 %vm256_vm0, %v1855_v42  ;;  %1797 = vmatmul.msk.f32.gmra.mxu1 %vm256_vm0, %v1785_v9 }
 0x167   : > { %1821 = vmatmul.msk.f32.gmra.mxu2 %vm256_vm0, %v1809_v10  ;;  %1845 = vmatmul.msk.f32.gmra.mxu3 %vm256_vm0, %v1833_v18 }
 0x16a   : > { %v552_v19 = vpop.f32.mrf.mxu2  ;;  %v702_v4 = vpop.f32.mrf.mxu3 }
 0x16b   : > { %v578_v20 = vadd.f32 %v552_v19, %v415_v13  ;;  %v849_v21 = vpop.f32.mrf.mxu0  ;;  %v417_v2 = vpop.f32.mrf.mxu1 }
 0x16c   : > { %v2807_v23 = vadd.f32 %v849_v21, %v727_v16  ;;  %v418_v25 = vadd.f32 %v417_v2, %v2621_v40  ;;  %v1857_v40 = vld [vmem:[%s2916_s1 + $0x348] sm:$0xff] }
 0x16d   : > { %v728_v26 = vadd.f32 %v702_v4, %v578_v20 }
 0x16e   : > { %1868 = vmatmul.msk.f32.gmra.mxu0 %vm256_vm0, %v1856_v49  ;;  %1798 = vmatmul.msk.f32.gmra.mxu1 %vm256_vm0, %v1786_v12 }
 0x16f   : > { %1822 = vmatmul.msk.f32.gmra.mxu2 %vm256_vm0, %v1810_v24  ;;  %1846 = vmatmul.msk.f32.gmra.mxu3 %vm256_vm0, %v1834_v28 }
 0x172   : > { %v555_v29 = vpop.f32.mrf.mxu2  ;;  %v705_v30 = vpop.f32.mrf.mxu3 }
 0x173   : > { %v579_v11 = vadd.f32 %v555_v29, %v418_v25  ;;  %v852_v31 = vpop.f32.mrf.mxu0  ;;  %v420_v32 = vpop.f32.mrf.mxu1 }
 0x174   : > { %v2826_v33 = vadd.f32 %v852_v31, %v728_v26  ;;  %v421_v15 = vadd.f32 %v420_v32, %v2643_v47  ;;  %v1858_v47 = vld [vmem:[%s2916_s1 + $0x350] sm:$0xff] }
 0x175   : > { %v729_v35 = vadd.f32 %v705_v30, %v579_v11 }
 0x176   : > { %1869 = vmatmul.msk.f32.gmra.mxu0 %vm256_vm0, %v1857_v40  ;;  %1799 = vmatmul.msk.f32.gmra.mxu1 %vm256_vm0, %v1787_v7  ;;  %v1512_v40 = vpop.permute.xlu0 %1511 }
 0x177   : > { %1823 = vmatmul.msk.f32.gmra.mxu2 %vm256_vm0, %v1811_v34  ;;  %1847 = vmatmul.msk.f32.gmra.mxu3 %vm256_vm0, %v1835_v38 }
 0x17a   : > { %v558_v39 = vpop.f32.mrf.mxu2  ;;  %v708_v14 = vpop.f32.mrf.mxu3 }
 0x17b   : > { %v580_v17 = vadd.f32 %v558_v39, %v421_v15  ;;  %v855_v43 = vpop.f32.mrf.mxu0  ;;  %v423_v44 = vpop.f32.mrf.mxu1 }
 0x17c   : > { %v2848_v45 = vadd.f32 %v855_v43, %v729_v35  ;;  %v424_v46 = vadd.f32 %v423_v44, %v2669_v56 }
 0x17d   : > { %v730_v48 = vadd.f32 %v708_v14, %v580_v17 }
 0x17e   : > { %1870 = vmatmul.msk.f32.gmra.mxu0 %vm256_vm0, %v1858_v47 }
 0x182   : > { %v561_v51 = vpop.f32.mrf.mxu2  ;;  %v711_v52 = vpop.f32.mrf.mxu3 }
 0x183   : > { %v581_v36 = vadd.f32 %v561_v51, %v424_v46  ;;  %v858_v53 = vpop.f32.mrf.mxu0  ;;  %v426_v57 = vpop.f32.mrf.mxu1 }
 0x184   : > { %v2855_v59 = vadd.f32 %v858_v53, %v730_v48  ;;  %v427_v61 = vadd.f32 %v426_v57, %v2624_v41 }
 0x185   : > { %v731_v60 = vadd.f32 %v711_v52, %v581_v36 }
 0x186   : > { %1871 = vmatmul.msk.f32.gmra.mxu0 %vm256_vm0, %v1859_v55  ;;  %v1522_v55 = vpop.permute.xlu2 %1521 }
 0x18a   : > { %v564_v56 = vpop.f32.mrf.mxu2  ;;  %v714_v63 = vpop.f32.mrf.mxu3 }
 0x18b   : > { %v582_v62 = vadd.f32 %v564_v56, %v427_v61  ;;  %v861_v0 = vpop.f32.mrf.mxu0  ;;  %v429_v1 = vpop.f32.mrf.mxu1 }
 0x18c   : > { %v2859_v3 = vadd.f32 %v861_v0, %v731_v60  ;;  %v430_v5 = vadd.f32 %v429_v1, %v2648_v50 }
 0x18d   : > { %v732_v42 = vadd.f32 %v714_v63, %v582_v62 }
 0x192   : > { %v567_v9 = vpop.f32.mrf.mxu2  ;;  %v717_v13 = vpop.f32.mrf.mxu3 }
 0x193   : > { %v583_v10 = vadd.f32 %v567_v9, %v430_v5  ;;  %v864_v16 = vpop.f32.mrf.mxu0  ;;  %v432_v18 = vpop.f32.mrf.mxu1 }
 0x194   : > { %v2862_v19 = vadd.f32 %v864_v16, %v732_v42  ;;  %v433_v41 = vadd.f32 %v432_v18, %v2671_v58 }
 0x195   : > { %v733_v20 = vadd.f32 %v717_v13, %v583_v10 }
 0x19a   : > { %v570_v4 = vpop.f32.mrf.mxu2  ;;  %v720_v49 = vpop.f32.mrf.mxu3 }
 0x19b   : > { %v584_v21 = vadd.f32 %v570_v4, %v433_v41  ;;  %v867_v22 = vpop.f32.mrf.mxu0  ;;  %v987_v12 = vpop.f32.mrf.mxu1 }
 0x19c   : > { %v2865_v2 = vadd.f32 %v867_v22, %v733_v20  ;;  %v1023_v28 = vadd.f32 %v987_v12, %v2717_v27 }
 0x19d   : > { %v734_v24 = vadd.f32 %v720_v49, %v584_v21  ;;  %v1532_v49 = vpop.permute.xlu2 %1531 }
 0x1a2   : > { %v1137_v25 = vpop.f32.mrf.mxu2  ;;  %v1287_v26 = vpop.f32.mrf.mxu3 }
 0x1a3   : > { %v870_v50 = vpop.f32.mrf.mxu0  ;;  %v990_v11 = vpop.f32.mrf.mxu1  ;;  %v1173_v30 = vadd.f32 %v1137_v25, %v1023_v28 }
 0x1a4   : > { %v2868_v29 = vadd.f32 %v870_v50, %v734_v24  ;;  %v1024_v34 = vadd.f32 %v990_v11, %v2738_v37  ;;  %v1517_v37 = vpop.permute.xlu1 %1516 }
 0x1a5   : > { %v1323_v31 = vadd.f32 %v1287_v26, %v1173_v30 }
 0x1aa   : > { %v1140_v58 = vpop.f32.mrf.mxu2  ;;  %v1290_v32 = vpop.f32.mrf.mxu3 }
 0x1ab   : > { %v1437_v7 = vpop.f32.mrf.mxu0  ;;  %v993_v6 = vpop.f32.mrf.mxu1  ;;  %v1174_v35 = vadd.f32 %v1140_v58, %v1024_v34 }
 0x1ac   : > { %v1473_v15 = vadd.f32 %v1437_v7, %v1323_v31  ;;  %v1025_v47 = vadd.f32 %v993_v6, %v2763_v54  ;;  %v1527_v5 = vpop.permute.xlu1 %1526  ;;  %v1537_v31 = vpop.permute.xlu0 %1536 }
 0x1ad   : > { %v1324_v39 = vadd.f32 %v1290_v32, %v1174_v35 }
 0x1ae   : > { %vm1497_vm1 = vcmp.gt.f32.partialorder %v1473_v15, 0.0  ;;  %v1569_v27 = vmul.f32 %v1512_v40, %v1473_v15 }
 0x1b0   : > { %v1581_v38 = vsel %vm1497_vm1, %v1473_v15, %v1569_v27 }
 0x1b1   : > { %1594 = vst.msk [vmem:[%s2876_s29] sm:$0xff] %vm1593_vm2, %v1581_v38 }
 0x1b2   : > { %v1143_v17 = vpop.f32.mrf.mxu2  ;;  %v1293_v14 = vpop.f32.mrf.mxu3 }
 0x1b3   : > { %v1440_v43 = vpop.f32.mrf.mxu0  ;;  %v996_v44 = vpop.f32.mrf.mxu1  ;;  %v1175_v48 = vadd.f32 %v1143_v17, %v1025_v47 }
 0x1b4   : > { %v1474_v46 = vadd.f32 %v1440_v43, %v1324_v39  ;;  %v1026_v61 = vadd.f32 %v996_v44, %v2785_v8  ;;  %v1542_v38 = vpop.permute.xlu1 %1541 }
 0x1b5   : > { %v1325_v52 = vadd.f32 %v1293_v14, %v1175_v48 }
 0x1b6   : > { %vm1498_vm3 = vcmp.gt.f32.partialorder %v1474_v46, 0.0  ;;  %v1570_v51 = vmul.f32 %v1517_v37, %v1474_v46 }
 0x1b8   : > { %v1582_v36 = vsel %vm1498_vm3, %v1474_v46, %v1570_v51  ;;  %v1547_v51 = vpop.permute.xlu2 %1546 }
 0x1b9   : > { %1595 = vst.msk [vmem:[%s2876_s29 + $0x8] sm:$0xff] %vm1593_vm2, %v1582_v36 }
 0x1ba   : > { %v1146_v53 = vpop.f32.mrf.mxu2  ;;  %v1296_v57 = vpop.f32.mrf.mxu3 }
 0x1bb   : > { %v1443_v60 = vpop.f32.mrf.mxu0  ;;  %v999_v56 = vpop.f32.mrf.mxu1  ;;  %v1176_v63 = vadd.f32 %v1146_v53, %v1026_v61 }
 0x1bc   : > { %v1475_v62 = vadd.f32 %v1443_v60, %v1325_v52  ;;  %v1027_v13 = vadd.f32 %v999_v56, %v2807_v23 }
 0x1bd   : > { %v1326_v1 = vadd.f32 %v1296_v57, %v1176_v63 }
 0x1be   : > { %vm1499_vm4 = vcmp.gt.f32.partialorder %v1475_v62, 0.0  ;;  %v1571_v54 = vmul.f32 %v1522_v55, %v1475_v62 }
 0x1c0   : > { %v1583_v0 = vsel %vm1499_vm4, %v1475_v62, %v1571_v54 }
 0x1c1   : > { %1596 = vst.msk [vmem:[%s2876_s29 + $0x10] sm:$0xff] %vm1593_vm2, %v1583_v0 }
 0x1c2   : > { %v1149_v42 = vpop.f32.mrf.mxu2  ;;  %v1299_v9 = vpop.f32.mrf.mxu3 }
 0x1c3   : > { %v1446_v10 = vpop.f32.mrf.mxu0  ;;  %v1002_v16 = vpop.f32.mrf.mxu1  ;;  %v1177_v20 = vadd.f32 %v1149_v42, %v1027_v13 }
 0x1c4   : > { %v1476_v18 = vadd.f32 %v1446_v10, %v1326_v1  ;;  %v1028_v24 = vadd.f32 %v1002_v16, %v2826_v33  ;;  %v1552_v42 = vpop.permute.xlu0 %1551 }
 0x1c5   : > { %v1327_v4 = vadd.f32 %v1299_v9, %v1177_v20 }
 0x1c6   : > { %vm1500_vm5 = vcmp.gt.f32.partialorder %v1476_v18, 0.0  ;;  %v1572_v8 = vmul.f32 %v1527_v5, %v1476_v18 }
 0x1c8   : > { %v1584_v41 = vsel %vm1500_vm5, %v1476_v18, %v1572_v8 }
 0x1c9   : > { %1597 = vst.msk [vmem:[%s2876_s29 + $0x18] sm:$0xff] %vm1593_vm2, %v1584_v41 }
 0x1ca   : > { %v1152_v21 = vpop.f32.mrf.mxu2  ;;  %v1302_v22 = vpop.f32.mrf.mxu3 }
 0x1cb   : > { %v1449_v12 = vpop.f32.mrf.mxu0  ;;  %v1005_v25 = vpop.f32.mrf.mxu1  ;;  %v1178_v26 = vadd.f32 %v1152_v21, %v1028_v24 }
 0x1cc   : > { %v1477_v50 = vadd.f32 %v1449_v12, %v1327_v4  ;;  %v1029_v32 = vadd.f32 %v1005_v25, %v2848_v45  ;;  %v1557_v4 = vpop.permute.xlu1 %1556 }
 0x1cd   : > { %v1328_v11 = vadd.f32 %v1302_v22, %v1178_v26 }
 0x1ce   : > { %vm1501_vm6 = vcmp.gt.f32.partialorder %v1477_v50, 0.0  ;;  %v1573_v23 = vmul.f32 %v1532_v49, %v1477_v50 }
 0x1d0   : > { %v1585_v28 = vsel %vm1501_vm6, %v1477_v50, %v1573_v23  ;;  %v1562_v23 = vpop.permute.xlu2 %1561 }
 0x1d1   : > { %1598 = vst.msk [vmem:[%s2876_s29 + $0x20] sm:$0xff] %vm1593_vm2, %v1585_v28 }
 0x1d2   : > { %v1155_v30 = vpop.f32.mrf.mxu2  ;;  %v1305_v58 = vpop.f32.mrf.mxu3 }
 0x1d3   : > { %v1452_v40 = vpop.f32.mrf.mxu0  ;;  %v1008_v7 = vpop.f32.mrf.mxu1  ;;  %v1179_v6 = vadd.f32 %v1155_v30, %v1029_v32 }
 0x1d4   : > { %v1478_v34 = vadd.f32 %v1452_v40, %v1328_v11  ;;  %v1030_v37 = vadd.f32 %v1008_v7, %v2855_v59  ;;  %v1567_v32 = vpop.permute.xlu0 %1566 }
 0x1d5   : > { %v1329_v35 = vadd.f32 %v1305_v58, %v1179_v6 }
 0x1d6   : > { %vm1502_vm7 = vcmp.gt.f32.partialorder %v1478_v34, 0.0  ;;  %v1574_v33 = vmul.f32 %v1537_v31, %v1478_v34 }
 0x1d8   : > { %v1586_v15 = vsel %vm1502_vm7, %v1478_v34, %v1574_v33 }
 0x1d9   : > { %1599 = vst.msk [vmem:[%s2876_s29 + $0x28] sm:$0xff] %vm1593_vm2, %v1586_v15 }
 0x1da   : > { %v1158_v27 = vpop.f32.mrf.mxu2  ;;  %v1308_v39 = vpop.f32.mrf.mxu3 }
 0x1db   : > { %v1455_v17 = vpop.f32.mrf.mxu0  ;;  %v1011_v14 = vpop.f32.mrf.mxu1  ;;  %v1180_v47 = vadd.f32 %v1158_v27, %v1030_v37 }
 0x1dc   : > { %v1479_v43 = vadd.f32 %v1455_v17, %v1329_v35  ;;  %v1031_v53 = vadd.f32 %v1011_v14, %v2859_v3 }
 0x1dd   : > { %v1330_v46 = vadd.f32 %v1308_v39, %v1180_v47 }
 0x1de   : > { %vm1503_vm8 = vcmp.gt.f32.partialorder %v1479_v43, 0.0  ;;  %v1575_v45 = vmul.f32 %v1542_v38, %v1479_v43 }
 0x1e0   : > { %v1587_v44 = vsel %vm1503_vm8, %v1479_v43, %v1575_v45 }
 0x1e1   : > { %1600 = vst.msk [vmem:[%s2876_s29 + $0x30] sm:$0xff] %vm1593_vm2, %v1587_v44 }
 0x1e2   : > { %v1161_v48 = vpop.f32.mrf.mxu2  ;;  %v1311_v36 = vpop.f32.mrf.mxu3 }
 0x1e3   : > { %v1458_v52 = vpop.f32.mrf.mxu0  ;;  %v1014_v57 = vpop.f32.mrf.mxu1  ;;  %v1181_v60 = vadd.f32 %v1161_v48, %v1031_v53 }
 0x1e4   : > { %v1480_v55 = vadd.f32 %v1458_v52, %v1330_v46  ;;  %v1032_v0 = vadd.f32 %v1014_v57, %v2862_v19 }
 0x1e5   : > { %v1331_v56 = vadd.f32 %v1311_v36, %v1181_v60 }
 0x1e6   : > { %vm1504_vm9 = vcmp.gt.f32.partialorder %v1480_v55, 0.0  ;;  %v1576_v59 = vmul.f32 %v1547_v51, %v1480_v55 }
 0x1e8   : > { %v1588_v61 = vsel %vm1504_vm9, %v1480_v55, %v1576_v59 }
 0x1e9   : > { %1601 = vst.msk [vmem:[%s2876_s29 + $0x38] sm:$0xff] %vm1593_vm2, %v1588_v61 }
 0x1ea   : > { %v1164_v62 = vpop.f32.mrf.mxu2  ;;  %v1314_v63 = vpop.f32.mrf.mxu3 }
 0x1eb   : > { %v1461_v54 = vpop.f32.mrf.mxu0  ;;  %v1182_v5 = vadd.f32 %v1164_v62, %v1032_v0  ;;  %v1017_v9 = vpop.f32.mrf.mxu1 }
 0x1ec   : > { %v1481_v1 = vadd.f32 %v1461_v54, %v1331_v56  ;;  %v1033_v20 = vadd.f32 %v1017_v9, %v2865_v2 }
 0x1ed   : > { %v1332_v13 = vadd.f32 %v1314_v63, %v1182_v5 }
 0x1ee   : > { %vm1505_vm10 = vcmp.gt.f32.partialorder %v1481_v1, 0.0  ;;  %v1577_v3 = vmul.f32 %v1552_v42, %v1481_v1 }
 0x1f0   : > { %v1589_v10 = vsel %vm1505_vm10, %v1481_v1, %v1577_v3 }
 0x1f1   : > { %1602 = vst.msk [vmem:[%s2876_s29 + $0x40] sm:$0xff] %vm1593_vm2, %v1589_v10 }
 0x1f2   : > { %v1167_v16 = vpop.f32.mrf.mxu2  ;;  %v1317_v41 = vpop.f32.mrf.mxu3 }
 0x1f3   : > { %v1464_v18 = vpop.f32.mrf.mxu0  ;;  %v1183_v21 = vadd.f32 %v1167_v16, %v1033_v20  ;;  %v1020_v22 = vpop.f32.mrf.mxu1 }
 0x1f4   : > { %v1482_v8 = vadd.f32 %v1464_v18, %v1332_v13  ;;  %v1034_v50 = vadd.f32 %v1020_v22, %v2868_v29 }
 0x1f5   : > { %v1333_v12 = vadd.f32 %v1317_v41, %v1183_v21 }
 0x1f6   : > { %vm1506_vm11 = vcmp.gt.f32.partialorder %v1482_v8, 0.0  ;;  %v1578_v19 = vmul.f32 %v1557_v4, %v1482_v8 }
 0x1f8   : > { %v1590_v49 = vsel %vm1506_vm11, %v1482_v8, %v1578_v19 }
 0x1f9   : > { %1603 = vst.msk [vmem:[%s2876_s29 + $0x48] sm:$0xff] %vm1593_vm2, %v1590_v49 }
 0x1fa   : > { %v1170_v24 = vpop.f32.mrf.mxu2  ;;  %v1320_v11 = vpop.f32.mrf.mxu3 }
 0x1fb   : > { %v1467_v25 = vpop.f32.mrf.mxu0  ;;  %v1184_v2 = vadd.f32 %v1170_v24, %v1034_v50 }
 0x1fc   : > { %v1483_v26 = vadd.f32 %v1467_v25, %v1333_v12 }
 0x1fd   : > { %v1334_v31 = vadd.f32 %v1320_v11, %v1184_v2 }
 0x1fe   : > { %vm1507_vm12 = vcmp.gt.f32.partialorder %v1483_v26, 0.0  ;;  %v1579_v28 = vmul.f32 %v1562_v23, %v1483_v26 }
 0x200   : > { %v1591_v30 = vsel %vm1507_vm12, %v1483_v26, %v1579_v28 }
 0x201   : > { %1604 = vst.msk [vmem:[%s2876_s29 + $0x50] sm:$0xff] %vm1593_vm2, %v1591_v30 }
 0x203   : > { %v1470_v58 = vpop.f32.mrf.mxu0 }
 0x204   : > { %v1484_v40 = vadd.f32 %v1470_v58, %v1334_v31 }
 0x206   : > { %vm1508_vm13 = vcmp.gt.f32.partialorder %v1484_v40, 0.0  ;;  %v1580_v7 = vmul.f32 %v1567_v32, %v1484_v40 }
 0x208   : > { %v1592_v34 = vsel %vm1508_vm13, %v1484_v40, %v1580_v7 }
 0x209   : > { %1605 = vst.msk [vmem:[%s2876_s29 + $0x58] sm:$0xff] %vm1593_vm2, %v1592_v34 }
 0x20a PF: > { %s13_s12 = sadd.s32 1, %s2177_s12  }
 0x20b   : > { %p10_p4 = scmp.ge.s32.totalorder %s13_s12, 4  }
 0x20d   :  { %12 = sbr.rel (!%p10_p4) target bundleno = 1 (0x1), region = 70 }

</bundles_post_ra>
